<compile_context>
chip_gen: v6e
topology: v6e:2x2x1
jax: 0.10.0
libtpu: 0.0.40
codegen_flags: <defaults>
</compile_context>

<pallas_src>
import numpy as np
import jax
import jax.numpy as jnp
from jax import lax
from jax.experimental import pallas as pl
from jax.experimental.pallas import tpu as pltpu


_DILATIONS = (3, 2, 1)          # merge1, merge2, merge3


def _round_up(v, m):
    return (v + m - 1) // m * m


def _prelu(v, a):
    return jnp.where(v >= 0, v, a * v)


# --------------------------------------------------------------------------
# Fused kernel factory (specialized on C, H, W via closure).
# --------------------------------------------------------------------------
def _make_kernel(C, H, W):
    Wp = W + 2                         # width  + left/right conv halo
    Hp = H + 3                         # height + top halo + bottom halo + slack row
    Lreal = Hp * Wp                    # real flattened padded pixel count

    louts_real = [(H + 2 - 2 * d) * Wp for d in _DILATIONS]
    louts = [_round_up(v, 128) for v in louts_real]           # lane-dense output rows
    smax = [2 * d * (Wp + 1) for d in _DILATIONS]             # largest tap shift
    LPAD = _round_up(max([Lreal] + [s + L for s, L in zip(smax, louts)]), 128)

    def kernel(x_ref, mask_ref, w1_ref, b1_ref, wm_ref, bm_ref, w2_ref, b2_ref,
               a_ref, o1_ref, o2_ref, o3_ref, ys_ref):
        out_refs = (o1_ref, o2_ref, o3_ref)
        msk = mask_ref[...]                                    # (1, LPAD): 1 interior, 0 halo/pad

        for b, d in enumerate(_DILATIONS):
            # ---- stage 1: 1x1 conv + PReLU + halo mask -> VMEM scratch ----------
            y = jnp.zeros((C, LPAD), jnp.float32) + b1_ref[:, b:b + 1]
            for c in range(C):
                y = y + w1_ref[:, b * C + c:b * C + c + 1] * x_ref[c:c + 1, :]
            y = _prelu(y, a_ref[b]) * msk                      # re-zero halo (conv padding)
            ys_ref[...] = y

            # ---- stage 2: dilated 3x3 merge conv (9 static tap windows) ---------
            Lout = louts[b]
            acc = jnp.zeros((C, Lout), jnp.float32) + bm_ref[:, b:b + 1]
            for t in range(9):
                ki, kj = divmod(t, 3)
                s = ki * d * Wp + kj * d                       # static flat shift
                base = (b * 9 + t) * C
                for c in range(C):
                    win = ys_ref[c:c + 1, s:s + Lout]          # (1, Lout) addressed load
                    acc = acc + wm_ref[:, base + c:base + c + 1] * win
            m = _prelu(acc, a_ref[3 + b])

            # ---- stage 3: trailing 1x1 conv + PReLU, one dense block store ------
            z = jnp.zeros((C, Lout), jnp.float32) + b2_ref[:, b:b + 1]
            for c in range(C):
                z = z + w2_ref[:, b * C + c:b * C + c + 1] * m[c:c + 1, :]
            out_refs[b][...] = _prelu(z, a_ref[6 + b])

    geom = dict(Wp=Wp, Hp=Hp, Lreal=Lreal, LPAD=LPAD, louts=louts)
    return kernel, geom


# --------------------------------------------------------------------------
# Parameter initialization (mimicking nn.Conv2d / nn.PReLU defaults).
# --------------------------------------------------------------------------
def _conv_init(key, cin, cout, kh, kw):
    kw_key, kb_key = jax.random.split(key)
    fan_in = cin * kh * kw
    bound = 1.0 / np.sqrt(fan_in)
    w = jax.random.uniform(kw_key, (cout, cin, kh, kw), jnp.float32, -bound, bound)
    b = jax.random.uniform(kb_key, (cout,), jnp.float32, -bound, bound)
    a = jnp.array([0.25], jnp.float32)
    return {"w": w, "b": b, "a": a}


def init_params(in_channels, seed=0):
    names_1x1 = ["conv1", "conv2", "conv3", "conv4", "conv5", "conv6"]
    names_3x3 = ["merge1", "merge2", "merge3"]
    keys = jax.random.split(jax.random.PRNGKey(seed), len(names_1x1) + len(names_3x3))
    params = {}
    for name, k in zip(names_1x1, keys[:6]):
        params[name] = _conv_init(k, in_channels, in_channels, 1, 1)
    for name, k in zip(names_3x3, keys[6:]):
        params[name] = _conv_init(k, in_channels, in_channels, 3, 3)
    return params


# --------------------------------------------------------------------------
# Forward pass (single pallas_call for the whole module).
# --------------------------------------------------------------------------
def scale_aware_attention_forward(x_nchw, params):
    N, C, H, W = x_nchw.shape
    kernel, g = _make_kernel(C, H, W)
    Wp, Hp, Lreal, LPAD, louts = g["Wp"], g["Hp"], g["Lreal"], g["LPAD"], g["louts"]
    f32 = jnp.float32

    names1 = ("conv1", "conv2", "conv3")
    namesM = ("merge1", "merge2", "merge3")
    names2 = ("conv4", "conv5", "conv6")

    # ---- pack weights as per-output-channel columns (C on sublanes) -------------
    w1 = jnp.concatenate([params[n]["w"][:, :, 0, 0] for n in names1], axis=1)     # (C, 3C)
    w2 = jnp.concatenate([params[n]["w"][:, :, 0, 0] for n in names2], axis=1)     # (C, 3C)
    wm = jnp.concatenate(
        [jnp.transpose(params[n]["w"], (0, 2, 3, 1)).reshape(C, 9 * C)
         for n in namesM], axis=1)                                                 # (C, 27C)
    b1 = jnp.stack([params[n]["b"] for n in names1], axis=1)                       # (C, 3)
    bm = jnp.stack([params[n]["b"] for n in namesM], axis=1)                       # (C, 3)
    b2 = jnp.stack([params[n]["b"] for n in names2], axis=1)                       # (C, 3)
    a = jnp.stack([params[n]["a"][0] for n in names1 + namesM + names2])           # (9,) SMEM

    # ---- single zero pad of the input (conv halo), pixels -> lanes, 128-aligned --
    xp = jnp.pad(x_nchw, ((0, 0), (0, 0), (1, 2), (1, 1))).reshape(N, C, Lreal)
    xp = jnp.pad(xp, ((0, 0), (0, 0), (0, LPAD - Lreal)))
    mask = (jnp.zeros((Hp, Wp), f32).at[1:H + 1, 1:W + 1].set(1.0)).reshape(1, Lreal)
    mask = jnp.pad(mask, ((0, 0), (0, LPAD - Lreal)))

    def full(arr):
        nd = arr.ndim
        return pl.BlockSpec(arr.shape, lambda n, _nd=nd: (0,) * _nd)

    smem = pl.BlockSpec(memory_space=pltpu.MemorySpace.SMEM)

    out_shapes = tuple(jax.ShapeDtypeStruct((N, C, L), f32) for L in louts)
    out_specs = tuple(pl.BlockSpec((None, C, L), lambda n: (n, 0, 0)) for L in louts)

    outs = pl.pallas_call(
        kernel,
        out_shape=out_shapes,
        grid=(N,),
        in_specs=[
            pl.BlockSpec((None, C, LPAD), lambda n: (n, 0, 0)),   # x (one image per step)
            full(mask),                                           # interior mask
            full(w1), full(b1), full(wm), full(bm), full(w2), full(b2),
            smem,                                                 # PReLU slopes (9,)
        ],
        out_specs=out_specs,
        scratch_shapes=[pltpu.VMEM((C, LPAD), f32)],              # per-branch activations
        compiler_params=pltpu.CompilerParams(
            dimension_semantics=("parallel",)),                   # 2 images -> 2 TCs on v7x
    )(xp, mask, w1, b1, wm, bm, w2, b2, a)

    # crop lane-padded rows back to the true output width/height (cheap glue)
    results = []
    for of, d in zip(outs, _DILATIONS):
        Ho, Wo = H + 2 - 2 * d, W + 2 - 2 * d
        results.append(of[:, :, :Ho * Wp].reshape(N, C, Ho, Wp)[:, :, :, :Wo])
    return tuple(results)


# --------------------------------------------------------------------------
# Pure-JAX reference (NCHW, lax conv) for correctness checking.
# --------------------------------------------------------------------------
def _ref_conv_prelu(x, p, dilation, padding):
    y = lax.conv_general_dilated(
        x, p["w"], window_strides=(1, 1),
        padding=((padding, padding), (padding, padding)),
        rhs_dilation=(dilation, dilation),
        dimension_numbers=("NCHW", "OIHW", "NCHW"),
        precision=lax.Precision.HIGHEST)
    y = y + p["b"].reshape(1, -1, 1, 1)
    return jnp.where(y > 0, y, p["a"][0] * y)


def reference_forward(x, params):
    c1 = _ref_conv_prelu(x, params["conv1"], 1, 0)
    c2 = _ref_conv_prelu(x, params["conv2"], 1, 0)
    c3 = _ref_conv_prelu(x, params["conv3"], 1, 0)
    m1 = _ref_conv_prelu(_ref_conv_prelu(c1, params["merge1"], 3, 1), params["conv4"], 1, 0)
    m2 = _ref_conv_prelu(_ref_conv_prelu(c2, params["merge2"], 2, 1), params["conv5"], 1, 0)
    m3 = _ref_conv_prelu(_ref_conv_prelu(c3, params["merge3"], 1, 1), params["conv6"], 1, 0)
    return m1, m2, m3


if __name__ == "__main__":
    in_channels = 4
    x = jax.random.normal(jax.random.PRNGKey(0), (2, in_channels, 16, 16), jnp.float32)
    params = init_params(in_channels, seed=0)

    outs = scale_aware_attention_forward(x, params)
    outs = jax.block_until_ready(outs)

    refs = reference_forward(x, params)
    expected_shapes = [(2, 4, 12, 12), (2, 4, 14, 14), (2, 4, 16, 16)]
    for o, r, s in zip(outs, refs, expected_shapes):
        assert o.shape == s, (o.shape, s)
        np.testing.assert_allclose(np.asarray(o), np.asarray(r), rtol=1e-2, atol=1e-2)

    print("KERNEL_OK")
</pallas_src>

<mosaic_0001>
module attributes {stable_mosaic.version = 11 : i64} {
  func.func @kernel(%arg0: i32, %arg1: memref<1x4x512xf32, #tpu.memory_space<vmem>>, %arg2: memref<1x512xf32, #tpu.memory_space<vmem>>, %arg3: memref<4x12xf32, #tpu.memory_space<vmem>>, %arg4: memref<4x3xf32, #tpu.memory_space<vmem>>, %arg5: memref<4x108xf32, #tpu.memory_space<vmem>>, %arg6: memref<4x3xf32, #tpu.memory_space<vmem>>, %arg7: memref<4x12xf32, #tpu.memory_space<vmem>>, %arg8: memref<4x3xf32, #tpu.memory_space<vmem>>, %arg9: memref<9xf32, #tpu.memory_space<smem>>, %arg10: memref<1x4x256xf32, #tpu.memory_space<vmem>>, %arg11: memref<1x4x256xf32, #tpu.memory_space<vmem>>, %arg12: memref<1x4x384xf32, #tpu.memory_space<vmem>>, %arg13: memref<4x512xf32, #tpu.memory_space<vmem>>) attributes {dimension_semantics = [#tpu.dimension_semantics<parallel>], iteration_bounds = array<i64: 2>, scalar_prefetch = 0 : i64, scratch_operands = 1 : i64, tpu.core_type = #tpu.core_type<tc>, window_params = [{transform_indices = @transform_0, window_bounds = array<i64: 1, 4, 512>}, {pipeline_mode = #tpu.pipeline_mode<synchronous>, transform_indices = @transform_1, window_bounds = array<i64: 1, 512>}, {pipeline_mode = #tpu.pipeline_mode<synchronous>, transform_indices = @transform_2, window_bounds = array<i64: 4, 12>}, {pipeline_mode = #tpu.pipeline_mode<synchronous>, transform_indices = @transform_3, window_bounds = array<i64: 4, 3>}, {pipeline_mode = #tpu.pipeline_mode<synchronous>, transform_indices = @transform_4, window_bounds = array<i64: 4, 108>}, {pipeline_mode = #tpu.pipeline_mode<synchronous>, transform_indices = @transform_5, window_bounds = array<i64: 4, 3>}, {pipeline_mode = #tpu.pipeline_mode<synchronous>, transform_indices = @transform_6, window_bounds = array<i64: 4, 12>}, {pipeline_mode = #tpu.pipeline_mode<synchronous>, transform_indices = @transform_7, window_bounds = array<i64: 4, 3>}, {transform_indices = @transform_8, window_bounds = array<i64: 9>}, {transform_indices = @transform_9, window_bounds = array<i64: 1, 4, 256>}, {transform_indices = @transform_10, window_bounds = array<i64: 1, 4, 256>}, {transform_indices = @transform_11, window_bounds = array<i64: 1, 4, 384>}]} {
    %c0 = arith.constant 0 : index
    %c0_0 = arith.constant 0 : index
    %0 = vector.load %arg2[%c0, %c0_0] : memref<1x512xf32, #tpu.memory_space<vmem>>, vector<1x512xf32>
    %cst = arith.constant 0.000000e+00 : f32
    %1 = vector.broadcast %cst : f32 to vector<4x512xf32>
    %c0_1 = arith.constant 0 : index
    %c0_2 = arith.constant 0 : index
    %2 = vector.load %arg4[%c0_1, %c0_2] : memref<4x3xf32, #tpu.memory_space<vmem>>, vector<4x1xf32>
    %3 = vector.broadcast %2 : vector<4x1xf32> to vector<4x512xf32>
    %4 = arith.addf %1, %3 : vector<4x512xf32>
    %c0_3 = arith.constant 0 : index
    %c0_4 = arith.constant 0 : index
    %5 = vector.load %arg3[%c0_3, %c0_4] : memref<4x12xf32, #tpu.memory_space<vmem>>, vector<4x1xf32>
    %c0_5 = arith.constant 0 : index
    %c0_6 = arith.constant 0 : index
    %c0_7 = arith.constant 0 : index
    %6 = vector.load %arg1[%c0_5, %c0_6, %c0_7] : memref<1x4x512xf32, #tpu.memory_space<vmem>>, vector<1x1x512xf32>
    %7 = vector.shape_cast %6 : vector<1x1x512xf32> to vector<1x512xf32>
    %8 = vector.broadcast %5 : vector<4x1xf32> to vector<4x512xf32>
    %9 = vector.broadcast %7 : vector<1x512xf32> to vector<4x512xf32>
    %10 = arith.mulf %8, %9 : vector<4x512xf32>
    %11 = arith.addf %4, %10 : vector<4x512xf32>
    %c0_8 = arith.constant 0 : index
    %c1 = arith.constant 1 : index
    %12 = vector.load %arg3[%c0_8, %c1] : memref<4x12xf32, #tpu.memory_space<vmem>>, vector<4x1xf32>
    %c0_9 = arith.constant 0 : index
    %c1_10 = arith.constant 1 : index
    %c0_11 = arith.constant 0 : index
    %13 = vector.load %arg1[%c0_9, %c1_10, %c0_11] : memref<1x4x512xf32, #tpu.memory_space<vmem>>, vector<1x1x512xf32>
    %14 = vector.shape_cast %13 : vector<1x1x512xf32> to vector<1x512xf32>
    %15 = vector.broadcast %12 : vector<4x1xf32> to vector<4x512xf32>
    %16 = vector.broadcast %14 : vector<1x512xf32> to vector<4x512xf32>
    %17 = arith.mulf %15, %16 : vector<4x512xf32>
    %18 = arith.addf %11, %17 : vector<4x512xf32>
    %c0_12 = arith.constant 0 : index
    %c2 = arith.constant 2 : index
    %19 = vector.load %arg3[%c0_12, %c2] : memref<4x12xf32, #tpu.memory_space<vmem>>, vector<4x1xf32>
    %c0_13 = arith.constant 0 : index
    %c2_14 = arith.constant 2 : index
    %c0_15 = arith.constant 0 : index
    %20 = vector.load %arg1[%c0_13, %c2_14, %c0_15] : memref<1x4x512xf32, #tpu.memory_space<vmem>>, vector<1x1x512xf32>
    %21 = vector.shape_cast %20 : vector<1x1x512xf32> to vector<1x512xf32>
    %22 = vector.broadcast %19 : vector<4x1xf32> to vector<4x512xf32>
    %23 = vector.broadcast %21 : vector<1x512xf32> to vector<4x512xf32>
    %24 = arith.mulf %22, %23 : vector<4x512xf32>
    %25 = arith.addf %18, %24 : vector<4x512xf32>
    %c0_16 = arith.constant 0 : index
    %c3 = arith.constant 3 : index
    %26 = vector.load %arg3[%c0_16, %c3] : memref<4x12xf32, #tpu.memory_space<vmem>>, vector<4x1xf32>
    %c0_17 = arith.constant 0 : index
    %c3_18 = arith.constant 3 : index
    %c0_19 = arith.constant 0 : index
    %27 = vector.load %arg1[%c0_17, %c3_18, %c0_19] : memref<1x4x512xf32, #tpu.memory_space<vmem>>, vector<1x1x512xf32>
    %28 = vector.shape_cast %27 : vector<1x1x512xf32> to vector<1x512xf32>
    %29 = vector.broadcast %26 : vector<4x1xf32> to vector<4x512xf32>
    %30 = vector.broadcast %28 : vector<1x512xf32> to vector<4x512xf32>
    %31 = arith.mulf %29, %30 : vector<4x512xf32>
    %32 = arith.addf %25, %31 : vector<4x512xf32>
    %c0_20 = arith.constant 0 : index
    %33 = memref.load %arg9[%c0_20] : memref<9xf32, #tpu.memory_space<smem>>
    %cst_21 = arith.constant 0.000000e+00 : f32
    %34 = vector.broadcast %cst_21 : f32 to vector<4x512xf32>
    %35 = arith.cmpf oge, %32, %34 : vector<4x512xf32>
    %36 = vector.broadcast %33 : f32 to vector<4x512xf32>
    %37 = arith.mulf %36, %32 : vector<4x512xf32>
    %38 = arith.select %35, %32, %37 : vector<4x512xi1>, vector<4x512xf32>
    %39 = vector.broadcast %0 : vector<1x512xf32> to vector<4x512xf32>
    %40 = arith.mulf %38, %39 : vector<4x512xf32>
    %c0_22 = arith.constant 0 : index
    %c0_23 = arith.constant 0 : index
    %41 = vector.load %arg13[%c0_22, %c0_23] : memref<4x512xf32, #tpu.memory_space<vmem>>, vector<4x512xf32>
    tpu.vector_store %arg13[%c0_22, %c0_23], %40 {strides = array<i32>} : memref<4x512xf32, #tpu.memory_space<vmem>>, vector<4x512xf32>,
    %cst_24 = arith.constant 0.000000e+00 : f32
    %42 = vector.broadcast %cst_24 : f32 to vector<4x256xf32>
    %c0_25 = arith.constant 0 : index
    %c0_26 = arith.constant 0 : index
    %43 = vector.load %arg6[%c0_25, %c0_26] : memref<4x3xf32, #tpu.memory_space<vmem>>, vector<4x1xf32>
    %44 = vector.broadcast %43 : vector<4x1xf32> to vector<4x256xf32>
    %45 = arith.addf %42, %44 : vector<4x256xf32>
    %c0_27 = arith.constant 0 : index
    %c0_28 = arith.constant 0 : index
    %46 = vector.load %arg13[%c0_27, %c0_28] : memref<4x512xf32, #tpu.memory_space<vmem>>, vector<1x256xf32>
    %c0_29 = arith.constant 0 : index
    %c0_30 = arith.constant 0 : index
    %47 = vector.load %arg5[%c0_29, %c0_30] : memref<4x108xf32, #tpu.memory_space<vmem>>, vector<4x1xf32>
    %48 = vector.broadcast %47 : vector<4x1xf32> to vector<4x256xf32>
    %49 = vector.broadcast %46 : vector<1x256xf32> to vector<4x256xf32>
    %50 = arith.mulf %48, %49 : vector<4x256xf32>
    %51 = arith.addf %45, %50 : vector<4x256xf32>
    %c1_31 = arith.constant 1 : index
    %c0_32 = arith.constant 0 : index
    %52 = vector.load %arg13[%c1_31, %c0_32] : memref<4x512xf32, #tpu.memory_space<vmem>>, vector<1x256xf32>
    %c0_33 = arith.constant 0 : index
    %c1_34 = arith.constant 1 : index
    %53 = vector.load %arg5[%c0_33, %c1_34] : memref<4x108xf32, #tpu.memory_space<vmem>>, vector<4x1xf32>
    %54 = vector.broadcast %53 : vector<4x1xf32> to vector<4x256xf32>
    %55 = vector.broadcast %52 : vector<1x256xf32> to vector<4x256xf32>
    %56 = arith.mulf %54, %55 : vector<4x256xf32>
    %57 = arith.addf %51, %56 : vector<4x256xf32>
    %c2_35 = arith.constant 2 : index
    %c0_36 = arith.constant 0 : index
    %58 = vector.load %arg13[%c2_35, %c0_36] : memref<4x512xf32, #tpu.memory_space<vmem>>, vector<1x256xf32>
    %c0_37 = arith.constant 0 : index
    %c2_38 = arith.constant 2 : index
    %59 = vector.load %arg5[%c0_37, %c2_38] : memref<4x108xf32, #tpu.memory_space<vmem>>, vector<4x1xf32>
    %60 = vector.broadcast %59 : vector<4x1xf32> to vector<4x256xf32>
    %61 = vector.broadcast %58 : vector<1x256xf32> to vector<4x256xf32>
    %62 = arith.mulf %60, %61 : vector<4x256xf32>
    %63 = arith.addf %57, %62 : vector<4x256xf32>
    %c3_39 = arith.constant 3 : index
    %c0_40 = arith.constant 0 : index
    %64 = vector.load %arg13[%c3_39, %c0_40] : memref<4x512xf32, #tpu.memory_space<vmem>>, vector<1x256xf32>
    %c0_41 = arith.constant 0 : index
    %c3_42 = arith.constant 3 : index
    %65 = vector.load %arg5[%c0_41, %c3_42] : memref<4x108xf32, #tpu.memory_space<vmem>>, vector<4x1xf32>
    %66 = vector.broadcast %65 : vector<4x1xf32> to vector<4x256xf32>
    %67 = vector.broadcast %64 : vector<1x256xf32> to vector<4x256xf32>
    %68 = arith.mulf %66, %67 : vector<4x256xf32>
    %69 = arith.addf %63, %68 : vector<4x256xf32>
    %c0_43 = arith.constant 0 : index
    %c3_44 = arith.constant 3 : index
    %70 = vector.load %arg13[%c0_43, %c3_44] : memref<4x512xf32, #tpu.memory_space<vmem>>, vector<1x256xf32>
    %c0_45 = arith.constant 0 : index
    %c4 = arith.constant 4 : index
    %71 = vector.load %arg5[%c0_45, %c4] : memref<4x108xf32, #tpu.memory_space<vmem>>, vector<4x1xf32>
    %72 = vector.broadcast %71 : vector<4x1xf32> to vector<4x256xf32>
    %73 = vector.broadcast %70 : vector<1x256xf32> to vector<4x256xf32>
    %74 = arith.mulf %72, %73 : vector<4x256xf32>
    %75 = arith.addf %69, %74 : vector<4x256xf32>
    %c1_46 = arith.constant 1 : index
    %c3_47 = arith.constant 3 : index
    %76 = vector.load %arg13[%c1_46, %c3_47] : memref<4x512xf32, #tpu.memory_space<vmem>>, vector<1x256xf32>
    %c0_48 = arith.constant 0 : index
    %c5 = arith.constant 5 : index
    %77 = vector.load %arg5[%c0_48, %c5] : memref<4x108xf32, #tpu.memory_space<vmem>>, vector<4x1xf32>
    %78 = vector.broadcast %77 : vector<4x1xf32> to vector<4x256xf32>
    %79 = vector.broadcast %76 : vector<1x256xf32> to vector<4x256xf32>
    %80 = arith.mulf %78, %79 : vector<4x256xf32>
    %81 = arith.addf %75, %80 : vector<4x256xf32>
    %c2_49 = arith.constant 2 : index
    %c3_50 = arith.constant 3 : index
    %82 = vector.load %arg13[%c2_49, %c3_50] : memref<4x512xf32, #tpu.memory_space<vmem>>, vector<1x256xf32>
    %c0_51 = arith.constant 0 : index
    %c6 = arith.constant 6 : index
    %83 = vector.load %arg5[%c0_51, %c6] : memref<4x108xf32, #tpu.memory_space<vmem>>, vector<4x1xf32>
    %84 = vector.broadcast %83 : vector<4x1xf32> to vector<4x256xf32>
    %85 = vector.broadcast %82 : vector<1x256xf32> to vector<4x256xf32>
    %86 = arith.mulf %84, %85 : vector<4x256xf32>
    %87 = arith.addf %81, %86 : vector<4x256xf32>
    %c3_52 = arith.constant 3 : index
    %c3_53 = arith.constant 3 : index
    %88 = vector.load %arg13[%c3_52, %c3_53] : memref<4x512xf32, #tpu.memory_space<vmem>>, vector<1x256xf32>
    %c0_54 = arith.constant 0 : index
    %c7 = arith.constant 7 : index
    %89 = vector.load %arg5[%c0_54, %c7] : memref<4x108xf32, #tpu.memory_space<vmem>>, vector<4x1xf32>
    %90 = vector.broadcast %89 : vector<4x1xf32> to vector<4x256xf32>
    %91 = vector.broadcast %88 : vector<1x256xf32> to vector<4x256xf32>
    %92 = arith.mulf %90, %91 : vector<4x256xf32>
    %93 = arith.addf %87, %92 : vector<4x256xf32>
    %c0_55 = arith.constant 0 : index
    %c6_56 = arith.constant 6 : index
    %94 = vector.load %arg13[%c0_55, %c6_56] : memref<4x512xf32, #tpu.memory_space<vmem>>, vector<1x256xf32>
    %c0_57 = arith.constant 0 : index
    %c8 = arith.constant 8 : index
    %95 = vector.load %arg5[%c0_57, %c8] : memref<4x108xf32, #tpu.memory_space<vmem>>, vector<4x1xf32>
    %96 = vector.broadcast %95 : vector<4x1xf32> to vector<4x256xf32>
    %97 = vector.broadcast %94 : vector<1x256xf32> to vector<4x256xf32>
    %98 = arith.mulf %96, %97 : vector<4x256xf32>
    %99 = arith.addf %93, %98 : vector<4x256xf32>
    %c1_58 = arith.constant 1 : index
    %c6_59 = arith.constant 6 : index
    %100 = vector.load %arg13[%c1_58, %c6_59] : memref<4x512xf32, #tpu.memory_space<vmem>>, vector<1x256xf32>
    %c0_60 = arith.constant 0 : index
    %c9 = arith.constant 9 : index
    %101 = vector.load %arg5[%c0_60, %c9] : memref<4x108xf32, #tpu.memory_space<vmem>>, vector<4x1xf32>
    %102 = vector.broadcast %101 : vector<4x1xf32> to vector<4x256xf32>
    %103 = vector.broadcast %100 : vector<1x256xf32> to vector<4x256xf32>
    %104 = arith.mulf %102, %103 : vector<4x256xf32>
    %105 = arith.addf %99, %104 : vector<4x256xf32>
    %c2_61 = arith.constant 2 : index
    %c6_62 = arith.constant 6 : index
    %106 = vector.load %arg13[%c2_61, %c6_62] : memref<4x512xf32, #tpu.memory_space<vmem>>, vector<1x256xf32>
    %c0_63 = arith.constant 0 : index
    %c10 = arith.constant 10 : index
    %107 = vector.load %arg5[%c0_63, %c10] : memref<4x108xf32, #tpu.memory_space<vmem>>, vector<4x1xf32>
    %108 = vector.broadcast %107 : vector<4x1xf32> to vector<4x256xf32>
    %109 = vector.broadcast %106 : vector<1x256xf32> to vector<4x256xf32>
    %110 = arith.mulf %108, %109 : vector<4x256xf32>
    %111 = arith.addf %105, %110 : vector<4x256xf32>
    %c3_64 = arith.constant 3 : index
    %c6_65 = arith.constant 6 : index
    %112 = vector.load %arg13[%c3_64, %c6_65] : memref<4x512xf32, #tpu.memory_space<vmem>>, vector<1x256xf32>
    %c0_66 = arith.constant 0 : index
    %c11 = arith.constant 11 : index
    %113 = vector.load %arg5[%c0_66, %c11] : memref<4x108xf32, #tpu.memory_space<vmem>>, vector<4x1xf32>
    %114 = vector.broadcast %113 : vector<4x1xf32> to vector<4x256xf32>
    %115 = vector.broadcast %112 : vector<1x256xf32> to vector<4x256xf32>
    %116 = arith.mulf %114, %115 : vector<4x256xf32>
    %117 = arith.addf %111, %116 : vector<4x256xf32>
    %c0_67 = arith.constant 0 : index
    %c54 = arith.constant 54 : index
    %118 = vector.load %arg13[%c0_67, %c54] : memref<4x512xf32, #tpu.memory_space<vmem>>, vector<1x256xf32>
    %c0_68 = arith.constant 0 : index
    %c12 = arith.constant 12 : index
    %119 = vector.load %arg5[%c0_68, %c12] : memref<4x108xf32, #tpu.memory_space<vmem>>, vector<4x1xf32>
    %120 = vector.broadcast %119 : vector<4x1xf32> to vector<4x256xf32>
    %121 = vector.broadcast %118 : vector<1x256xf32> to vector<4x256xf32>
    %122 = arith.mulf %120, %121 : vector<4x256xf32>
    %123 = arith.addf %117, %122 : vector<4x256xf32>
    %c1_69 = arith.constant 1 : index
    %c54_70 = arith.constant 54 : index
    %124 = vector.load %arg13[%c1_69, %c54_70] : memref<4x512xf32, #tpu.memory_space<vmem>>, vector<1x256xf32>
    %c0_71 = arith.constant 0 : index
    %c13 = arith.constant 13 : index
    %125 = vector.load %arg5[%c0_71, %c13] : memref<4x108xf32, #tpu.memory_space<vmem>>, vector<4x1xf32>
    %126 = vector.broadcast %125 : vector<4x1xf32> to vector<4x256xf32>
    %127 = vector.broadcast %124 : vector<1x256xf32> to vector<4x256xf32>
    %128 = arith.mulf %126, %127 : vector<4x256xf32>
    %129 = arith.addf %123, %128 : vector<4x256xf32>
    %c2_72 = arith.constant 2 : index
    %c54_73 = arith.constant 54 : index
    %130 = vector.load %arg13[%c2_72, %c54_73] : memref<4x512xf32, #tpu.memory_space<vmem>>, vector<1x256xf32>
    %c0_74 = arith.constant 0 : index
    %c14 = arith.constant 14 : index
    %131 = vector.load %arg5[%c0_74, %c14] : memref<4x108xf32, #tpu.memory_space<vmem>>, vector<4x1xf32>
    %132 = vector.broadcast %131 : vector<4x1xf32> to vector<4x256xf32>
    %133 = vector.broadcast %130 : vector<1x256xf32> to vector<4x256xf32>
    %134 = arith.mulf %132, %133 : vector<4x256xf32>
    %135 = arith.addf %129, %134 : vector<4x256xf32>
    %c3_75 = arith.constant 3 : index
    %c54_76 = arith.constant 54 : index
    %136 = vector.load %arg13[%c3_75, %c54_76] : memref<4x512xf32, #tpu.memory_space<vmem>>, vector<1x256xf32>
    %c0_77 = arith.constant 0 : index
    %c15 = arith.constant 15 : index
    %137 = vector.load %arg5[%c0_77, %c15] : memref<4x108xf32, #tpu.memory_space<vmem>>, vector<4x1xf32>
    %138 = vector.broadcast %137 : vector<4x1xf32> to vector<4x256xf32>
    %139 = vector.broadcast %136 : vector<1x256xf32> to vector<4x256xf32>
    %140 = arith.mulf %138, %139 : vector<4x256xf32>
    %141 = arith.addf %135, %140 : vector<4x256xf32>
    %c0_78 = arith.constant 0 : index
    %c57 = arith.constant 57 : index
    %142 = vector.load %arg13[%c0_78, %c57] : memref<4x512xf32, #tpu.memory_space<vmem>>, vector<1x256xf32>
    %c0_79 = arith.constant 0 : index
    %c16 = arith.constant 16 : index
    %143 = vector.load %arg5[%c0_79, %c16] : memref<4x108xf32, #tpu.memory_space<vmem>>, vector<4x1xf32>
    %144 = vector.broadcast %143 : vector<4x1xf32> to vector<4x256xf32>
    %145 = vector.broadcast %142 : vector<1x256xf32> to vector<4x256xf32>
    %146 = arith.mulf %144, %145 : vector<4x256xf32>
    %147 = arith.addf %141, %146 : vector<4x256xf32>
    %c1_80 = arith.constant 1 : index
    %c57_81 = arith.constant 57 : index
    %148 = vector.load %arg13[%c1_80, %c57_81] : memref<4x512xf32, #tpu.memory_space<vmem>>, vector<1x256xf32>
    %c0_82 = arith.constant 0 : index
    %c17 = arith.constant 17 : index
    %149 = vector.load %arg5[%c0_82, %c17] : memref<4x108xf32, #tpu.memory_space<vmem>>, vector<4x1xf32>
    %150 = vector.broadcast %149 : vector<4x1xf32> to vector<4x256xf32>
    %151 = vector.broadcast %148 : vector<1x256xf32> to vector<4x256xf32>
    %152 = arith.mulf %150, %151 : vector<4x256xf32>
    %153 = arith.addf %147, %152 : vector<4x256xf32>
    %c2_83 = arith.constant 2 : index
    %c57_84 = arith.constant 57 : index
    %154 = vector.load %arg13[%c2_83, %c57_84] : memref<4x512xf32, #tpu.memory_space<vmem>>, vector<1x256xf32>
    %c0_85 = arith.constant 0 : index
    %c18 = arith.constant 18 : index
    %155 = vector.load %arg5[%c0_85, %c18] : memref<4x108xf32, #tpu.memory_space<vmem>>, vector<4x1xf32>
    %156 = vector.broadcast %155 : vector<4x1xf32> to vector<4x256xf32>
    %157 = vector.broadcast %154 : vector<1x256xf32> to vector<4x256xf32>
    %158 = arith.mulf %156, %157 : vector<4x256xf32>
    %159 = arith.addf %153, %158 : vector<4x256xf32>
    %c3_86 = arith.constant 3 : index
    %c57_87 = arith.constant 57 : index
    %160 = vector.load %arg13[%c3_86, %c57_87] : memref<4x512xf32, #tpu.memory_space<vmem>>, vector<1x256xf32>
    %c0_88 = arith.constant 0 : index
    %c19 = arith.constant 19 : index
    %161 = vector.load %arg5[%c0_88, %c19] : memref<4x108xf32, #tpu.memory_space<vmem>>, vector<4x1xf32>
    %162 = vector.broadcast %161 : vector<4x1xf32> to vector<4x256xf32>
    %163 = vector.broadcast %160 : vector<1x256xf32> to vector<4x256xf32>
    %164 = arith.mulf %162, %163 : vector<4x256xf32>
    %165 = arith.addf %159, %164 : vector<4x256xf32>
    %c0_89 = arith.constant 0 : index
    %c60 = arith.constant 60 : index
    %166 = vector.load %arg13[%c0_89, %c60] : memref<4x512xf32, #tpu.memory_space<vmem>>, vector<1x256xf32>
    %c0_90 = arith.constant 0 : index
    %c20 = arith.constant 20 : index
    %167 = vector.load %arg5[%c0_90, %c20] : memref<4x108xf32, #tpu.memory_space<vmem>>, vector<4x1xf32>
    %168 = vector.broadcast %167 : vector<4x1xf32> to vector<4x256xf32>
    %169 = vector.broadcast %166 : vector<1x256xf32> to vector<4x256xf32>
    %170 = arith.mulf %168, %169 : vector<4x256xf32>
    %171 = arith.addf %165, %170 : vector<4x256xf32>
    %c1_91 = arith.constant 1 : index
    %c60_92 = arith.constant 60 : index
    %172 = vector.load %arg13[%c1_91, %c60_92] : memref<4x512xf32, #tpu.memory_space<vmem>>, vector<1x256xf32>
    %c0_93 = arith.constant 0 : index
    %c21 = arith.constant 21 : index
    %173 = vector.load %arg5[%c0_93, %c21] : memref<4x108xf32, #tpu.memory_space<vmem>>, vector<4x1xf32>
    %174 = vector.broadcast %173 : vector<4x1xf32> to vector<4x256xf32>
    %175 = vector.broadcast %172 : vector<1x256xf32> to vector<4x256xf32>
    %176 = arith.mulf %174, %175 : vector<4x256xf32>
    %177 = arith.addf %171, %176 : vector<4x256xf32>
    %c2_94 = arith.constant 2 : index
    %c60_95 = arith.constant 60 : index
    %178 = vector.load %arg13[%c2_94, %c60_95] : memref<4x512xf32, #tpu.memory_space<vmem>>, vector<1x256xf32>
    %c0_96 = arith.constant 0 : index
    %c22 = arith.constant 22 : index
    %179 = vector.load %arg5[%c0_96, %c22] : memref<4x108xf32, #tpu.memory_space<vmem>>, vector<4x1xf32>
    %180 = vector.broadcast %179 : vector<4x1xf32> to vector<4x256xf32>
    %181 = vector.broadcast %178 : vector<1x256xf32> to vector<4x256xf32>
    %182 = arith.mulf %180, %181 : vector<4x256xf32>
    %183 = arith.addf %177, %182 : vector<4x256xf32>
    %c3_97 = arith.constant 3 : index
    %c60_98 = arith.constant 60 : index
    %184 = vector.load %arg13[%c3_97, %c60_98] : memref<4x512xf32, #tpu.memory_space<vmem>>, vector<1x256xf32>
    %c0_99 = arith.constant 0 : index
    %c23 = arith.constant 23 : index
    %185 = vector.load %arg5[%c0_99, %c23] : memref<4x108xf32, #tpu.memory_space<vmem>>, vector<4x1xf32>
    %186 = vector.broadcast %185 : vector<4x1xf32> to vector<4x256xf32>
    %187 = vector.broadcast %184 : vector<1x256xf32> to vector<4x256xf32>
    %188 = arith.mulf %186, %187 : vector<4x256xf32>
    %189 = arith.addf %183, %188 : vector<4x256xf32>
    %c0_100 = arith.constant 0 : index
    %c108 = arith.constant 108 : index
    %190 = vector.load %arg13[%c0_100, %c108] : memref<4x512xf32, #tpu.memory_space<vmem>>, vector<1x256xf32>
    %c0_101 = arith.constant 0 : index
    %c24 = arith.constant 24 : index
    %191 = vector.load %arg5[%c0_101, %c24] : memref<4x108xf32, #tpu.memory_space<vmem>>, vector<4x1xf32>
    %192 = vector.broadcast %191 : vector<4x1xf32> to vector<4x256xf32>
    %193 = vector.broadcast %190 : vector<1x256xf32> to vector<4x256xf32>
    %194 = arith.mulf %192, %193 : vector<4x256xf32>
    %195 = arith.addf %189, %194 : vector<4x256xf32>
    %c1_102 = arith.constant 1 : index
    %c108_103 = arith.constant 108 : index
    %196 = vector.load %arg13[%c1_102, %c108_103] : memref<4x512xf32, #tpu.memory_space<vmem>>, vector<1x256xf32>
    %c0_104 = arith.constant 0 : index
    %c25 = arith.constant 25 : index
    %197 = vector.load %arg5[%c0_104, %c25] : memref<4x108xf32, #tpu.memory_space<vmem>>, vector<4x1xf32>
    %198 = vector.broadcast %197 : vector<4x1xf32> to vector<4x256xf32>
    %199 = vector.broadcast %196 : vector<1x256xf32> to vector<4x256xf32>
    %200 = arith.mulf %198, %199 : vector<4x256xf32>
    %201 = arith.addf %195, %200 : vector<4x256xf32>
    %c2_105 = arith.constant 2 : index
    %c108_106 = arith.constant 108 : index
    %202 = vector.load %arg13[%c2_105, %c108_106] : memref<4x512xf32, #tpu.memory_space<vmem>>, vector<1x256xf32>
    %c0_107 = arith.constant 0 : index
    %c26 = arith.constant 26 : index
    %203 = vector.load %arg5[%c0_107, %c26] : memref<4x108xf32, #tpu.memory_space<vmem>>, vector<4x1xf32>
    %204 = vector.broadcast %203 : vector<4x1xf32> to vector<4x256xf32>
    %205 = vector.broadcast %202 : vector<1x256xf32> to vector<4x256xf32>
    %206 = arith.mulf %204, %205 : vector<4x256xf32>
    %207 = arith.addf %201, %206 : vector<4x256xf32>
    %c3_108 = arith.constant 3 : index
    %c108_109 = arith.constant 108 : index
    %208 = vector.load %arg13[%c3_108, %c108_109] : memref<4x512xf32, #tpu.memory_space<vmem>>, vector<1x256xf32>
    %c0_110 = arith.constant 0 : index
    %c27 = arith.constant 27 : index
    %209 = vector.load %arg5[%c0_110, %c27] : memref<4x108xf32, #tpu.memory_space<vmem>>, vector<4x1xf32>
    %210 = vector.broadcast %209 : vector<4x1xf32> to vector<4x256xf32>
    %211 = vector.broadcast %208 : vector<1x256xf32> to vector<4x256xf32>
    %212 = arith.mulf %210, %211 : vector<4x256xf32>
    %213 = arith.addf %207, %212 : vector<4x256xf32>
    %c0_111 = arith.constant 0 : index
    %c111 = arith.constant 111 : index
    %214 = vector.load %arg13[%c0_111, %c111] : memref<4x512xf32, #tpu.memory_space<vmem>>, vector<1x256xf32>
    %c0_112 = arith.constant 0 : index
    %c28 = arith.constant 28 : index
    %215 = vector.load %arg5[%c0_112, %c28] : memref<4x108xf32, #tpu.memory_space<vmem>>, vector<4x1xf32>
    %216 = vector.broadcast %215 : vector<4x1xf32> to vector<4x256xf32>
    %217 = vector.broadcast %214 : vector<1x256xf32> to vector<4x256xf32>
    %218 = arith.mulf %216, %217 : vector<4x256xf32>
    %219 = arith.addf %213, %218 : vector<4x256xf32>
    %c1_113 = arith.constant 1 : index
    %c111_114 = arith.constant 111 : index
    %220 = vector.load %arg13[%c1_113, %c111_114] : memref<4x512xf32, #tpu.memory_space<vmem>>, vector<1x256xf32>
    %c0_115 = arith.constant 0 : index
    %c29 = arith.constant 29 : index
    %221 = vector.load %arg5[%c0_115, %c29] : memref<4x108xf32, #tpu.memory_space<vmem>>, vector<4x1xf32>
    %222 = vector.broadcast %221 : vector<4x1xf32> to vector<4x256xf32>
    %223 = vector.broadcast %220 : vector<1x256xf32> to vector<4x256xf32>
    %224 = arith.mulf %222, %223 : vector<4x256xf32>
    %225 = arith.addf %219, %224 : vector<4x256xf32>
    %c2_116 = arith.constant 2 : index
    %c111_117 = arith.constant 111 : index
    %226 = vector.load %arg13[%c2_116, %c111_117] : memref<4x512xf32, #tpu.memory_space<vmem>>, vector<1x256xf32>
    %c0_118 = arith.constant 0 : index
    %c30 = arith.constant 30 : index
    %227 = vector.load %arg5[%c0_118, %c30] : memref<4x108xf32, #tpu.memory_space<vmem>>, vector<4x1xf32>
    %228 = vector.broadcast %227 : vector<4x1xf32> to vector<4x256xf32>
    %229 = vector.broadcast %226 : vector<1x256xf32> to vector<4x256xf32>
    %230 = arith.mulf %228, %229 : vector<4x256xf32>
    %231 = arith.addf %225, %230 : vector<4x256xf32>
    %c3_119 = arith.constant 3 : index
    %c111_120 = arith.constant 111 : index
    %232 = vector.load %arg13[%c3_119, %c111_120] : memref<4x512xf32, #tpu.memory_space<vmem>>, vector<1x256xf32>
    %c0_121 = arith.constant 0 : index
    %c31 = arith.constant 31 : index
    %233 = vector.load %arg5[%c0_121, %c31] : memref<4x108xf32, #tpu.memory_space<vmem>>, vector<4x1xf32>
    %234 = vector.broadcast %233 : vector<4x1xf32> to vector<4x256xf32>
    %235 = vector.broadcast %232 : vector<1x256xf32> to vector<4x256xf32>
    %236 = arith.mulf %234, %235 : vector<4x256xf32>
    %237 = arith.addf %231, %236 : vector<4x256xf32>
    %c0_122 = arith.constant 0 : index
    %c114 = arith.constant 114 : index
    %238 = vector.load %arg13[%c0_122, %c114] : memref<4x512xf32, #tpu.memory_space<vmem>>, vector<1x256xf32>
    %c0_123 = arith.constant 0 : index
    %c32 = arith.constant 32 : index
    %239 = vector.load %arg5[%c0_123, %c32] : memref<4x108xf32, #tpu.memory_space<vmem>>, vector<4x1xf32>
    %240 = vector.broadcast %239 : vector<4x1xf32> to vector<4x256xf32>
    %241 = vector.broadcast %238 : vector<1x256xf32> to vector<4x256xf32>
    %242 = arith.mulf %240, %241 : vector<4x256xf32>
    %243 = arith.addf %237, %242 : vector<4x256xf32>
    %c1_124 = arith.constant 1 : index
    %c114_125 = arith.constant 114 : index
    %244 = vector.load %arg13[%c1_124, %c114_125] : memref<4x512xf32, #tpu.memory_space<vmem>>, vector<1x256xf32>
    %c0_126 = arith.constant 0 : index
    %c33 = arith.constant 33 : index
    %245 = vector.load %arg5[%c0_126, %c33] : memref<4x108xf32, #tpu.memory_space<vmem>>, vector<4x1xf32>
    %246 = vector.broadcast %245 : vector<4x1xf32> to vector<4x256xf32>
    %247 = vector.broadcast %244 : vector<1x256xf32> to vector<4x256xf32>
    %248 = arith.mulf %246, %247 : vector<4x256xf32>
    %249 = arith.addf %243, %248 : vector<4x256xf32>
    %c2_127 = arith.constant 2 : index
    %c114_128 = arith.constant 114 : index
    %250 = vector.load %arg13[%c2_127, %c114_128] : memref<4x512xf32, #tpu.memory_space<vmem>>, vector<1x256xf32>
    %c0_129 = arith.constant 0 : index
    %c34 = arith.constant 34 : index
    %251 = vector.load %arg5[%c0_129, %c34] : memref<4x108xf32, #tpu.memory_space<vmem>>, vector<4x1xf32>
    %252 = vector.broadcast %251 : vector<4x1xf32> to vector<4x256xf32>
    %253 = vector.broadcast %250 : vector<1x256xf32> to vector<4x256xf32>
    %254 = arith.mulf %252, %253 : vector<4x256xf32>
    %255 = arith.addf %249, %254 : vector<4x256xf32>
    %c3_130 = arith.constant 3 : index
    %c114_131 = arith.constant 114 : index
    %256 = vector.load %arg13[%c3_130, %c114_131] : memref<4x512xf32, #tpu.memory_space<vmem>>, vector<1x256xf32>
    %c0_132 = arith.constant 0 : index
    %c35 = arith.constant 35 : index
    %257 = vector.load %arg5[%c0_132, %c35] : memref<4x108xf32, #tpu.memory_space<vmem>>, vector<4x1xf32>
    %258 = vector.broadcast %257 : vector<4x1xf32> to vector<4x256xf32>
    %259 = vector.broadcast %256 : vector<1x256xf32> to vector<4x256xf32>
    %260 = arith.mulf %258, %259 : vector<4x256xf32>
    %261 = arith.addf %255, %260 : vector<4x256xf32>
    %c3_133 = arith.constant 3 : index
    %262 = memref.load %arg9[%c3_133] : memref<9xf32, #tpu.memory_space<smem>>
    %cst_134 = arith.constant 0.000000e+00 : f32
    %263 = vector.broadcast %cst_134 : f32 to vector<4x256xf32>
    %264 = arith.cmpf oge, %261, %263 : vector<4x256xf32>
    %265 = vector.broadcast %262 : f32 to vector<4x256xf32>
    %266 = arith.mulf %265, %261 : vector<4x256xf32>
    %267 = arith.select %264, %261, %266 : vector<4x256xi1>, vector<4x256xf32>
    %cst_135 = arith.constant 0.000000e+00 : f32
    %268 = vector.broadcast %cst_135 : f32 to vector<4x256xf32>
    %c0_136 = arith.constant 0 : index
    %c0_137 = arith.constant 0 : index
    %269 = vector.load %arg8[%c0_136, %c0_137] : memref<4x3xf32, #tpu.memory_space<vmem>>, vector<4x1xf32>
    %270 = vector.broadcast %269 : vector<4x1xf32> to vector<4x256xf32>
    %271 = arith.addf %268, %270 : vector<4x256xf32>
    %c0_138 = arith.constant 0 : index
    %c0_139 = arith.constant 0 : index
    %272 = vector.load %arg7[%c0_138, %c0_139] : memref<4x12xf32, #tpu.memory_space<vmem>>, vector<4x1xf32>
    %273 = vector.extract_strided_slice %267 {offsets = [0, 0], sizes = [1, 256], strides = [1, 1]} : vector<4x256xf32> to vector<1x256xf32>
    %274 = vector.broadcast %272 : vector<4x1xf32> to vector<4x256xf32>
    %275 = vector.broadcast %273 : vector<1x256xf32> to vector<4x256xf32>
    %276 = arith.mulf %274, %275 : vector<4x256xf32>
    %277 = arith.addf %271, %276 : vector<4x256xf32>
    %c0_140 = arith.constant 0 : index
    %c1_141 = arith.constant 1 : index
    %278 = vector.load %arg7[%c0_140, %c1_141] : memref<4x12xf32, #tpu.memory_space<vmem>>, vector<4x1xf32>
    %279 = vector.extract_strided_slice %267 {offsets = [1, 0], sizes = [1, 256], strides = [1, 1]} : vector<4x256xf32> to vector<1x256xf32>
    %280 = vector.broadcast %278 : vector<4x1xf32> to vector<4x256xf32>
    %281 = vector.broadcast %279 : vector<1x256xf32> to vector<4x256xf32>
    %282 = arith.mulf %280, %281 : vector<4x256xf32>
    %283 = arith.addf %277, %282 : vector<4x256xf32>
    %c0_142 = arith.constant 0 : index
    %c2_143 = arith.constant 2 : index
    %284 = vector.load %arg7[%c0_142, %c2_143] : memref<4x12xf32, #tpu.memory_space<vmem>>, vector<4x1xf32>
    %285 = vector.extract_strided_slice %267 {offsets = [2, 0], sizes = [1, 256], strides = [1, 1]} : vector<4x256xf32> to vector<1x256xf32>
    %286 = vector.broadcast %284 : vector<4x1xf32> to vector<4x256xf32>
    %287 = vector.broadcast %285 : vector<1x256xf32> to vector<4x256xf32>
    %288 = arith.mulf %286, %287 : vector<4x256xf32>
    %289 = arith.addf %283, %288 : vector<4x256xf32>
    %c0_144 = arith.constant 0 : index
    %c3_145 = arith.constant 3 : index
    %290 = vector.load %arg7[%c0_144, %c3_145] : memref<4x12xf32, #tpu.memory_space<vmem>>, vector<4x1xf32>
    %291 = vector.extract_strided_slice %267 {offsets = [3, 0], sizes = [1, 256], strides = [1, 1]} : vector<4x256xf32> to vector<1x256xf32>
    %292 = vector.broadcast %290 : vector<4x1xf32> to vector<4x256xf32>
    %293 = vector.broadcast %291 : vector<1x256xf32> to vector<4x256xf32>
    %294 = arith.mulf %292, %293 : vector<4x256xf32>
    %295 = arith.addf %289, %294 : vector<4x256xf32>
    %c6_146 = arith.constant 6 : index
    %296 = memref.load %arg9[%c6_146] : memref<9xf32, #tpu.memory_space<smem>>
    %cst_147 = arith.constant 0.000000e+00 : f32
    %297 = vector.broadcast %cst_147 : f32 to vector<4x256xf32>
    %298 = arith.cmpf oge, %295, %297 : vector<4x256xf32>
    %299 = vector.broadcast %296 : f32 to vector<4x256xf32>
    %300 = arith.mulf %299, %295 : vector<4x256xf32>
    %301 = arith.select %298, %295, %300 : vector<4x256xi1>, vector<4x256xf32>
    %c0_148 = arith.constant 0 : index
    %c0_149 = arith.constant 0 : index
    %c0_150 = arith.constant 0 : index
    %302 = vector.load %arg10[%c0_148, %c0_149, %c0_150] : memref<1x4x256xf32, #tpu.memory_space<vmem>>, vector<1x4x256xf32>
    %303 = vector.shape_cast %302 : vector<1x4x256xf32> to vector<4x256xf32>
    %304 = vector.shape_cast %301 : vector<4x256xf32> to vector<1x4x256xf32>
    tpu.vector_store %arg10[%c0_148, %c0_149, %c0_150], %304 {strides = array<i32>} : memref<1x4x256xf32, #tpu.memory_space<vmem>>, vector<1x4x256xf32>,
    %cst_151 = arith.constant 0.000000e+00 : f32
    %305 = vector.broadcast %cst_151 : f32 to vector<4x512xf32>
    %c0_152 = arith.constant 0 : index
    %c1_153 = arith.constant 1 : index
    %306 = vector.load %arg4[%c0_152, %c1_153] : memref<4x3xf32, #tpu.memory_space<vmem>>, vector<4x1xf32>
    %307 = vector.broadcast %306 : vector<4x1xf32> to vector<4x512xf32>
    %308 = arith.addf %305, %307 : vector<4x512xf32>
    %c0_154 = arith.constant 0 : index
    %c4_155 = arith.constant 4 : index
    %309 = vector.load %arg3[%c0_154, %c4_155] : memref<4x12xf32, #tpu.memory_space<vmem>>, vector<4x1xf32>
    %c0_156 = arith.constant 0 : index
    %c0_157 = arith.constant 0 : index
    %c0_158 = arith.constant 0 : index
    %310 = vector.load %arg1[%c0_156, %c0_157, %c0_158] : memref<1x4x512xf32, #tpu.memory_space<vmem>>, vector<1x1x512xf32>
    %311 = vector.shape_cast %310 : vector<1x1x512xf32> to vector<1x512xf32>
    %312 = vector.broadcast %309 : vector<4x1xf32> to vector<4x512xf32>
    %313 = vector.broadcast %311 : vector<1x512xf32> to vector<4x512xf32>
    %314 = arith.mulf %312, %313 : vector<4x512xf32>
    %315 = arith.addf %308, %314 : vector<4x512xf32>
    %c0_159 = arith.constant 0 : index
    %c5_160 = arith.constant 5 : index
    %316 = vector.load %arg3[%c0_159, %c5_160] : memref<4x12xf32, #tpu.memory_space<vmem>>, vector<4x1xf32>
    %c0_161 = arith.constant 0 : index
    %c1_162 = arith.constant 1 : index
    %c0_163 = arith.constant 0 : index
    %317 = vector.load %arg1[%c0_161, %c1_162, %c0_163] : memref<1x4x512xf32, #tpu.memory_space<vmem>>, vector<1x1x512xf32>
    %318 = vector.shape_cast %317 : vector<1x1x512xf32> to vector<1x512xf32>
    %319 = vector.broadcast %316 : vector<4x1xf32> to vector<4x512xf32>
    %320 = vector.broadcast %318 : vector<1x512xf32> to vector<4x512xf32>
    %321 = arith.mulf %319, %320 : vector<4x512xf32>
    %322 = arith.addf %315, %321 : vector<4x512xf32>
    %c0_164 = arith.constant 0 : index
    %c6_165 = arith.constant 6 : index
    %323 = vector.load %arg3[%c0_164, %c6_165] : memref<4x12xf32, #tpu.memory_space<vmem>>, vector<4x1xf32>
    %c0_166 = arith.constant 0 : index
    %c2_167 = arith.constant 2 : index
    %c0_168 = arith.constant 0 : index
    %324 = vector.load %arg1[%c0_166, %c2_167, %c0_168] : memref<1x4x512xf32, #tpu.memory_space<vmem>>, vector<1x1x512xf32>
    %325 = vector.shape_cast %324 : vector<1x1x512xf32> to vector<1x512xf32>
    %326 = vector.broadcast %323 : vector<4x1xf32> to vector<4x512xf32>
    %327 = vector.broadcast %325 : vector<1x512xf32> to vector<4x512xf32>
    %328 = arith.mulf %326, %327 : vector<4x512xf32>
    %329 = arith.addf %322, %328 : vector<4x512xf32>
    %c0_169 = arith.constant 0 : index
    %c7_170 = arith.constant 7 : index
    %330 = vector.load %arg3[%c0_169, %c7_170] : memref<4x12xf32, #tpu.memory_space<vmem>>, vector<4x1xf32>
    %c0_171 = arith.constant 0 : index
    %c3_172 = arith.constant 3 : index
    %c0_173 = arith.constant 0 : index
    %331 = vector.load %arg1[%c0_171, %c3_172, %c0_173] : memref<1x4x512xf32, #tpu.memory_space<vmem>>, vector<1x1x512xf32>
    %332 = vector.shape_cast %331 : vector<1x1x512xf32> to vector<1x512xf32>
    %333 = vector.broadcast %330 : vector<4x1xf32> to vector<4x512xf32>
    %334 = vector.broadcast %332 : vector<1x512xf32> to vector<4x512xf32>
    %335 = arith.mulf %333, %334 : vector<4x512xf32>
    %336 = arith.addf %329, %335 : vector<4x512xf32>
    %c1_174 = arith.constant 1 : index
    %337 = memref.load %arg9[%c1_174] : memref<9xf32, #tpu.memory_space<smem>>
    %cst_175 = arith.constant 0.000000e+00 : f32
    %338 = vector.broadcast %cst_175 : f32 to vector<4x512xf32>
    %339 = arith.cmpf oge, %336, %338 : vector<4x512xf32>
    %340 = vector.broadcast %337 : f32 to vector<4x512xf32>
    %341 = arith.mulf %340, %336 : vector<4x512xf32>
    %342 = arith.select %339, %336, %341 : vector<4x512xi1>, vector<4x512xf32>
    %343 = vector.broadcast %0 : vector<1x512xf32> to vector<4x512xf32>
    %344 = arith.mulf %342, %343 : vector<4x512xf32>
    %c0_176 = arith.constant 0 : index
    %c0_177 = arith.constant 0 : index
    %345 = vector.load %arg13[%c0_176, %c0_177] : memref<4x512xf32, #tpu.memory_space<vmem>>, vector<4x512xf32>
    tpu.vector_store %arg13[%c0_176, %c0_177], %344 {strides = array<i32>} : memref<4x512xf32, #tpu.memory_space<vmem>>, vector<4x512xf32>,
    %cst_178 = arith.constant 0.000000e+00 : f32
    %346 = vector.broadcast %cst_178 : f32 to vector<4x256xf32>
    %c0_179 = arith.constant 0 : index
    %c1_180 = arith.constant 1 : index
    %347 = vector.load %arg6[%c0_179, %c1_180] : memref<4x3xf32, #tpu.memory_space<vmem>>, vector<4x1xf32>
    %348 = vector.broadcast %347 : vector<4x1xf32> to vector<4x256xf32>
    %349 = arith.addf %346, %348 : vector<4x256xf32>
    %c0_181 = arith.constant 0 : index
    %c0_182 = arith.constant 0 : index
    %350 = vector.load %arg13[%c0_181, %c0_182] : memref<4x512xf32, #tpu.memory_space<vmem>>, vector<1x256xf32>
    %c0_183 = arith.constant 0 : index
    %c36 = arith.constant 36 : index
    %351 = vector.load %arg5[%c0_183, %c36] : memref<4x108xf32, #tpu.memory_space<vmem>>, vector<4x1xf32>
    %352 = vector.broadcast %351 : vector<4x1xf32> to vector<4x256xf32>
    %353 = vector.broadcast %350 : vector<1x256xf32> to vector<4x256xf32>
    %354 = arith.mulf %352, %353 : vector<4x256xf32>
    %355 = arith.addf %349, %354 : vector<4x256xf32>
    %c1_184 = arith.constant 1 : index
    %c0_185 = arith.constant 0 : index
    %356 = vector.load %arg13[%c1_184, %c0_185] : memref<4x512xf32, #tpu.memory_space<vmem>>, vector<1x256xf32>
    %c0_186 = arith.constant 0 : index
    %c37 = arith.constant 37 : index
    %357 = vector.load %arg5[%c0_186, %c37] : memref<4x108xf32, #tpu.memory_space<vmem>>, vector<4x1xf32>
    %358 = vector.broadcast %357 : vector<4x1xf32> to vector<4x256xf32>
    %359 = vector.broadcast %356 : vector<1x256xf32> to vector<4x256xf32>
    %360 = arith.mulf %358, %359 : vector<4x256xf32>
    %361 = arith.addf %355, %360 : vector<4x256xf32>
    %c2_187 = arith.constant 2 : index
    %c0_188 = arith.constant 0 : index
    %362 = vector.load %arg13[%c2_187, %c0_188] : memref<4x512xf32, #tpu.memory_space<vmem>>, vector<1x256xf32>
    %c0_189 = arith.constant 0 : index
    %c38 = arith.constant 38 : index
    %363 = vector.load %arg5[%c0_189, %c38] : memref<4x108xf32, #tpu.memory_space<vmem>>, vector<4x1xf32>
    %364 = vector.broadcast %363 : vector<4x1xf32> to vector<4x256xf32>
    %365 = vector.broadcast %362 : vector<1x256xf32> to vector<4x256xf32>
    %366 = arith.mulf %364, %365 : vector<4x256xf32>
    %367 = arith.addf %361, %366 : vector<4x256xf32>
    %c3_190 = arith.constant 3 : index
    %c0_191 = arith.constant 0 : index
    %368 = vector.load %arg13[%c3_190, %c0_191] : memref<4x512xf32, #tpu.memory_space<vmem>>, vector<1x256xf32>
    %c0_192 = arith.constant 0 : index
    %c39 = arith.constant 39 : index
    %369 = vector.load %arg5[%c0_192, %c39] : memref<4x108xf32, #tpu.memory_space<vmem>>, vector<4x1xf32>
    %370 = vector.broadcast %369 : vector<4x1xf32> to vector<4x256xf32>
    %371 = vector.broadcast %368 : vector<1x256xf32> to vector<4x256xf32>
    %372 = arith.mulf %370, %371 : vector<4x256xf32>
    %373 = arith.addf %367, %372 : vector<4x256xf32>
    %c0_193 = arith.constant 0 : index
    %c2_194 = arith.constant 2 : index
    %374 = vector.load %arg13[%c0_193, %c2_194] : memref<4x512xf32, #tpu.memory_space<vmem>>, vector<1x256xf32>
    %c0_195 = arith.constant 0 : index
    %c40 = arith.constant 40 : index
    %375 = vector.load %arg5[%c0_195, %c40] : memref<4x108xf32, #tpu.memory_space<vmem>>, vector<4x1xf32>
    %376 = vector.broadcast %375 : vector<4x1xf32> to vector<4x256xf32>
    %377 = vector.broadcast %374 : vector<1x256xf32> to vector<4x256xf32>
    %378 = arith.mulf %376, %377 : vector<4x256xf32>
    %379 = arith.addf %373, %378 : vector<4x256xf32>
    %c1_196 = arith.constant 1 : index
    %c2_197 = arith.constant 2 : index
    %380 = vector.load %arg13[%c1_196, %c2_197] : memref<4x512xf32, #tpu.memory_space<vmem>>, vector<1x256xf32>
    %c0_198 = arith.constant 0 : index
    %c41 = arith.constant 41 : index
    %381 = vector.load %arg5[%c0_198, %c41] : memref<4x108xf32, #tpu.memory_space<vmem>>, vector<4x1xf32>
    %382 = vector.broadcast %381 : vector<4x1xf32> to vector<4x256xf32>
    %383 = vector.broadcast %380 : vector<1x256xf32> to vector<4x256xf32>
    %384 = arith.mulf %382, %383 : vector<4x256xf32>
    %385 = arith.addf %379, %384 : vector<4x256xf32>
    %c2_199 = arith.constant 2 : index
    %c2_200 = arith.constant 2 : index
    %386 = vector.load %arg13[%c2_199, %c2_200] : memref<4x512xf32, #tpu.memory_space<vmem>>, vector<1x256xf32>
    %c0_201 = arith.constant 0 : index
    %c42 = arith.constant 42 : index
    %387 = vector.load %arg5[%c0_201, %c42] : memref<4x108xf32, #tpu.memory_space<vmem>>, vector<4x1xf32>
    %388 = vector.broadcast %387 : vector<4x1xf32> to vector<4x256xf32>
    %389 = vector.broadcast %386 : vector<1x256xf32> to vector<4x256xf32>
    %390 = arith.mulf %388, %389 : vector<4x256xf32>
    %391 = arith.addf %385, %390 : vector<4x256xf32>
    %c3_202 = arith.constant 3 : index
    %c2_203 = arith.constant 2 : index
    %392 = vector.load %arg13[%c3_202, %c2_203] : memref<4x512xf32, #tpu.memory_space<vmem>>, vector<1x256xf32>
    %c0_204 = arith.constant 0 : index
    %c43 = arith.constant 43 : index
    %393 = vector.load %arg5[%c0_204, %c43] : memref<4x108xf32, #tpu.memory_space<vmem>>, vector<4x1xf32>
    %394 = vector.broadcast %393 : vector<4x1xf32> to vector<4x256xf32>
    %395 = vector.broadcast %392 : vector<1x256xf32> to vector<4x256xf32>
    %396 = arith.mulf %394, %395 : vector<4x256xf32>
    %397 = arith.addf %391, %396 : vector<4x256xf32>
    %c0_205 = arith.constant 0 : index
    %c4_206 = arith.constant 4 : index
    %398 = vector.load %arg13[%c0_205, %c4_206] : memref<4x512xf32, #tpu.memory_space<vmem>>, vector<1x256xf32>
    %c0_207 = arith.constant 0 : index
    %c44 = arith.constant 44 : index
    %399 = vector.load %arg5[%c0_207, %c44] : memref<4x108xf32, #tpu.memory_space<vmem>>, vector<4x1xf32>
    %400 = vector.broadcast %399 : vector<4x1xf32> to vector<4x256xf32>
    %401 = vector.broadcast %398 : vector<1x256xf32> to vector<4x256xf32>
    %402 = arith.mulf %400, %401 : vector<4x256xf32>
    %403 = arith.addf %397, %402 : vector<4x256xf32>
    %c1_208 = arith.constant 1 : index
    %c4_209 = arith.constant 4 : index
    %404 = vector.load %arg13[%c1_208, %c4_209] : memref<4x512xf32, #tpu.memory_space<vmem>>, vector<1x256xf32>
    %c0_210 = arith.constant 0 : index
    %c45 = arith.constant 45 : index
    %405 = vector.load %arg5[%c0_210, %c45] : memref<4x108xf32, #tpu.memory_space<vmem>>, vector<4x1xf32>
    %406 = vector.broadcast %405 : vector<4x1xf32> to vector<4x256xf32>
    %407 = vector.broadcast %404 : vector<1x256xf32> to vector<4x256xf32>
    %408 = arith.mulf %406, %407 : vector<4x256xf32>
    %409 = arith.addf %403, %408 : vector<4x256xf32>
    %c2_211 = arith.constant 2 : index
    %c4_212 = arith.constant 4 : index
    %410 = vector.load %arg13[%c2_211, %c4_212] : memref<4x512xf32, #tpu.memory_space<vmem>>, vector<1x256xf32>
    %c0_213 = arith.constant 0 : index
    %c46 = arith.constant 46 : index
    %411 = vector.load %arg5[%c0_213, %c46] : memref<4x108xf32, #tpu.memory_space<vmem>>, vector<4x1xf32>
    %412 = vector.broadcast %411 : vector<4x1xf32> to vector<4x256xf32>
    %413 = vector.broadcast %410 : vector<1x256xf32> to vector<4x256xf32>
    %414 = arith.mulf %412, %413 : vector<4x256xf32>
    %415 = arith.addf %409, %414 : vector<4x256xf32>
    %c3_214 = arith.constant 3 : index
    %c4_215 = arith.constant 4 : index
    %416 = vector.load %arg13[%c3_214, %c4_215] : memref<4x512xf32, #tpu.memory_space<vmem>>, vector<1x256xf32>
    %c0_216 = arith.constant 0 : index
    %c47 = arith.constant 47 : index
    %417 = vector.load %arg5[%c0_216, %c47] : memref<4x108xf32, #tpu.memory_space<vmem>>, vector<4x1xf32>
    %418 = vector.broadcast %417 : vector<4x1xf32> to vector<4x256xf32>
    %419 = vector.broadcast %416 : vector<1x256xf32> to vector<4x256xf32>
    %420 = arith.mulf %418, %419 : vector<4x256xf32>
    %421 = arith.addf %415, %420 : vector<4x256xf32>
    %c0_217 = arith.constant 0 : index
    %c36_218 = arith.constant 36 : index
    %422 = vector.load %arg13[%c0_217, %c36_218] : memref<4x512xf32, #tpu.memory_space<vmem>>, vector<1x256xf32>
    %c0_219 = arith.constant 0 : index
    %c48 = arith.constant 48 : index
    %423 = vector.load %arg5[%c0_219, %c48] : memref<4x108xf32, #tpu.memory_space<vmem>>, vector<4x1xf32>
    %424 = vector.broadcast %423 : vector<4x1xf32> to vector<4x256xf32>
    %425 = vector.broadcast %422 : vector<1x256xf32> to vector<4x256xf32>
    %426 = arith.mulf %424, %425 : vector<4x256xf32>
    %427 = arith.addf %421, %426 : vector<4x256xf32>
    %c1_220 = arith.constant 1 : index
    %c36_221 = arith.constant 36 : index
    %428 = vector.load %arg13[%c1_220, %c36_221] : memref<4x512xf32, #tpu.memory_space<vmem>>, vector<1x256xf32>
    %c0_222 = arith.constant 0 : index
    %c49 = arith.constant 49 : index
    %429 = vector.load %arg5[%c0_222, %c49] : memref<4x108xf32, #tpu.memory_space<vmem>>, vector<4x1xf32>
    %430 = vector.broadcast %429 : vector<4x1xf32> to vector<4x256xf32>
    %431 = vector.broadcast %428 : vector<1x256xf32> to vector<4x256xf32>
    %432 = arith.mulf %430, %431 : vector<4x256xf32>
    %433 = arith.addf %427, %432 : vector<4x256xf32>
    %c2_223 = arith.constant 2 : index
    %c36_224 = arith.constant 36 : index
    %434 = vector.load %arg13[%c2_223, %c36_224] : memref<4x512xf32, #tpu.memory_space<vmem>>, vector<1x256xf32>
    %c0_225 = arith.constant 0 : index
    %c50 = arith.constant 50 : index
    %435 = vector.load %arg5[%c0_225, %c50] : memref<4x108xf32, #tpu.memory_space<vmem>>, vector<4x1xf32>
    %436 = vector.broadcast %435 : vector<4x1xf32> to vector<4x256xf32>
    %437 = vector.broadcast %434 : vector<1x256xf32> to vector<4x256xf32>
    %438 = arith.mulf %436, %437 : vector<4x256xf32>
    %439 = arith.addf %433, %438 : vector<4x256xf32>
    %c3_226 = arith.constant 3 : index
    %c36_227 = arith.constant 36 : index
    %440 = vector.load %arg13[%c3_226, %c36_227] : memref<4x512xf32, #tpu.memory_space<vmem>>, vector<1x256xf32>
    %c0_228 = arith.constant 0 : index
    %c51 = arith.constant 51 : index
    %441 = vector.load %arg5[%c0_228, %c51] : memref<4x108xf32, #tpu.memory_space<vmem>>, vector<4x1xf32>
    %442 = vector.broadcast %441 : vector<4x1xf32> to vector<4x256xf32>
    %443 = vector.broadcast %440 : vector<1x256xf32> to vector<4x256xf32>
    %444 = arith.mulf %442, %443 : vector<4x256xf32>
    %445 = arith.addf %439, %444 : vector<4x256xf32>
    %c0_229 = arith.constant 0 : index
    %c38_230 = arith.constant 38 : index
    %446 = vector.load %arg13[%c0_229, %c38_230] : memref<4x512xf32, #tpu.memory_space<vmem>>, vector<1x256xf32>
    %c0_231 = arith.constant 0 : index
    %c52 = arith.constant 52 : index
    %447 = vector.load %arg5[%c0_231, %c52] : memref<4x108xf32, #tpu.memory_space<vmem>>, vector<4x1xf32>
    %448 = vector.broadcast %447 : vector<4x1xf32> to vector<4x256xf32>
    %449 = vector.broadcast %446 : vector<1x256xf32> to vector<4x256xf32>
    %450 = arith.mulf %448, %449 : vector<4x256xf32>
    %451 = arith.addf %445, %450 : vector<4x256xf32>
    %c1_232 = arith.constant 1 : index
    %c38_233 = arith.constant 38 : index
    %452 = vector.load %arg13[%c1_232, %c38_233] : memref<4x512xf32, #tpu.memory_space<vmem>>, vector<1x256xf32>
    %c0_234 = arith.constant 0 : index
    %c53 = arith.constant 53 : index
    %453 = vector.load %arg5[%c0_234, %c53] : memref<4x108xf32, #tpu.memory_space<vmem>>, vector<4x1xf32>
    %454 = vector.broadcast %453 : vector<4x1xf32> to vector<4x256xf32>
    %455 = vector.broadcast %452 : vector<1x256xf32> to vector<4x256xf32>
    %456 = arith.mulf %454, %455 : vector<4x256xf32>
    %457 = arith.addf %451, %456 : vector<4x256xf32>
    %c2_235 = arith.constant 2 : index
    %c38_236 = arith.constant 38 : index
    %458 = vector.load %arg13[%c2_235, %c38_236] : memref<4x512xf32, #tpu.memory_space<vmem>>, vector<1x256xf32>
    %c0_237 = arith.constant 0 : index
    %c54_238 = arith.constant 54 : index
    %459 = vector.load %arg5[%c0_237, %c54_238] : memref<4x108xf32, #tpu.memory_space<vmem>>, vector<4x1xf32>
    %460 = vector.broadcast %459 : vector<4x1xf32> to vector<4x256xf32>
    %461 = vector.broadcast %458 : vector<1x256xf32> to vector<4x256xf32>
    %462 = arith.mulf %460, %461 : vector<4x256xf32>
    %463 = arith.addf %457, %462 : vector<4x256xf32>
    %c3_239 = arith.constant 3 : index
    %c38_240 = arith.constant 38 : index
    %464 = vector.load %arg13[%c3_239, %c38_240] : memref<4x512xf32, #tpu.memory_space<vmem>>, vector<1x256xf32>
    %c0_241 = arith.constant 0 : index
    %c55 = arith.constant 55 : index
    %465 = vector.load %arg5[%c0_241, %c55] : memref<4x108xf32, #tpu.memory_space<vmem>>, vector<4x1xf32>
    %466 = vector.broadcast %465 : vector<4x1xf32> to vector<4x256xf32>
    %467 = vector.broadcast %464 : vector<1x256xf32> to vector<4x256xf32>
    %468 = arith.mulf %466, %467 : vector<4x256xf32>
    %469 = arith.addf %463, %468 : vector<4x256xf32>
    %c0_242 = arith.constant 0 : index
    %c40_243 = arith.constant 40 : index
    %470 = vector.load %arg13[%c0_242, %c40_243] : memref<4x512xf32, #tpu.memory_space<vmem>>, vector<1x256xf32>
    %c0_244 = arith.constant 0 : index
    %c56 = arith.constant 56 : index
    %471 = vector.load %arg5[%c0_244, %c56] : memref<4x108xf32, #tpu.memory_space<vmem>>, vector<4x1xf32>
    %472 = vector.broadcast %471 : vector<4x1xf32> to vector<4x256xf32>
    %473 = vector.broadcast %470 : vector<1x256xf32> to vector<4x256xf32>
    %474 = arith.mulf %472, %473 : vector<4x256xf32>
    %475 = arith.addf %469, %474 : vector<4x256xf32>
    %c1_245 = arith.constant 1 : index
    %c40_246 = arith.constant 40 : index
    %476 = vector.load %arg13[%c1_245, %c40_246] : memref<4x512xf32, #tpu.memory_space<vmem>>, vector<1x256xf32>
    %c0_247 = arith.constant 0 : index
    %c57_248 = arith.constant 57 : index
    %477 = vector.load %arg5[%c0_247, %c57_248] : memref<4x108xf32, #tpu.memory_space<vmem>>, vector<4x1xf32>
    %478 = vector.broadcast %477 : vector<4x1xf32> to vector<4x256xf32>
    %479 = vector.broadcast %476 : vector<1x256xf32> to vector<4x256xf32>
    %480 = arith.mulf %478, %479 : vector<4x256xf32>
    %481 = arith.addf %475, %480 : vector<4x256xf32>
    %c2_249 = arith.constant 2 : index
    %c40_250 = arith.constant 40 : index
    %482 = vector.load %arg13[%c2_249, %c40_250] : memref<4x512xf32, #tpu.memory_space<vmem>>, vector<1x256xf32>
    %c0_251 = arith.constant 0 : index
    %c58 = arith.constant 58 : index
    %483 = vector.load %arg5[%c0_251, %c58] : memref<4x108xf32, #tpu.memory_space<vmem>>, vector<4x1xf32>
    %484 = vector.broadcast %483 : vector<4x1xf32> to vector<4x256xf32>
    %485 = vector.broadcast %482 : vector<1x256xf32> to vector<4x256xf32>
    %486 = arith.mulf %484, %485 : vector<4x256xf32>
    %487 = arith.addf %481, %486 : vector<4x256xf32>
    %c3_252 = arith.constant 3 : index
    %c40_253 = arith.constant 40 : index
    %488 = vector.load %arg13[%c3_252, %c40_253] : memref<4x512xf32, #tpu.memory_space<vmem>>, vector<1x256xf32>
    %c0_254 = arith.constant 0 : index
    %c59 = arith.constant 59 : index
    %489 = vector.load %arg5[%c0_254, %c59] : memref<4x108xf32, #tpu.memory_space<vmem>>, vector<4x1xf32>
    %490 = vector.broadcast %489 : vector<4x1xf32> to vector<4x256xf32>
    %491 = vector.broadcast %488 : vector<1x256xf32> to vector<4x256xf32>
    %492 = arith.mulf %490, %491 : vector<4x256xf32>
    %493 = arith.addf %487, %492 : vector<4x256xf32>
    %c0_255 = arith.constant 0 : index
    %c72 = arith.constant 72 : index
    %494 = vector.load %arg13[%c0_255, %c72] : memref<4x512xf32, #tpu.memory_space<vmem>>, vector<1x256xf32>
    %c0_256 = arith.constant 0 : index
    %c60_257 = arith.constant 60 : index
    %495 = vector.load %arg5[%c0_256, %c60_257] : memref<4x108xf32, #tpu.memory_space<vmem>>, vector<4x1xf32>
    %496 = vector.broadcast %495 : vector<4x1xf32> to vector<4x256xf32>
    %497 = vector.broadcast %494 : vector<1x256xf32> to vector<4x256xf32>
    %498 = arith.mulf %496, %497 : vector<4x256xf32>
    %499 = arith.addf %493, %498 : vector<4x256xf32>
    %c1_258 = arith.constant 1 : index
    %c72_259 = arith.constant 72 : index
    %500 = vector.load %arg13[%c1_258, %c72_259] : memref<4x512xf32, #tpu.memory_space<vmem>>, vector<1x256xf32>
    %c0_260 = arith.constant 0 : index
    %c61 = arith.constant 61 : index
    %501 = vector.load %arg5[%c0_260, %c61] : memref<4x108xf32, #tpu.memory_space<vmem>>, vector<4x1xf32>
    %502 = vector.broadcast %501 : vector<4x1xf32> to vector<4x256xf32>
    %503 = vector.broadcast %500 : vector<1x256xf32> to vector<4x256xf32>
    %504 = arith.mulf %502, %503 : vector<4x256xf32>
    %505 = arith.addf %499, %504 : vector<4x256xf32>
    %c2_261 = arith.constant 2 : index
    %c72_262 = arith.constant 72 : index
    %506 = vector.load %arg13[%c2_261, %c72_262] : memref<4x512xf32, #tpu.memory_space<vmem>>, vector<1x256xf32>
    %c0_263 = arith.constant 0 : index
    %c62 = arith.constant 62 : index
    %507 = vector.load %arg5[%c0_263, %c62] : memref<4x108xf32, #tpu.memory_space<vmem>>, vector<4x1xf32>
    %508 = vector.broadcast %507 : vector<4x1xf32> to vector<4x256xf32>
    %509 = vector.broadcast %506 : vector<1x256xf32> to vector<4x256xf32>
    %510 = arith.mulf %508, %509 : vector<4x256xf32>
    %511 = arith.addf %505, %510 : vector<4x256xf32>
    %c3_264 = arith.constant 3 : index
    %c72_265 = arith.constant 72 : index
    %512 = vector.load %arg13[%c3_264, %c72_265] : memref<4x512xf32, #tpu.memory_space<vmem>>, vector<1x256xf32>
    %c0_266 = arith.constant 0 : index
    %c63 = arith.constant 63 : index
    %513 = vector.load %arg5[%c0_266, %c63] : memref<4x108xf32, #tpu.memory_space<vmem>>, vector<4x1xf32>
    %514 = vector.broadcast %513 : vector<4x1xf32> to vector<4x256xf32>
    %515 = vector.broadcast %512 : vector<1x256xf32> to vector<4x256xf32>
    %516 = arith.mulf %514, %515 : vector<4x256xf32>
    %517 = arith.addf %511, %516 : vector<4x256xf32>
    %c0_267 = arith.constant 0 : index
    %c74 = arith.constant 74 : index
    %518 = vector.load %arg13[%c0_267, %c74] : memref<4x512xf32, #tpu.memory_space<vmem>>, vector<1x256xf32>
    %c0_268 = arith.constant 0 : index
    %c64 = arith.constant 64 : index
    %519 = vector.load %arg5[%c0_268, %c64] : memref<4x108xf32, #tpu.memory_space<vmem>>, vector<4x1xf32>
    %520 = vector.broadcast %519 : vector<4x1xf32> to vector<4x256xf32>
    %521 = vector.broadcast %518 : vector<1x256xf32> to vector<4x256xf32>
    %522 = arith.mulf %520, %521 : vector<4x256xf32>
    %523 = arith.addf %517, %522 : vector<4x256xf32>
    %c1_269 = arith.constant 1 : index
    %c74_270 = arith.constant 74 : index
    %524 = vector.load %arg13[%c1_269, %c74_270] : memref<4x512xf32, #tpu.memory_space<vmem>>, vector<1x256xf32>
    %c0_271 = arith.constant 0 : index
    %c65 = arith.constant 65 : index
    %525 = vector.load %arg5[%c0_271, %c65] : memref<4x108xf32, #tpu.memory_space<vmem>>, vector<4x1xf32>
    %526 = vector.broadcast %525 : vector<4x1xf32> to vector<4x256xf32>
    %527 = vector.broadcast %524 : vector<1x256xf32> to vector<4x256xf32>
    %528 = arith.mulf %526, %527 : vector<4x256xf32>
    %529 = arith.addf %523, %528 : vector<4x256xf32>
    %c2_272 = arith.constant 2 : index
    %c74_273 = arith.constant 74 : index
    %530 = vector.load %arg13[%c2_272, %c74_273] : memref<4x512xf32, #tpu.memory_space<vmem>>, vector<1x256xf32>
    %c0_274 = arith.constant 0 : index
    %c66 = arith.constant 66 : index
    %531 = vector.load %arg5[%c0_274, %c66] : memref<4x108xf32, #tpu.memory_space<vmem>>, vector<4x1xf32>
    %532 = vector.broadcast %531 : vector<4x1xf32> to vector<4x256xf32>
    %533 = vector.broadcast %530 : vector<1x256xf32> to vector<4x256xf32>
    %534 = arith.mulf %532, %533 : vector<4x256xf32>
    %535 = arith.addf %529, %534 : vector<4x256xf32>
    %c3_275 = arith.constant 3 : index
    %c74_276 = arith.constant 74 : index
    %536 = vector.load %arg13[%c3_275, %c74_276] : memref<4x512xf32, #tpu.memory_space<vmem>>, vector<1x256xf32>
    %c0_277 = arith.constant 0 : index
    %c67 = arith.constant 67 : index
    %537 = vector.load %arg5[%c0_277, %c67] : memref<4x108xf32, #tpu.memory_space<vmem>>, vector<4x1xf32>
    %538 = vector.broadcast %537 : vector<4x1xf32> to vector<4x256xf32>
    %539 = vector.broadcast %536 : vector<1x256xf32> to vector<4x256xf32>
    %540 = arith.mulf %538, %539 : vector<4x256xf32>
    %541 = arith.addf %535, %540 : vector<4x256xf32>
    %c0_278 = arith.constant 0 : index
    %c76 = arith.constant 76 : index
    %542 = vector.load %arg13[%c0_278, %c76] : memref<4x512xf32, #tpu.memory_space<vmem>>, vector<1x256xf32>
    %c0_279 = arith.constant 0 : index
    %c68 = arith.constant 68 : index
    %543 = vector.load %arg5[%c0_279, %c68] : memref<4x108xf32, #tpu.memory_space<vmem>>, vector<4x1xf32>
    %544 = vector.broadcast %543 : vector<4x1xf32> to vector<4x256xf32>
    %545 = vector.broadcast %542 : vector<1x256xf32> to vector<4x256xf32>
    %546 = arith.mulf %544, %545 : vector<4x256xf32>
    %547 = arith.addf %541, %546 : vector<4x256xf32>
    %c1_280 = arith.constant 1 : index
    %c76_281 = arith.constant 76 : index
    %548 = vector.load %arg13[%c1_280, %c76_281] : memref<4x512xf32, #tpu.memory_space<vmem>>, vector<1x256xf32>
    %c0_282 = arith.constant 0 : index
    %c69 = arith.constant 69 : index
    %549 = vector.load %arg5[%c0_282, %c69] : memref<4x108xf32, #tpu.memory_space<vmem>>, vector<4x1xf32>
    %550 = vector.broadcast %549 : vector<4x1xf32> to vector<4x256xf32>
    %551 = vector.broadcast %548 : vector<1x256xf32> to vector<4x256xf32>
    %552 = arith.mulf %550, %551 : vector<4x256xf32>
    %553 = arith.addf %547, %552 : vector<4x256xf32>
    %c2_283 = arith.constant 2 : index
    %c76_284 = arith.constant 76 : index
    %554 = vector.load %arg13[%c2_283, %c76_284] : memref<4x512xf32, #tpu.memory_space<vmem>>, vector<1x256xf32>
    %c0_285 = arith.constant 0 : index
    %c70 = arith.constant 70 : index
    %555 = vector.load %arg5[%c0_285, %c70] : memref<4x108xf32, #tpu.memory_space<vmem>>, vector<4x1xf32>
    %556 = vector.broadcast %555 : vector<4x1xf32> to vector<4x256xf32>
    %557 = vector.broadcast %554 : vector<1x256xf32> to vector<4x256xf32>
    %558 = arith.mulf %556, %557 : vector<4x256xf32>
    %559 = arith.addf %553, %558 : vector<4x256xf32>
    %c3_286 = arith.constant 3 : index
    %c76_287 = arith.constant 76 : index
    %560 = vector.load %arg13[%c3_286, %c76_287] : memref<4x512xf32, #tpu.memory_space<vmem>>, vector<1x256xf32>
    %c0_288 = arith.constant 0 : index
    %c71 = arith.constant 71 : index
    %561 = vector.load %arg5[%c0_288, %c71] : memref<4x108xf32, #tpu.memory_space<vmem>>, vector<4x1xf32>
    %562 = vector.broadcast %561 : vector<4x1xf32> to vector<4x256xf32>
    %563 = vector.broadcast %560 : vector<1x256xf32> to vector<4x256xf32>
    %564 = arith.mulf %562, %563 : vector<4x256xf32>
    %565 = arith.addf %559, %564 : vector<4x256xf32>
    %c4_289 = arith.constant 4 : index
    %566 = memref.load %arg9[%c4_289] : memref<9xf32, #tpu.memory_space<smem>>
    %cst_290 = arith.constant 0.000000e+00 : f32
    %567 = vector.broadcast %cst_290 : f32 to vector<4x256xf32>
    %568 = arith.cmpf oge, %565, %567 : vector<4x256xf32>
    %569 = vector.broadcast %566 : f32 to vector<4x256xf32>
    %570 = arith.mulf %569, %565 : vector<4x256xf32>
    %571 = arith.select %568, %565, %570 : vector<4x256xi1>, vector<4x256xf32>
    %cst_291 = arith.constant 0.000000e+00 : f32
    %572 = vector.broadcast %cst_291 : f32 to vector<4x256xf32>
    %c0_292 = arith.constant 0 : index
    %c1_293 = arith.constant 1 : index
    %573 = vector.load %arg8[%c0_292, %c1_293] : memref<4x3xf32, #tpu.memory_space<vmem>>, vector<4x1xf32>
    %574 = vector.broadcast %573 : vector<4x1xf32> to vector<4x256xf32>
    %575 = arith.addf %572, %574 : vector<4x256xf32>
    %c0_294 = arith.constant 0 : index
    %c4_295 = arith.constant 4 : index
    %576 = vector.load %arg7[%c0_294, %c4_295] : memref<4x12xf32, #tpu.memory_space<vmem>>, vector<4x1xf32>
    %577 = vector.extract_strided_slice %571 {offsets = [0, 0], sizes = [1, 256], strides = [1, 1]} : vector<4x256xf32> to vector<1x256xf32>
    %578 = vector.broadcast %576 : vector<4x1xf32> to vector<4x256xf32>
    %579 = vector.broadcast %577 : vector<1x256xf32> to vector<4x256xf32>
    %580 = arith.mulf %578, %579 : vector<4x256xf32>
    %581 = arith.addf %575, %580 : vector<4x256xf32>
    %c0_296 = arith.constant 0 : index
    %c5_297 = arith.constant 5 : index
    %582 = vector.load %arg7[%c0_296, %c5_297] : memref<4x12xf32, #tpu.memory_space<vmem>>, vector<4x1xf32>
    %583 = vector.extract_strided_slice %571 {offsets = [1, 0], sizes = [1, 256], strides = [1, 1]} : vector<4x256xf32> to vector<1x256xf32>
    %584 = vector.broadcast %582 : vector<4x1xf32> to vector<4x256xf32>
    %585 = vector.broadcast %583 : vector<1x256xf32> to vector<4x256xf32>
    %586 = arith.mulf %584, %585 : vector<4x256xf32>
    %587 = arith.addf %581, %586 : vector<4x256xf32>
    %c0_298 = arith.constant 0 : index
    %c6_299 = arith.constant 6 : index
    %588 = vector.load %arg7[%c0_298, %c6_299] : memref<4x12xf32, #tpu.memory_space<vmem>>, vector<4x1xf32>
    %589 = vector.extract_strided_slice %571 {offsets = [2, 0], sizes = [1, 256], strides = [1, 1]} : vector<4x256xf32> to vector<1x256xf32>
    %590 = vector.broadcast %588 : vector<4x1xf32> to vector<4x256xf32>
    %591 = vector.broadcast %589 : vector<1x256xf32> to vector<4x256xf32>
    %592 = arith.mulf %590, %591 : vector<4x256xf32>
    %593 = arith.addf %587, %592 : vector<4x256xf32>
    %c0_300 = arith.constant 0 : index
    %c7_301 = arith.constant 7 : index
    %594 = vector.load %arg7[%c0_300, %c7_301] : memref<4x12xf32, #tpu.memory_space<vmem>>, vector<4x1xf32>
    %595 = vector.extract_strided_slice %571 {offsets = [3, 0], sizes = [1, 256], strides = [1, 1]} : vector<4x256xf32> to vector<1x256xf32>
    %596 = vector.broadcast %594 : vector<4x1xf32> to vector<4x256xf32>
    %597 = vector.broadcast %595 : vector<1x256xf32> to vector<4x256xf32>
    %598 = arith.mulf %596, %597 : vector<4x256xf32>
    %599 = arith.addf %593, %598 : vector<4x256xf32>
    %c7_302 = arith.constant 7 : index
    %600 = memref.load %arg9[%c7_302] : memref<9xf32, #tpu.memory_space<smem>>
    %cst_303 = arith.constant 0.000000e+00 : f32
    %601 = vector.broadcast %cst_303 : f32 to vector<4x256xf32>
    %602 = arith.cmpf oge, %599, %601 : vector<4x256xf32>
    %603 = vector.broadcast %600 : f32 to vector<4x256xf32>
    %604 = arith.mulf %603, %599 : vector<4x256xf32>
    %605 = arith.select %602, %599, %604 : vector<4x256xi1>, vector<4x256xf32>
    %c0_304 = arith.constant 0 : index
    %c0_305 = arith.constant 0 : index
    %c0_306 = arith.constant 0 : index
    %606 = vector.load %arg11[%c0_304, %c0_305, %c0_306] : memref<1x4x256xf32, #tpu.memory_space<vmem>>, vector<1x4x256xf32>
    %607 = vector.shape_cast %606 : vector<1x4x256xf32> to vector<4x256xf32>
    %608 = vector.shape_cast %605 : vector<4x256xf32> to vector<1x4x256xf32>
    tpu.vector_store %arg11[%c0_304, %c0_305, %c0_306], %608 {strides = array<i32>} : memref<1x4x256xf32, #tpu.memory_space<vmem>>, vector<1x4x256xf32>,
    %cst_307 = arith.constant 0.000000e+00 : f32
    %609 = vector.broadcast %cst_307 : f32 to vector<4x512xf32>
    %c0_308 = arith.constant 0 : index
    %c2_309 = arith.constant 2 : index
    %610 = vector.load %arg4[%c0_308, %c2_309] : memref<4x3xf32, #tpu.memory_space<vmem>>, vector<4x1xf32>
    %611 = vector.broadcast %610 : vector<4x1xf32> to vector<4x512xf32>
    %612 = arith.addf %609, %611 : vector<4x512xf32>
    %c0_310 = arith.constant 0 : index
    %c8_311 = arith.constant 8 : index
    %613 = vector.load %arg3[%c0_310, %c8_311] : memref<4x12xf32, #tpu.memory_space<vmem>>, vector<4x1xf32>
    %c0_312 = arith.constant 0 : index
    %c0_313 = arith.constant 0 : index
    %c0_314 = arith.constant 0 : index
    %614 = vector.load %arg1[%c0_312, %c0_313, %c0_314] : memref<1x4x512xf32, #tpu.memory_space<vmem>>, vector<1x1x512xf32>
    %615 = vector.shape_cast %614 : vector<1x1x512xf32> to vector<1x512xf32>
    %616 = vector.broadcast %613 : vector<4x1xf32> to vector<4x512xf32>
    %617 = vector.broadcast %615 : vector<1x512xf32> to vector<4x512xf32>
    %618 = arith.mulf %616, %617 : vector<4x512xf32>
    %619 = arith.addf %612, %618 : vector<4x512xf32>
    %c0_315 = arith.constant 0 : index
    %c9_316 = arith.constant 9 : index
    %620 = vector.load %arg3[%c0_315, %c9_316] : memref<4x12xf32, #tpu.memory_space<vmem>>, vector<4x1xf32>
    %c0_317 = arith.constant 0 : index
    %c1_318 = arith.constant 1 : index
    %c0_319 = arith.constant 0 : index
    %621 = vector.load %arg1[%c0_317, %c1_318, %c0_319] : memref<1x4x512xf32, #tpu.memory_space<vmem>>, vector<1x1x512xf32>
    %622 = vector.shape_cast %621 : vector<1x1x512xf32> to vector<1x512xf32>
    %623 = vector.broadcast %620 : vector<4x1xf32> to vector<4x512xf32>
    %624 = vector.broadcast %622 : vector<1x512xf32> to vector<4x512xf32>
    %625 = arith.mulf %623, %624 : vector<4x512xf32>
    %626 = arith.addf %619, %625 : vector<4x512xf32>
    %c0_320 = arith.constant 0 : index
    %c10_321 = arith.constant 10 : index
    %627 = vector.load %arg3[%c0_320, %c10_321] : memref<4x12xf32, #tpu.memory_space<vmem>>, vector<4x1xf32>
    %c0_322 = arith.constant 0 : index
    %c2_323 = arith.constant 2 : index
    %c0_324 = arith.constant 0 : index
    %628 = vector.load %arg1[%c0_322, %c2_323, %c0_324] : memref<1x4x512xf32, #tpu.memory_space<vmem>>, vector<1x1x512xf32>
    %629 = vector.shape_cast %628 : vector<1x1x512xf32> to vector<1x512xf32>
    %630 = vector.broadcast %627 : vector<4x1xf32> to vector<4x512xf32>
    %631 = vector.broadcast %629 : vector<1x512xf32> to vector<4x512xf32>
    %632 = arith.mulf %630, %631 : vector<4x512xf32>
    %633 = arith.addf %626, %632 : vector<4x512xf32>
    %c0_325 = arith.constant 0 : index
    %c11_326 = arith.constant 11 : index
    %634 = vector.load %arg3[%c0_325, %c11_326] : memref<4x12xf32, #tpu.memory_space<vmem>>, vector<4x1xf32>
    %c0_327 = arith.constant 0 : index
    %c3_328 = arith.constant 3 : index
    %c0_329 = arith.constant 0 : index
    %635 = vector.load %arg1[%c0_327, %c3_328, %c0_329] : memref<1x4x512xf32, #tpu.memory_space<vmem>>, vector<1x1x512xf32>
    %636 = vector.shape_cast %635 : vector<1x1x512xf32> to vector<1x512xf32>
    %637 = vector.broadcast %634 : vector<4x1xf32> to vector<4x512xf32>
    %638 = vector.broadcast %636 : vector<1x512xf32> to vector<4x512xf32>
    %639 = arith.mulf %637, %638 : vector<4x512xf32>
    %640 = arith.addf %633, %639 : vector<4x512xf32>
    %c2_330 = arith.constant 2 : index
    %641 = memref.load %arg9[%c2_330] : memref<9xf32, #tpu.memory_space<smem>>
    %cst_331 = arith.constant 0.000000e+00 : f32
    %642 = vector.broadcast %cst_331 : f32 to vector<4x512xf32>
    %643 = arith.cmpf oge, %640, %642 : vector<4x512xf32>
    %644 = vector.broadcast %641 : f32 to vector<4x512xf32>
    %645 = arith.mulf %644, %640 : vector<4x512xf32>
    %646 = arith.select %643, %640, %645 : vector<4x512xi1>, vector<4x512xf32>
    %647 = vector.broadcast %0 : vector<1x512xf32> to vector<4x512xf32>
    %648 = arith.mulf %646, %647 : vector<4x512xf32>
    %c0_332 = arith.constant 0 : index
    %c0_333 = arith.constant 0 : index
    %649 = vector.load %arg13[%c0_332, %c0_333] : memref<4x512xf32, #tpu.memory_space<vmem>>, vector<4x512xf32>
    tpu.vector_store %arg13[%c0_332, %c0_333], %648 {strides = array<i32>} : memref<4x512xf32, #tpu.memory_space<vmem>>, vector<4x512xf32>,
    %cst_334 = arith.constant 0.000000e+00 : f32
    %650 = vector.broadcast %cst_334 : f32 to vector<4x384xf32>
    %c0_335 = arith.constant 0 : index
    %c2_336 = arith.constant 2 : index
    %651 = vector.load %arg6[%c0_335, %c2_336] : memref<4x3xf32, #tpu.memory_space<vmem>>, vector<4x1xf32>
    %652 = vector.broadcast %651 : vector<4x1xf32> to vector<4x384xf32>
    %653 = arith.addf %650, %652 : vector<4x384xf32>
    %c0_337 = arith.constant 0 : index
    %c0_338 = arith.constant 0 : index
    %654 = vector.load %arg13[%c0_337, %c0_338] : memref<4x512xf32, #tpu.memory_space<vmem>>, vector<1x384xf32>
    %c0_339 = arith.constant 0 : index
    %c72_340 = arith.constant 72 : index
    %655 = vector.load %arg5[%c0_339, %c72_340] : memref<4x108xf32, #tpu.memory_space<vmem>>, vector<4x1xf32>
    %656 = vector.broadcast %655 : vector<4x1xf32> to vector<4x384xf32>
    %657 = vector.broadcast %654 : vector<1x384xf32> to vector<4x384xf32>
    %658 = arith.mulf %656, %657 : vector<4x384xf32>
    %659 = arith.addf %653, %658 : vector<4x384xf32>
    %c1_341 = arith.constant 1 : index
    %c0_342 = arith.constant 0 : index
    %660 = vector.load %arg13[%c1_341, %c0_342] : memref<4x512xf32, #tpu.memory_space<vmem>>, vector<1x384xf32>
    %c0_343 = arith.constant 0 : index
    %c73 = arith.constant 73 : index
    %661 = vector.load %arg5[%c0_343, %c73] : memref<4x108xf32, #tpu.memory_space<vmem>>, vector<4x1xf32>
    %662 = vector.broadcast %661 : vector<4x1xf32> to vector<4x384xf32>
    %663 = vector.broadcast %660 : vector<1x384xf32> to vector<4x384xf32>
    %664 = arith.mulf %662, %663 : vector<4x384xf32>
    %665 = arith.addf %659, %664 : vector<4x384xf32>
    %c2_344 = arith.constant 2 : index
    %c0_345 = arith.constant 0 : index
    %666 = vector.load %arg13[%c2_344, %c0_345] : memref<4x512xf32, #tpu.memory_space<vmem>>, vector<1x384xf32>
    %c0_346 = arith.constant 0 : index
    %c74_347 = arith.constant 74 : index
    %667 = vector.load %arg5[%c0_346, %c74_347] : memref<4x108xf32, #tpu.memory_space<vmem>>, vector<4x1xf32>
    %668 = vector.broadcast %667 : vector<4x1xf32> to vector<4x384xf32>
    %669 = vector.broadcast %666 : vector<1x384xf32> to vector<4x384xf32>
    %670 = arith.mulf %668, %669 : vector<4x384xf32>
    %671 = arith.addf %665, %670 : vector<4x384xf32>
    %c3_348 = arith.constant 3 : index
    %c0_349 = arith.constant 0 : index
    %672 = vector.load %arg13[%c3_348, %c0_349] : memref<4x512xf32, #tpu.memory_space<vmem>>, vector<1x384xf32>
    %c0_350 = arith.constant 0 : index
    %c75 = arith.constant 75 : index
    %673 = vector.load %arg5[%c0_350, %c75] : memref<4x108xf32, #tpu.memory_space<vmem>>, vector<4x1xf32>
    %674 = vector.broadcast %673 : vector<4x1xf32> to vector<4x384xf32>
    %675 = vector.broadcast %672 : vector<1x384xf32> to vector<4x384xf32>
    %676 = arith.mulf %674, %675 : vector<4x384xf32>
    %677 = arith.addf %671, %676 : vector<4x384xf32>
    %c0_351 = arith.constant 0 : index
    %c1_352 = arith.constant 1 : index
    %678 = vector.load %arg13[%c0_351, %c1_352] : memref<4x512xf32, #tpu.memory_space<vmem>>, vector<1x384xf32>
    %c0_353 = arith.constant 0 : index
    %c76_354 = arith.constant 76 : index
    %679 = vector.load %arg5[%c0_353, %c76_354] : memref<4x108xf32, #tpu.memory_space<vmem>>, vector<4x1xf32>
    %680 = vector.broadcast %679 : vector<4x1xf32> to vector<4x384xf32>
    %681 = vector.broadcast %678 : vector<1x384xf32> to vector<4x384xf32>
    %682 = arith.mulf %680, %681 : vector<4x384xf32>
    %683 = arith.addf %677, %682 : vector<4x384xf32>
    %c1_355 = arith.constant 1 : index
    %c1_356 = arith.constant 1 : index
    %684 = vector.load %arg13[%c1_355, %c1_356] : memref<4x512xf32, #tpu.memory_space<vmem>>, vector<1x384xf32>
    %c0_357 = arith.constant 0 : index
    %c77 = arith.constant 77 : index
    %685 = vector.load %arg5[%c0_357, %c77] : memref<4x108xf32, #tpu.memory_space<vmem>>, vector<4x1xf32>
    %686 = vector.broadcast %685 : vector<4x1xf32> to vector<4x384xf32>
    %687 = vector.broadcast %684 : vector<1x384xf32> to vector<4x384xf32>
    %688 = arith.mulf %686, %687 : vector<4x384xf32>
    %689 = arith.addf %683, %688 : vector<4x384xf32>
    %c2_358 = arith.constant 2 : index
    %c1_359 = arith.constant 1 : index
    %690 = vector.load %arg13[%c2_358, %c1_359] : memref<4x512xf32, #tpu.memory_space<vmem>>, vector<1x384xf32>
    %c0_360 = arith.constant 0 : index
    %c78 = arith.constant 78 : index
    %691 = vector.load %arg5[%c0_360, %c78] : memref<4x108xf32, #tpu.memory_space<vmem>>, vector<4x1xf32>
    %692 = vector.broadcast %691 : vector<4x1xf32> to vector<4x384xf32>
    %693 = vector.broadcast %690 : vector<1x384xf32> to vector<4x384xf32>
    %694 = arith.mulf %692, %693 : vector<4x384xf32>
    %695 = arith.addf %689, %694 : vector<4x384xf32>
    %c3_361 = arith.constant 3 : index
    %c1_362 = arith.constant 1 : index
    %696 = vector.load %arg13[%c3_361, %c1_362] : memref<4x512xf32, #tpu.memory_space<vmem>>, vector<1x384xf32>
    %c0_363 = arith.constant 0 : index
    %c79 = arith.constant 79 : index
    %697 = vector.load %arg5[%c0_363, %c79] : memref<4x108xf32, #tpu.memory_space<vmem>>, vector<4x1xf32>
    %698 = vector.broadcast %697 : vector<4x1xf32> to vector<4x384xf32>
    %699 = vector.broadcast %696 : vector<1x384xf32> to vector<4x384xf32>
    %700 = arith.mulf %698, %699 : vector<4x384xf32>
    %701 = arith.addf %695, %700 : vector<4x384xf32>
    %c0_364 = arith.constant 0 : index
    %c2_365 = arith.constant 2 : index
    %702 = vector.load %arg13[%c0_364, %c2_365] : memref<4x512xf32, #tpu.memory_space<vmem>>, vector<1x384xf32>
    %c0_366 = arith.constant 0 : index
    %c80 = arith.constant 80 : index
    %703 = vector.load %arg5[%c0_366, %c80] : memref<4x108xf32, #tpu.memory_space<vmem>>, vector<4x1xf32>
    %704 = vector.broadcast %703 : vector<4x1xf32> to vector<4x384xf32>
    %705 = vector.broadcast %702 : vector<1x384xf32> to vector<4x384xf32>
    %706 = arith.mulf %704, %705 : vector<4x384xf32>
    %707 = arith.addf %701, %706 : vector<4x384xf32>
    %c1_367 = arith.constant 1 : index
    %c2_368 = arith.constant 2 : index
    %708 = vector.load %arg13[%c1_367, %c2_368] : memref<4x512xf32, #tpu.memory_space<vmem>>, vector<1x384xf32>
    %c0_369 = arith.constant 0 : index
    %c81 = arith.constant 81 : index
    %709 = vector.load %arg5[%c0_369, %c81] : memref<4x108xf32, #tpu.memory_space<vmem>>, vector<4x1xf32>
    %710 = vector.broadcast %709 : vector<4x1xf32> to vector<4x384xf32>
    %711 = vector.broadcast %708 : vector<1x384xf32> to vector<4x384xf32>
    %712 = arith.mulf %710, %711 : vector<4x384xf32>
    %713 = arith.addf %707, %712 : vector<4x384xf32>
    %c2_370 = arith.constant 2 : index
    %c2_371 = arith.constant 2 : index
    %714 = vector.load %arg13[%c2_370, %c2_371] : memref<4x512xf32, #tpu.memory_space<vmem>>, vector<1x384xf32>
    %c0_372 = arith.constant 0 : index
    %c82 = arith.constant 82 : index
    %715 = vector.load %arg5[%c0_372, %c82] : memref<4x108xf32, #tpu.memory_space<vmem>>, vector<4x1xf32>
    %716 = vector.broadcast %715 : vector<4x1xf32> to vector<4x384xf32>
    %717 = vector.broadcast %714 : vector<1x384xf32> to vector<4x384xf32>
    %718 = arith.mulf %716, %717 : vector<4x384xf32>
    %719 = arith.addf %713, %718 : vector<4x384xf32>
    %c3_373 = arith.constant 3 : index
    %c2_374 = arith.constant 2 : index
    %720 = vector.load %arg13[%c3_373, %c2_374] : memref<4x512xf32, #tpu.memory_space<vmem>>, vector<1x384xf32>
    %c0_375 = arith.constant 0 : index
    %c83 = arith.constant 83 : index
    %721 = vector.load %arg5[%c0_375, %c83] : memref<4x108xf32, #tpu.memory_space<vmem>>, vector<4x1xf32>
    %722 = vector.broadcast %721 : vector<4x1xf32> to vector<4x384xf32>
    %723 = vector.broadcast %720 : vector<1x384xf32> to vector<4x384xf32>
    %724 = arith.mulf %722, %723 : vector<4x384xf32>
    %725 = arith.addf %719, %724 : vector<4x384xf32>
    %c0_376 = arith.constant 0 : index
    %c18_377 = arith.constant 18 : index
    %726 = vector.load %arg13[%c0_376, %c18_377] : memref<4x512xf32, #tpu.memory_space<vmem>>, vector<1x384xf32>
    %c0_378 = arith.constant 0 : index
    %c84 = arith.constant 84 : index
    %727 = vector.load %arg5[%c0_378, %c84] : memref<4x108xf32, #tpu.memory_space<vmem>>, vector<4x1xf32>
    %728 = vector.broadcast %727 : vector<4x1xf32> to vector<4x384xf32>
    %729 = vector.broadcast %726 : vector<1x384xf32> to vector<4x384xf32>
    %730 = arith.mulf %728, %729 : vector<4x384xf32>
    %731 = arith.addf %725, %730 : vector<4x384xf32>
    %c1_379 = arith.constant 1 : index
    %c18_380 = arith.constant 18 : index
    %732 = vector.load %arg13[%c1_379, %c18_380] : memref<4x512xf32, #tpu.memory_space<vmem>>, vector<1x384xf32>
    %c0_381 = arith.constant 0 : index
    %c85 = arith.constant 85 : index
    %733 = vector.load %arg5[%c0_381, %c85] : memref<4x108xf32, #tpu.memory_space<vmem>>, vector<4x1xf32>
    %734 = vector.broadcast %733 : vector<4x1xf32> to vector<4x384xf32>
    %735 = vector.broadcast %732 : vector<1x384xf32> to vector<4x384xf32>
    %736 = arith.mulf %734, %735 : vector<4x384xf32>
    %737 = arith.addf %731, %736 : vector<4x384xf32>
    %c2_382 = arith.constant 2 : index
    %c18_383 = arith.constant 18 : index
    %738 = vector.load %arg13[%c2_382, %c18_383] : memref<4x512xf32, #tpu.memory_space<vmem>>, vector<1x384xf32>
    %c0_384 = arith.constant 0 : index
    %c86 = arith.constant 86 : index
    %739 = vector.load %arg5[%c0_384, %c86] : memref<4x108xf32, #tpu.memory_space<vmem>>, vector<4x1xf32>
    %740 = vector.broadcast %739 : vector<4x1xf32> to vector<4x384xf32>
    %741 = vector.broadcast %738 : vector<1x384xf32> to vector<4x384xf32>
    %742 = arith.mulf %740, %741 : vector<4x384xf32>
    %743 = arith.addf %737, %742 : vector<4x384xf32>
    %c3_385 = arith.constant 3 : index
    %c18_386 = arith.constant 18 : index
    %744 = vector.load %arg13[%c3_385, %c18_386] : memref<4x512xf32, #tpu.memory_space<vmem>>, vector<1x384xf32>
    %c0_387 = arith.constant 0 : index
    %c87 = arith.constant 87 : index
    %745 = vector.load %arg5[%c0_387, %c87] : memref<4x108xf32, #tpu.memory_space<vmem>>, vector<4x1xf32>
    %746 = vector.broadcast %745 : vector<4x1xf32> to vector<4x384xf32>
    %747 = vector.broadcast %744 : vector<1x384xf32> to vector<4x384xf32>
    %748 = arith.mulf %746, %747 : vector<4x384xf32>
    %749 = arith.addf %743, %748 : vector<4x384xf32>
    %c0_388 = arith.constant 0 : index
    %c19_389 = arith.constant 19 : index
    %750 = vector.load %arg13[%c0_388, %c19_389] : memref<4x512xf32, #tpu.memory_space<vmem>>, vector<1x384xf32>
    %c0_390 = arith.constant 0 : index
    %c88 = arith.constant 88 : index
    %751 = vector.load %arg5[%c0_390, %c88] : memref<4x108xf32, #tpu.memory_space<vmem>>, vector<4x1xf32>
    %752 = vector.broadcast %751 : vector<4x1xf32> to vector<4x384xf32>
    %753 = vector.broadcast %750 : vector<1x384xf32> to vector<4x384xf32>
    %754 = arith.mulf %752, %753 : vector<4x384xf32>
    %755 = arith.addf %749, %754 : vector<4x384xf32>
    %c1_391 = arith.constant 1 : index
    %c19_392 = arith.constant 19 : index
    %756 = vector.load %arg13[%c1_391, %c19_392] : memref<4x512xf32, #tpu.memory_space<vmem>>, vector<1x384xf32>
    %c0_393 = arith.constant 0 : index
    %c89 = arith.constant 89 : index
    %757 = vector.load %arg5[%c0_393, %c89] : memref<4x108xf32, #tpu.memory_space<vmem>>, vector<4x1xf32>
    %758 = vector.broadcast %757 : vector<4x1xf32> to vector<4x384xf32>
    %759 = vector.broadcast %756 : vector<1x384xf32> to vector<4x384xf32>
    %760 = arith.mulf %758, %759 : vector<4x384xf32>
    %761 = arith.addf %755, %760 : vector<4x384xf32>
    %c2_394 = arith.constant 2 : index
    %c19_395 = arith.constant 19 : index
    %762 = vector.load %arg13[%c2_394, %c19_395] : memref<4x512xf32, #tpu.memory_space<vmem>>, vector<1x384xf32>
    %c0_396 = arith.constant 0 : index
    %c90 = arith.constant 90 : index
    %763 = vector.load %arg5[%c0_396, %c90] : memref<4x108xf32, #tpu.memory_space<vmem>>, vector<4x1xf32>
    %764 = vector.broadcast %763 : vector<4x1xf32> to vector<4x384xf32>
    %765 = vector.broadcast %762 : vector<1x384xf32> to vector<4x384xf32>
    %766 = arith.mulf %764, %765 : vector<4x384xf32>
    %767 = arith.addf %761, %766 : vector<4x384xf32>
    %c3_397 = arith.constant 3 : index
    %c19_398 = arith.constant 19 : index
    %768 = vector.load %arg13[%c3_397, %c19_398] : memref<4x512xf32, #tpu.memory_space<vmem>>, vector<1x384xf32>
    %c0_399 = arith.constant 0 : index
    %c91 = arith.constant 91 : index
    %769 = vector.load %arg5[%c0_399, %c91] : memref<4x108xf32, #tpu.memory_space<vmem>>, vector<4x1xf32>
    %770 = vector.broadcast %769 : vector<4x1xf32> to vector<4x384xf32>
    %771 = vector.broadcast %768 : vector<1x384xf32> to vector<4x384xf32>
    %772 = arith.mulf %770, %771 : vector<4x384xf32>
    %773 = arith.addf %767, %772 : vector<4x384xf32>
    %c0_400 = arith.constant 0 : index
    %c20_401 = arith.constant 20 : index
    %774 = vector.load %arg13[%c0_400, %c20_401] : memref<4x512xf32, #tpu.memory_space<vmem>>, vector<1x384xf32>
    %c0_402 = arith.constant 0 : index
    %c92 = arith.constant 92 : index
    %775 = vector.load %arg5[%c0_402, %c92] : memref<4x108xf32, #tpu.memory_space<vmem>>, vector<4x1xf32>
    %776 = vector.broadcast %775 : vector<4x1xf32> to vector<4x384xf32>
    %777 = vector.broadcast %774 : vector<1x384xf32> to vector<4x384xf32>
    %778 = arith.mulf %776, %777 : vector<4x384xf32>
    %779 = arith.addf %773, %778 : vector<4x384xf32>
    %c1_403 = arith.constant 1 : index
    %c20_404 = arith.constant 20 : index
    %780 = vector.load %arg13[%c1_403, %c20_404] : memref<4x512xf32, #tpu.memory_space<vmem>>, vector<1x384xf32>
    %c0_405 = arith.constant 0 : index
    %c93 = arith.constant 93 : index
    %781 = vector.load %arg5[%c0_405, %c93] : memref<4x108xf32, #tpu.memory_space<vmem>>, vector<4x1xf32>
    %782 = vector.broadcast %781 : vector<4x1xf32> to vector<4x384xf32>
    %783 = vector.broadcast %780 : vector<1x384xf32> to vector<4x384xf32>
    %784 = arith.mulf %782, %783 : vector<4x384xf32>
    %785 = arith.addf %779, %784 : vector<4x384xf32>
    %c2_406 = arith.constant 2 : index
    %c20_407 = arith.constant 20 : index
    %786 = vector.load %arg13[%c2_406, %c20_407] : memref<4x512xf32, #tpu.memory_space<vmem>>, vector<1x384xf32>
    %c0_408 = arith.constant 0 : index
    %c94 = arith.constant 94 : index
    %787 = vector.load %arg5[%c0_408, %c94] : memref<4x108xf32, #tpu.memory_space<vmem>>, vector<4x1xf32>
    %788 = vector.broadcast %787 : vector<4x1xf32> to vector<4x384xf32>
    %789 = vector.broadcast %786 : vector<1x384xf32> to vector<4x384xf32>
    %790 = arith.mulf %788, %789 : vector<4x384xf32>
    %791 = arith.addf %785, %790 : vector<4x384xf32>
    %c3_409 = arith.constant 3 : index
    %c20_410 = arith.constant 20 : index
    %792 = vector.load %arg13[%c3_409, %c20_410] : memref<4x512xf32, #tpu.memory_space<vmem>>, vector<1x384xf32>
    %c0_411 = arith.constant 0 : index
    %c95 = arith.constant 95 : index
    %793 = vector.load %arg5[%c0_411, %c95] : memref<4x108xf32, #tpu.memory_space<vmem>>, vector<4x1xf32>
    %794 = vector.broadcast %793 : vector<4x1xf32> to vector<4x384xf32>
    %795 = vector.broadcast %792 : vector<1x384xf32> to vector<4x384xf32>
    %796 = arith.mulf %794, %795 : vector<4x384xf32>
    %797 = arith.addf %791, %796 : vector<4x384xf32>
    %c0_412 = arith.constant 0 : index
    %c36_413 = arith.constant 36 : index
    %798 = vector.load %arg13[%c0_412, %c36_413] : memref<4x512xf32, #tpu.memory_space<vmem>>, vector<1x384xf32>
    %c0_414 = arith.constant 0 : index
    %c96 = arith.constant 96 : index
    %799 = vector.load %arg5[%c0_414, %c96] : memref<4x108xf32, #tpu.memory_space<vmem>>, vector<4x1xf32>
    %800 = vector.broadcast %799 : vector<4x1xf32> to vector<4x384xf32>
    %801 = vector.broadcast %798 : vector<1x384xf32> to vector<4x384xf32>
    %802 = arith.mulf %800, %801 : vector<4x384xf32>
    %803 = arith.addf %797, %802 : vector<4x384xf32>
    %c1_415 = arith.constant 1 : index
    %c36_416 = arith.constant 36 : index
    %804 = vector.load %arg13[%c1_415, %c36_416] : memref<4x512xf32, #tpu.memory_space<vmem>>, vector<1x384xf32>
    %c0_417 = arith.constant 0 : index
    %c97 = arith.constant 97 : index
    %805 = vector.load %arg5[%c0_417, %c97] : memref<4x108xf32, #tpu.memory_space<vmem>>, vector<4x1xf32>
    %806 = vector.broadcast %805 : vector<4x1xf32> to vector<4x384xf32>
    %807 = vector.broadcast %804 : vector<1x384xf32> to vector<4x384xf32>
    %808 = arith.mulf %806, %807 : vector<4x384xf32>
    %809 = arith.addf %803, %808 : vector<4x384xf32>
    %c2_418 = arith.constant 2 : index
    %c36_419 = arith.constant 36 : index
    %810 = vector.load %arg13[%c2_418, %c36_419] : memref<4x512xf32, #tpu.memory_space<vmem>>, vector<1x384xf32>
    %c0_420 = arith.constant 0 : index
    %c98 = arith.constant 98 : index
    %811 = vector.load %arg5[%c0_420, %c98] : memref<4x108xf32, #tpu.memory_space<vmem>>, vector<4x1xf32>
    %812 = vector.broadcast %811 : vector<4x1xf32> to vector<4x384xf32>
    %813 = vector.broadcast %810 : vector<1x384xf32> to vector<4x384xf32>
    %814 = arith.mulf %812, %813 : vector<4x384xf32>
    %815 = arith.addf %809, %814 : vector<4x384xf32>
    %c3_421 = arith.constant 3 : index
    %c36_422 = arith.constant 36 : index
    %816 = vector.load %arg13[%c3_421, %c36_422] : memref<4x512xf32, #tpu.memory_space<vmem>>, vector<1x384xf32>
    %c0_423 = arith.constant 0 : index
    %c99 = arith.constant 99 : index
    %817 = vector.load %arg5[%c0_423, %c99] : memref<4x108xf32, #tpu.memory_space<vmem>>, vector<4x1xf32>
    %818 = vector.broadcast %817 : vector<4x1xf32> to vector<4x384xf32>
    %819 = vector.broadcast %816 : vector<1x384xf32> to vector<4x384xf32>
    %820 = arith.mulf %818, %819 : vector<4x384xf32>
    %821 = arith.addf %815, %820 : vector<4x384xf32>
    %c0_424 = arith.constant 0 : index
    %c37_425 = arith.constant 37 : index
    %822 = vector.load %arg13[%c0_424, %c37_425] : memref<4x512xf32, #tpu.memory_space<vmem>>, vector<1x384xf32>
    %c0_426 = arith.constant 0 : index
    %c100 = arith.constant 100 : index
    %823 = vector.load %arg5[%c0_426, %c100] : memref<4x108xf32, #tpu.memory_space<vmem>>, vector<4x1xf32>
    %824 = vector.broadcast %823 : vector<4x1xf32> to vector<4x384xf32>
    %825 = vector.broadcast %822 : vector<1x384xf32> to vector<4x384xf32>
    %826 = arith.mulf %824, %825 : vector<4x384xf32>
    %827 = arith.addf %821, %826 : vector<4x384xf32>
    %c1_427 = arith.constant 1 : index
    %c37_428 = arith.constant 37 : index
    %828 = vector.load %arg13[%c1_427, %c37_428] : memref<4x512xf32, #tpu.memory_space<vmem>>, vector<1x384xf32>
    %c0_429 = arith.constant 0 : index
    %c101 = arith.constant 101 : index
    %829 = vector.load %arg5[%c0_429, %c101] : memref<4x108xf32, #tpu.memory_space<vmem>>, vector<4x1xf32>
    %830 = vector.broadcast %829 : vector<4x1xf32> to vector<4x384xf32>
    %831 = vector.broadcast %828 : vector<1x384xf32> to vector<4x384xf32>
    %832 = arith.mulf %830, %831 : vector<4x384xf32>
    %833 = arith.addf %827, %832 : vector<4x384xf32>
    %c2_430 = arith.constant 2 : index
    %c37_431 = arith.constant 37 : index
    %834 = vector.load %arg13[%c2_430, %c37_431] : memref<4x512xf32, #tpu.memory_space<vmem>>, vector<1x384xf32>
    %c0_432 = arith.constant 0 : index
    %c102 = arith.constant 102 : index
    %835 = vector.load %arg5[%c0_432, %c102] : memref<4x108xf32, #tpu.memory_space<vmem>>, vector<4x1xf32>
    %836 = vector.broadcast %835 : vector<4x1xf32> to vector<4x384xf32>
    %837 = vector.broadcast %834 : vector<1x384xf32> to vector<4x384xf32>
    %838 = arith.mulf %836, %837 : vector<4x384xf32>
    %839 = arith.addf %833, %838 : vector<4x384xf32>
    %c3_433 = arith.constant 3 : index
    %c37_434 = arith.constant 37 : index
    %840 = vector.load %arg13[%c3_433, %c37_434] : memref<4x512xf32, #tpu.memory_space<vmem>>, vector<1x384xf32>
    %c0_435 = arith.constant 0 : index
    %c103 = arith.constant 103 : index
    %841 = vector.load %arg5[%c0_435, %c103] : memref<4x108xf32, #tpu.memory_space<vmem>>, vector<4x1xf32>
    %842 = vector.broadcast %841 : vector<4x1xf32> to vector<4x384xf32>
    %843 = vector.broadcast %840 : vector<1x384xf32> to vector<4x384xf32>
    %844 = arith.mulf %842, %843 : vector<4x384xf32>
    %845 = arith.addf %839, %844 : vector<4x384xf32>
    %c0_436 = arith.constant 0 : index
    %c38_437 = arith.constant 38 : index
    %846 = vector.load %arg13[%c0_436, %c38_437] : memref<4x512xf32, #tpu.memory_space<vmem>>, vector<1x384xf32>
    %c0_438 = arith.constant 0 : index
    %c104 = arith.constant 104 : index
    %847 = vector.load %arg5[%c0_438, %c104] : memref<4x108xf32, #tpu.memory_space<vmem>>, vector<4x1xf32>
    %848 = vector.broadcast %847 : vector<4x1xf32> to vector<4x384xf32>
    %849 = vector.broadcast %846 : vector<1x384xf32> to vector<4x384xf32>
    %850 = arith.mulf %848, %849 : vector<4x384xf32>
    %851 = arith.addf %845, %850 : vector<4x384xf32>
    %c1_439 = arith.constant 1 : index
    %c38_440 = arith.constant 38 : index
    %852 = vector.load %arg13[%c1_439, %c38_440] : memref<4x512xf32, #tpu.memory_space<vmem>>, vector<1x384xf32>
    %c0_441 = arith.constant 0 : index
    %c105 = arith.constant 105 : index
    %853 = vector.load %arg5[%c0_441, %c105] : memref<4x108xf32, #tpu.memory_space<vmem>>, vector<4x1xf32>
    %854 = vector.broadcast %853 : vector<4x1xf32> to vector<4x384xf32>
    %855 = vector.broadcast %852 : vector<1x384xf32> to vector<4x384xf32>
    %856 = arith.mulf %854, %855 : vector<4x384xf32>
    %857 = arith.addf %851, %856 : vector<4x384xf32>
    %c2_442 = arith.constant 2 : index
    %c38_443 = arith.constant 38 : index
    %858 = vector.load %arg13[%c2_442, %c38_443] : memref<4x512xf32, #tpu.memory_space<vmem>>, vector<1x384xf32>
    %c0_444 = arith.constant 0 : index
    %c106 = arith.constant 106 : index
    %859 = vector.load %arg5[%c0_444, %c106] : memref<4x108xf32, #tpu.memory_space<vmem>>, vector<4x1xf32>
    %860 = vector.broadcast %859 : vector<4x1xf32> to vector<4x384xf32>
    %861 = vector.broadcast %858 : vector<1x384xf32> to vector<4x384xf32>
    %862 = arith.mulf %860, %861 : vector<4x384xf32>
    %863 = arith.addf %857, %862 : vector<4x384xf32>
    %c3_445 = arith.constant 3 : index
    %c38_446 = arith.constant 38 : index
    %864 = vector.load %arg13[%c3_445, %c38_446] : memref<4x512xf32, #tpu.memory_space<vmem>>, vector<1x384xf32>
    %c0_447 = arith.constant 0 : index
    %c107 = arith.constant 107 : index
    %865 = vector.load %arg5[%c0_447, %c107] : memref<4x108xf32, #tpu.memory_space<vmem>>, vector<4x1xf32>
    %866 = vector.broadcast %865 : vector<4x1xf32> to vector<4x384xf32>
    %867 = vector.broadcast %864 : vector<1x384xf32> to vector<4x384xf32>
    %868 = arith.mulf %866, %867 : vector<4x384xf32>
    %869 = arith.addf %863, %868 : vector<4x384xf32>
    %c5_448 = arith.constant 5 : index
    %870 = memref.load %arg9[%c5_448] : memref<9xf32, #tpu.memory_space<smem>>
    %cst_449 = arith.constant 0.000000e+00 : f32
    %871 = vector.broadcast %cst_449 : f32 to vector<4x384xf32>
    %872 = arith.cmpf oge, %869, %871 : vector<4x384xf32>
    %873 = vector.broadcast %870 : f32 to vector<4x384xf32>
    %874 = arith.mulf %873, %869 : vector<4x384xf32>
    %875 = arith.select %872, %869, %874 : vector<4x384xi1>, vector<4x384xf32>
    %cst_450 = arith.constant 0.000000e+00 : f32
    %876 = vector.broadcast %cst_450 : f32 to vector<4x384xf32>
    %c0_451 = arith.constant 0 : index
    %c2_452 = arith.constant 2 : index
    %877 = vector.load %arg8[%c0_451, %c2_452] : memref<4x3xf32, #tpu.memory_space<vmem>>, vector<4x1xf32>
    %878 = vector.broadcast %877 : vector<4x1xf32> to vector<4x384xf32>
    %879 = arith.addf %876, %878 : vector<4x384xf32>
    %c0_453 = arith.constant 0 : index
    %c8_454 = arith.constant 8 : index
    %880 = vector.load %arg7[%c0_453, %c8_454] : memref<4x12xf32, #tpu.memory_space<vmem>>, vector<4x1xf32>
    %881 = vector.extract_strided_slice %875 {offsets = [0, 0], sizes = [1, 384], strides = [1, 1]} : vector<4x384xf32> to vector<1x384xf32>
    %882 = vector.broadcast %880 : vector<4x1xf32> to vector<4x384xf32>
    %883 = vector.broadcast %881 : vector<1x384xf32> to vector<4x384xf32>
    %884 = arith.mulf %882, %883 : vector<4x384xf32>
    %885 = arith.addf %879, %884 : vector<4x384xf32>
    %c0_455 = arith.constant 0 : index
    %c9_456 = arith.constant 9 : index
    %886 = vector.load %arg7[%c0_455, %c9_456] : memref<4x12xf32, #tpu.memory_space<vmem>>, vector<4x1xf32>
    %887 = vector.extract_strided_slice %875 {offsets = [1, 0], sizes = [1, 384], strides = [1, 1]} : vector<4x384xf32> to vector<1x384xf32>
    %888 = vector.broadcast %886 : vector<4x1xf32> to vector<4x384xf32>
    %889 = vector.broadcast %887 : vector<1x384xf32> to vector<4x384xf32>
    %890 = arith.mulf %888, %889 : vector<4x384xf32>
    %891 = arith.addf %885, %890 : vector<4x384xf32>
    %c0_457 = arith.constant 0 : index
    %c10_458 = arith.constant 10 : index
    %892 = vector.load %arg7[%c0_457, %c10_458] : memref<4x12xf32, #tpu.memory_space<vmem>>, vector<4x1xf32>
    %893 = vector.extract_strided_slice %875 {offsets = [2, 0], sizes = [1, 384], strides = [1, 1]} : vector<4x384xf32> to vector<1x384xf32>
    %894 = vector.broadcast %892 : vector<4x1xf32> to vector<4x384xf32>
    %895 = vector.broadcast %893 : vector<1x384xf32> to vector<4x384xf32>
    %896 = arith.mulf %894, %895 : vector<4x384xf32>
    %897 = arith.addf %891, %896 : vector<4x384xf32>
    %c0_459 = arith.constant 0 : index
    %c11_460 = arith.constant 11 : index
    %898 = vector.load %arg7[%c0_459, %c11_460] : memref<4x12xf32, #tpu.memory_space<vmem>>, vector<4x1xf32>
    %899 = vector.extract_strided_slice %875 {offsets = [3, 0], sizes = [1, 384], strides = [1, 1]} : vector<4x384xf32> to vector<1x384xf32>
    %900 = vector.broadcast %898 : vector<4x1xf32> to vector<4x384xf32>
    %901 = vector.broadcast %899 : vector<1x384xf32> to vector<4x384xf32>
    %902 = arith.mulf %900, %901 : vector<4x384xf32>
    %903 = arith.addf %897, %902 : vector<4x384xf32>
    %c8_461 = arith.constant 8 : index
    %904 = memref.load %arg9[%c8_461] : memref<9xf32, #tpu.memory_space<smem>>
    %cst_462 = arith.constant 0.000000e+00 : f32
    %905 = vector.broadcast %cst_462 : f32 to vector<4x384xf32>
    %906 = arith.cmpf oge, %903, %905 : vector<4x384xf32>
    %907 = vector.broadcast %904 : f32 to vector<4x384xf32>
    %908 = arith.mulf %907, %903 : vector<4x384xf32>
    %909 = arith.select %906, %903, %908 : vector<4x384xi1>, vector<4x384xf32>
    %c0_463 = arith.constant 0 : index
    %c0_464 = arith.constant 0 : index
    %c0_465 = arith.constant 0 : index
    %910 = vector.load %arg12[%c0_463, %c0_464, %c0_465] : memref<1x4x384xf32, #tpu.memory_space<vmem>>, vector<1x4x384xf32>
    %911 = vector.shape_cast %910 : vector<1x4x384xf32> to vector<4x384xf32>
    %912 = vector.shape_cast %909 : vector<4x384xf32> to vector<1x4x384xf32>
    tpu.vector_store %arg12[%c0_463, %c0_464, %c0_465], %912 {strides = array<i32>} : memref<1x4x384xf32, #tpu.memory_space<vmem>>, vector<1x4x384xf32>,
    return
  }
  func.func @transform_0(%arg0: i32) -> (i32, i32, i32) {
    %c0_i32 = arith.constant 0 : i32
    %c0_i32_0 = arith.constant 0 : i32
    %c0_i32_1 = arith.constant 0 : i32
    return %arg0, %c0_i32, %c0_i32_0 : i32, i32, i32
  }
  func.func @transform_1(%arg0: i32) -> (i32, i32) {
    %c0_i32 = arith.constant 0 : i32
    %c0_i32_0 = arith.constant 0 : i32
    %c0_i32_1 = arith.constant 0 : i32
    return %c0_i32, %c0_i32_0 : i32, i32
  }
  func.func @transform_2(%arg0: i32) -> (i32, i32) {
    %c0_i32 = arith.constant 0 : i32
    %c0_i32_0 = arith.constant 0 : i32
    %c0_i32_1 = arith.constant 0 : i32
    return %c0_i32, %c0_i32_0 : i32, i32
  }
  func.func @transform_3(%arg0: i32) -> (i32, i32) {
    %c0_i32 = arith.constant 0 : i32
    %c0_i32_0 = arith.constant 0 : i32
    %c0_i32_1 = arith.constant 0 : i32
    return %c0_i32, %c0_i32_0 : i32, i32
  }
  func.func @transform_4(%arg0: i32) -> (i32, i32) {
    %c0_i32 = arith.constant 0 : i32
    %c0_i32_0 = arith.constant 0 : i32
    %c0_i32_1 = arith.constant 0 : i32
    return %c0_i32, %c0_i32_0 : i32, i32
  }
  func.func @transform_5(%arg0: i32) -> (i32, i32) {
    %c0_i32 = arith.constant 0 : i32
    %c0_i32_0 = arith.constant 0 : i32
    %c0_i32_1 = arith.constant 0 : i32
    return %c0_i32, %c0_i32_0 : i32, i32
  }
  func.func @transform_6(%arg0: i32) -> (i32, i32) {
    %c0_i32 = arith.constant 0 : i32
    %c0_i32_0 = arith.constant 0 : i32
    %c0_i32_1 = arith.constant 0 : i32
    return %c0_i32, %c0_i32_0 : i32, i32
  }
  func.func @transform_7(%arg0: i32) -> (i32, i32) {
    %c0_i32 = arith.constant 0 : i32
    %c0_i32_0 = arith.constant 0 : i32
    %c0_i32_1 = arith.constant 0 : i32
    return %c0_i32, %c0_i32_0 : i32, i32
  }
  func.func @transform_8(%arg0: i32) -> i32 {
    %c0_i32 = arith.constant 0 : i32
    %c0_i32_0 = arith.constant 0 : i32
    return %c0_i32 : i32
  }
  func.func @transform_9(%arg0: i32) -> (i32, i32, i32) {
    %c0_i32 = arith.constant 0 : i32
    %c0_i32_0 = arith.constant 0 : i32
    %c0_i32_1 = arith.constant 0 : i32
    return %arg0, %c0_i32, %c0_i32_0 : i32, i32, i32
  }
  func.func @transform_10(%arg0: i32) -> (i32, i32, i32) {
    %c0_i32 = arith.constant 0 : i32
    %c0_i32_0 = arith.constant 0 : i32
    %c0_i32_1 = arith.constant 0 : i32
    return %arg0, %c0_i32, %c0_i32_0 : i32, i32, i32
  }
  func.func @transform_11(%arg0: i32) -> (i32, i32, i32) {
    %c0_i32 = arith.constant 0 : i32
    %c0_i32_0 = arith.constant 0 : i32
    %c0_i32_1 = arith.constant 0 : i32
    return %arg0, %c0_i32, %c0_i32_0 : i32, i32, i32
  }
}

</mosaic_0001>

<bundles_post_ra>
// kernel: tpu_custom_call.1
= control target key start
LH: loop header
LB: loop body
LE: loop exit
PB: predicated region body
PF: predicated region fallthrough
CT: control target
= control target key end

     0   :  { %s7907_s0 = inlined_call_operand.hbm [shape: f32[2,4,512], index: 0, kind: input, shape index: {}]   ;;  %s7908_s1 = inlined_call_operand.hbm [shape: f32[1,512], index: 1, kind: input, shape index: {}]   ;;  %s7909_s2 = inlined_call_operand.hbm [shape: f32[4,12], index: 2, kind: input, shape index: {}]   ;;  %s7910_s3 = inlined_call_operand.vmem [shape: f32[4,3], index: 3, kind: input, shape index: {}]   ;;  %s7911_s4 = inlined_call_operand.hbm [shape: f32[4,108], index: 4, kind: input, shape index: {}]   ;;  %s7912_s5 = inlined_call_operand.vmem [shape: f32[4,3], index: 5, kind: input, shape index: {}]   ;;  %s7913_s6 = inlined_call_operand.hbm [shape: f32[4,12], index: 6, kind: input, shape index: {}]   ;;  %s7914_s7 = inlined_call_operand.vmem [shape: f32[4,3], index: 7, kind: input, shape index: {}]   ;;  %s7915_s8 = inlined_call_operand.vmem [shape: f32[9], index: 8, kind: input, shape index: {}]   ;;  %s7916_s9 = inlined_call_operand.hbm [shape: f32[2,4,256], index: 9, kind: output, shape index: {0}]   ;;  %s7917_s10 = inlined_call_operand.hbm [shape: f32[2,4,256], index: 10, kind: output, shape index: {1}]   ;;  %s7918_s11 = inlined_call_operand.hbm [shape: f32[2,4,384], index: 11, kind: output, shape index: {2}]  }
   0x1   :  { %8027 = sst [smem:[#allocation114_spill]] %s7908_s1 }
   0x2   :  { %8028 = sst [smem:[#allocation115_spill]] %s7909_s2 }
   0x3   :  { %8029 = sst [smem:[#allocation116_spill]] %s7911_s4 }
   0x4   :  { %8030 = sst [smem:[#allocation117_spill]] %s7913_s6 }
   0x5   :  { %8031 = sst [smem:[#allocation118_spill]] %s7915_s8 }
   0x6   :  { %17 = vsyncpa [#allocation4], 0 }
   0x7   :  { %19 = vsyncpa [#allocation4 + $0x1], 0 }
   0x8   :  { %20 = vsyncpa [#allocation8], 0 }
   0x9   :  { %21 = vsyncpa [#allocation11], 0 }
   0xa   :  { %22 = vsyncpa [#allocation6], 0 }
   0xb   :  { %23 = vsyncpa [#allocation5], 0 }
   0xc   :  { %25 = vsyncpa [#allocation5 + $0x1], 0 }
   0xd   :  { %26 = vsyncpa [#allocation16], 0 }
   0xe   :  { %28 = vsyncpa [#allocation16 + $0x1], 0  ;;  %s5365_s17 = smov 0   ;;  %s5367_s18 = smov 0  }
   0xf   :  { %s5369_s19 = smov 0   ;;  %s5371_s20 = smov 0  }
  0x10 LB: > { %s5167_s21 = smov [#allocation7]   ;;  %s5386_s23 = sadd.s32 4294967295, %s5165_s20   ;;  %s5165_s20 = sphi %s5371_s20, %s8382_s20   ;;  %s5161_s19 = sphi %s5369_s19, %s8381_s19   ;;  %s5157_s18 = sphi %s5367_s18, %s8380_s18   ;;  %s5153_s17 = sphi %s5365_s17, %s8379_s17  }
  0x11   : > { %s324_s22 = sshll.u32 %s5167_s21, 4  ;;  %p4459_p0 = scmp.ge.s32.totalorder %s5165_s20, 1  ;;  %s325_s22 = int_to_ptr.vmem [resolvable:$true] %s324_s22 }
  0x12   : > { %p7919_p1 = scmp.eq.s32.totalorder %s5386_s23, 0  ;;  %p311_p2 = scmp.lt.s32.totalorder %s5165_s20, 3 }
  0x13   : > { %s5168_s25 = smov [#allocation10]   ;;  %s5169_s27 = smov [#allocation9]  }
  0x14   : > { %p5391_p3 = pnand %p4459_p0, %p311_p2  ;;  %s349_s26 = sshll.u32 %s5168_s25, 4  ;;  %s350_s26 = int_to_ptr.vmem [resolvable:$true] %s349_s26 }
  0x15   : > { %s335_s28 = sshll.u32 %s5169_s27, 4  ;;  %s8034_s8 = sld [smem:[#allocation118_spill]]  ;;  %s5404_s28 = int_to_ptr.vmem [resolvable:$true] %s335_s28 }
  0x16   : > { %s8032_s24 = scalar_select %p5391_p3, 1, 0 }
  0x17   : > { %p4537_p5 = pneg %p5391_p3  ;;  %s5170_s14 = smov [#allocation12]  }
  0x18   : > { %s5409_s15 = sshll.u32 %s5170_s14, 4  ;;  %s4897_s21 = scalar_lea.vmem %s325_s22, 64  ;;  %s364_s15 = int_to_ptr.vmem [resolvable:$true] %s5409_s15 }
  0x19   : > { %p5400_p6 = pnand %p4537_p5, %p7919_p1  ;;  %p4898_p8 = scmp.ne.s32.totalorder %s325_s22, %s4897_s21 }
  0x1a   : > { %p4905_p11 = scmp.lt.s32.totalorder %s325_s22, %s325_s22  ;;  %p4906_p12 = scmp.lt.s32.totalorder %s4897_s21, %s4897_s21 }
  0x1b   : > { %s377_s13 = sshll.u32 %s8034_s8, 4  ;;  %p5413_p7 = pneg %p5400_p6  ;;  %s378_s13 = int_to_ptr.vmem [resolvable:$true] %s377_s13 }
  0x1c   : > { %p4907_p13 = por %p4906_p12, %p4905_p11 }
  0x1d   : > { %p4900_p9 = pnand %p4898_p8, %p5413_p7 }
  0x1f   : > { %p4901_p10 = pneg %p4900_p9 }
  0x21   : > { %p4908_p0 = pnand %p4907_p13, %p4901_p10 }
  0x23   : > { %4911 = shalt.err (!%p4908_p0)
}
  0x24   : > { %s8036_s1 = sld [smem:[#allocation114_spill]]  ;;  %s4923_s30 = scalar_lea.vmem %s350_s26, 64 }
  0x25   : > { %p4924_p2 = scmp.ne.s32.totalorder %s350_s26, %s4923_s30  ;;  %p4931_p1 = scmp.lt.s32.totalorder %s350_s26, %s350_s26 }
  0x26   : > { %p4932_p8 = scmp.lt.s32.totalorder %s4923_s30, %s4923_s30 }
  0x27   : > { %p4926_p5 = pnand %p4924_p2, %p5413_p7 }
  0x28   : > { %p4933_p9 = por %p4932_p8, %p4931_p1 }
  0x29   : > { %p4927_p4 = pneg %p4926_p5 }
  0x2a   : > { %4540 = dma.hbm_to_vmem [thread:$0]  (!%p5400_p6), %s8036_s1, 64, %s325_s22, [#allocation8]  }
  0x2b   : > { %p4934_p3 = pnand %p4933_p9, %p4927_p4 }
  0x2d   : > { %4937 = shalt.err (!%p4934_p3)
}
  0x2e   : > { %s8037_s4 = sld [smem:[#allocation116_spill]]  ;;  %s4949_s22 = scalar_lea.vmem %s5404_s28, 64 }
  0x2f   : > { %p4950_p10 = scmp.ne.s32.totalorder %s5404_s28, %s4949_s22  ;;  %p4957_p13 = scmp.lt.s32.totalorder %s5404_s28, %s5404_s28 }
  0x30   : > { %p4958_p1 = scmp.lt.s32.totalorder %s4949_s22, %s4949_s22 }
  0x31   : > { %p4952_p11 = pnand %p4950_p10, %p5413_p7 }
  0x32   : > { %p4959_p4 = por %p4958_p1, %p4957_p13 }
  0x33   : > { %p4953_p12 = pneg %p4952_p11 }
  0x34   : > { %4546 = dma.hbm_to_vmem [thread:$0]  (!%p5400_p6), %s8037_s4, 64, %s350_s26, [#allocation11]  }
  0x35   : > { %p4960_p3 = pnand %p4959_p4, %p4953_p12 }
  0x37   : > { %4963 = shalt.err (!%p4960_p3)
}
  0x38   : > { %s8038_s2 = sld [smem:[#allocation115_spill]]  ;;  %s4975_s30 = scalar_lea.vmem %s364_s15, 64 }
  0x39   : > { %p4976_p0 = scmp.ne.s32.totalorder %s364_s15, %s4975_s30  ;;  %p4983_p8 = scmp.lt.s32.totalorder %s364_s15, %s364_s15 }
  0x3a   : > { %p4984_p9 = scmp.lt.s32.totalorder %s4975_s30, %s4975_s30 }
  0x3b   : > { %p4978_p2 = pnand %p4976_p0, %p5413_p7 }
  0x3c   : > { %p4985_p10 = por %p4984_p9, %p4983_p8 }
  0x3d   : > { %p4979_p5 = pneg %p4978_p2 }
  0x3e   : > { %4543 = dma.hbm_to_vmem [thread:$0]  (!%p5400_p6), %s8038_s2, 64, %s5404_s28, [#allocation8]  }
  0x3f   : > { %p4986_p11 = pnand %p4985_p10, %p4979_p5 }
  0x41   : > { %4989 = shalt.err (!%p4986_p11)
}
  0x42   : > { %s8039_s6 = sld [smem:[#allocation117_spill]]  ;;  %s4990_s14 = scalar_lea.vmem %s378_s13, 16 }
  0x43   : > { %p4991_p12 = scmp.ne.s32.totalorder %s378_s13, %s4990_s14  ;;  %p4998_p4 = scmp.lt.s32.totalorder %s378_s13, %s378_s13 }
  0x44   : > { %p4999_p3 = scmp.lt.s32.totalorder %s4990_s14, %s4990_s14 }
  0x45   : > { %p4993_p13 = pnand %p4991_p12, %p5413_p7 }
  0x46   : > { %p5000_p0 = por %p4999_p3, %p4998_p4 }
  0x47   : > { %p4994_p1 = pneg %p4993_p13 }
  0x48   : > { %4549 = dma.hbm_to_vmem [thread:$0]  (!%p5400_p6), %s8039_s6, 64, %s364_s15, [#allocation11]  }
  0x49   : > { %p5001_p2 = pnand %p5000_p0, %p4994_p1 }
  0x4b   : > { %5004 = shalt.err (!%p5001_p2)
}
  0x4c   : > { %s5171_s22 = smov [#allocation13]   ;;  %s7921_s15 = sadd.s32 4294967294, %s5165_s20  }
  0x4d   : > { %4552 = dma.vmem_to_smem (!%p5400_p6), %s378_s13, 16, %s5171_s22, [#allocation6]  }
  0x4e   : > { %s5461_s16 = sadd.s32 1, %s5165_s20   ;;  %s41_s29 = sadd.s32 1, %s5161_s19 }
  0x4f   : > { %s38_s21 = ssub.s32 %s5165_s20, %s5461_s16  ;;  %p48_p7 = scmp.ne.s32.totalorder %s5161_s19, %s5157_s18 }
  0x50   : > { %p39_p5 = scmp.eq.s32.totalorder %s38_s21, 0  ;;  %p49_p8 = scmp.eq.s32.totalorder %s5165_s20, 0 }
  0x51   : > { %p54_p9 = scmp.ne.s32.totalorder %s5157_s18, %s5153_s17  ;;  %p246_p10 = scmp.eq.s32.totalorder %s5386_s23, 1 }
  0x52   : > { %s5473_s25 = scalar_select %p39_p5, %s5161_s19, %s41_s29  }
  0x53   : > { %p50_p11 = por %p49_p8, %p48_p7  ;;  %p8041_p12 = scmp.eq.s32.totalorder %s5386_s23, 0 }
  0x54   : > { %8040 = sst [smem:[#allocation24_spill]] %s5473_s25  ;;  %p5481_p6 = por %p246_p10, %p48_p7 }
  0x55   : > { %p5477_p13 = por %p8041_p12, %p54_p9  ;;  %p252_p1 = scmp.eq.s32.totalorder %s7921_s15, 1 }
  0x56   : > { %s8043_s13 = scalar_select %p5481_p6, 1, 0 }
  0x57   : > { %s8042_s26 = scalar_select %p5477_p13, 1, 0 }
  0x58   : > { %p4572_p4 = scmp.lt.s32.totalorder %s5165_s20, 2  ;;  %s388_s27 = sand.u32 1, %s5161_s19  }
  0x59   : > { %p5489_p3 = por %p252_p1, %p54_p9  ;;  %s4466_s12 = sshll.u32 %s388_s27, 4 }
  0x5a   : > { %s4504_s28 = sshll.u32 %s5165_s20, 8  ;;  %s392_s21 = scalar_lea.vmem [#allocation3], %s4466_s12 }
  0x5b   : > { %s8044_s30 = scalar_select %p5489_p3, 1, 0 }
  0x5c   : > { %s5497_s29 = scalar_lea.hbm %s7907_s0, %s4504_s28  ;;  %s400_s1 = sshll.u32 %s392_s21, 4  ;;  %s401_s1 = int_to_ptr.vmem [resolvable:$true] %s400_s1 }
  0x5d   : > { %p5499_p0 = pnand %p4572_p4, %p50_p11  ;;  %s389_s2 = scalar_lea.sflag [#allocation4], %s388_s27 }
  0x5e   : > { %s5005_s4 = scalar_lea.hbm %s5497_s29, 256  ;;  %s5010_s22 = scalar_lea.hbm %s7907_s0, 512 }
  0x5f   : > { %p5006_p2 = scmp.ne.s32.totalorder %s5497_s29, %s5005_s4  ;;  %p5007_p7 = pneg %p5499_p0 }
  0x60   : > { %p5011_p9 = scmp.lt.s32.totalorder %s5497_s29, %s7907_s0  ;;  %p5012_p10 = scmp.lt.s32.totalorder %s5010_s22, %s5005_s4 }
  0x61   : > { %p5008_p5 = pnand %p5007_p7, %p5006_p2 }
  0x62   : > { %p5013_p11 = por %p5012_p10, %p5011_p9 }
  0x63   : > { %p5009_p8 = pneg %p5008_p5 }
  0x65   : > { %p5014_p12 = pnand %p5013_p11, %p5009_p8 }
  0x67   : > { %5017 = shalt.err (!%p5014_p12)
}
  0x68   : > { %s5018_s21 = scalar_lea.vmem %s401_s1, 256  ;;  %s5172_s27 = smov [#allocation3]  }
  0x69   : > { %p5019_p1 = scmp.ne.s32.totalorder %s401_s1, %s5018_s21  ;;  %s5023_s8 = sshll.u32 %s5172_s27, 4  ;;  %s5024_s8 = int_to_ptr.vmem [resolvable:$false] %s5023_s8 }
  0x6a   : > { %s5025_s25 = scalar_lea.vmem %s5024_s8, 512  ;;  %p5026_p2 = scmp.lt.s32.totalorder %s401_s1, %s5024_s8 }
  0x6b   : > { %p5021_p4 = pnand %p5019_p1, %p5007_p7  ;;  %p5027_p5 = scmp.lt.s32.totalorder %s5025_s25, %s5018_s21 }
  0x6d   : > { %p5022_p3 = pneg %p5021_p4  ;;  %p5028_p6 = por %p5027_p5, %p5026_p2 }
  0x6f   : > { %p5029_p13 = pnand %p5028_p6, %p5022_p3 }
  0x71   : > { %5032 = shalt.err (!%p5029_p13)
}
  0x72   : > { %4556 = dma.hbm_to_vmem [thread:$0]  (!%p5499_p0), %s5497_s29, 256, %s401_s1, %s389_s2  }
  0x73   : > { %p8046_p8 = scmp.ne.s32.totalorder %s8032_s24, 0 }
  0x75   : > { %409 = sbr.rel (%p8046_p8) target bundleno = 9583 (0x256f), region = 56 }
  0x7a   : > { %s5520_s4 = sand.u32 1, %s5157_s18   ;;  %p8047_p7 = scmp.ne.s32.totalorder %s8042_s26, 0 }
  0x7b   : > { %s4470_s6 = sshll.u32 %s5520_s4, 4  ;;  %s412_s28 = scalar_lea.sflag [#allocation4], %s5520_s4 }
  0x7c   : > { %s5524_s8 = scalar_lea.vmem [#allocation3], %s4470_s6 }
  0x7d   : > { %5128 = dma.done.wait (%p8047_p7), %s412_s28, 256  }
  0x7e   : > { %5130 = vsyncadd (%p8047_p7), %s412_s28, 4294967040  ;;  %p8048_p13 = scmp.eq.s32.totalorder %s5386_s23, 0 }
  0x80   : > { %5132 = dma.done.wait (%p8048_p13), [#allocation8], 128   ;;  %p8049_p6 = pmov %p8048_p13 }
  0x82   : > { %5134 = vsyncadd (%p8049_p6), [#allocation8], 4294967168  ;;  %p8050_p3 = pmov %p8049_p6 }
  0x84   : > { %5136 = dma.done.wait (%p8050_p3), [#allocation11], 128   ;;  %p8051_p0 = pmov %p8050_p3 }
  0x86   : > { %5138 = vsyncadd (%p8051_p0), [#allocation11], 4294967168  ;;  %p8052_p9 = pmov %p8051_p0 }
  0x87   : > { %p8053_p10 = pmov %p8051_p0 }
  0x88   : > { %5140 = dma.done.wait (%p8052_p9), [#allocation6], 16  }
  0x89   : > { %5142 = vsyncadd (%p8053_p10), [#allocation6], 4294967280 }
  0x8a   : > { %440 = sfence }
  0x8b   : > { %v493_v0 = vld [vmem:[#allocation9] sm:$0xf]  ;;  %v7942_v1 = vmov 3   ;;  %v7943_v2 = vmov 1   ;;  %v5544_v3 = vld [vmem:[#allocation10] sm:$0xf]  ;;  %v501_v28 = vlaneseq }
  0x8c   : > { %4747 = vset.pattern.permute.xlu0 %v7942_v1  ;;  %4745 = vset.pattern.permute.xlu1 %v7943_v2  ;;  %v7936_v4 = vmov 4   ;;  %v7940_v5 = vmov 2   ;;  %v683_v6 = vld [vmem:[%s7912_s5] sm:$0xf]  ;;  %v7945_v8 = vmov 0   ;;  %v7938_v9 = vmov 5  }
  0x8d   : > { %602 = vperm.xlu0 %4747, %v493_v0   ;;  %532 = vperm.xlu1 %4745, %v493_v0   ;;  %v486_v7 = vld [vmem:[%s7910_s3] sm:$0xf]  ;;  %v7934_v10 = vmov 6   ;;  %v7932_v11 = vmov 7   ;;  %v7928_v12 = vmov 8   ;;  %v7930_v13 = vmov 9  }
  0x8e   : > { %v7926_v14 = vmov 10   ;;  %v7924_v15 = vmov 11   ;;  %v5185_v16 = vmov 12   ;;  %v5186_v17 = vmov 13   ;;  %s5617_s25 = sld [smem:[#allocation13]]  ;;  %s5195_s26 = smov 125  }
  0x8f   : > { %v5187_v18 = vmov 14   ;;  %v5188_v19 = vmov 15   ;;  %v5189_v20 = vmov 16   ;;  %v5190_v21 = vmov 17   ;;  %s5196_s29 = smov 122   ;;  %s5197_s14 = smov 74  }
  0x90   : > { %v5191_v22 = vmov 18   ;;  %v5192_v23 = vmov 19   ;;  %v5193_v24 = vmov 20   ;;  %v5194_v25 = vmov 21   ;;  %s5198_s22 = smov 71   ;;  %s5199_s12 = smov 68  }
  0x91   : > { %4751 = vset.pattern.permute.xlu0 %v7936_v4  ;;  %4746 = vset.pattern.permute.xlu1 %v7940_v5  ;;  %v502_v29 = vshrl.u32 %v501_v28, 7  ;;  %v4478_v32 = vld [vmem:[%s5524_s8 + $0x1] ss:$4 sm:$0xf]  ;;  %s5204_s21 = smov 20   ;;  %s5209_s27 = smov 17  }
  0x92   : > { %777 = vperm.xlu0 %4751, %v5544_v3   ;;  %567 = vperm.xlu1 %4746, %v493_v0   ;;  %v494_v33 = vld [vmem:[%s5524_s8] ss:$4 sm:$0xf]  ;;  %v4480_v38 = vld [vmem:[%s5524_s8 + $0x3] ss:$4 sm:$0xf] }
  0x93   : > { %v5589_v34 = vsub.s32 0, %v502_v29  ;;  %v5591_v35 = vsub.s32 1, %v502_v29  ;;  %v5593_v36 = vsub.s32 2, %v502_v29  ;;  %v5595_v37 = vsub.s32 3, %v502_v29  ;;  %s5214_s6 = smov 14   ;;  %s5238_s28 = smov 90  }
  0x94   : > { %v4479_v41 = vld [vmem:[%s5524_s8 + $0x2] ss:$4 sm:$0xf]  ;;  %vm808_vm4 = vcmask 1022976   ;;  %vm948_vm5 = vcmask 998400   ;;  %vm1037_vm6 = vcmask 605184  }
  0x95   : > { %8054 = vst [vmem:[#allocation25_spill] sm:$0xff] %v5589_v34  ;;  %8055 = vst [vmem:[#allocation26_spill] sm:$0xff] %v5591_v35  ;;  %v504_v42 = vrot.slane %v494_v33, %v5589_v34  ;;  %v508_v43 = vrot.slane %v494_v33, %v5591_v35  ;;  %v512_v44 = vrot.slane %v494_v33, %v5593_v36  ;;  %vm1126_vm11 = vcmask 580608   ;;  %s5243_s1 = smov 88   ;;  %s5248_s2 = smov 56  }
  0x96   : > { %4752 = vset.pattern.permute.xlu0 %v7945_v8  ;;  %4748 = vset.pattern.permute.xlu1 %v7945_v8  ;;  %8056 = vst [vmem:[#allocation27_spill] sm:$0xff] %v5593_v36  ;;  %8057 = vst [vmem:[#allocation28_spill] sm:$0xff] %v5595_v37  ;;  %v516_v45 = vrot.slane %v494_v33, %v5595_v37  ;;  %v539_v46 = vrot.slane %v4478_v32, %v5589_v34  ;;  %vm1215_vm12 = vcmask 556032   ;;  %vm1304_vm13 = vcmask 162816   ;;  %s5253_s24 = smov 54   ;;  %s5258_s15 = smov 52  }
  0x97   : > { %686 = vperm.xlu1 %4748, %v683_v6   ;;  %489 = vperm.xlu0 %4752, %v486_v7   ;;  %v543_v47 = vrot.slane %v4478_v32, %v5591_v35  ;;  %v547_v48 = vrot.slane %v4478_v32, %v5593_v36  ;;  %v551_v49 = vrot.slane %v4478_v32, %v5595_v37  ;;  %vm1393_vm14 = vcmask 138240   ;;  %p8372_p12 = scmp.ne.s32.totalorder %s8043_s13, 0 }
  0x98   : > { %v609_v50 = vrot.slane %v4480_v38, %v5589_v34  ;;  %v613_v51 = vrot.slane %v4480_v38, %v5591_v35  ;;  %v617_v52 = vrot.slane %v4480_v38, %v5593_v36  ;;  %v621_v53 = vrot.slane %v4480_v38, %v5595_v37 }
  0x99   : > { %v574_v54 = vrot.slane %v4479_v41, %v5589_v34  ;;  %v578_v55 = vrot.slane %v4479_v41, %v5591_v35  ;;  %v582_v56 = vrot.slane %v4479_v41, %v5593_v36  ;;  %v586_v57 = vrot.slane %v4479_v41, %v5595_v37 }
  0x9a   : > { %vm1482_vm15 = vcmask 113664  }
  0x9b   : > { %694 = vperm.xlu1 %4748, %v5544_v3   ;;  %497 = vperm.xlu0 %4752, %v493_v0  }
  0x9f   : > { %4749 = vset.pattern.permute.xlu1 %v7940_v5 }
  0xa0   : > { %736 = vperm.xlu1 %4749, %v5544_v3  }
  0xa4   : > { %4750 = vset.pattern.permute.xlu1 %v7942_v1 }
  0xa5   : > { %757 = vperm.xlu1 %4750, %v5544_v3  }
  0xa9   : > { %4753 = vset.pattern.permute.xlu1 %v7938_v9 }
  0xaa   : > { %817 = vperm.xlu1 %4753, %v5544_v3  }
  0xae   : > { %4754 = vset.pattern.permute.xlu1 %v7934_v10 }
  0xaf   : > { %856 = vperm.xlu1 %4754, %v5544_v3  }
  0xb3   : > { %4755 = vset.pattern.permute.xlu1 %v7932_v11 }
  0xb4   : > { %895 = vperm.xlu1 %4755, %v5544_v3  }
  0xb8   : > { %4756 = vset.pattern.permute.xlu1 %v7928_v12 }
  0xb9   : > { %933 = vperm.xlu1 %4756, %v5544_v3  }
  0xbd   : > { %4757 = vset.pattern.permute.xlu1 %v7930_v13 }
  0xbe   : > { %956 = vperm.xlu1 %4757, %v5544_v3  }
  0xc2   : > { %4758 = vset.pattern.permute.xlu1 %v7926_v14 }
  0xc3   : > { %978 = vperm.xlu1 %4758, %v5544_v3  }
  0xc7   : > { %4759 = vset.pattern.permute.xlu1 %v7924_v15 }
  0xc8   : > { %1000 = vperm.xlu1 %4759, %v5544_v3  }
  0xcc   : > { %4760 = vset.pattern.permute.xlu1 %v5185_v16 }
  0xcd   : > { %1022 = vperm.xlu1 %4760, %v5544_v3  }
  0xd1   : > { %4761 = vset.pattern.permute.xlu1 %v5186_v17 }
  0xd2   : > { %1045 = vperm.xlu1 %4761, %v5544_v3  }
  0xd6   : > { %4762 = vset.pattern.permute.xlu1 %v5187_v18 }
  0xd7   : > { %1067 = vperm.xlu1 %4762, %v5544_v3  }
  0xdb   : > { %4763 = vset.pattern.permute.xlu1 %v5188_v19 }
  0xdc   : > { %1089 = vperm.xlu1 %4763, %v5544_v3  }
  0xe0   : > { %4764 = vset.pattern.permute.xlu1 %v5189_v20 }
  0xe1   : > { %1111 = vperm.xlu1 %4764, %v5544_v3  }
  0xe5   : > { %4765 = vset.pattern.permute.xlu1 %v5190_v21 }
  0xe6   : > { %1134 = vperm.xlu1 %4765, %v5544_v3  }
  0xea   : > { %4766 = vset.pattern.permute.xlu1 %v5191_v22 }
  0xeb   : > { %1156 = vperm.xlu1 %4766, %v5544_v3  }
  0xef   : > { %4767 = vset.pattern.permute.xlu1 %v5192_v23 }
  0xf0   : > { %1178 = vperm.xlu1 %4767, %v5544_v3  }
  0xf4   : > { %4768 = vset.pattern.permute.xlu1 %v5193_v24 }
  0xf5   : > { %1200 = vperm.xlu1 %4768, %v5544_v3  }
  0xf9   : > { %4769 = vset.pattern.permute.xlu1 %v5194_v25 }
 0x108   : > { %v603_v26 = vpop.permute.xlu0 %602  ;;  %v533_v27 = vpop.permute.xlu1 %532 }
 0x109   : > { %v556_v0 = vmul.f32 %v539_v46, %v533_v27  ;;  %v557_v6 = vmul.f32 %v543_v47, %v533_v27  ;;  %v558_v7 = vmul.f32 %v547_v48, %v533_v27  ;;  %v559_v16 = vmul.f32 %v551_v49, %v533_v27  ;;  %v485_v27 = vld [vmem:[#allocation7] sm:$0xf] }
 0x10a   : > { %v626_v38 = vmul.f32 %v609_v50, %v603_v26  ;;  %v627_v41 = vmul.f32 %v613_v51, %v603_v26  ;;  %v639_v47 = vstv %s5617_s25  ;;  %v5631_v50 = vrot.slane %v485_v27, %v5593_v36  ;;  %s4492_s25 = sld [smem:[#allocation13 + $0x2]] }
 0x10c   : > { %8060 = vst [vmem:[#allocation31_spill] sm:$0xff] %v5631_v50 }
 0x10d   : > { %v5585_v30 = vpop.permute.xlu0 %777  ;;  %v568_v31 = vpop.permute.xlu1 %567 }
 0x10e   : > { %v591_v21 = vmul.f32 %v574_v54, %v568_v31  ;;  %v592_v22 = vmul.f32 %v578_v55, %v568_v31  ;;  %v593_v23 = vmul.f32 %v582_v56, %v568_v31  ;;  %v594_v24 = vmul.f32 %v586_v57, %v568_v31 }
 0x10f   : > { %v5625_v55 = vrot.slane %v485_v27, %v5589_v34  ;;  %v5628_v56 = vrot.slane %v485_v27, %v5591_v35 }
 0x111   : > { %8058 = vst [vmem:[#allocation29_spill] sm:$0xff] %v5625_v55  ;;  %8059 = vst [vmem:[#allocation30_spill] sm:$0xff] %v5628_v56 }
 0x112   : > { %v490_v39 = vpop.permute.xlu0 %489  ;;  %v5598_v40 = vpop.permute.xlu1 %686 }
 0x116   : > { %v498_v58 = vpop.permute.xlu0 %497  ;;  %v5619_v63 = vpop.permute.xlu1 %694 }
 0x117   : > { %v521_v59 = vmul.f32 %v504_v42, %v498_v58  ;;  %v522_v60 = vmul.f32 %v508_v43, %v498_v58  ;;  %v523_v61 = vmul.f32 %v512_v44, %v498_v58  ;;  %v524_v62 = vmul.f32 %v516_v45, %v498_v58 }
 0x118   : > { %v628_v42 = vmul.f32 %v617_v52, %v603_v26  ;;  %v629_v43 = vmul.f32 %v621_v53, %v603_v26  ;;  %v5634_v26 = vrot.slane %v485_v27, %v5595_v37 }
 0x119   : > { %v525_v17 = vadd.f32 %v521_v59, %v490_v39  ;;  %v526_v18 = vadd.f32 %v522_v60, %v490_v39  ;;  %v527_v19 = vadd.f32 %v523_v61, %v490_v39  ;;  %v528_v20 = vadd.f32 %v524_v62, %v490_v39 }
 0x11a   : > { %8061 = vst [vmem:[#allocation32_spill] sm:$0xff] %v5634_v26 }
 0x11b   : > { %v560_v25 = vadd.f32 %v556_v0, %v525_v17  ;;  %v561_v28 = vadd.f32 %v557_v6, %v526_v18  ;;  %v562_v29 = vadd.f32 %v558_v7, %v527_v19  ;;  %v563_v32 = vadd.f32 %v559_v16, %v528_v20  ;;  %v5621_v33 = vpop.permute.xlu1 %736 }
 0x11d   : > { %v595_v44 = vadd.f32 %v591_v21, %v560_v25  ;;  %v596_v45 = vadd.f32 %v592_v22, %v561_v28  ;;  %v597_v46 = vadd.f32 %v593_v23, %v562_v29  ;;  %v598_v39 = vadd.f32 %v594_v24, %v563_v32 }
 0x11f   : > { %v630_v48 = vadd.f32 %v626_v38, %v595_v44  ;;  %v631_v49 = vadd.f32 %v627_v41, %v596_v45  ;;  %v632_v54 = vadd.f32 %v628_v42, %v597_v46  ;;  %v633_v31 = vadd.f32 %v629_v43, %v598_v39 }
 0x120   : > { %v5636_v51 = vpop.permute.xlu1 %757 }
 0x121   : > { %vm635_vm0 = vcmp.ge.f32.partialorder %v630_v48, 0.0  ;;  %vm636_vm1 = vcmp.ge.f32.partialorder %v631_v49, 0.0  ;;  %vm637_vm2 = vcmp.ge.f32.partialorder %v632_v54, 0.0  ;;  %vm638_vm3 = vcmp.ge.f32.partialorder %v633_v31, 0.0 }
 0x122   : > { %v640_v52 = vmul.f32 %v639_v47, %v630_v48  ;;  %v641_v53 = vmul.f32 %v639_v47, %v631_v49  ;;  %v642_v57 = vmul.f32 %v639_v47, %v632_v54  ;;  %v643_v58 = vmul.f32 %v639_v47, %v633_v31 }
 0x124   : > { %v644_v59 = vsel %vm635_vm0, %v630_v48, %v640_v52  ;;  %v645_v60 = vsel %vm636_vm1, %v631_v49, %v641_v53  ;;  %v646_v61 = vsel %vm637_vm2, %v632_v54, %v642_v57  ;;  %v647_v62 = vsel %vm638_vm3, %v633_v31, %v643_v58 }
 0x125   : > { %v669_v0 = vmul.f32 %v5625_v55, %v644_v59  ;;  %v670_v6 = vmul.f32 %v5628_v56, %v645_v60  ;;  %v671_v7 = vmul.f32 %v5631_v50, %v646_v61  ;;  %v672_v16 = vmul.f32 %v5634_v26, %v647_v62  ;;  %v818_v17 = vpop.permute.xlu1 %817 }
 0x127   : > { %v677_v18 = vcombine.low %v669_v0, %v670_v6  ;;  %v678_v19 = vcombine.low %v671_v7, %v672_v16 }
 0x129   : > { %681 = vst [vmem:[#allocation2] sm:$0xff] %v677_v18  ;;  %682 = vst [vmem:[#allocation2 + $0x8] sm:$0xff] %v678_v19 }
 0x12a   : > { %v857_v20 = vpop.permute.xlu1 %856 }
 0x12f   : > { %v896_v21 = vpop.permute.xlu1 %895 }
 0x130   : > { %v775_v22 = vld [vmem:[#allocation2] ss:$4 sm:$0x7]  ;;  %v815_v25 = vld [vmem:[#allocation2 + $0x1] ss:$4 sm:$0x7] }
 0x131   : > { %v5643_v23 = vrot.slane %v775_v22, %v5593_v36  ;;  %v5646_v24 = vrot.slane %v775_v22, %v5589_v34  ;;  %v5653_v38 = vrot.slane %v815_v25, %v5589_v34  ;;  %v5656_v41 = vrot.slane %v775_v22, %v5591_v35  ;;  %v854_v46 = vld [vmem:[#allocation2 + $0x2] ss:$4 sm:$0x7]  ;;  %v893_v49 = vld [vmem:[#allocation2 + $0x3] ss:$4 sm:$0x7] }
 0x132   : > { %v5664_v27 = vrot.slane %v815_v25, %v5593_v36  ;;  %v5667_v44 = vrot.slane %v815_v25, %v5591_v35  ;;  %v5674_v48 = vrot.slane %v854_v46, %v5589_v34  ;;  %v5684_v53 = vrot.slane %v854_v46, %v5593_v36 }
 0x133   : > { %v798_v29 = vmul.f32 %v5643_v23, %v5585_v30  ;;  %v796_v32 = vmul.f32 %v5646_v24, %v5585_v30  ;;  %v836_v42 = vmul.f32 %v5653_v38, %v818_v17  ;;  %v797_v43 = vmul.f32 %v5656_v41, %v5585_v30 }
 0x134   : > { %v934_v28 = vpop.permute.xlu1 %933  ;;  %v838_v39 = vmul.f32 %v5664_v27, %v818_v17  ;;  %v837_v47 = vmul.f32 %v5667_v44, %v818_v17  ;;  %v5677_v30 = vrot.slane %v854_v46, %v5591_v35  ;;  %v875_v31 = vmul.f32 %v5674_v48, %v857_v20 }
 0x135   : > { %806 = vrot.lane.b32.xlu0 %v798_v29, %s5195_s26  ;;  %802 = vrot.lane.b32.xlu1 %v796_v32, %s5195_s26  ;;  %v5687_v57 = vrot.slane %v893_v49, %v5591_v35  ;;  %v877_v59 = vmul.f32 %v5684_v53, %v857_v20  ;;  %v5694_v61 = vrot.slane %v893_v49, %v5589_v34 }
 0x136   : > { %v876_v52 = vmul.f32 %v5677_v30, %v857_v20  ;;  %v937_v6 = vmul.f32 %v934_v28, %v5656_v41  ;;  %v5701_v7 = vrot.slane %v893_v49, %v5593_v36  ;;  %v936_v19 = vmul.f32 %v934_v28, %v5646_v24 }
 0x137   : > { %v915_v60 = vmul.f32 %v5687_v57, %v896_v21  ;;  %v914_v0 = vmul.f32 %v5694_v61, %v896_v21  ;;  %v938_v25 = vmul.f32 %v934_v28, %v5643_v23 }
 0x138   : > { %v916_v16 = vmul.f32 %v5701_v7, %v896_v21 }
 0x139   : > { %v957_v45 = vpop.permute.xlu1 %956  ;;  %842 = vrot.lane.b32.xlu0 %v836_v42, %s5195_s26  ;;  %804 = vrot.lane.b32.xlu1 %v797_v43, %s5195_s26 }
 0x13a   : > { %v960_v17 = vmul.f32 %v957_v45, %v5667_v44  ;;  %v959_v32 = vmul.f32 %v957_v45, %v5653_v38  ;;  %v961_v43 = vmul.f32 %v957_v45, %v5664_v27 }
 0x13d   : > { %846 = vrot.lane.b32.xlu0 %v838_v39, %s5195_s26  ;;  %844 = vrot.lane.b32.xlu1 %v837_v47, %s5195_s26 }
 0x13e   : > { %v979_v54 = vpop.permute.xlu1 %978 }
 0x13f   : > { %v982_v20 = vmul.f32 %v979_v54, %v5677_v30  ;;  %v981_v39 = vmul.f32 %v979_v54, %v5674_v48 }
 0x141   : > { %881 = vrot.lane.b32.xlu0 %v875_v31, %s5195_s26  ;;  %883 = vrot.lane.b32.xlu1 %v876_v52, %s5195_s26  ;;  %v983_v31 = vmul.f32 %v979_v54, %v5684_v53 }
 0x143   : > { %v1001_v58 = vpop.permute.xlu1 %1000 }
 0x144   : > { %v1004_v21 = vmul.f32 %v1001_v58, %v5687_v57  ;;  %v1003_v52 = vmul.f32 %v1001_v58, %v5694_v61 }
 0x145   : > { %885 = vrot.lane.b32.xlu0 %v877_v59, %s5195_s26  ;;  %922 = vrot.lane.b32.xlu1 %v915_v60, %s5195_s26 }
 0x148   : > { %v1023_v62 = vpop.permute.xlu1 %1022 }
 0x149   : > { %920 = vrot.lane.b32.xlu0 %v914_v0, %s5195_s26  ;;  %944 = vrot.lane.b32.xlu1 %v937_v6, %s5196_s29  ;;  %v1026_v42 = vmul.f32 %v1023_v62, %v5656_v41  ;;  %v1005_v0 = vmul.f32 %v1001_v58, %v5701_v7 }
 0x14d   : > { %v1046_v18 = vpop.permute.xlu1 %1045  ;;  %924 = vrot.lane.b32.xlu0 %v916_v16, %s5195_s26  ;;  %967 = vrot.lane.b32.xlu1 %v960_v17, %s5196_s29  ;;  %v1025_v16 = vmul.f32 %v1023_v62, %v5646_v24  ;;  %s6166_s26 = sld [smem:[#allocation13 + $0x1]] }
 0x14e   : > { %v1049_v28 = vmul.f32 %v1046_v18, %v5667_v44 }
 0x151   : > { %942 = vrot.lane.b32.xlu0 %v936_v19, %s5196_s29  ;;  %989 = vrot.lane.b32.xlu1 %v982_v20, %s5196_s29  ;;  %v1027_v19 = vmul.f32 %v1023_v62, %v5643_v23 }
 0x152   : > { %v1068_v22 = vpop.permute.xlu1 %1067 }
 0x153   : > { %v1071_v47 = vmul.f32 %v1068_v22, %v5677_v30  ;;  %v1070_v62 = vmul.f32 %v1068_v22, %v5674_v48 }
 0x155   : > { %946 = vrot.lane.b32.xlu0 %v938_v25, %s5196_s29  ;;  %1011 = vrot.lane.b32.xlu1 %v1004_v21, %s5196_s29  ;;  %v1048_v25 = vmul.f32 %v1046_v18, %v5653_v38 }
 0x157   : > { %v1090_v29 = vpop.permute.xlu1 %1089 }
 0x158   : > { %v1093_v45 = vmul.f32 %v1090_v29, %v5687_v57 }
 0x159   : > { %965 = vrot.lane.b32.xlu0 %v959_v32, %s5196_s29  ;;  %1033 = vrot.lane.b32.xlu1 %v1026_v42, %s5197_s14  ;;  %v1050_v32 = vmul.f32 %v1046_v18, %v5664_v27  ;;  %v5200_v42 = vmov 22   ;;  %v1094_v18 = vmul.f32 %v1090_v29, %v5701_v7 }
 0x15c   : > { %v1112_v46 = vpop.permute.xlu1 %1111 }
 0x15d   : > { %969 = vrot.lane.b32.xlu0 %v961_v43, %s5196_s29  ;;  %1056 = vrot.lane.b32.xlu1 %v1049_v28, %s5197_s14  ;;  %v1115_v59 = vmul.f32 %v1112_v46, %v5656_v41  ;;  %v1072_v43 = vmul.f32 %v1068_v22, %v5684_v53  ;;  %v1092_v28 = vmul.f32 %v1090_v29, %v5694_v61 }
 0x161   : > { %987 = vrot.lane.b32.xlu0 %v981_v39, %s5196_s29  ;;  %1078 = vrot.lane.b32.xlu1 %v1071_v47, %s5197_s14  ;;  %v1135_v49 = vpop.permute.xlu1 %1134  ;;  %v1114_v39 = vmul.f32 %v1112_v46, %v5646_v24  ;;  %v1116_v47 = vmul.f32 %v1112_v46, %v5643_v23 }
 0x162   : > { %v1138_v54 = vmul.f32 %v1135_v49, %v5667_v44  ;;  %v1137_v22 = vmul.f32 %v1135_v49, %v5653_v38 }
 0x165   : > { %991 = vrot.lane.b32.xlu0 %v983_v31, %s5196_s29  ;;  %1100 = vrot.lane.b32.xlu1 %v1093_v45, %s5197_s14  ;;  %v1139_v31 = vmul.f32 %v1135_v49, %v5664_v27 }
 0x166   : > { %v1157_v60 = vpop.permute.xlu1 %1156 }
 0x167   : > { %v1160_v17 = vmul.f32 %v1157_v60, %v5677_v30  ;;  %v1159_v29 = vmul.f32 %v1157_v60, %v5674_v48  ;;  %v1161_v45 = vmul.f32 %v1157_v60, %v5684_v53 }
 0x169   : > { %1009 = vrot.lane.b32.xlu0 %v1003_v52, %s5196_s29  ;;  %1122 = vrot.lane.b32.xlu1 %v1115_v59, %s5198_s22 }
 0x16b   : > { %v1179_v6 = vpop.permute.xlu1 %1178 }
 0x16c   : > { %v1182_v20 = vmul.f32 %v1179_v6, %v5687_v57  ;;  %v1181_v46 = vmul.f32 %v1179_v6, %v5694_v61  ;;  %v1183_v49 = vmul.f32 %v1179_v6, %v5701_v7 }
 0x16d   : > { %1013 = vrot.lane.b32.xlu0 %v1005_v0, %s5196_s29  ;;  %1145 = vrot.lane.b32.xlu1 %v1138_v54, %s5198_s22  ;;  %s5223_s29 = smov 126  }
 0x170   : > { %v1201_v58 = vpop.permute.xlu1 %1200 }
 0x171   : > { %1031 = vrot.lane.b32.xlu0 %v1025_v16, %s5197_s14  ;;  %1167 = vrot.lane.b32.xlu1 %v1160_v17, %s5198_s22  ;;  %v1204_v21 = vmul.f32 %v1201_v58, %v5656_v41  ;;  %v1203_v54 = vmul.f32 %v1201_v58, %v5646_v24  ;;  %v1205_v16 = vmul.f32 %v1201_v58, %v5643_v23 }
 0x175   : > { %1035 = vrot.lane.b32.xlu0 %v1027_v19, %s5197_s14  ;;  %1189 = vrot.lane.b32.xlu1 %v1182_v20, %s5198_s22 }
 0x179   : > { %1054 = vrot.lane.b32.xlu0 %v1048_v25, %s5197_s14  ;;  %1211 = vrot.lane.b32.xlu1 %v1204_v21, %s5199_s12 }
 0x17d   : > { %1058 = vrot.lane.b32.xlu0 %v1050_v32, %s5197_s14  ;;  %1223 = vperm.xlu1 %4769, %v5544_v3  }
 0x181   : > { %1076 = vrot.lane.b32.xlu0 %v1070_v62, %s5197_s14  ;;  %4770 = vset.pattern.permute.xlu1 %v5200_v42 }
 0x185   : > { %1080 = vrot.lane.b32.xlu0 %v1072_v43, %s5197_s14 }
 0x189   : > { %1098 = vrot.lane.b32.xlu0 %v1092_v28, %s5197_s14 }
 0x18d   : > { %1102 = vrot.lane.b32.xlu0 %v1094_v18, %s5197_s14  ;;  %s4481_s14 = sld [smem:[#allocation13 + $0x3]] }
 0x191   : > { %1120 = vrot.lane.b32.xlu0 %v1114_v39, %s5198_s22 }
 0x195   : > { %1124 = vrot.lane.b32.xlu0 %v1116_v47, %s5198_s22 }
 0x199   : > { %1143 = vrot.lane.b32.xlu0 %v1137_v22, %s5198_s22 }
 0x19d   : > { %1147 = vrot.lane.b32.xlu0 %v1139_v31, %s5198_s22 }
 0x1a1   : > { %1165 = vrot.lane.b32.xlu0 %v1159_v29, %s5198_s22 }
 0x1a5   : > { %1169 = vrot.lane.b32.xlu0 %v1161_v45, %s5198_s22  ;;  %v5201_v45 = vmov 23  }
 0x1a7   : > { %v5776_v52 = vpop.permute.xlu1 %802 }
 0x1a9   : > { %1187 = vrot.lane.b32.xlu0 %v1181_v46, %s5198_s22 }
 0x1ab   : > { %v5780_v59 = vpop.permute.xlu1 %804 }
 0x1ad   : > { %1191 = vrot.lane.b32.xlu0 %v1183_v49, %s5198_s22  ;;  %s4482_s22 = sld [smem:[#allocation13 + $0x6]] }
 0x1af   : > { %v5784_v0 = vpop.permute.xlu1 %844 }
 0x1b1   : > { %1209 = vrot.lane.b32.xlu0 %v1203_v54, %s5199_s12 }
 0x1b3   : > { %v5788_v60 = vpop.permute.xlu1 %883 }
 0x1b5   : > { %1213 = vrot.lane.b32.xlu0 %v1205_v16, %s5199_s12 }
 0x1b7   : > { %v5792_v17 = vpop.permute.xlu1 %922 }
 0x1bb   : > { %v5794_v19 = vpop.permute.xlu1 %944 }
 0x1bf   : > { %v5796_v20 = vpop.permute.xlu1 %967 }
 0x1c3   : > { %v5798_v6 = vpop.permute.xlu1 %989 }
 0x1c7   : > { %v5800_v25 = vpop.permute.xlu1 %1011 }
 0x1c8   : > { %8062 = vst [vmem:[#allocation33_spill] sm:$0xff] %v5800_v25 }
 0x1cb   : > { %v5802_v21 = vpop.permute.xlu1 %1033 }
 0x1cc   : > { %8063 = vst [vmem:[#allocation34_spill] sm:$0xff] %v5802_v21 }
 0x1cf   : > { %v5804_v32 = vpop.permute.xlu1 %1056 }
 0x1d0   : > { %8064 = vst [vmem:[#allocation35_spill] sm:$0xff] %v5804_v32 }
 0x1d3   : > { %v5806_v62 = vpop.permute.xlu1 %1078 }
 0x1d4   : > { %8065 = vst [vmem:[#allocation36_spill] sm:$0xff] %v5806_v62 }
 0x1d7   : > { %v5808_v42 = vpop.permute.xlu1 %1100 }
 0x1d8   : > { %8066 = vst [vmem:[#allocation37_spill] sm:$0xff] %v5808_v42 }
 0x1db   : > { %v5810_v58 = vpop.permute.xlu1 %1122 }
 0x1dc   : > { %8067 = vst [vmem:[#allocation38_spill] sm:$0xff] %v5810_v58 }
 0x1df   : > { %v5812_v43 = vpop.permute.xlu1 %1145 }
 0x1e0   : > { %8068 = vst [vmem:[#allocation39_spill] sm:$0xff] %v5812_v43 }
 0x1e3   : > { %v5814_v28 = vpop.permute.xlu1 %1167 }
 0x1e4   : > { %8069 = vst [vmem:[#allocation40_spill] sm:$0xff] %v5814_v28 }
 0x1e7   : > { %v5816_v18 = vpop.permute.xlu1 %1189 }
 0x1e8   : > { %8070 = vst [vmem:[#allocation41_spill] sm:$0xff] %v5816_v18 }
 0x1eb   : > { %v5818_v39 = vpop.permute.xlu1 %1211 }
 0x1ec   : > { %8071 = vst [vmem:[#allocation42_spill] sm:$0xff] %v5818_v39 }
 0x1f8   : > { %v1224_v47 = vpop.permute.xlu1 %1223 }
 0x1f9   : > { %v1227_v22 = vmul.f32 %v1224_v47, %v5667_v44  ;;  %v1226_v31 = vmul.f32 %v1224_v47, %v5653_v38  ;;  %v1228_v29 = vmul.f32 %v1224_v47, %v5664_v27  ;;  %v5202_v47 = vmov 24  }
 0x1fb   : > { %1234 = vrot.lane.b32.xlu1 %v1227_v22, %s5199_s12  ;;  %1232 = vrot.lane.b32.xlu0 %v1226_v31, %s5199_s12 }
 0x1ff   : > { %1245 = vperm.xlu1 %4770, %v5544_v3   ;;  %1236 = vrot.lane.b32.xlu0 %v1228_v29, %s5199_s12 }
 0x203   : > { %4771 = vset.pattern.permute.xlu1 %v5201_v45 }
 0x26d   : > { %v5827_v46 = vpop.permute.xlu1 %1234 }
 0x26e   : > { %8072 = vst [vmem:[#allocation43_spill] sm:$0xff] %v5827_v46 }
 0x27a   : > { %v1246_v49 = vpop.permute.xlu1 %1245 }
 0x27b   : > { %v1249_v54 = vmul.f32 %v1246_v49, %v5677_v30  ;;  %v1248_v16 = vmul.f32 %v1246_v49, %v5674_v48  ;;  %v1250_v22 = vmul.f32 %v1246_v49, %v5684_v53  ;;  %v5203_v49 = vmov 25  }
 0x27d   : > { %1256 = vrot.lane.b32.xlu1 %v1249_v54, %s5199_s12  ;;  %1254 = vrot.lane.b32.xlu0 %v1248_v16, %s5199_s12 }
 0x281   : > { %1267 = vperm.xlu1 %4771, %v5544_v3   ;;  %1258 = vrot.lane.b32.xlu0 %v1250_v22, %s5199_s12 }
 0x285   : > { %4772 = vset.pattern.permute.xlu1 %v5202_v47 }
 0x2ef   : > { %v5836_v31 = vpop.permute.xlu1 %1256 }
 0x2f0   : > { %8073 = vst [vmem:[#allocation44_spill] sm:$0xff] %v5836_v31 }
 0x2fc   : > { %v1268_v29 = vpop.permute.xlu1 %1267 }
 0x2fd   : > { %v1271_v45 = vmul.f32 %v1268_v29, %v5687_v57  ;;  %v1270_v15 = vmul.f32 %v1268_v29, %v5694_v61  ;;  %v1272_v54 = vmul.f32 %v1268_v29, %v5701_v7  ;;  %v5205_v29 = vmov 26  }
 0x2ff   : > { %1278 = vrot.lane.b32.xlu1 %v1271_v45, %s5199_s12  ;;  %1276 = vrot.lane.b32.xlu0 %v1270_v15, %s5199_s12 }
 0x303   : > { %1289 = vperm.xlu1 %4772, %v5544_v3   ;;  %1280 = vrot.lane.b32.xlu0 %v1272_v54, %s5199_s12  ;;  %s4476_s12 = sshll.u32 %s5520_s4, 3 }
 0x307   : > { %4773 = vset.pattern.permute.xlu1 %v5203_v49 }
 0x371   : > { %v5845_v16 = vpop.permute.xlu1 %1278 }
 0x372   : > { %8074 = vst [vmem:[#allocation45_spill] sm:$0xff] %v5845_v16 }
 0x37e   : > { %v1290_v22 = vpop.permute.xlu1 %1289 }
 0x37f   : > { %v1293_v47 = vmul.f32 %v1290_v22, %v5656_v41  ;;  %v1292_v14 = vmul.f32 %v1290_v22, %v5646_v24  ;;  %v1294_v15 = vmul.f32 %v1290_v22, %v5643_v23  ;;  %v5206_v22 = vmov 27  }
 0x381   : > { %1300 = vrot.lane.b32.xlu1 %v1293_v47, %s5204_s21  ;;  %1298 = vrot.lane.b32.xlu0 %v1292_v14, %s5204_s21 }
 0x385   : > { %1312 = vperm.xlu1 %4773, %v5544_v3   ;;  %1302 = vrot.lane.b32.xlu0 %v1294_v15, %s5204_s21 }
 0x389   : > { %4774 = vset.pattern.permute.xlu1 %v5205_v29 }
 0x3f3   : > { %v5854_v45 = vpop.permute.xlu1 %1300 }
 0x3f4   : > { %8075 = vst [vmem:[#allocation46_spill] sm:$0xff] %v5854_v45 }
 0x400   : > { %v1313_v54 = vpop.permute.xlu1 %1312 }
 0x401   : > { %v1316_v49 = vmul.f32 %v1313_v54, %v5667_v44  ;;  %v1315_v12 = vmul.f32 %v1313_v54, %v5653_v38  ;;  %v1317_v14 = vmul.f32 %v1313_v54, %v5664_v27  ;;  %v5207_v54 = vmov 28  }
 0x403   : > { %1323 = vrot.lane.b32.xlu1 %v1316_v49, %s5204_s21  ;;  %1321 = vrot.lane.b32.xlu0 %v1315_v12, %s5204_s21 }
 0x407   : > { %1334 = vperm.xlu1 %4774, %v5544_v3   ;;  %1325 = vrot.lane.b32.xlu0 %v1317_v14, %s5204_s21 }
 0x40b   : > { %4775 = vset.pattern.permute.xlu1 %v5206_v22 }
 0x475   : > { %v5863_v47 = vpop.permute.xlu1 %1323 }
 0x476   : > { %8076 = vst [vmem:[#allocation47_spill] sm:$0xff] %v5863_v47 }
 0x482   : > { %v1335_v15 = vpop.permute.xlu1 %1334 }
 0x483   : > { %v1338_v29 = vmul.f32 %v1335_v15, %v5677_v30  ;;  %v1337_v13 = vmul.f32 %v1335_v15, %v5674_v48  ;;  %v1339_v12 = vmul.f32 %v1335_v15, %v5684_v53  ;;  %v5208_v15 = vmov 29  }
 0x485   : > { %1345 = vrot.lane.b32.xlu1 %v1338_v29, %s5204_s21  ;;  %1343 = vrot.lane.b32.xlu0 %v1337_v13, %s5204_s21 }
 0x489   : > { %1356 = vperm.xlu1 %4775, %v5544_v3   ;;  %1347 = vrot.lane.b32.xlu0 %v1339_v12, %s5204_s21 }
 0x48d   : > { %4776 = vset.pattern.permute.xlu1 %v5207_v54 }
 0x4f7   : > { %v5872_v49 = vpop.permute.xlu1 %1345 }
 0x4f8   : > { %8077 = vst [vmem:[#allocation48_spill] sm:$0xff] %v5872_v49 }
 0x504   : > { %v1357_v14 = vpop.permute.xlu1 %1356 }
 0x505   : > { %v1359_v22 = vmul.f32 %v1357_v14, %v5694_v61  ;;  %v1360_v11 = vmul.f32 %v1357_v14, %v5687_v57  ;;  %v1361_v13 = vmul.f32 %v1357_v14, %v5701_v7  ;;  %v5210_v14 = vmov 30  }
 0x507   : > { %1367 = vrot.lane.b32.xlu1 %v1360_v11, %s5204_s21  ;;  %1365 = vrot.lane.b32.xlu0 %v1359_v22, %s5204_s21 }
 0x50b   : > { %1378 = vperm.xlu1 %4776, %v5544_v3   ;;  %1369 = vrot.lane.b32.xlu0 %v1361_v13, %s5204_s21  ;;  %s6395_s21 = scalar_lea.vmem [#allocation14], %s4476_s12 }
 0x50f   : > { %4777 = vset.pattern.permute.xlu1 %v5208_v15  ;;  %v5892_v15 = vpop.permute.xlu0 %806 }
 0x579   : > { %v5881_v29 = vpop.permute.xlu1 %1367 }
 0x57a   : > { %8078 = vst [vmem:[#allocation49_spill] sm:$0xff] %v5881_v29 }
 0x586   : > { %v1379_v12 = vpop.permute.xlu1 %1378 }
 0x587   : > { %v1381_v54 = vmul.f32 %v1379_v12, %v5646_v24  ;;  %v1382_v10 = vmul.f32 %v1379_v12, %v5656_v41  ;;  %v1383_v11 = vmul.f32 %v1379_v12, %v5643_v23  ;;  %v5899_v12 = vpop.permute.xlu0 %842 }
 0x589   : > { %1389 = vrot.lane.b32.xlu1 %v1382_v10, %s5209_s27  ;;  %1387 = vrot.lane.b32.xlu0 %v1381_v54, %s5209_s27  ;;  %v5211_v54 = vmov 31  }
 0x58b   : > { %v5905_v5 = vpop.permute.xlu0 %846 }
 0x58d   : > { %1401 = vperm.xlu1 %4777, %v5544_v3   ;;  %1391 = vrot.lane.b32.xlu0 %v1383_v11, %s5209_s27 }
 0x591   : > { %4778 = vset.pattern.permute.xlu1 %v5210_v14 }
 0x5fb   : > { %v5890_v22 = vpop.permute.xlu1 %1389 }
 0x5fc   : > { %8079 = vst [vmem:[#allocation50_spill] sm:$0xff] %v5890_v22 }
 0x608   : > { %v1402_v13 = vpop.permute.xlu1 %1401 }
 0x609   : > { %v1404_v4 = vmul.f32 %v1402_v13, %v5653_v38  ;;  %v1405_v9 = vmul.f32 %v1402_v13, %v5667_v44  ;;  %v1406_v10 = vmul.f32 %v1402_v13, %v5664_v27  ;;  %v5912_v13 = vpop.permute.xlu0 %881 }
 0x60b   : > { %1412 = vrot.lane.b32.xlu1 %v1405_v9, %s5209_s27  ;;  %1410 = vrot.lane.b32.xlu0 %v1404_v4, %s5209_s27 }
 0x60d   : > { %v5918_v8 = vpop.permute.xlu0 %885 }
 0x60f   : > { %1423 = vperm.xlu1 %4778, %v5544_v3   ;;  %1414 = vrot.lane.b32.xlu0 %v1406_v10, %s5209_s27  ;;  %v5212_v10 = vmov 32  }
 0x613   : > { %4779 = vset.pattern.permute.xlu1 %v5211_v54 }
 0x67d   : > { %v5903_v11 = vpop.permute.xlu1 %1412 }
 0x67e   : > { %8080 = vst [vmem:[#allocation51_spill] sm:$0xff] %v5903_v11 }
 0x68a   : > { %v1424_v14 = vpop.permute.xlu1 %1423 }
 0x68b   : > { %v1426_v1 = vmul.f32 %v1424_v14, %v5674_v48  ;;  %v1427_v9 = vmul.f32 %v1424_v14, %v5677_v30  ;;  %v1428_v4 = vmul.f32 %v1424_v14, %v5684_v53  ;;  %v5925_v14 = vpop.permute.xlu0 %920 }
 0x68d   : > { %1434 = vrot.lane.b32.xlu1 %v1427_v9, %s5209_s27  ;;  %1432 = vrot.lane.b32.xlu0 %v1426_v1, %s5209_s27 }
 0x68f   : > { %v5931_v22 = vpop.permute.xlu0 %924 }
 0x691   : > { %1445 = vperm.xlu1 %4779, %v5544_v3   ;;  %1436 = vrot.lane.b32.xlu0 %v1428_v4, %s5209_s27  ;;  %v5213_v4 = vmov 33  }
 0x695   : > { %4780 = vset.pattern.permute.xlu1 %v5212_v10 }
 0x6ff   : > { %v5916_v54 = vpop.permute.xlu1 %1434 }
 0x700   : > { %8081 = vst [vmem:[#allocation52_spill] sm:$0xff] %v5916_v54 }
 0x70c   : > { %v1446_v2 = vpop.permute.xlu1 %1445 }
 0x70d   : > { %v1448_v11 = vmul.f32 %v1446_v2, %v5694_v61  ;;  %v1449_v9 = vmul.f32 %v1446_v2, %v5687_v57  ;;  %v1450_v1 = vmul.f32 %v1446_v2, %v5701_v7 }
 0x70f   : > { %1456 = vrot.lane.b32.xlu1 %v1449_v9, %s5209_s27  ;;  %1454 = vrot.lane.b32.xlu0 %v1448_v11, %s5209_s27  ;;  %v5938_v11 = vpop.permute.xlu0 %942 }
 0x713   : > { %1467 = vperm.xlu1 %4780, %v5544_v3   ;;  %1458 = vrot.lane.b32.xlu0 %v1450_v1, %s5209_s27  ;;  %v5215_v1 = vmov 34   ;;  %s5228_s27 = smov 124  }
 0x717   : > { %4781 = vset.pattern.permute.xlu1 %v5213_v4 }
 0x781   : > { %v5929_v10 = vpop.permute.xlu1 %1456 }
 0x782   : > { %8082 = vst [vmem:[#allocation53_spill] sm:$0xff] %v5929_v10  ;;  %v5944_v10 = vpop.permute.xlu0 %946 }
 0x78e   : > { %v1468_v54 = vpop.permute.xlu1 %1467 }
 0x78f   : > { %v1470_v29 = vmul.f32 %v1468_v54, %v5646_v24  ;;  %v1471_v9 = vmul.f32 %v1468_v54, %v5656_v41  ;;  %v1472_v2 = vmul.f32 %v1468_v54, %v5643_v23  ;;  %v5216_v54 = vmov 35  }
 0x791   : > { %1478 = vrot.lane.b32.xlu1 %v1471_v9, %s5214_s6  ;;  %1476 = vrot.lane.b32.xlu0 %v1470_v29, %s5214_s6  ;;  %v5951_v29 = vpop.permute.xlu0 %965 }
 0x795   : > { %1490 = vperm.xlu1 %4781, %v5544_v3   ;;  %1480 = vrot.lane.b32.xlu0 %v1472_v2, %s5214_s6  ;;  %v5955_v2 = vpop.permute.xlu0 %969 }
 0x799   : > { %4782 = vset.pattern.permute.xlu1 %v5215_v1  ;;  %v5957_v1 = vpop.permute.xlu0 %987 }
 0x803   : > { %v5942_v4 = vpop.permute.xlu1 %1478 }
 0x804   : > { %8083 = vst [vmem:[#allocation54_spill] sm:$0xff] %v5942_v4 }
 0x810   : > { %v1491_v24 = vpop.permute.xlu1 %1490 }
 0x811   : > { %v1493_v41 = vmul.f32 %v1491_v24, %v5653_v38  ;;  %v1494_v9 = vmul.f32 %v1491_v24, %v5667_v44  ;;  %v1495_v23 = vmul.f32 %v1491_v24, %v5664_v27  ;;  %v5959_v38 = vpop.permute.xlu0 %991 }
 0x813   : > { %1501 = vrot.lane.b32.xlu1 %v1494_v9, %s5214_s6  ;;  %1499 = vrot.lane.b32.xlu0 %v1493_v41, %s5214_s6 }
 0x815   : > { %v5963_v9 = vpop.permute.xlu0 %1009 }
 0x816   : > { %8085 = vst [vmem:[#allocation56_spill] sm:$0xff] %v5963_v9 }
 0x817   : > { %1512 = vperm.xlu1 %4782, %v5544_v3   ;;  %1503 = vrot.lane.b32.xlu0 %v1495_v23, %s5214_s6 }
 0x819   : > { %v5967_v4 = vpop.permute.xlu0 %1013 }
 0x81a   : > { %8086 = vst [vmem:[#allocation57_spill] sm:$0xff] %v5967_v4  ;;  %v4485_v4 = vld [vmem:[%s5524_s8 + $0x3] ss:$4 sm:$0xf] }
 0x81b   : > { %4783 = vset.pattern.permute.xlu1 %v5216_v54 }
 0x81d   : > { %v5974_v54 = vpop.permute.xlu0 %1031 }
 0x81e   : > { %8087 = vst [vmem:[#allocation58_spill] sm:$0xff] %v5974_v54 }
 0x821   : > { %v5977_v49 = vpop.permute.xlu0 %1035 }
 0x822   : > { %8089 = vst [vmem:[#allocation59_spill] sm:$0xff] %v5977_v49 }
 0x885   : > { %v5961_v44 = vpop.permute.xlu1 %1501 }
 0x886   : > { %8084 = vst [vmem:[#allocation55_spill] sm:$0xff] %v5961_v44  ;;  %v8088_v44 = vmov 0  }
 0x892   : > { %v1513_v41 = vpop.permute.xlu1 %1512 }
 0x893   : > { %v1515_v27 = vmul.f32 %v1513_v41, %v5674_v48  ;;  %v1516_v24 = vmul.f32 %v1513_v41, %v5677_v30  ;;  %v1517_v23 = vmul.f32 %v1513_v41, %v5684_v53  ;;  %v5979_v48 = vpop.permute.xlu0 %1054 }
 0x894   : > { %8090 = vst [vmem:[#allocation60_spill] sm:$0xff] %v5979_v48 }
 0x895   : > { %1523 = vrot.lane.b32.xlu1 %v1516_v24, %s5214_s6  ;;  %1521 = vrot.lane.b32.xlu0 %v1515_v27, %s5214_s6 }
 0x897   : > { %v5981_v30 = vpop.permute.xlu0 %1058 }
 0x898   : > { %8091 = vst [vmem:[#allocation61_spill] sm:$0xff] %v5981_v30 }
 0x899   : > { %1534 = vperm.xlu1 %4783, %v5544_v3   ;;  %1525 = vrot.lane.b32.xlu0 %v1517_v23, %s5214_s6 }
 0x89b   : > { %v5983_v47 = vpop.permute.xlu0 %1076 }
 0x89c   : > { %8092 = vst [vmem:[#allocation62_spill] sm:$0xff] %v5983_v47 }
 0x89d   : > { %4784 = vset.pattern.permute.xlu1 %v8088_v44 }
 0x89f   : > { %v5985_v24 = vpop.permute.xlu0 %1080 }
 0x8a0   : > { %8093 = vst [vmem:[#allocation63_spill] sm:$0xff] %v5985_v24  ;;  %v810_v24 = vsel %vm808_vm4, %v5780_v59, %v5892_v15 }
 0x8a3   : > { %v5987_v27 = vpop.permute.xlu0 %1098 }
 0x8a4   : > { %8094 = vst [vmem:[#allocation64_spill] sm:$0xff] %v5987_v27 }
 0x8a7   : > { %v5989_v53 = vpop.permute.xlu0 %1102 }
 0x8a8   : > { %8095 = vst [vmem:[#allocation65_spill] sm:$0xff] %v5989_v53 }
 0x8ab   : > { %v5991_v3 = vpop.permute.xlu0 %1120 }
 0x8ac   : > { %8096 = vst [vmem:[#allocation66_spill] sm:$0xff] %v5991_v3 }
 0x8af   : > { %v5993_v41 = vpop.permute.xlu0 %1124 }
 0x8b0   : > { %8097 = vst [vmem:[#allocation67_spill] sm:$0xff] %v5993_v41 }
 0x8b3   : > { %v5995_v23 = vpop.permute.xlu0 %1143 }
 0x8b4   : > { %8098 = vst [vmem:[#allocation68_spill] sm:$0xff] %v5995_v23 }
 0x8b7   : > { %v5997_v44 = vpop.permute.xlu0 %1147 }
 0x8b8   : > { %8099 = vst [vmem:[#allocation69_spill] sm:$0xff] %v5997_v44 }
 0x8bb   : > { %v5999_v45 = vpop.permute.xlu0 %1165 }
 0x8bc   : > { %8100 = vst [vmem:[#allocation70_spill] sm:$0xff] %v5999_v45 }
 0x8bf   : > { %v6001_v16 = vpop.permute.xlu0 %1169 }
 0x8c0   : > { %8101 = vst [vmem:[#allocation71_spill] sm:$0xff] %v6001_v16 }
 0x8c3   : > { %v6003_v31 = vpop.permute.xlu0 %1187 }
 0x8c4   : > { %8102 = vst [vmem:[#allocation72_spill] sm:$0xff] %v6003_v31 }
 0x8c7   : > { %v6005_v46 = vpop.permute.xlu0 %1191 }
 0x8c8   : > { %8103 = vst [vmem:[#allocation73_spill] sm:$0xff] %v6005_v46  ;;  %v4483_v46 = vld [vmem:[%s5524_s8 + $0x1] ss:$4 sm:$0xf] }
 0x8cb   : > { %v6007_v39 = vpop.permute.xlu0 %1209 }
 0x8cc   : > { %8104 = vst [vmem:[#allocation74_spill] sm:$0xff] %v6007_v39 }
 0x8cf   : > { %v6009_v18 = vpop.permute.xlu0 %1213 }
 0x8d0   : > { %8105 = vst [vmem:[#allocation75_spill] sm:$0xff] %v6009_v18 }
 0x8d3   : > { %v6011_v28 = vpop.permute.xlu0 %1232 }
 0x8d4   : > { %8106 = vst [vmem:[#allocation76_spill] sm:$0xff] %v6011_v28  ;;  %v1563_v28 = vld [vmem:[%s7914_s7] sm:$0xf] }
 0x8d7   : > { %v6013_v43 = vpop.permute.xlu0 %1236 }
 0x8d8   : > { %8107 = vst [vmem:[#allocation77_spill] sm:$0xff] %v6013_v43 }
 0x8db   : > { %v6015_v41 = vpop.permute.xlu0 %1254 }
 0x8dc   : > { %8108 = vst [vmem:[#allocation78_spill] sm:$0xff] %v6015_v41 }
 0x8df   : > { %v6019_v45 = vpop.permute.xlu0 %1258 }
 0x8e0   : > { %8110 = vst [vmem:[#allocation80_spill] sm:$0xff] %v6019_v45 }
 0x8e3   : > { %v6028_v43 = vpop.permute.xlu0 %1276 }
 0x8e4   : > { %8111 = vst [vmem:[#allocation81_spill] sm:$0xff] %v6028_v43  ;;  %v1656_v43 = vld [vmem:[#allocation9] sm:$0xf] }
 0x8e7   : > { %v6032_v45 = vpop.permute.xlu0 %1280 }
 0x8e8   : > { %8112 = vst [vmem:[#allocation82_spill] sm:$0xff] %v6032_v45 }
 0x907   : > { %v6017_v23 = vpop.permute.xlu1 %1523 }
 0x908   : > { %8109 = vst [vmem:[#allocation79_spill] sm:$0xff] %v6017_v23  ;;  %v1570_v23 = vld [vmem:[#allocation12] sm:$0xf] }
 0x914   : > { %v1535_v44 = vpop.permute.xlu1 %1534 }
 0x915   : > { %v1537_v16 = vmul.f32 %v1535_v44, %v5694_v61  ;;  %v1538_v31 = vmul.f32 %v1535_v44, %v5687_v57  ;;  %v1539_v41 = vmul.f32 %v1535_v44, %v5701_v7  ;;  %v8113_v61 = vmov 1   ;;  %v6035_v57 = vpop.permute.xlu0 %1298  ;;  %v1649_v7 = vld [vmem:[%s7910_s3] sm:$0xf] }
 0x916   : > { %8114 = vst [vmem:[#allocation83_spill] sm:$0xff] %v6035_v57 }
 0x917   : > { %1545 = vrot.lane.b32.xlu1 %v1538_v31, %s5214_s6  ;;  %1543 = vrot.lane.b32.xlu0 %v1537_v16, %s5214_s6  ;;  %v8115_v31 = vmov 3   ;;  %v8116_v16 = vmov 2  }
 0x91b   : > { %1566 = vperm.xlu1 %4784, %v1563_v28   ;;  %1547 = vrot.lane.b32.xlu0 %v1539_v41, %s5214_s6  ;;  %v8117_v28 = vmov 5   ;;  %v6043_v41 = vpop.permute.xlu0 %1302  ;;  %s5233_s6 = smov 92  }
 0x91c   : > { %8118 = vst [vmem:[#allocation84_spill] sm:$0xff] %v6043_v41  ;;  %v8122_v41 = vmov 6  }
 0x91f   : > { %4785 = vset.pattern.permute.xlu1 %v8113_v61  ;;  %1573 = vperm.xlu0 %4752, %v1570_v23   ;;  %v6046_v44 = vpop.permute.xlu0 %1321 }
 0x920   : > { %1589 = vperm.xlu1 %4785, %v1570_v23   ;;  %8119 = vst [vmem:[#allocation85_spill] sm:$0xff] %v6046_v44  ;;  %v5217_v44 = vmov 38  }
 0x923   : > { %4787 = vset.pattern.permute.xlu0 %v8115_v31  ;;  %v8120_v31 = vmov 4  }
 0x924   : > { %4786 = vset.pattern.permute.xlu1 %v8116_v16  ;;  %1621 = vperm.xlu0 %4787, %v1570_v23   ;;  %v1822_v16 = vld [vmem:[%s7912_s5] sm:$0xf] }
 0x925   : > { %1605 = vperm.xlu1 %4786, %v1570_v23   ;;  %v4883_v23 = vld [vmem:[#allocation10] sm:$0xf] }
 0x928   : > { %4790 = vset.pattern.permute.xlu0 %v8117_v28  ;;  %v6053_v28 = vpop.permute.xlu0 %1325 }
 0x929   : > { %4788 = vset.pattern.permute.xlu1 %v8113_v61  ;;  %1694 = vperm.xlu0 %4790, %v1656_v43   ;;  %8121 = vst [vmem:[#allocation86_spill] sm:$0xff] %v6053_v28  ;;  %v5219_v28 = vmov 37  }
 0x92a   : > { %1652 = vperm.xlu1 %4788, %v1649_v7   ;;  %v6056_v7 = vld [vmem:[#allocation10] sm:$0xf] }
 0x92b   : > { %8123 = vst [vmem:[#allocation87_spill] sm:$0xff] %v6056_v7 }
 0x92d   : > { %4791 = vset.pattern.permute.xlu0 %v8113_v61  ;;  %v6058_v61 = vpop.permute.xlu0 %1343 }
 0x92e   : > { %4789 = vset.pattern.permute.xlu1 %v8120_v31  ;;  %715 = vperm.xlu0 %4791, %v4883_v23   ;;  %8124 = vst [vmem:[#allocation88_spill] sm:$0xff] %v6058_v61  ;;  %v8125_v23 = vmov 7   ;;  %v5220_v61 = vmov 39  }
 0x92f   : > { %1660 = vperm.xlu1 %4789, %v1656_v43  }
 0x931   : > { %v6063_v57 = vpop.permute.xlu0 %1347 }
 0x932   : > { %1825 = vperm.xlu0 %4791, %v1822_v16   ;;  %8126 = vst [vmem:[#allocation89_spill] sm:$0xff] %v6063_v57  ;;  %v5218_v16 = vmov 36  }
 0x933   : > { %4792 = vset.pattern.permute.xlu1 %v8122_v41 }
 0x934   : > { %1728 = vperm.xlu1 %4792, %v1656_v43  }
 0x935   : > { %v6066_v41 = vpop.permute.xlu0 %1365 }
 0x936   : > { %4796 = vset.pattern.permute.xlu0 %v5217_v44  ;;  %8127 = vst [vmem:[#allocation90_spill] sm:$0xff] %v6066_v41  ;;  %v5222_v41 = vmov 41  }
 0x937   : > { %1873 = vperm.xlu0 %4796, %v6056_v7  }
 0x938   : > { %4793 = vset.pattern.permute.xlu1 %v8125_v23 }
 0x939   : > { %1762 = vperm.xlu1 %4793, %v1656_v43   ;;  %v6069_v44 = vpop.permute.xlu0 %1369 }
 0x93a   : > { %8128 = vst [vmem:[#allocation91_spill] sm:$0xff] %v6069_v44 }
 0x93b   : > { %4831 = vset.pattern.permute.xlu0 %v8120_v31  ;;  %v5221_v31 = vmov 40  }
 0x93d   : > { %4794 = vset.pattern.permute.xlu1 %v5218_v16  ;;  %v6072_v43 = vpop.permute.xlu0 %1387 }
 0x93e   : > { %1833 = vperm.xlu1 %4794, %v6056_v7   ;;  %8129 = vst [vmem:[#allocation92_spill] sm:$0xff] %v6072_v43 }
 0x941   : > { %v6075_v16 = vpop.permute.xlu0 %1391 }
 0x942   : > { %4795 = vset.pattern.permute.xlu1 %v5219_v28  ;;  %8130 = vst [vmem:[#allocation93_spill] sm:$0xff] %v6075_v16 }
 0x943   : > { %1853 = vperm.xlu1 %4795, %v6056_v7  }
 0x945   : > { %v6077_v23 = vpop.permute.xlu0 %1410 }
 0x946   : > { %8131 = vst [vmem:[#allocation94_spill] sm:$0xff] %v6077_v23 }
 0x947   : > { %4797 = vset.pattern.permute.xlu1 %v5220_v61 }
 0x948   : > { %1893 = vperm.xlu1 %4797, %v6056_v7  }
 0x949   : > { %v6079_v28 = vpop.permute.xlu0 %1414 }
 0x94a   : > { %8132 = vst [vmem:[#allocation95_spill] sm:$0xff] %v6079_v28 }
 0x94c   : > { %4798 = vset.pattern.permute.xlu1 %v5221_v31 }
 0x94d   : > { %1913 = vperm.xlu1 %4798, %v6056_v7   ;;  %v6081_v57 = vpop.permute.xlu0 %1432 }
 0x94e   : > { %8133 = vst [vmem:[#allocation96_spill] sm:$0xff] %v6081_v57 }
 0x951   : > { %4799 = vset.pattern.permute.xlu1 %v5222_v41  ;;  %v6083_v44 = vpop.permute.xlu0 %1436 }
 0x952   : > { %8134 = vst [vmem:[#allocation97_spill] sm:$0xff] %v6083_v44 }
 0x955   : > { %v6085_v61 = vpop.permute.xlu0 %1454 }
 0x956   : > { %8135 = vst [vmem:[#allocation98_spill] sm:$0xff] %v6085_v61 }
 0x959   : > { %v6087_v45 = vpop.permute.xlu0 %1458 }
 0x95a   : > { %8136 = vst [vmem:[#allocation99_spill] sm:$0xff] %v6087_v45 }
 0x95d   : > { %v6089_v43 = vpop.permute.xlu0 %1476 }
 0x95e   : > { %8137 = vst [vmem:[#allocation100_spill] sm:$0xff] %v6089_v43  ;;  %v690_v43 = vld [vmem:[#allocation2] ss:$4 sm:$0x3] }
 0x961   : > { %v6091_v31 = vpop.permute.xlu0 %1480 }
 0x962   : > { %8138 = vst [vmem:[#allocation101_spill] sm:$0xff] %v6091_v31 }
 0x965   : > { %v6093_v7 = vpop.permute.xlu0 %1499 }
 0x966   : > { %8139 = vst [vmem:[#allocation102_spill] sm:$0xff] %v6093_v7  ;;  %v734_v7 = vld [vmem:[#allocation2 + $0x2] ss:$4 sm:$0x3] }
 0x969   : > { %v6095_v16 = vpop.permute.xlu0 %1503 }
 0x96a   : > { %8140 = vst [vmem:[#allocation103_spill] sm:$0xff] %v6095_v16  ;;  %v701_v16 = vrot.slane %v690_v43, %v5589_v34 }
 0x96d   : > { %v6097_v23 = vpop.permute.xlu0 %1521 }
 0x96e   : > { %8141 = vst [vmem:[#allocation104_spill] sm:$0xff] %v6097_v23  ;;  %v705_v23 = vrot.slane %v690_v43, %v5591_v35  ;;  %v713_v43 = vld [vmem:[#allocation2 + $0x1] ss:$4 sm:$0x3] }
 0x970   : > { %v709_v39 = vmul.f32 %v705_v23, %v5619_v63  ;;  %v1705_v23 = vrot.slane %v4483_v46, %v5591_v35 }
 0x971   : > { %v6099_v41 = vpop.permute.xlu0 %1525 }
 0x972   : > { %8142 = vst [vmem:[#allocation105_spill] sm:$0xff] %v6099_v41  ;;  %v755_v41 = vld [vmem:[#allocation2 + $0x3] ss:$4 sm:$0x3] }
 0x989   : > { %v6101_v28 = vpop.permute.xlu0 %1543  ;;  %v6103_v57 = vpop.permute.xlu1 %1545 }
 0x98a   : > { %8143 = vst [vmem:[#allocation106_spill] sm:$0xff] %v6101_v28  ;;  %8144 = vst [vmem:[#allocation107_spill] sm:$0xff] %v6103_v57  ;;  %v743_v28 = vrot.slane %v734_v7, %v5589_v34  ;;  %v764_v57 = vrot.slane %v755_v41, %v5589_v34 }
 0x98c   : > { %v750_v3 = vmul.f32 %v743_v28, %v5621_v33  ;;  %v722_v28 = vrot.slane %v713_v43, %v5589_v34 }
 0x98d   : > { %v6107_v61 = vpop.permute.xlu0 %1547 }
 0x98e   : > { %8146 = vst [vmem:[#allocation109_spill] sm:$0xff] %v6107_v61  ;;  %v747_v61 = vrot.slane %v734_v7, %v5591_v35  ;;  %v771_v7 = vmul.f32 %v764_v57, %v5636_v51  ;;  %v1713_v57 = vrot.slane %v4483_v46, %v5595_v37 }
 0x996   : > { %v6105_v44 = vpop.permute.xlu1 %1566 }
 0x997   : > { %8145 = vst [vmem:[#allocation108_spill] sm:$0xff] %v6105_v44  ;;  %v708_v44 = vmul.f32 %v701_v16, %v5619_v63  ;;  %v751_v16 = vmul.f32 %v747_v61, %v5621_v33  ;;  %v1701_v63 = vrot.slane %v4483_v46, %v5589_v34  ;;  %v1709_v33 = vrot.slane %v4483_v46, %v5593_v36 }
 0x998   : > { %v849_v46 = vsel %vm808_vm4, %v5784_v0, %v5905_v5 }
 0x99a   : > { %v6109_v45 = vpop.permute.xlu0 %1573 }
 0x99b   : > { %8147 = vst [vmem:[#allocation110_spill] sm:$0xff] %v6109_v45  ;;  %v6111_v31 = vpop.permute.xlu1 %1589  ;;  %v768_v45 = vrot.slane %v755_v41, %v5591_v35  ;;  %v1657_v41 = vld [vmem:[%s5524_s8] ss:$4 sm:$0xf] }
 0x99c   : > { %8148 = vst [vmem:[#allocation111_spill] sm:$0xff] %v6111_v31  ;;  %v1675_v61 = vrot.slane %v1657_v41, %v5593_v36  ;;  %v1679_v42 = vrot.slane %v1657_v41, %v5595_v37 }
 0x99d   : > { %v772_v58 = vmul.f32 %v768_v45, %v5636_v51  ;;  %v726_v51 = vrot.slane %v713_v43, %v5591_v35  ;;  %v4484_v45 = vld [vmem:[%s5524_s8 + $0x2] ss:$4 sm:$0xf]  ;;  %v887_v43 = vsel %vm808_vm4, %v5912_v13, %v5788_v60 }
 0x99e   : > { %v1735_v30 = vrot.slane %v4484_v45, %v5589_v34 }
 0x99f   : > { %v6116_v18 = vpop.permute.xlu0 %1621 }
 0x9a0   : > { %8149 = vst [vmem:[#allocation112_spill] sm:$0xff] %v6116_v18  ;;  %v6122_v31 = vpop.permute.xlu1 %1605  ;;  %v710_v18 = vadd.f32 %v708_v44, %v5598_v40  ;;  %v809_v44 = vsel %vm808_vm4, %v5776_v52, %v5780_v59  ;;  %v848_v52 = vsel %vm808_vm4, %v5899_v12, %v5784_v0  ;;  %v1739_v59 = vrot.slane %v4484_v45, %v5591_v35 }
 0x9a1   : > { %8150 = vst [vmem:[#allocation113_spill] sm:$0xff] %v6122_v31  ;;  %v711_v31 = vadd.f32 %v709_v39, %v5598_v40  ;;  %v1667_v40 = vrot.slane %v1657_v41, %v5589_v34  ;;  %v1671_v39 = vrot.slane %v1657_v41, %v5591_v35 }
 0x9a4   : > { %v1695_v53 = vpop.permute.xlu0 %1694 }
 0x9a5   : > { %v1653_v27 = vpop.permute.xlu1 %1652  ;;  %v1718_v47 = vmul.f32 %v1701_v63, %v1695_v53  ;;  %v1719_v41 = vmul.f32 %v1705_v23, %v1695_v53  ;;  %v1720_v15 = vmul.f32 %v1709_v33, %v1695_v53  ;;  %v1721_v48 = vmul.f32 %v1713_v57, %v1695_v53 }
 0x9a6   : > { %v1743_v63 = vrot.slane %v4484_v45, %v5593_v36  ;;  %v1747_v23 = vrot.slane %v4484_v45, %v5595_v37 }
 0x9a9   : > { %v716_v62 = vpop.permute.xlu0 %715 }
 0x9aa   : > { %v729_v12 = vmul.f32 %v722_v28, %v716_v62  ;;  %v730_v32 = vmul.f32 %v726_v51, %v716_v62  ;;  %v1661_v49 = vpop.permute.xlu1 %1660  ;;  %v1769_v62 = vrot.slane %v4485_v4, %v5589_v34  ;;  %v1773_v28 = vrot.slane %v4485_v4, %v5591_v35 }
 0x9ab   : > { %v1684_v54 = vmul.f32 %v1667_v40, %v1661_v49  ;;  %v1685_v5 = vmul.f32 %v1671_v39, %v1661_v49  ;;  %v1686_v0 = vmul.f32 %v1675_v61, %v1661_v49  ;;  %v1687_v21 = vmul.f32 %v1679_v42, %v1661_v49 }
 0x9ac   : > { %v731_v13 = vadd.f32 %v729_v12, %v710_v18  ;;  %v732_v9 = vadd.f32 %v730_v32, %v711_v31 }
 0x9ad   : > { %v1688_v25 = vadd.f32 %v1684_v54, %v1653_v27  ;;  %v1689_v26 = vadd.f32 %v1685_v5, %v1653_v27  ;;  %v1690_v50 = vadd.f32 %v1686_v0, %v1653_v27  ;;  %v1691_v56 = vadd.f32 %v1687_v21, %v1653_v27 }
 0x9ae   : > { %v752_v33 = vadd.f32 %v750_v3, %v731_v13  ;;  %v753_v53 = vadd.f32 %v751_v16, %v732_v9  ;;  %v1777_v21 = vrot.slane %v4485_v4, %v5593_v36  ;;  %v1781_v9 = vrot.slane %v4485_v4, %v5595_v37 }
 0x9af   : > { %v1729_v42 = vpop.permute.xlu1 %1728  ;;  %v1722_v49 = vadd.f32 %v1718_v47, %v1688_v25  ;;  %v1723_v18 = vadd.f32 %v1719_v41, %v1689_v26  ;;  %v1724_v32 = vadd.f32 %v1720_v15, %v1690_v50  ;;  %v1725_v31 = vadd.f32 %v1721_v48, %v1691_v56 }
 0x9b0   : > { %v773_v57 = vadd.f32 %v771_v7, %v752_v33  ;;  %v774_v51 = vadd.f32 %v772_v58, %v753_v53  ;;  %v1752_v45 = vmul.f32 %v1735_v30, %v1729_v42  ;;  %v1753_v54 = vmul.f32 %v1739_v59, %v1729_v42 }
 0x9b1   : > { %v1754_v40 = vmul.f32 %v1743_v63, %v1729_v42  ;;  %v1755_v39 = vmul.f32 %v1747_v23, %v1729_v42  ;;  %v888_v27 = vsel %vm808_vm4, %v5788_v60, %v5918_v8  ;;  %v926_v26 = vsel %vm808_vm4, %v5925_v14, %v5792_v17 }
 0x9b2   : > { %v813_v50 = vadd.f32 %v809_v44, %v773_v57  ;;  %v814_v56 = vadd.f32 %v810_v24, %v774_v51  ;;  %v927_v25 = vsel %vm808_vm4, %v5792_v17, %v5931_v22  ;;  %v949_v58 = vsel %vm948_vm5, %v5938_v11, %v5794_v19  ;;  %v8152_v51 = vld [vmem:[#allocation31_spill] sm:$0xff] }
 0x9b3   : > { %v1756_v47 = vadd.f32 %v1752_v45, %v1722_v49  ;;  %v1757_v4 = vadd.f32 %v1753_v54, %v1723_v18  ;;  %v1758_v8 = vadd.f32 %v1754_v40, %v1724_v32  ;;  %v1759_v60 = vadd.f32 %v1755_v39, %v1725_v31  ;;  %v8151_v18 = vld [vmem:[#allocation30_spill] sm:$0xff]  ;;  %v8153_v45 = vld [vmem:[#allocation32_spill] sm:$0xff]  ;;  %v8154_v40 = vld [vmem:[#allocation33_spill] sm:$0xff] }
 0x9b4   : > { %v852_v48 = vadd.f32 %v848_v52, %v813_v50  ;;  %v853_v30 = vadd.f32 %v849_v46, %v814_v56  ;;  %v1763_v3 = vpop.permute.xlu1 %1762  ;;  %v950_v17 = vsel %vm948_vm5, %v5794_v19, %v5944_v10  ;;  %v1799_v11 = vstv %s6166_s26  ;;  %v8156_v39 = vld [vmem:[#allocation57_spill] sm:$0xff]  ;;  %s5286_s26 = smov 108  }
 0x9b5   : > { %v1786_v16 = vmul.f32 %v1769_v62, %v1763_v3  ;;  %v1787_v14 = vmul.f32 %v1773_v28, %v1763_v3  ;;  %v1788_v7 = vmul.f32 %v1777_v21, %v1763_v3  ;;  %v1789_v24 = vmul.f32 %v1781_v9, %v1763_v3  ;;  %v8161_v3 = vld [vmem:[#allocation60_spill] sm:$0xff] }
 0x9b6   : > { %v891_v22 = vadd.f32 %v887_v43, %v852_v48  ;;  %v892_v44 = vadd.f32 %v888_v27, %v853_v30  ;;  %v971_v46 = vsel %vm948_vm5, %v5951_v29, %v5796_v20  ;;  %v972_v15 = vsel %vm948_vm5, %v5796_v20, %v5955_v2 }
 0x9b7   : > { %v1790_v61 = vadd.f32 %v1786_v16, %v1756_v47  ;;  %v1791_v41 = vadd.f32 %v1787_v14, %v1757_v4  ;;  %v1792_v59 = vadd.f32 %v1788_v7, %v1758_v8  ;;  %v1793_v52 = vadd.f32 %v1789_v24, %v1759_v60  ;;  %v8159_v4 = vld [vmem:[#allocation59_spill] sm:$0xff]  ;;  %v8162_v14 = vld [vmem:[#allocation61_spill] sm:$0xff] }
 0x9b8   : > { %v930_v12 = vadd.f32 %v926_v26, %v891_v22  ;;  %v931_v5 = vadd.f32 %v927_v25, %v892_v44  ;;  %v993_v29 = vsel %vm948_vm5, %v5957_v1, %v5798_v6  ;;  %v994_v20 = vsel %vm948_vm5, %v5798_v6, %v5959_v38  ;;  %v8155_v6 = vld [vmem:[#allocation56_spill] sm:$0xff]  ;;  %v8157_v25 = vld [vmem:[#allocation34_spill] sm:$0xff]  ;;  %v8160_v60 = vld [vmem:[#allocation35_spill] sm:$0xff] }
 0x9b9   : > { %vm1795_vm7 = vcmp.ge.f32.partialorder %v1790_v61, 0.0  ;;  %vm1796_vm8 = vcmp.ge.f32.partialorder %v1791_v41, 0.0  ;;  %vm1797_vm9 = vcmp.ge.f32.partialorder %v1792_v59, 0.0  ;;  %vm1798_vm10 = vcmp.ge.f32.partialorder %v1793_v52, 0.0  ;;  %v6192_v13 = vpop.permute.xlu1 %1833  ;;  %v8163_v22 = vld [vmem:[#allocation36_spill] sm:$0xff]  ;;  %v8164_v44 = vld [vmem:[#allocation62_spill] sm:$0xff] }
 0x9ba   : > { %v953_v19 = vadd.f32 %v949_v58, %v930_v12  ;;  %v954_v10 = vadd.f32 %v950_v17, %v931_v5  ;;  %v1800_v43 = vmul.f32 %v1799_v11, %v1790_v61  ;;  %v1801_v0 = vmul.f32 %v1799_v11, %v1791_v41  ;;  %v8158_v58 = vld [vmem:[#allocation58_spill] sm:$0xff]  ;;  %v8167_v12 = vld [vmem:[#allocation64_spill] sm:$0xff] }
 0x9bb   : > { %v1802_v2 = vmul.f32 %v1799_v11, %v1792_v59  ;;  %v1803_v63 = vmul.f32 %v1799_v11, %v1793_v52  ;;  %v1015_v38 = vsel %vm948_vm5, %v8155_v6, %v8154_v40  ;;  %v1016_v21 = vsel %vm948_vm5, %v8154_v40, %v8156_v39  ;;  %v8175_v40 = vld [vmem:[#allocation40_spill] sm:$0xff]  ;;  %v8176_v6 = vld [vmem:[#allocation70_spill] sm:$0xff]  ;;  %v8177_v39 = vld [vmem:[#allocation71_spill] sm:$0xff] }
 0x9bc   : > { %v975_v23 = vadd.f32 %v971_v46, %v953_v19  ;;  %v976_v33 = vadd.f32 %v972_v15, %v954_v10  ;;  %v1804_v53 = vsel %vm1795_vm7, %v1790_v61, %v1800_v43  ;;  %v1805_v62 = vsel %vm1796_vm8, %v1791_v41, %v1801_v0  ;;  %v8165_v61 = vld [vmem:[#allocation63_spill] sm:$0xff]  ;;  %v8166_v15 = vld [vmem:[#allocation37_spill] sm:$0xff] }
 0x9bd   : > { %v1806_v28 = vsel %vm1797_vm9, %v1792_v59, %v1802_v2  ;;  %v1807_v42 = vsel %vm1798_vm10, %v1793_v52, %v1803_v63  ;;  %v1808_v49 = vmul.f32 %v1804_v53, %v5625_v55  ;;  %v1809_v32 = vmul.f32 %v1805_v62, %v8151_v18  ;;  %v8168_v19 = vld [vmem:[#allocation65_spill] sm:$0xff]  ;;  %v8171_v63 = vld [vmem:[#allocation67_spill] sm:$0xff] }
 0x9be   : > { %v997_v31 = vadd.f32 %v993_v29, %v975_v23  ;;  %v998_v57 = vadd.f32 %v994_v20, %v976_v33  ;;  %v1810_v1 = vmul.f32 %v1806_v28, %v8152_v51  ;;  %v1811_v54 = vmul.f32 %v1807_v42, %v8153_v45  ;;  %v6210_v56 = vpop.permute.xlu1 %1853  ;;  %v8169_v29 = vld [vmem:[#allocation38_spill] sm:$0xff]  ;;  %v8172_v28 = vld [vmem:[#allocation39_spill] sm:$0xff]  ;;  %v8173_v42 = vld [vmem:[#allocation68_spill] sm:$0xff] }
 0x9bf   : > { %v1816_v9 = vcombine.low %v1808_v49, %v1809_v32  ;;  %v1038_v47 = vsel %vm1037_vm6, %v8158_v58, %v8157_v25  ;;  %v1039_v48 = vsel %vm1037_vm6, %v8157_v25, %v8159_v4  ;;  %v1060_v16 = vsel %vm1037_vm6, %v8161_v3, %v8160_v60  ;;  %v8170_v20 = vld [vmem:[#allocation66_spill] sm:$0xff]  ;;  %v8174_v32 = vld [vmem:[#allocation69_spill] sm:$0xff] }
 0x9c0   : > { %v1019_v27 = vadd.f32 %v1015_v38, %v997_v31  ;;  %v1020_v26 = vadd.f32 %v1016_v21, %v998_v57  ;;  %v1817_v50 = vcombine.low %v1810_v1, %v1811_v54  ;;  %v1061_v7 = vsel %vm1037_vm6, %v8160_v60, %v8162_v14  ;;  %v8180_v4 = vld [vmem:[#allocation73_spill] sm:$0xff]  ;;  %v8181_v14 = vld [vmem:[#allocation42_spill] sm:$0xff] }
 0x9c1   : > { %1820 = vst [vmem:[#allocation2] sm:$0xff] %v1816_v9  ;;  %v1082_v11 = vsel %vm1037_vm6, %v8164_v44, %v8163_v22  ;;  %v1083_v41 = vsel %vm1037_vm6, %v8163_v22, %v8165_v61  ;;  %v1104_v5 = vsel %vm1037_vm6, %v8167_v12, %v8166_v15  ;;  %v1105_v10 = vsel %vm1037_vm6, %v8166_v15, %v8168_v19  ;;  %v8184_v61 = vld [vmem:[#allocation43_spill] sm:$0xff] }
 0x9c2   : > { %v1042_v30 = vadd.f32 %v1038_v47, %v1019_v27  ;;  %v1043_v8 = vadd.f32 %v1039_v48, %v1020_v26  ;;  %1821 = vst [vmem:[#allocation2 + $0x8] sm:$0xff] %v1817_v50  ;;  %v1127_v2 = vsel %vm1126_vm11, %v8170_v20, %v8169_v29  ;;  %v1128_v23 = vsel %vm1126_vm11, %v8169_v29, %v8171_v63  ;;  %v8178_v26 = vld [vmem:[#allocation41_spill] sm:$0xff]  ;;  %v8179_v50 = vld [vmem:[#allocation72_spill] sm:$0xff] }
 0x9c3   : > { %v6230_v46 = vpop.permute.xlu1 %1893  ;;  %v1149_v49 = vsel %vm1126_vm11, %v8173_v42, %v8172_v28  ;;  %v1150_v31 = vsel %vm1126_vm11, %v8172_v28, %v8174_v32  ;;  %v1171_v38 = vsel %vm1126_vm11, %v8176_v6, %v8175_v40  ;;  %v1172_v21 = vsel %vm1126_vm11, %v8175_v40, %v8177_v39  ;;  %v8189_v29 = vld [vmem:[#allocation80_spill] sm:$0xff]  ;;  %v8193_v28 = vld [vmem:[#allocation82_spill] sm:$0xff] }
 0x9c4   : > { %v1064_v24 = vadd.f32 %v1060_v16, %v1042_v30  ;;  %v1065_v17 = vadd.f32 %v1061_v7, %v1043_v8  ;;  %v1193_v25 = vsel %vm1126_vm11, %v8179_v50, %v8178_v26  ;;  %v1194_v48 = vsel %vm1126_vm11, %v8178_v26, %v8180_v4  ;;  %v8182_v7 = vld [vmem:[#allocation74_spill] sm:$0xff]  ;;  %v8198_v26 = vld [vmem:[#allocation85_spill] sm:$0xff] }
 0x9c5   : > { %v5224_v6 = vmov 42   ;;  %vm1944_vm4 = vcmask 1031168   ;;  %vm2084_vm5 = vcmask 1014784   ;;  %vm2173_vm6 = vcmask 752640  }
 0x9c6   : > { %v1086_v59 = vadd.f32 %v1082_v11, %v1064_v24  ;;  %v1087_v52 = vadd.f32 %v1083_v41, %v1065_v17  ;;  %v1216_v24 = vsel %vm1215_vm12, %v8182_v7, %v8181_v14  ;;  %v8183_v17 = vld [vmem:[#allocation75_spill] sm:$0xff]  ;;  %v8185_v41 = vld [vmem:[#allocation76_spill] sm:$0xff]  ;;  %vm2262_vm7 = vcmask 736256  }
 0x9c7   : > { %v1217_v22 = vsel %vm1215_vm12, %v8181_v14, %v8183_v17  ;;  %v8204_v17 = vld [vmem:[#allocation90_spill] sm:$0xff]  ;;  %vm2351_vm8 = vcmask 719872   ;;  %vm2440_vm9 = vcmask 457728   ;;  %vm2529_vm10 = vcmask 441344  }
 0x9c8   : > { %v1108_v43 = vadd.f32 %v1104_v5, %v1086_v59  ;;  %v1109_v0 = vadd.f32 %v1105_v10, %v1087_v52  ;;  %v1914_v54 = vpop.permute.xlu1 %1913  ;;  %v1238_v59 = vsel %vm1215_vm12, %v8185_v41, %v8184_v61  ;;  %v8186_v52 = vld [vmem:[#allocation77_spill] sm:$0xff]  ;;  %v8187_v10 = vld [vmem:[#allocation44_spill] sm:$0xff]  ;;  %vm2618_vm11 = vcmask 424960  }
 0x9c9   : > { %v1911_v62 = vld [vmem:[#allocation2] ss:$4 sm:$0x7]  ;;  %v1239_v15 = vsel %vm1215_vm12, %v8184_v61, %v8186_v52  ;;  %v1261_v20 = vsel %vm1215_vm12, %v8187_v10, %v8189_v29  ;;  %v8207_v52 = vld [vmem:[#allocation92_spill] sm:$0xff] }
 0x9ca   : > { %v1131_v33 = vadd.f32 %v1127_v2, %v1108_v43  ;;  %v1132_v53 = vadd.f32 %v1128_v23, %v1109_v0  ;;  %v6257_v9 = vrot.slane %v1911_v62, %v5589_v34  ;;  %v6260_v27 = vrot.slane %v1911_v62, %v5591_v35  ;;  %v8188_v43 = vld [vmem:[#allocation78_spill] sm:$0xff]  ;;  %v8190_v2 = vld [vmem:[#allocation87_spill] sm:$0xff] }
 0x9cb   : > { %v6269_v30 = vrot.slane %v1911_v62, %v5593_v36  ;;  %v1260_v0 = vsel %vm1215_vm12, %v8188_v43, %v8187_v10  ;;  %v8209_v43 = vld [vmem:[#allocation51_spill] sm:$0xff] }
 0x9cc   : > { %v1153_v57 = vadd.f32 %v1149_v49, %v1131_v33  ;;  %v1154_v1 = vadd.f32 %v1150_v31, %v1132_v53  ;;  %v1932_v8 = vmul.f32 %v6257_v9, %v1914_v54  ;;  %v1933_v60 = vmul.f32 %v6260_v27, %v1914_v54  ;;  %v8191_v33 = vld [vmem:[#allocation45_spill] sm:$0xff]  ;;  %v8194_v31 = vld [vmem:[#allocation46_spill] sm:$0xff] }
 0x9cd   : > { %v1934_v12 = vmul.f32 %v6269_v30, %v1914_v54  ;;  %v8192_v53 = vld [vmem:[#allocation81_spill] sm:$0xff]  ;;  %v1283_v42 = vsel %vm1215_vm12, %v8191_v33, %v8193_v28  ;;  %v8196_v54 = vld [vmem:[#allocation84_spill] sm:$0xff] }
 0x9ce   : > { %v1175_v58 = vadd.f32 %v1171_v38, %v1153_v57  ;;  %v1176_v47 = vadd.f32 %v1172_v21, %v1154_v1  ;;  %1940 = vrot.lane.b32.xlu1 %v1933_v60, %s5223_s29  ;;  %1938 = vrot.lane.b32.xlu0 %v1932_v8, %s5223_s29  ;;  %v1282_v62 = vsel %vm1215_vm12, %v8192_v53, %v8191_v33  ;;  %v8195_v57 = vld [vmem:[#allocation83_spill] sm:$0xff]  ;;  %v8201_v8 = vld [vmem:[#allocation88_spill] sm:$0xff] }
 0x9cf   : > { %v1305_v1 = vsel %vm1304_vm13, %v8195_v57, %v8194_v31  ;;  %v1306_v40 = vsel %vm1304_vm13, %v8194_v31, %v8196_v54  ;;  %v8197_v21 = vld [vmem:[#allocation47_spill] sm:$0xff]  ;;  %v8212_v53 = vld [vmem:[#allocation52_spill] sm:$0xff]  ;;  %v8215_v57 = vld [vmem:[#allocation53_spill] sm:$0xff] }
 0x9d0   : > { %v1197_v3 = vadd.f32 %v1193_v25, %v1175_v58  ;;  %v1198_v16 = vadd.f32 %v1194_v48, %v1176_v47  ;;  %v1327_v50 = vsel %vm1304_vm13, %v8198_v26, %v8197_v21  ;;  %v8199_v25 = vld [vmem:[#allocation86_spill] sm:$0xff]  ;;  %v8200_v48 = vld [vmem:[#allocation48_spill] sm:$0xff] }
 0x9d1   : > { %v1328_v58 = vsel %vm1304_vm13, %v8197_v21, %v8199_v25  ;;  %v1349_v60 = vsel %vm1304_vm13, %v8201_v8, %v8200_v48  ;;  %v8218_v21 = vld [vmem:[#allocation54_spill] sm:$0xff]  ;;  %v8219_v26 = vld [vmem:[#allocation100_spill] sm:$0xff]  ;;  %v8220_v25 = vld [vmem:[#allocation101_spill] sm:$0xff] }
 0x9d2   : > { %v1220_v44 = vadd.f32 %v1216_v24, %v1197_v3  ;;  %v1221_v11 = vadd.f32 %v1217_v22, %v1198_v16  ;;  %1953 = vperm.xlu1 %4799, %v8190_v2   ;;  %1942 = vrot.lane.b32.xlu0 %v1934_v12, %s5223_s29  ;;  %v8202_v3 = vld [vmem:[#allocation89_spill] sm:$0xff]  ;;  %v8222_v8 = vld [vmem:[#allocation102_spill] sm:$0xff] }
 0x9d3   : > { %v1350_v16 = vsel %vm1304_vm13, %v8200_v48, %v8202_v3  ;;  %v8203_v24 = vld [vmem:[#allocation49_spill] sm:$0xff]  ;;  %v8221_v48 = vld [vmem:[#allocation55_spill] sm:$0xff] }
 0x9d4   : > { %v1242_v5 = vadd.f32 %v1238_v59, %v1220_v44  ;;  %v1243_v19 = vadd.f32 %v1239_v15, %v1221_v11  ;;  %v1371_v22 = vsel %vm1304_vm13, %v8204_v17, %v8203_v24  ;;  %v8205_v44 = vld [vmem:[#allocation91_spill] sm:$0xff]  ;;  %v8206_v59 = vld [vmem:[#allocation50_spill] sm:$0xff]  ;;  %v8208_v12 = vld [vmem:[#allocation93_spill] sm:$0xff] }
 0x9d5   : > { %v1372_v11 = vsel %vm1304_vm13, %v8203_v24, %v8205_v44  ;;  %v1394_v15 = vsel %vm1393_vm14, %v8207_v52, %v8206_v59  ;;  %v8223_v3 = vld [vmem:[#allocation103_spill] sm:$0xff]  ;;  %v8225_v17 = vld [vmem:[#allocation104_spill] sm:$0xff]  ;;  %v8226_v44 = vld [vmem:[#allocation105_spill] sm:$0xff] }
 0x9d6   : > { %v1264_v63 = vadd.f32 %v1260_v0, %v1242_v5  ;;  %v1265_v23 = vadd.f32 %v1261_v20, %v1243_v19  ;;  %4800 = vset.pattern.permute.xlu1 %v5224_v6  ;;  %v1395_v5 = vsel %vm1393_vm14, %v8206_v59, %v8208_v12  ;;  %v8210_v0 = vld [vmem:[#allocation94_spill] sm:$0xff]  ;;  %v8211_v20 = vld [vmem:[#allocation95_spill] sm:$0xff]  ;;  %v8229_v12 = vld [vmem:[#allocation109_spill] sm:$0xff] }
 0x9d7   : > { %v1416_v29 = vsel %vm1393_vm14, %v8210_v0, %v8209_v43  ;;  %v8224_v24 = vld [vmem:[#allocation79_spill] sm:$0xff]  ;;  %v8228_v52 = vld [vmem:[#allocation106_spill] sm:$0xff] }
 0x9d8   : > { %v1286_v49 = vadd.f32 %v1282_v62, %v1264_v63  ;;  %v1287_v32 = vadd.f32 %v1283_v42, %v1265_v23  ;;  %v1417_v63 = vsel %vm1393_vm14, %v8209_v43, %v8211_v20  ;;  %v8213_v62 = vld [vmem:[#allocation96_spill] sm:$0xff]  ;;  %v8214_v42 = vld [vmem:[#allocation97_spill] sm:$0xff]  ;;  %v8227_v59 = vld [vmem:[#allocation107_spill] sm:$0xff] }
 0x9d9   : > { %v1438_v28 = vsel %vm1393_vm14, %v8213_v62, %v8212_v53 }
 0x9da   : > { %v1309_v38 = vadd.f32 %v1305_v1, %v1286_v49  ;;  %v1310_v39 = vadd.f32 %v1306_v40, %v1287_v32  ;;  %v1439_v49 = vsel %vm1393_vm14, %v8212_v53, %v8214_v42  ;;  %v8216_v1 = vld [vmem:[#allocation98_spill] sm:$0xff]  ;;  %v8217_v40 = vld [vmem:[#allocation99_spill] sm:$0xff] }
 0x9db   : > { %v1460_v54 = vsel %vm1393_vm14, %v8216_v1, %v8215_v57  ;;  %v1461_v6 = vsel %vm1393_vm14, %v8215_v57, %v8217_v40 }
 0x9dc   : > { %v1331_v47 = vadd.f32 %v1327_v50, %v1309_v38  ;;  %v1332_v4 = vadd.f32 %v1328_v58, %v1310_v39  ;;  %v1483_v50 = vsel %vm1482_vm15, %v8219_v26, %v8218_v21  ;;  %v1484_v58 = vsel %vm1482_vm15, %v8218_v21, %v8220_v25  ;;  %v8233_v25 = vld [vmem:[#allocation113_spill] sm:$0xff] }
 0x9de   : > { %v1353_v14 = vadd.f32 %v1349_v60, %v1331_v47  ;;  %v1354_v7 = vadd.f32 %v1350_v16, %v1332_v4  ;;  %v1505_v60 = vsel %vm1482_vm15, %v8222_v8, %v8221_v48  ;;  %v1506_v16 = vsel %vm1482_vm15, %v8221_v48, %v8223_v3  ;;  %v8234_v8 = vld [vmem:[#allocation112_spill] sm:$0xff] }
 0x9e0   : > { %v1375_v61 = vadd.f32 %v1371_v22, %v1353_v14  ;;  %v1376_v41 = vadd.f32 %v1372_v11, %v1354_v7  ;;  %v1527_v22 = vsel %vm1482_vm15, %v8225_v17, %v8224_v24  ;;  %v1528_v11 = vsel %vm1482_vm15, %v8224_v24, %v8226_v44 }
 0x9e2   : > { %v1398_v19 = vadd.f32 %v1394_v15, %v1375_v61  ;;  %v1399_v10 = vadd.f32 %v1395_v5, %v1376_v41  ;;  %v1549_v15 = vsel %vm1482_vm15, %v8228_v52, %v8227_v59  ;;  %v1550_v5 = vsel %vm1482_vm15, %v8227_v59, %v8229_v12 }
 0x9e4   : > { %v1420_v23 = vadd.f32 %v1416_v29, %v1398_v19  ;;  %v1421_v33 = vadd.f32 %v1417_v63, %v1399_v10  ;;  %v1558_v19 = vstv %s4481_s14  ;;  %s5301_s14 = smov 91  }
 0x9e6   : > { %v1442_v32 = vadd.f32 %v1438_v28, %v1420_v23  ;;  %v1443_v31 = vadd.f32 %v1439_v49, %v1421_v33  ;;  %v8230_v28 = vld [vmem:[#allocation110_spill] sm:$0xff] }
 0x9e8   : > { %v1464_v38 = vadd.f32 %v1460_v54, %v1442_v32  ;;  %v1465_v39 = vadd.f32 %v1461_v6, %v1443_v31  ;;  %v8231_v54 = vld [vmem:[#allocation108_spill] sm:$0xff] }
 0x9ea   : > { %v1487_v47 = vadd.f32 %v1483_v50, %v1464_v38  ;;  %v1488_v4 = vadd.f32 %v1484_v58, %v1465_v39  ;;  %v8232_v38 = vld [vmem:[#allocation111_spill] sm:$0xff] }
 0x9ec   : > { %v1509_v14 = vadd.f32 %v1505_v60, %v1487_v47  ;;  %v1510_v7 = vadd.f32 %v1506_v16, %v1488_v4  ;;  %v1639_v16 = vstv %s4482_s22 }
 0x9ee   : > { %v1531_v61 = vadd.f32 %v1527_v22, %v1509_v14  ;;  %v1532_v41 = vadd.f32 %v1528_v11, %v1510_v7 }
 0x9f0   : > { %v1553_v10 = vadd.f32 %v1549_v15, %v1531_v61  ;;  %v1554_v43 = vadd.f32 %v1550_v5, %v1532_v41  ;;  %v1951_v41 = vld [vmem:[#allocation2 + $0x1] ss:$4 sm:$0x7] }
 0x9f1   : > { %v6401_v59 = vrot.slane %v1951_v41, %v5589_v34  ;;  %v6404_v52 = vrot.slane %v1951_v41, %v5591_v35 }
 0x9f2   : > { %vm1556_vm0 = vcmp.ge.f32.partialorder %v1553_v10, 0.0  ;;  %vm1557_vm1 = vcmp.ge.f32.partialorder %v1554_v43, 0.0  ;;  %v1559_v0 = vmul.f32 %v1558_v19, %v1553_v10  ;;  %v1560_v29 = vmul.f32 %v1558_v19, %v1554_v43 }
 0x9f3   : > { %v6409_v19 = vrot.slane %v1951_v41, %v5593_v36 }
 0x9f4   : > { %v1561_v20 = vsel %vm1556_vm0, %v1553_v10, %v1559_v0  ;;  %v1562_v63 = vsel %vm1557_vm1, %v1554_v43, %v1560_v29  ;;  %v5225_v43 = vmov 43   ;;  %v1990_v29 = vld [vmem:[#allocation2 + $0x2] ss:$4 sm:$0x7] }
 0x9f5   : > { %v1579_v23 = vrot.slane %v1561_v20, %v5589_v34  ;;  %v1583_v33 = vrot.slane %v1562_v63, %v5589_v34  ;;  %v1595_v53 = vrot.slane %v1561_v20, %v5591_v35  ;;  %v1599_v62 = vrot.slane %v1562_v63, %v5591_v35 }
 0x9f6   : > { %v1611_v32 = vrot.slane %v1561_v20, %v5593_v36  ;;  %v1615_v31 = vrot.slane %v1562_v63, %v5593_v36  ;;  %v1627_v57 = vrot.slane %v1561_v20, %v5595_v37  ;;  %v1631_v1 = vrot.slane %v1562_v63, %v5595_v37 }
 0x9f7   : > { %v1584_v42 = vmul.f32 %v1579_v23, %v8230_v28  ;;  %v1585_v49 = vmul.f32 %v1583_v33, %v8230_v28  ;;  %v1600_v39 = vmul.f32 %v1595_v53, %v8232_v38  ;;  %v1601_v21 = vmul.f32 %v1599_v62, %v8232_v38 }
 0x9f8   : > { %v1616_v58 = vmul.f32 %v1611_v32, %v8233_v25  ;;  %v1617_v47 = vmul.f32 %v1615_v31, %v8233_v25  ;;  %v1632_v60 = vmul.f32 %v1627_v57, %v8234_v8  ;;  %v1633_v3 = vmul.f32 %v1631_v1, %v8234_v8  ;;  %v2029_v32 = vld [vmem:[#allocation2 + $0x3] ss:$4 sm:$0x7] }
 0x9f9   : > { %v1586_v40 = vadd.f32 %v1584_v42, %v8231_v54  ;;  %v1587_v6 = vadd.f32 %v1585_v49, %v8231_v54  ;;  %v6419_v20 = vrot.slane %v1990_v29, %v5589_v34  ;;  %v6422_v63 = vrot.slane %v1990_v29, %v5591_v35 }
 0x9fa   : > { %v6427_v62 = vrot.slane %v1990_v29, %v5593_v36  ;;  %v5226_v42 = vmov 44   ;;  %v6437_v31 = vrot.slane %v2029_v32, %v5589_v34  ;;  %v6440_v57 = vrot.slane %v2029_v32, %v5591_v35 }
 0x9fb   : > { %v1602_v26 = vadd.f32 %v1600_v39, %v1586_v40  ;;  %v1603_v50 = vadd.f32 %v1601_v21, %v1587_v6  ;;  %v6445_v6 = vrot.slane %v2029_v32, %v5593_v36  ;;  %v5227_v39 = vmov 45  }
 0x9fd   : > { %v1618_v4 = vadd.f32 %v1616_v58, %v1602_v26  ;;  %v1619_v48 = vadd.f32 %v1617_v47, %v1603_v50  ;;  %v5229_v47 = vmov 46  }
 0x9ff   : > { %v1634_v14 = vadd.f32 %v1632_v60, %v1618_v4  ;;  %v1635_v7 = vadd.f32 %v1633_v3, %v1619_v48 }
 0xa01   : > { %vm1637_vm2 = vcmp.ge.f32.partialorder %v1634_v14, 0.0  ;;  %vm1638_vm3 = vcmp.ge.f32.partialorder %v1635_v7, 0.0  ;;  %v1640_v24 = vmul.f32 %v1639_v16, %v1634_v14  ;;  %v1641_v17 = vmul.f32 %v1639_v16, %v1635_v7 }
 0xa02   : > { %v5230_v16 = vmov 47  }
 0xa03   : > { %v1642_v22 = vsel %vm1637_vm2, %v1634_v14, %v1640_v24  ;;  %v1643_v44 = vsel %vm1638_vm3, %v1635_v7, %v1641_v17 }
 0xa04   : > { %v1646_v11 = vcombine.low %v1642_v22, %v1643_v44  ;;  %v5231_v44 = vmov 48  }
 0xa06   : > { %1648 = vst [vmem:[%s6395_s21] sm:$0xff] %v1646_v11 }
 0xa40   : > { %v6398_v61 = vpop.permute.xlu1 %1940 }
 0xa4d   : > { %v1954_v15 = vpop.permute.xlu1 %1953 }
 0xa4e   : > { %v1972_v12 = vmul.f32 %v6401_v59, %v1954_v15  ;;  %v1973_v5 = vmul.f32 %v6404_v52, %v1954_v15  ;;  %v1974_v10 = vmul.f32 %v6409_v19, %v1954_v15 }
 0xa50   : > { %1980 = vrot.lane.b32.xlu1 %v1973_v5, %s5223_s29  ;;  %1978 = vrot.lane.b32.xlu0 %v1972_v12, %s5223_s29 }
 0xa54   : > { %1992 = vperm.xlu1 %4800, %v8190_v2   ;;  %1982 = vrot.lane.b32.xlu0 %v1974_v10, %s5223_s29  ;;  %v5232_v10 = vmov 49  }
 0xa58   : > { %4801 = vset.pattern.permute.xlu1 %v5225_v43 }
 0xac2   : > { %v6416_v0 = vpop.permute.xlu1 %1980 }
 0xacf   : > { %v1993_v23 = vpop.permute.xlu1 %1992 }
 0xad0   : > { %v2011_v33 = vmul.f32 %v6419_v20, %v1993_v23  ;;  %v2012_v53 = vmul.f32 %v6422_v63, %v1993_v23  ;;  %v2013_v28 = vmul.f32 %v6427_v62, %v1993_v23 }
 0xad2   : > { %2019 = vrot.lane.b32.xlu1 %v2012_v53, %s5223_s29  ;;  %2017 = vrot.lane.b32.xlu0 %v2011_v33, %s5223_s29 }
 0xad6   : > { %2031 = vperm.xlu1 %4801, %v8190_v2   ;;  %2021 = vrot.lane.b32.xlu0 %v2013_v28, %s5223_s29  ;;  %v5234_v28 = vmov 50  }
 0xada   : > { %4802 = vset.pattern.permute.xlu1 %v5226_v42 }
 0xb44   : > { %v6434_v49 = vpop.permute.xlu1 %2019 }
 0xb51   : > { %v2032_v1 = vpop.permute.xlu1 %2031 }
 0xb52   : > { %v2050_v54 = vmul.f32 %v6437_v31, %v2032_v1  ;;  %v2051_v40 = vmul.f32 %v6440_v57, %v2032_v1  ;;  %v2052_v38 = vmul.f32 %v6445_v6, %v2032_v1 }
 0xb54   : > { %2058 = vrot.lane.b32.xlu1 %v2051_v40, %s5223_s29  ;;  %2056 = vrot.lane.b32.xlu0 %v2050_v54, %s5223_s29 }
 0xb58   : > { %2069 = vperm.xlu1 %4802, %v8190_v2   ;;  %2060 = vrot.lane.b32.xlu0 %v2052_v38, %s5223_s29  ;;  %v5235_v38 = vmov 51  }
 0xb5c   : > { %4803 = vset.pattern.permute.xlu1 %v5227_v39 }
 0xbc6   : > { %v6452_v21 = vpop.permute.xlu1 %2058 }
 0xbd3   : > { %v2070_v26 = vpop.permute.xlu1 %2069 }
 0xbd4   : > { %v2072_v50 = vmul.f32 %v2070_v26, %v6257_v9  ;;  %v2073_v25 = vmul.f32 %v2070_v26, %v6260_v27  ;;  %v2074_v58 = vmul.f32 %v2070_v26, %v6269_v30 }
 0xbd6   : > { %2080 = vrot.lane.b32.xlu1 %v2073_v25, %s5228_s27  ;;  %2078 = vrot.lane.b32.xlu0 %v2072_v50, %s5228_s27 }
 0xbda   : > { %2092 = vperm.xlu1 %4803, %v8190_v2   ;;  %2082 = vrot.lane.b32.xlu0 %v2074_v58, %s5228_s27 }
 0xbde   : > { %4804 = vset.pattern.permute.xlu1 %v5229_v47  ;;  %v5236_v47 = vmov 52  }
 0xc48   : > { %v6461_v4 = vpop.permute.xlu1 %2080 }
 0xc55   : > { %v2093_v48 = vpop.permute.xlu1 %2092 }
 0xc56   : > { %v2095_v8 = vmul.f32 %v2093_v48, %v6401_v59  ;;  %v2096_v60 = vmul.f32 %v2093_v48, %v6404_v52  ;;  %v2097_v3 = vmul.f32 %v2093_v48, %v6409_v19 }
 0xc58   : > { %2103 = vrot.lane.b32.xlu1 %v2096_v60, %s5228_s27  ;;  %2101 = vrot.lane.b32.xlu0 %v2095_v8, %s5228_s27 }
 0xc5c   : > { %2114 = vperm.xlu1 %4804, %v8190_v2   ;;  %2105 = vrot.lane.b32.xlu0 %v2097_v3, %s5228_s27 }
 0xc60   : > { %4805 = vset.pattern.permute.xlu1 %v5230_v16 }
 0xcca   : > { %v6470_v14 = vpop.permute.xlu1 %2103 }
 0xcd7   : > { %v2115_v7 = vpop.permute.xlu1 %2114 }
 0xcd8   : > { %v2117_v24 = vmul.f32 %v2115_v7, %v6419_v20  ;;  %v2118_v17 = vmul.f32 %v2115_v7, %v6422_v63  ;;  %v2119_v22 = vmul.f32 %v2115_v7, %v6427_v62  ;;  %v5237_v7 = vmov 53  }
 0xcda   : > { %2125 = vrot.lane.b32.xlu1 %v2118_v17, %s5228_s27  ;;  %2123 = vrot.lane.b32.xlu0 %v2117_v24, %s5228_s27 }
 0xcde   : > { %2136 = vperm.xlu1 %4805, %v8190_v2   ;;  %2127 = vrot.lane.b32.xlu0 %v2119_v22, %s5228_s27 }
 0xce2   : > { %4806 = vset.pattern.permute.xlu1 %v5231_v44 }
 0xd4c   : > { %v6479_v11 = vpop.permute.xlu1 %2125 }
 0xd59   : > { %v2137_v41 = vpop.permute.xlu1 %2136 }
 0xd5a   : > { %v2139_v15 = vmul.f32 %v2137_v41, %v6437_v31  ;;  %v2140_v12 = vmul.f32 %v2137_v41, %v6440_v57  ;;  %v2141_v5 = vmul.f32 %v2137_v41, %v6445_v6 }
 0xd5c   : > { %2147 = vrot.lane.b32.xlu1 %v2140_v12, %s5228_s27  ;;  %2145 = vrot.lane.b32.xlu0 %v2139_v15, %s5228_s27  ;;  %v5239_v15 = vmov 54  }
 0xd60   : > { %2158 = vperm.xlu1 %4806, %v8190_v2   ;;  %2149 = vrot.lane.b32.xlu0 %v2141_v5, %s5228_s27  ;;  %s4505_s27 = sshll.u32 %s5386_s23, 7 }
 0xd64   : > { %4807 = vset.pattern.permute.xlu1 %v5232_v10 }
 0xdce   : > { %v6488_v43 = vpop.permute.xlu1 %2147 }
 0xddb   : > { %v2159_v29 = vpop.permute.xlu1 %2158 }
 0xddc   : > { %v2161_v23 = vmul.f32 %v2159_v29, %v6257_v9  ;;  %v2162_v33 = vmul.f32 %v2159_v29, %v6260_v27  ;;  %v2163_v53 = vmul.f32 %v2159_v29, %v6269_v30 }
 0xdde   : > { %2169 = vrot.lane.b32.xlu1 %v2162_v33, %s5233_s6  ;;  %2167 = vrot.lane.b32.xlu0 %v2161_v23, %s5233_s6  ;;  %v5240_v33 = vmov 55  }
 0xde2   : > { %2181 = vperm.xlu1 %4807, %v8190_v2   ;;  %2171 = vrot.lane.b32.xlu0 %v2163_v53, %s5233_s6 }
 0xde6   : > { %4808 = vset.pattern.permute.xlu1 %v5234_v28 }
 0xe50   : > { %v6497_v42 = vpop.permute.xlu1 %2169 }
 0xe5d   : > { %v2182_v32 = vpop.permute.xlu1 %2181 }
 0xe5e   : > { %v2184_v1 = vmul.f32 %v2182_v32, %v6401_v59  ;;  %v2185_v54 = vmul.f32 %v2182_v32, %v6404_v52  ;;  %v2186_v40 = vmul.f32 %v2182_v32, %v6409_v19 }
 0xe60   : > { %2192 = vrot.lane.b32.xlu1 %v2185_v54, %s5233_s6  ;;  %2190 = vrot.lane.b32.xlu0 %v2184_v1, %s5233_s6 }
 0xe64   : > { %2203 = vperm.xlu1 %4808, %v8190_v2   ;;  %2194 = vrot.lane.b32.xlu0 %v2186_v40, %s5233_s6  ;;  %v6549_v40 = vld [vmem:[#allocation10] sm:$0xf] }
 0xe68   : > { %4809 = vset.pattern.permute.xlu1 %v5235_v38 }
 0xed2   : > { %v6506_v39 = vpop.permute.xlu1 %2192 }
 0xedf   : > { %v2204_v26 = vpop.permute.xlu1 %2203 }
 0xee0   : > { %v2206_v50 = vmul.f32 %v2204_v26, %v6419_v20  ;;  %v2207_v25 = vmul.f32 %v2204_v26, %v6422_v63  ;;  %v2208_v58 = vmul.f32 %v2204_v26, %v6427_v62 }
 0xee2   : > { %2214 = vrot.lane.b32.xlu1 %v2207_v25, %s5233_s6  ;;  %2212 = vrot.lane.b32.xlu0 %v2206_v50, %s5233_s6 }
 0xee6   : > { %2225 = vperm.xlu1 %4809, %v8190_v2   ;;  %2216 = vrot.lane.b32.xlu0 %v2208_v58, %s5233_s6 }
 0xeea   : > { %4810 = vset.pattern.permute.xlu1 %v5236_v47  ;;  %v5242_v47 = vmov 57  }
 0xf54   : > { %v6515_v48 = vpop.permute.xlu1 %2214 }
 0xf61   : > { %v2226_v8 = vpop.permute.xlu1 %2225 }
 0xf62   : > { %v2228_v60 = vmul.f32 %v2226_v8, %v6437_v31  ;;  %v2229_v3 = vmul.f32 %v2226_v8, %v6440_v57  ;;  %v2230_v16 = vmul.f32 %v2226_v8, %v6445_v6 }
 0xf64   : > { %2236 = vrot.lane.b32.xlu1 %v2229_v3, %s5233_s6  ;;  %2234 = vrot.lane.b32.xlu0 %v2228_v60, %s5233_s6 }
 0xf68   : > { %2247 = vperm.xlu1 %4810, %v8190_v2   ;;  %2238 = vrot.lane.b32.xlu0 %v2230_v16, %s5233_s6 }
 0xf6c   : > { %4811 = vset.pattern.permute.xlu1 %v5237_v7 }
 0xfd6   : > { %v6524_v24 = vpop.permute.xlu1 %2236 }
 0xfe3   : > { %v2248_v17 = vpop.permute.xlu1 %2247 }
 0xfe4   : > { %v2250_v22 = vmul.f32 %v2248_v17, %v6257_v9  ;;  %v2251_v44 = vmul.f32 %v2248_v17, %v6260_v27  ;;  %v2252_v41 = vmul.f32 %v2248_v17, %v6269_v30  ;;  %v5244_v17 = vmov 58  }
 0xfe6   : > { %2258 = vrot.lane.b32.xlu1 %v2251_v44, %s5238_s28  ;;  %2256 = vrot.lane.b32.xlu0 %v2250_v22, %s5238_s28 }
 0xfea   : > { %2270 = vperm.xlu1 %4811, %v8190_v2   ;;  %2260 = vrot.lane.b32.xlu0 %v2252_v41, %s5238_s28 }
 0xfee   : > { %4812 = vset.pattern.permute.xlu1 %v5239_v15 }
0x1058   : > { %v6533_v12 = vpop.permute.xlu1 %2258 }
0x1065   : > { %v2271_v5 = vpop.permute.xlu1 %2270 }
0x1066   : > { %v2273_v10 = vmul.f32 %v2271_v5, %v6401_v59  ;;  %v2274_v29 = vmul.f32 %v2271_v5, %v6404_v52  ;;  %v2275_v23 = vmul.f32 %v2271_v5, %v6409_v19 }
0x1068   : > { %2281 = vrot.lane.b32.xlu1 %v2274_v29, %s5238_s28  ;;  %2279 = vrot.lane.b32.xlu0 %v2273_v10, %s5238_s28  ;;  %v5245_v10 = vmov 59  }
0x106c   : > { %2292 = vperm.xlu1 %4812, %v8190_v2   ;;  %2283 = vrot.lane.b32.xlu0 %v2275_v23, %s5238_s28  ;;  %v5241_v2 = vmov 56  }
0x1070   : > { %4813 = vset.pattern.permute.xlu1 %v5240_v33 }
0x10da   : > { %v6542_v53 = vpop.permute.xlu1 %2281 }
0x10e7   : > { %v2293_v28 = vpop.permute.xlu1 %2292 }
0x10e8   : > { %v2295_v32 = vmul.f32 %v2293_v28, %v6419_v20  ;;  %v2296_v1 = vmul.f32 %v2293_v28, %v6422_v63  ;;  %v2297_v54 = vmul.f32 %v2293_v28, %v6427_v62 }
0x10ea   : > { %2303 = vrot.lane.b32.xlu1 %v2296_v1, %s5238_s28  ;;  %2301 = vrot.lane.b32.xlu0 %v2295_v32, %s5238_s28  ;;  %v5246_v1 = vmov 60  }
0x10ee   : > { %2314 = vperm.xlu1 %4813, %v6549_v40   ;;  %2305 = vrot.lane.b32.xlu0 %v2297_v54, %s5238_s28 }
0x10f2   : > { %4814 = vset.pattern.permute.xlu1 %v5241_v2 }
0x115c   : > { %v6553_v38 = vpop.permute.xlu1 %2303 }
0x115d   : > { %8235 = vst [vmem:[#allocation33_spill] sm:$0xff] %v6553_v38 }
0x1169   : > { %v2315_v26 = vpop.permute.xlu1 %2314 }
0x116a   : > { %v2317_v50 = vmul.f32 %v2315_v26, %v6437_v31  ;;  %v2318_v25 = vmul.f32 %v2315_v26, %v6440_v57  ;;  %v2319_v58 = vmul.f32 %v2315_v26, %v6445_v6 }
0x116c   : > { %2325 = vrot.lane.b32.xlu1 %v2318_v25, %s5238_s28  ;;  %2323 = vrot.lane.b32.xlu0 %v2317_v50, %s5238_s28 }
0x1170   : > { %2336 = vperm.xlu1 %4814, %v6549_v40   ;;  %2327 = vrot.lane.b32.xlu0 %v2319_v58, %s5238_s28  ;;  %v5247_v58 = vmov 61  }
0x1174   : > { %4815 = vset.pattern.permute.xlu1 %v5242_v47 }
0x11de   : > { %v6562_v8 = vpop.permute.xlu1 %2325 }
0x11df   : > { %8236 = vst [vmem:[#allocation56_spill] sm:$0xff] %v6562_v8 }
0x11eb   : > { %v2337_v60 = vpop.permute.xlu1 %2336 }
0x11ec   : > { %v2339_v3 = vmul.f32 %v2337_v60, %v6257_v9  ;;  %v2340_v16 = vmul.f32 %v2337_v60, %v6260_v27  ;;  %v2341_v7 = vmul.f32 %v2337_v60, %v6269_v30 }
0x11ee   : > { %2347 = vrot.lane.b32.xlu1 %v2340_v16, %s5243_s1  ;;  %2345 = vrot.lane.b32.xlu0 %v2339_v3, %s5243_s1 }
0x11f2   : > { %2359 = vperm.xlu1 %4815, %v6549_v40   ;;  %2349 = vrot.lane.b32.xlu0 %v2341_v7, %s5243_s1 }
0x11f6   : > { %4816 = vset.pattern.permute.xlu1 %v5244_v17  ;;  %v5249_v17 = vmov 62  }
0x1260   : > { %v6571_v22 = vpop.permute.xlu1 %2347 }
0x1261   : > { %8237 = vst [vmem:[#allocation57_spill] sm:$0xff] %v6571_v22 }
0x126d   : > { %v2360_v44 = vpop.permute.xlu1 %2359 }
0x126e   : > { %v2362_v41 = vmul.f32 %v2360_v44, %v6401_v59  ;;  %v2363_v15 = vmul.f32 %v2360_v44, %v6404_v52  ;;  %v2364_v5 = vmul.f32 %v2360_v44, %v6409_v19 }
0x1270   : > { %2370 = vrot.lane.b32.xlu1 %v2363_v15, %s5243_s1  ;;  %2368 = vrot.lane.b32.xlu0 %v2362_v41, %s5243_s1 }
0x1274   : > { %2381 = vperm.xlu1 %4816, %v6549_v40   ;;  %2372 = vrot.lane.b32.xlu0 %v2364_v5, %s5243_s1 }
0x1278   : > { %4817 = vset.pattern.permute.xlu1 %v5245_v10 }
0x12e2   : > { %v6580_v29 = vpop.permute.xlu1 %2370 }
0x12e3   : > { %8238 = vst [vmem:[#allocation34_spill] sm:$0xff] %v6580_v29 }
0x12ef   : > { %v2382_v23 = vpop.permute.xlu1 %2381 }
0x12f0   : > { %v2384_v33 = vmul.f32 %v2382_v23, %v6419_v20  ;;  %v2385_v28 = vmul.f32 %v2382_v23, %v6422_v63  ;;  %v2386_v32 = vmul.f32 %v2382_v23, %v6427_v62  ;;  %v5250_v23 = vmov 63  }
0x12f2   : > { %2392 = vrot.lane.b32.xlu1 %v2385_v28, %s5243_s1  ;;  %2390 = vrot.lane.b32.xlu0 %v2384_v33, %s5243_s1 }
0x12f6   : > { %2403 = vperm.xlu1 %4817, %v6549_v40   ;;  %2394 = vrot.lane.b32.xlu0 %v2386_v32, %s5243_s1 }
0x12fa   : > { %4818 = vset.pattern.permute.xlu1 %v5246_v1 }
0x1364   : > { %v6589_v54 = vpop.permute.xlu1 %2392 }
0x1365   : > { %8239 = vst [vmem:[#allocation58_spill] sm:$0xff] %v6589_v54 }
0x1371   : > { %v2404_v2 = vpop.permute.xlu1 %2403 }
0x1372   : > { %v2406_v26 = vmul.f32 %v2404_v2, %v6437_v31  ;;  %v2407_v50 = vmul.f32 %v2404_v2, %v6440_v57  ;;  %v2408_v25 = vmul.f32 %v2404_v2, %v6445_v6 }
0x1374   : > { %2414 = vrot.lane.b32.xlu1 %v2407_v50, %s5243_s1  ;;  %2412 = vrot.lane.b32.xlu0 %v2406_v26, %s5243_s1  ;;  %v5251_v26 = vmov 64  }
0x1378   : > { %2425 = vperm.xlu1 %4818, %v6549_v40   ;;  %2416 = vrot.lane.b32.xlu0 %v2408_v25, %s5243_s1 }
0x137c   : > { %4819 = vset.pattern.permute.xlu1 %v5247_v58 }
0x13e6   : > { %v6598_v47 = vpop.permute.xlu1 %2414 }
0x13e7   : > { %8240 = vst [vmem:[#allocation59_spill] sm:$0xff] %v6598_v47 }
0x13f3   : > { %v2426_v60 = vpop.permute.xlu1 %2425 }
0x13f4   : > { %v2428_v3 = vmul.f32 %v2426_v60, %v6257_v9  ;;  %v2429_v16 = vmul.f32 %v2426_v60, %v6260_v27  ;;  %v2430_v7 = vmul.f32 %v2426_v60, %v6269_v30 }
0x13f6   : > { %2436 = vrot.lane.b32.xlu1 %v2429_v16, %s5248_s2  ;;  %2434 = vrot.lane.b32.xlu0 %v2428_v3, %s5248_s2  ;;  %v6632_v16 = vpop.permute.xlu0 %1825 }
0x13fa   : > { %2448 = vperm.xlu1 %4819, %v6549_v40   ;;  %2438 = vrot.lane.b32.xlu0 %v2430_v7, %s5248_s2  ;;  %v5252_v7 = vmov 65  }
0x13fe   : > { %4820 = vset.pattern.permute.xlu1 %v5249_v17 }
0x1468   : > { %v6607_v44 = vpop.permute.xlu1 %2436 }
0x1469   : > { %8241 = vst [vmem:[#allocation35_spill] sm:$0xff] %v6607_v44 }
0x1475   : > { %v2449_v41 = vpop.permute.xlu1 %2448 }
0x1476   : > { %v2451_v15 = vmul.f32 %v2449_v41, %v6401_v59  ;;  %v2452_v5 = vmul.f32 %v2449_v41, %v6404_v52  ;;  %v2453_v10 = vmul.f32 %v2449_v41, %v6409_v19 }
0x1478   : > { %2459 = vrot.lane.b32.xlu1 %v2452_v5, %s5248_s2  ;;  %2457 = vrot.lane.b32.xlu0 %v2451_v15, %s5248_s2 }
0x147c   : > { %2470 = vperm.xlu1 %4820, %v6549_v40   ;;  %2461 = vrot.lane.b32.xlu0 %v2453_v10, %s5248_s2  ;;  %v6640_v10 = vpop.permute.xlu0 %1873 }
0x1480   : > { %4821 = vset.pattern.permute.xlu1 %v5250_v23 }
0x14ea   : > { %v6616_v33 = vpop.permute.xlu1 %2459 }
0x14eb   : > { %8242 = vst [vmem:[#allocation60_spill] sm:$0xff] %v6616_v33 }
0x14f7   : > { %v2471_v28 = vpop.permute.xlu1 %2470 }
0x14f8   : > { %v2473_v32 = vmul.f32 %v2471_v28, %v6419_v20  ;;  %v2474_v1 = vmul.f32 %v2471_v28, %v6422_v63  ;;  %v2475_v2 = vmul.f32 %v2471_v28, %v6427_v62  ;;  %v6645_v28 = vpop.permute.xlu0 %1938 }
0x14fa   : > { %2481 = vrot.lane.b32.xlu1 %v2474_v1, %s5248_s2  ;;  %2479 = vrot.lane.b32.xlu0 %v2473_v32, %s5248_s2  ;;  %v5254_v32 = vmov 66  }
0x14fe   : > { %2492 = vperm.xlu1 %4821, %v6549_v40   ;;  %2483 = vrot.lane.b32.xlu0 %v2475_v2, %s5248_s2 }
0x1502   : > { %4822 = vset.pattern.permute.xlu1 %v5251_v26 }
0x156c   : > { %v6625_v50 = vpop.permute.xlu1 %2481 }
0x156d   : > { %8243 = vst [vmem:[#allocation61_spill] sm:$0xff] %v6625_v50 }
0x1579   : > { %v2493_v25 = vpop.permute.xlu1 %2492 }
0x157a   : > { %v2495_v58 = vmul.f32 %v2493_v25, %v6437_v31  ;;  %v2496_v60 = vmul.f32 %v2493_v25, %v6440_v57  ;;  %v2497_v3 = vmul.f32 %v2493_v25, %v6445_v6 }
0x157c   : > { %2503 = vrot.lane.b32.xlu1 %v2496_v60, %s5248_s2  ;;  %2501 = vrot.lane.b32.xlu0 %v2495_v58, %s5248_s2  ;;  %v6653_v58 = vpop.permute.xlu0 %1942 }
0x1580   : > { %2514 = vperm.xlu1 %4822, %v6549_v40   ;;  %2505 = vrot.lane.b32.xlu0 %v2497_v3, %s5248_s2  ;;  %v6658_v3 = vpop.permute.xlu0 %1978  ;;  %s4487_s2 = sld [smem:[#allocation13 + $0x4]] }
0x1584   : > { %4823 = vset.pattern.permute.xlu1 %v5252_v7  ;;  %v5255_v7 = vmov 67  }
0x15ee   : > { %v6636_v17 = vpop.permute.xlu1 %2503 }
0x15ef   : > { %8244 = vst [vmem:[#allocation36_spill] sm:$0xff] %v6636_v17 }
0x15fb   : > { %v2515_v41 = vpop.permute.xlu1 %2514 }
0x15fc   : > { %v2517_v15 = vmul.f32 %v2515_v41, %v6257_v9  ;;  %v2518_v5 = vmul.f32 %v2515_v41, %v6260_v27  ;;  %v2519_v23 = vmul.f32 %v2515_v41, %v6269_v30 }
0x15fe   : > { %2525 = vrot.lane.b32.xlu1 %v2518_v5, %s5253_s24  ;;  %2523 = vrot.lane.b32.xlu0 %v2517_v15, %s5253_s24 }
0x1602   : > { %2537 = vperm.xlu1 %4823, %v6549_v40   ;;  %2527 = vrot.lane.b32.xlu0 %v2519_v23, %s5253_s24 }
0x1606   : > { %4824 = vset.pattern.permute.xlu1 %v5254_v32  ;;  %v6666_v32 = vpop.permute.xlu0 %1982 }
0x1670   : > { %v6649_v1 = vpop.permute.xlu1 %2525 }
0x1671   : > { %8245 = vst [vmem:[#allocation62_spill] sm:$0xff] %v6649_v1 }
0x167d   : > { %v2538_v2 = vpop.permute.xlu1 %2537 }
0x167e   : > { %v2540_v26 = vmul.f32 %v2538_v2, %v6401_v59  ;;  %v2541_v25 = vmul.f32 %v2538_v2, %v6404_v52  ;;  %v2542_v60 = vmul.f32 %v2538_v2, %v6409_v19 }
0x1680   : > { %2548 = vrot.lane.b32.xlu1 %v2541_v25, %s5253_s24  ;;  %2546 = vrot.lane.b32.xlu0 %v2540_v26, %s5253_s24  ;;  %v6671_v26 = vpop.permute.xlu0 %2017  ;;  %v5256_v25 = vmov 68  }
0x1684   : > { %2559 = vperm.xlu1 %4824, %v6549_v40   ;;  %2550 = vrot.lane.b32.xlu0 %v2542_v60, %s5253_s24 }
0x1688   : > { %4825 = vset.pattern.permute.xlu1 %v5255_v7 }
0x16f2   : > { %v6662_v41 = vpop.permute.xlu1 %2548 }
0x16f3   : > { %8246 = vst [vmem:[#allocation63_spill] sm:$0xff] %v6662_v41 }
0x16ff   : > { %v2560_v15 = vpop.permute.xlu1 %2559 }
0x1700   : > { %v2562_v5 = vmul.f32 %v2560_v15, %v6419_v20  ;;  %v2563_v23 = vmul.f32 %v2560_v15, %v6422_v63  ;;  %v2564_v2 = vmul.f32 %v2560_v15, %v6427_v62 }
0x1702   : > { %2570 = vrot.lane.b32.xlu1 %v2563_v23, %s5253_s24  ;;  %2568 = vrot.lane.b32.xlu0 %v2562_v5, %s5253_s24  ;;  %v6679_v23 = vpop.permute.xlu0 %2021 }
0x1706   : > { %2581 = vperm.xlu1 %4825, %v6549_v40   ;;  %2572 = vrot.lane.b32.xlu0 %v2564_v2, %s5253_s24  ;;  %v6684_v5 = vpop.permute.xlu0 %2056  ;;  %v5257_v2 = vmov 69  }
0x170a   : > { %4826 = vset.pattern.permute.xlu1 %v5256_v25 }
0x1774   : > { %v6675_v60 = vpop.permute.xlu1 %2570 }
0x1775   : > { %8247 = vst [vmem:[#allocation37_spill] sm:$0xff] %v6675_v60 }
0x1781   : > { %v2582_v7 = vpop.permute.xlu1 %2581 }
0x1782   : > { %v2584_v45 = vmul.f32 %v2582_v7, %v6437_v31  ;;  %v2585_v51 = vmul.f32 %v2582_v7, %v6440_v57  ;;  %v2586_v15 = vmul.f32 %v2582_v7, %v6445_v6 }
0x1784   : > { %2592 = vrot.lane.b32.xlu1 %v2585_v51, %s5253_s24  ;;  %2590 = vrot.lane.b32.xlu0 %v2584_v45, %s5253_s24  ;;  %v6692_v51 = vpop.permute.xlu0 %2060 }
0x1788   : > { %2603 = vperm.xlu1 %4826, %v6549_v40   ;;  %2594 = vrot.lane.b32.xlu0 %v2586_v15, %s5253_s24  ;;  %v6697_v7 = vpop.permute.xlu0 %2078  ;;  %v5259_v15 = vmov 70   ;;  %s7051_s24 = sld [smem:[#allocation13 + $0x7]] }
0x178c   : > { %4827 = vset.pattern.permute.xlu1 %v5257_v2 }
0x17f6   : > { %v6688_v25 = vpop.permute.xlu1 %2592 }
0x17f7   : > { %8248 = vst [vmem:[#allocation64_spill] sm:$0xff] %v6688_v25 }
0x1803   : > { %v2604_v18 = vpop.permute.xlu1 %2603 }
0x1804   : > { %v2606_v55 = vmul.f32 %v2604_v18, %v6257_v9  ;;  %v2607_v37 = vmul.f32 %v2604_v18, %v6260_v27  ;;  %v2608_v45 = vmul.f32 %v2604_v18, %v6269_v30  ;;  %v5260_v30 = vmov 71  }
0x1806   : > { %2614 = vrot.lane.b32.xlu1 %v2607_v37, %s5258_s15  ;;  %2612 = vrot.lane.b32.xlu0 %v2606_v55, %s5258_s15  ;;  %v6705_v37 = vpop.permute.xlu0 %2082 }
0x180a   : > { %2626 = vperm.xlu1 %4827, %v6549_v40   ;;  %2616 = vrot.lane.b32.xlu0 %v2608_v45, %s5258_s15  ;;  %v6710_v18 = vpop.permute.xlu0 %2101 }
0x180e   : > { %4828 = vset.pattern.permute.xlu1 %v5259_v15  ;;  %v6714_v45 = vpop.permute.xlu0 %2105 }
0x1878   : > { %v6701_v9 = vpop.permute.xlu1 %2614 }
0x1879   : > { %8249 = vst [vmem:[#allocation65_spill] sm:$0xff] %v6701_v9 }
0x1885   : > { %v2627_v27 = vpop.permute.xlu1 %2626 }
0x1886   : > { %v2629_v2 = vmul.f32 %v2627_v27, %v6401_v59  ;;  %v2630_v36 = vmul.f32 %v2627_v27, %v6404_v52  ;;  %v2631_v55 = vmul.f32 %v2627_v27, %v6409_v19  ;;  %v6718_v52 = vpop.permute.xlu0 %2123 }
0x1888   : > { %2637 = vrot.lane.b32.xlu1 %v2630_v36, %s5258_s15  ;;  %2635 = vrot.lane.b32.xlu0 %v2629_v2, %s5258_s15 }
0x188a   : > { %v6722_v19 = vpop.permute.xlu0 %2127 }
0x188c   : > { %2648 = vperm.xlu1 %4828, %v6549_v40   ;;  %2639 = vrot.lane.b32.xlu0 %v2631_v55, %s5258_s15 }
0x188e   : > { %v6727_v55 = vpop.permute.xlu0 %2145 }
0x1890   : > { %4829 = vset.pattern.permute.xlu1 %v5260_v30  ;;  %v8251_v30 = vmov 1  }
0x18fa   : > { %v6716_v59 = vpop.permute.xlu1 %2637 }
0x18fb   : > { %8250 = vst [vmem:[#allocation38_spill] sm:$0xff] %v6716_v59  ;;  %v6732_v59 = vpop.permute.xlu0 %2149 }
0x1907   : > { %v2649_v15 = vpop.permute.xlu1 %2648 }
0x1908   : > { %v2651_v36 = vmul.f32 %v2649_v15, %v6419_v20  ;;  %v2652_v2 = vmul.f32 %v2649_v15, %v6422_v63  ;;  %v2653_v27 = vmul.f32 %v2649_v15, %v6427_v62  ;;  %v6734_v20 = vpop.permute.xlu0 %2167 }
0x190a   : > { %2659 = vrot.lane.b32.xlu1 %v2652_v2, %s5258_s15  ;;  %2657 = vrot.lane.b32.xlu0 %v2651_v36, %s5258_s15 }
0x190c   : > { %v6736_v63 = vpop.permute.xlu0 %2171 }
0x190e   : > { %2670 = vperm.xlu1 %4829, %v6549_v40   ;;  %2661 = vrot.lane.b32.xlu0 %v2653_v27, %s5258_s15 }
0x1910   : > { %v6738_v9 = vpop.permute.xlu0 %2190 }
0x1912   : > { %4830 = vset.pattern.permute.xlu1 %v8251_v30 }
0x1914   : > { %v6740_v2 = vpop.permute.xlu0 %2194 }
0x1918   : > { %v6742_v36 = vpop.permute.xlu0 %2212 }
0x191c   : > { %v6744_v62 = vpop.permute.xlu0 %2216 }
0x1920   : > { %v6746_v15 = vpop.permute.xlu0 %2234 }
0x1924   : > { %v6748_v40 = vpop.permute.xlu0 %2238 }
0x1928   : > { %v6750_v27 = vpop.permute.xlu0 %2256 }
0x192c   : > { %v6752_v30 = vpop.permute.xlu0 %2260 }
0x1930   : > { %v6754_v25 = vpop.permute.xlu0 %2279 }
0x1934   : > { %v6756_v60 = vpop.permute.xlu0 %2283 }
0x1935   : > { %8252 = vst [vmem:[#allocation66_spill] sm:$0xff] %v6756_v60 }
0x1938   : > { %v6758_v41 = vpop.permute.xlu0 %2301 }
0x1939   : > { %8253 = vst [vmem:[#allocation67_spill] sm:$0xff] %v6758_v41 }
0x193c   : > { %v6760_v1 = vpop.permute.xlu0 %2305 }
0x193d   : > { %8254 = vst [vmem:[#allocation39_spill] sm:$0xff] %v6760_v1 }
0x1940   : > { %v6762_v17 = vpop.permute.xlu0 %2323 }
0x1941   : > { %8255 = vst [vmem:[#allocation68_spill] sm:$0xff] %v6762_v17 }
0x1944   : > { %v6764_v50 = vpop.permute.xlu0 %2327 }
0x1945   : > { %8256 = vst [vmem:[#allocation69_spill] sm:$0xff] %v6764_v50 }
0x1948   : > { %v6766_v33 = vpop.permute.xlu0 %2345 }
0x1949   : > { %8257 = vst [vmem:[#allocation40_spill] sm:$0xff] %v6766_v33 }
0x194c   : > { %v6768_v44 = vpop.permute.xlu0 %2349 }
0x194d   : > { %8258 = vst [vmem:[#allocation70_spill] sm:$0xff] %v6768_v44  ;;  %v5263_v44 = vmov 73  }
0x1950   : > { %v6770_v47 = vpop.permute.xlu0 %2368 }
0x1951   : > { %8259 = vst [vmem:[#allocation71_spill] sm:$0xff] %v6770_v47 }
0x1954   : > { %v6772_v54 = vpop.permute.xlu0 %2372 }
0x1955   : > { %8260 = vst [vmem:[#allocation41_spill] sm:$0xff] %v6772_v54  ;;  %v5262_v54 = vmov 72  }
0x1958   : > { %v6774_v29 = vpop.permute.xlu0 %2390 }
0x1959   : > { %8261 = vst [vmem:[#allocation72_spill] sm:$0xff] %v6774_v29  ;;  %v2699_v29 = vld [vmem:[%s7914_s7] sm:$0xf] }
0x195c   : > { %v6776_v22 = vpop.permute.xlu0 %2394 }
0x195d   : > { %8262 = vst [vmem:[#allocation73_spill] sm:$0xff] %v6776_v22 }
0x1960   : > { %v6780_v41 = vpop.permute.xlu0 %2412 }
0x1961   : > { %8264 = vst [vmem:[#allocation74_spill] sm:$0xff] %v6780_v41  ;;  %v8267_v41 = vmov 5  }
0x1964   : > { %v6784_v33 = vpop.permute.xlu0 %2416 }
0x1965   : > { %8265 = vst [vmem:[#allocation75_spill] sm:$0xff] %v6784_v33 }
0x197c   : > { %v6778_v8 = vpop.permute.xlu1 %2659 }
0x197d   : > { %8263 = vst [vmem:[#allocation42_spill] sm:$0xff] %v6778_v8  ;;  %v6792_v8 = vpop.permute.xlu0 %2434 }
0x197e   : > { %8266 = vst [vmem:[#allocation43_spill] sm:$0xff] %v6792_v8  ;;  %v8279_v8 = vmov 11  }
0x1989   : > { %v2671_v1 = vpop.permute.xlu1 %2670 }
0x198a   : > { %v2673_v17 = vmul.f32 %v2671_v1, %v6437_v31  ;;  %v2674_v50 = vmul.f32 %v2671_v1, %v6440_v57  ;;  %v2675_v22 = vmul.f32 %v2671_v1, %v6445_v6  ;;  %v2706_v31 = vld [vmem:[#allocation12] sm:$0xf]  ;;  %v6796_v57 = vpop.permute.xlu0 %2438  ;;  %v2785_v6 = vld [vmem:[%s7910_s3] sm:$0xf]  ;;  %v8273_v1 = vmov 2  }
0x198b   : > { %8268 = vst [vmem:[#allocation76_spill] sm:$0xff] %v6796_v57  ;;  %v8277_v57 = vmov 10  }
0x198c   : > { %2681 = vrot.lane.b32.xlu1 %v2674_v50, %s5258_s15  ;;  %2679 = vrot.lane.b32.xlu0 %v2673_v17, %s5258_s15  ;;  %v8269_v50 = vmov 7   ;;  %v8270_v17 = vmov 6  }
0x198e   : > { %v6800_v33 = vpop.permute.xlu0 %2457 }
0x198f   : > { %8271 = vst [vmem:[#allocation77_spill] sm:$0xff] %v6800_v33  ;;  %v6816_v33 = vld [vmem:[#allocation10] sm:$0xf] }
0x1990   : > { %2702 = vperm.xlu1 %4830, %v2699_v29   ;;  %2683 = vrot.lane.b32.xlu0 %v2675_v22, %s5258_s15  ;;  %v2792_v22 = vld [vmem:[#allocation9] sm:$0xf]  ;;  %v8272_v29 = vmov 9   ;;  %s7075_s15 = scalar_lea.vmem [#allocation15], %s4476_s12  ;;  %s5276_s12 = smov 110  }
0x1994   : > { %4832 = vset.pattern.permute.xlu1 %v8267_v41  ;;  %2709 = vperm.xlu0 %4831, %v2706_v31   ;;  %v6807_v41 = vpop.permute.xlu0 %2461 }
0x1995   : > { %2725 = vperm.xlu1 %4832, %v2706_v31   ;;  %8274 = vst [vmem:[#allocation44_spill] sm:$0xff] %v6807_v41  ;;  %v1829_v41 = vld [vmem:[#allocation2] ss:$4 sm:$0x3] }
0x1998   : > { %4834 = vset.pattern.permute.xlu0 %v8269_v50  ;;  %v2958_v50 = vld [vmem:[%s7912_s5] sm:$0xf] }
0x1999   : > { %4833 = vset.pattern.permute.xlu1 %v8270_v17  ;;  %2757 = vperm.xlu0 %4834, %v2706_v31   ;;  %v6814_v17 = vpop.permute.xlu0 %2479 }
0x199a   : > { %2741 = vperm.xlu1 %4833, %v2706_v31   ;;  %v8275_v31 = vmov 8   ;;  %8276 = vst [vmem:[#allocation78_spill] sm:$0xff] %v6814_v17  ;;  %v1851_v17 = vld [vmem:[#allocation2 + $0x1] ss:$4 sm:$0x3] }
0x199d   : > { %4837 = vset.pattern.permute.xlu0 %v8272_v29  ;;  %v5261_v29 = vmov 74  }
0x199e   : > { %4835 = vset.pattern.permute.xlu1 %v8273_v1  ;;  %2830 = vperm.xlu0 %4837, %v2792_v22  }
0x199f   : > { %2788 = vperm.xlu1 %4835, %v2785_v6   ;;  %v6820_v6 = vpop.permute.xlu0 %2483 }
0x19a0   : > { %8278 = vst [vmem:[#allocation80_spill] sm:$0xff] %v6820_v6 }
0x19a2   : > { %4840 = vset.pattern.permute.xlu0 %v8273_v1 }
0x19a3   : > { %4836 = vset.pattern.permute.xlu1 %v8275_v31  ;;  %2961 = vperm.xlu0 %4840, %v2958_v50   ;;  %v6823_v1 = vpop.permute.xlu0 %2501  ;;  %v1840_v50 = vrot.slane %v1829_v41, %v5589_v34  ;;  %v1844_v31 = vrot.slane %v1829_v41, %v5591_v35 }
0x19a4   : > { %2796 = vperm.xlu1 %4836, %v2792_v22   ;;  %8280 = vst [vmem:[#allocation87_spill] sm:$0xff] %v6823_v1  ;;  %v1864_v1 = vrot.slane %v1851_v17, %v5591_v35 }
0x19a7   : > { %4843 = vset.pattern.permute.xlu0 %v5261_v29  ;;  %v1847_v29 = vmul.f32 %v1840_v50, %v6192_v13  ;;  %v6830_v6 = vpop.permute.xlu0 %2505 }
0x19a8   : > { %4838 = vset.pattern.permute.xlu1 %v8277_v57  ;;  %3023 = vperm.xlu0 %4843, %v6816_v33   ;;  %v1848_v57 = vmul.f32 %v1844_v31, %v6192_v13  ;;  %8281 = vst [vmem:[#allocation45_spill] sm:$0xff] %v6830_v6  ;;  %v1868_v31 = vmul.f32 %v1864_v1, %v6210_v56  ;;  %v1891_v6 = vld [vmem:[#allocation2 + $0x3] ss:$4 sm:$0x3] }
0x19a9   : > { %2864 = vperm.xlu1 %4838, %v2792_v22   ;;  %v1849_v47 = vadd.f32 %v1847_v29, %v6632_v16  ;;  %v5264_v29 = vmov 75  }
0x19aa   : > { %v1850_v41 = vadd.f32 %v1848_v57, %v6632_v16  ;;  %v1904_v57 = vrot.slane %v1891_v6, %v5591_v35 }
0x19ac   : > { %v1870_v60 = vadd.f32 %v1868_v31, %v1850_v41  ;;  %v1908_v41 = vmul.f32 %v1904_v57, %v6230_v46 }
0x19ad   : > { %4839 = vset.pattern.permute.xlu1 %v8279_v8  ;;  %v1860_v8 = vrot.slane %v1851_v17, %v5589_v34 }
0x19ae   : > { %2898 = vperm.xlu1 %4839, %v2792_v22   ;;  %v1871_v22 = vld [vmem:[#allocation2 + $0x2] ss:$4 sm:$0x3] }
0x19af   : > { %v1867_v50 = vmul.f32 %v1860_v8, %v6210_v56  ;;  %v1880_v13 = vrot.slane %v1871_v22, %v5589_v34  ;;  %v1884_v17 = vrot.slane %v1871_v22, %v5591_v35  ;;  %v5265_v22 = vmov 76  }
0x19b1   : > { %v1869_v38 = vadd.f32 %v1867_v50, %v1849_v47  ;;  %v1887_v16 = vmul.f32 %v1880_v13, %v6640_v10  ;;  %v1888_v8 = vmul.f32 %v1884_v17, %v6640_v10  ;;  %v1945_v50 = vsel %vm1944_vm4, %v6645_v28, %v6398_v61 }
0x19b2   : > { %4841 = vset.pattern.permute.xlu1 %v5262_v54  ;;  %v6836_v54 = vpop.permute.xlu0 %2523  ;;  %v2023_v17 = vsel %vm1944_vm4, %v6671_v26, %v6434_v49  ;;  %v2085_v26 = vsel %vm2084_vm5, %v6697_v7, %v6461_v4  ;;  %v2129_v7 = vsel %vm2084_vm5, %v6718_v52, %v6479_v11  ;;  %v2174_v52 = vsel %vm2173_vm6, %v6734_v20, %v6497_v42 }
0x19b3   : > { %2969 = vperm.xlu1 %4841, %v6816_v33   ;;  %8282 = vst [vmem:[#allocation81_spill] sm:$0xff] %v6836_v54  ;;  %v1889_v56 = vadd.f32 %v1887_v16, %v1869_v38  ;;  %v1890_v1 = vadd.f32 %v1888_v8, %v1870_v60  ;;  %v1946_v38 = vsel %vm1944_vm4, %v6398_v61, %v6653_v58 }
0x19b4   : > { %v2024_v61 = vsel %vm1944_vm4, %v6434_v49, %v6679_v23  ;;  %v2086_v49 = vsel %vm2084_vm5, %v6461_v4, %v6705_v37  ;;  %v2130_v37 = vsel %vm2084_vm5, %v6479_v11, %v6722_v19  ;;  %v2175_v11 = vsel %vm2173_vm6, %v6497_v42, %v6736_v63 }
0x19b5   : > { %v1910_v60 = vadd.f32 %v1908_v41, %v1890_v1  ;;  %v5266_v1 = vmov 77   ;;  %v2218_v20 = vsel %vm2173_vm6, %v6742_v36, %v6515_v48  ;;  %v2219_v42 = vsel %vm2173_vm6, %v6515_v48, %v6744_v62 }
0x19b6   : > { %v6848_v54 = vpop.permute.xlu0 %2527  ;;  %4846 = vset.pattern.permute.xlu0 %v5266_v1  ;;  %v2263_v36 = vsel %vm2262_vm7, %v6750_v27, %v6533_v12  ;;  %v2264_v48 = vsel %vm2262_vm7, %v6533_v12, %v6752_v30  ;;  %v8285_v27 = vld [vmem:[#allocation67_spill] sm:$0xff] }
0x19b7   : > { %4842 = vset.pattern.permute.xlu1 %v5263_v44  ;;  %v1900_v44 = vrot.slane %v1891_v6, %v5589_v34  ;;  %v1984_v6 = vsel %vm1944_vm4, %v6658_v3, %v6416_v0  ;;  %v1950_v28 = vadd.f32 %v1946_v38, %v1910_v60  ;;  %v2062_v3 = vsel %vm1944_vm4, %v6684_v5, %v6452_v21 }
0x19b8   : > { %2996 = vperm.xlu1 %4842, %v6816_v33   ;;  %v2107_v5 = vsel %vm2084_vm5, %v6710_v18, %v6470_v14 }
0x19b9   : > { %v1907_v47 = vmul.f32 %v1900_v44, %v6230_v46  ;;  %v1985_v46 = vsel %vm1944_vm4, %v6416_v0, %v6666_v32  ;;  %v2063_v0 = vsel %vm1944_vm4, %v6452_v21, %v6692_v51  ;;  %v2108_v21 = vsel %vm2084_vm5, %v6470_v14, %v6714_v45 }
0x19ba   : > { %v6855_v13 = vpop.permute.xlu0 %2546  ;;  %v1989_v58 = vadd.f32 %v1985_v46, %v1950_v28  ;;  %v2152_v14 = vsel %vm2084_vm5, %v6488_v43, %v6732_v59 }
0x19bb   : > { %v1909_v10 = vadd.f32 %v1907_v47, %v1889_v56  ;;  %v2151_v47 = vsel %vm2084_vm5, %v6727_v55, %v6488_v43  ;;  %v2196_v55 = vsel %vm2173_vm6, %v6738_v9, %v6506_v39  ;;  %v2197_v43 = vsel %vm2173_vm6, %v6506_v39, %v6740_v2 }
0x19bc   : > { %4844 = vset.pattern.permute.xlu1 %v5264_v29  ;;  %v2028_v32 = vadd.f32 %v2024_v61, %v1989_v58  ;;  %v2240_v9 = vsel %vm2173_vm6, %v6746_v15, %v6524_v24  ;;  %v2241_v39 = vsel %vm2173_vm6, %v6524_v24, %v6748_v40  ;;  %v2285_v15 = vsel %vm2262_vm7, %v6754_v25, %v6542_v53  ;;  %v8287_v25 = vld [vmem:[#allocation56_spill] sm:$0xff] }
0x19bd   : > { %3050 = vperm.xlu1 %4844, %v6816_v33   ;;  %v1949_v31 = vadd.f32 %v1945_v50, %v1909_v10  ;;  %vm3117_vm5 = vcmask 1039360  }
0x19be   : > { %v6876_v44 = vpop.permute.xlu0 %2550  ;;  %v2067_v23 = vadd.f32 %v2063_v0, %v2028_v32 }
0x19bf   : > { %v1988_v29 = vadd.f32 %v1984_v6, %v1949_v31 }
0x19c0   : > { %v2090_v51 = vadd.f32 %v2086_v49, %v2067_v23  ;;  %v8290_v23 = vld [vmem:[#allocation57_spill] sm:$0xff] }
0x19c1   : > { %4845 = vset.pattern.permute.xlu1 %v5265_v22  ;;  %v2027_v16 = vadd.f32 %v2023_v17, %v1988_v29  ;;  %v8283_v17 = vld [vmem:[#allocation66_spill] sm:$0xff]  ;;  %v8284_v29 = vld [vmem:[#allocation33_spill] sm:$0xff] }
0x19c2   : > { %3077 = vperm.xlu1 %4845, %v6816_v33   ;;  %v6890_v8 = vpop.permute.xlu0 %2568  ;;  %v2112_v18 = vadd.f32 %v2108_v21, %v2090_v51  ;;  %v2286_v24 = vsel %vm2262_vm7, %v6542_v53, %v8283_v17  ;;  %v2307_v61 = vsel %vm2262_vm7, %v8285_v27, %v8284_v29  ;;  %v8292_v51 = vld [vmem:[#allocation70_spill] sm:$0xff] }
0x19c3   : > { %v2066_v57 = vadd.f32 %v2062_v3, %v2027_v16  ;;  %v8286_v3 = vld [vmem:[#allocation39_spill] sm:$0xff]  ;;  %v8288_v16 = vld [vmem:[#allocation68_spill] sm:$0xff] }
0x19c4   : > { %v2134_v45 = vadd.f32 %v2130_v37, %v2112_v18  ;;  %v2308_v12 = vsel %vm2262_vm7, %v8284_v29, %v8286_v3  ;;  %v2329_v0 = vsel %vm2262_vm7, %v8288_v16, %v8287_v25  ;;  %v8294_v37 = vld [vmem:[#allocation71_spill] sm:$0xff] }
0x19c5   : > { %v2089_v56 = vadd.f32 %v2085_v26, %v2066_v57  ;;  %v8289_v57 = vld [vmem:[#allocation69_spill] sm:$0xff] }
0x19c6   : > { %v6910_v41 = vpop.permute.xlu0 %2572  ;;  %v2156_v19 = vadd.f32 %v2152_v14, %v2134_v45  ;;  %v2330_v53 = vsel %vm2262_vm7, %v8287_v25, %v8289_v57 }
0x19c7   : > { %v2111_v4 = vadd.f32 %v2107_v5, %v2089_v56  ;;  %v8291_v5 = vld [vmem:[#allocation40_spill] sm:$0xff] }
0x19c8   : > { %v2179_v59 = vadd.f32 %v2175_v11, %v2156_v19  ;;  %v2352_v56 = vsel %vm2351_vm8, %v8291_v5, %v8290_v23 }
0x19c9   : > { %v2133_v22 = vadd.f32 %v2129_v7, %v2111_v4  ;;  %v2353_v7 = vsel %vm2351_vm8, %v8290_v23, %v8292_v51  ;;  %v8293_v4 = vld [vmem:[#allocation34_spill] sm:$0xff] }
0x19ca   : > { %v6924_v38 = vpop.permute.xlu0 %2590  ;;  %v2201_v63 = vadd.f32 %v2197_v43, %v2179_v59  ;;  %v2374_v18 = vsel %vm2351_vm8, %v8294_v37, %v8293_v4 }
0x19cb   : > { %v2155_v50 = vadd.f32 %v2151_v47, %v2133_v22  ;;  %v8295_v22 = vld [vmem:[#allocation41_spill] sm:$0xff] }
0x19cc   : > { %v2223_v2 = vadd.f32 %v2219_v42, %v2201_v63  ;;  %v2375_v14 = vsel %vm2351_vm8, %v8293_v4, %v8295_v22  ;;  %v8315_v4 = vld [vmem:[#allocation81_spill] sm:$0xff] }
0x19cd   : > { %v2178_v10 = vadd.f32 %v2174_v52, %v2155_v50  ;;  %v8296_v52 = vld [vmem:[#allocation58_spill] sm:$0xff]  ;;  %v8297_v50 = vld [vmem:[#allocation72_spill] sm:$0xff] }
0x19ce   : > { %v2245_v62 = vadd.f32 %v2241_v39, %v2223_v2  ;;  %v6944_v46 = vpop.permute.xlu0 %2594  ;;  %v2396_v11 = vsel %vm2351_vm8, %v8297_v50, %v8296_v52  ;;  %v8302_v2 = vld [vmem:[#allocation35_spill] sm:$0xff] }
0x19cf   : > { %v2200_v60 = vadd.f32 %v2196_v55, %v2178_v10  ;;  %v8298_v10 = vld [vmem:[#allocation73_spill] sm:$0xff] }
0x19d0   : > { %v2268_v40 = vadd.f32 %v2264_v48, %v2245_v62  ;;  %v2397_v43 = vsel %vm2351_vm8, %v8296_v52, %v8298_v10  ;;  %v8317_v10 = vld [vmem:[#allocation37_spill] sm:$0xff] }
0x19d1   : > { %v2222_v6 = vadd.f32 %v2218_v20, %v2200_v60  ;;  %v8299_v20 = vld [vmem:[#allocation59_spill] sm:$0xff]  ;;  %v8300_v60 = vld [vmem:[#allocation74_spill] sm:$0xff] }
0x19d2   : > { %v2290_v30 = vadd.f32 %v2286_v24, %v2268_v40  ;;  %v2613_v32 = vpop.permute.xlu0 %2612  ;;  %v2418_v42 = vsel %vm2351_vm8, %v8300_v60, %v8299_v20  ;;  %v8305_v24 = vld [vmem:[#allocation60_spill] sm:$0xff]  ;;  %v8306_v40 = vld [vmem:[#allocation77_spill] sm:$0xff] }
0x19d3   : > { %v2244_v31 = vadd.f32 %v2240_v9, %v2222_v6  ;;  %v8301_v9 = vld [vmem:[#allocation75_spill] sm:$0xff]  ;;  %v2463_v29 = vsel %vm2440_vm9, %v8306_v40, %v8305_v24  ;;  %v8318_v60 = vld [vmem:[#allocation64_spill] sm:$0xff] }
0x19d4   : > { %v2312_v49 = vadd.f32 %v2308_v12, %v2290_v30  ;;  %v2419_v6 = vsel %vm2351_vm8, %v8299_v20, %v8301_v9  ;;  %v8308_v12 = vld [vmem:[#allocation61_spill] sm:$0xff]  ;;  %v8309_v30 = vld [vmem:[#allocation78_spill] sm:$0xff]  ;;  %vm3419_vm8 = vcmask 900096  }
0x19d5   : > { %v2267_v28 = vadd.f32 %v2263_v36, %v2244_v31  ;;  %v8303_v36 = vld [vmem:[#allocation43_spill] sm:$0xff]  ;;  %v2485_v25 = vsel %vm2440_vm9, %v8309_v30, %v8308_v12  ;;  %v8319_v9 = vld [vmem:[#allocation65_spill] sm:$0xff] }
0x19d6   : > { %v2334_v1 = vadd.f32 %v2330_v53, %v2312_v49  ;;  %v2617_v19 = vpop.permute.xlu0 %2616  ;;  %v2441_v31 = vsel %vm2440_vm9, %v8303_v36, %v8302_v2  ;;  %v8311_v53 = vld [vmem:[#allocation36_spill] sm:$0xff]  ;;  %v8312_v49 = vld [vmem:[#allocation87_spill] sm:$0xff]  ;;  %v8320_v36 = vld [vmem:[#allocation38_spill] sm:$0xff] }
0x19d7   : > { %v2289_v58 = vadd.f32 %v2285_v15, %v2267_v28  ;;  %v8304_v15 = vld [vmem:[#allocation76_spill] sm:$0xff]  ;;  %v2507_v23 = vsel %vm2440_vm9, %v8312_v49, %v8311_v53 }
0x19d8   : > { %v2357_v45 = vadd.f32 %v2353_v7, %v2334_v1  ;;  %v2442_v28 = vsel %vm2440_vm9, %v8302_v2, %v8304_v15  ;;  %v8314_v1 = vld [vmem:[#allocation62_spill] sm:$0xff] }
0x19d9   : > { %v2311_v26 = vadd.f32 %v2307_v61, %v2289_v58  ;;  %v8307_v61 = vld [vmem:[#allocation44_spill] sm:$0xff]  ;;  %v2530_v37 = vsel %vm2529_vm10, %v8315_v4, %v8314_v1 }
0x19da   : > { %v2379_v59 = vadd.f32 %v2375_v14, %v2357_v45  ;;  %v2636_v48 = vpop.permute.xlu0 %2635  ;;  %v2464_v58 = vsel %vm2440_vm9, %v8305_v24, %v8307_v61  ;;  %v8316_v14 = vld [vmem:[#allocation63_spill] sm:$0xff] }
0x19db   : > { %v2333_v21 = vadd.f32 %v2329_v0, %v2311_v26  ;;  %v8310_v0 = vld [vmem:[#allocation80_spill] sm:$0xff]  ;;  %v2552_v45 = vsel %vm2529_vm10, %v6855_v13, %v8316_v14  ;;  %v2596_v13 = vsel %vm2529_vm10, %v6924_v38, %v8318_v60 }
0x19dc   : > { %v2401_v39 = vadd.f32 %v2397_v43, %v2379_v59  ;;  %v2486_v26 = vsel %vm2440_vm9, %v8308_v12, %v8310_v0  ;;  %v2574_v43 = vsel %vm2529_vm10, %v6890_v8, %v8317_v10  ;;  %v2619_v8 = vsel %vm2618_vm11, %v2613_v32, %v8319_v9 }
0x19dd   : > { %v2356_v47 = vadd.f32 %v2352_v56, %v2333_v21  ;;  %v8313_v21 = vld [vmem:[#allocation45_spill] sm:$0xff]  ;;  %v2694_v12 = vstv %s4487_s2 }
0x19de   : > { %v2423_v17 = vadd.f32 %v2419_v6, %v2401_v39  ;;  %v2640_v5 = vpop.permute.xlu0 %2639  ;;  %v2508_v51 = vsel %vm2440_vm9, %v8311_v53, %v8313_v21  ;;  %vm3536_vm9 = vcmask 891904  }
0x19df   : > { %v2378_v55 = vadd.f32 %v2374_v18, %v2356_v47  ;;  %v2531_v47 = vsel %vm2529_vm10, %v8314_v1, %v6848_v54  ;;  %v2575_v54 = vsel %vm2529_vm10, %v8317_v10, %v6910_v41  ;;  %v2620_v41 = vsel %vm2618_vm11, %v8319_v9, %v2617_v19 }
0x19e0   : > { %v2446_v3 = vadd.f32 %v2442_v28, %v2423_v17 }
0x19e1   : > { %v2400_v63 = vadd.f32 %v2396_v11, %v2378_v55  ;;  %v2553_v11 = vsel %vm2529_vm10, %v8316_v14, %v6876_v44  ;;  %v2597_v44 = vsel %vm2529_vm10, %v8318_v60, %v6944_v46  ;;  %v8321_v46 = vld [vmem:[#allocation42_spill] sm:$0xff] }
0x19e2   : > { %v2468_v57 = vadd.f32 %v2464_v58, %v2446_v3  ;;  %v2658_v52 = vpop.permute.xlu0 %2657  ;;  %v4489_v60 = vld [vmem:[%s5524_s8 + $0x1] ss:$4 sm:$0xf] }
0x19e3   : > { %v2422_v62 = vadd.f32 %v2418_v42, %v2400_v63  ;;  %v2663_v28 = vsel %vm2618_vm11, %v2658_v52, %v8321_v46  ;;  %v8323_v52 = vld [vmem:[#allocation28_spill] sm:$0xff] }
0x19e4   : > { %v2490_v7 = vadd.f32 %v2486_v26, %v2468_v57 }
0x19e5   : > { %v2445_v27 = vadd.f32 %v2441_v31, %v2422_v62  ;;  %v2641_v31 = vsel %vm2618_vm11, %v2636_v48, %v8320_v36  ;;  %v2642_v62 = vsel %vm2618_vm11, %v8320_v36, %v2640_v5 }
0x19e6   : > { %v2512_v22 = vadd.f32 %v2508_v51, %v2490_v7  ;;  %v2662_v6 = vpop.permute.xlu0 %2661 }
0x19e7   : > { %v2467_v16 = vadd.f32 %v2463_v29, %v2445_v27  ;;  %v2664_v40 = vsel %vm2618_vm11, %v8321_v46, %v2662_v6  ;;  %v2775_v6 = vstv %s7051_s24  ;;  %v2849_v46 = vrot.slane %v4489_v60, %v8323_v52  ;;  %s7776_s24 = scalar_lea.hbm %s7917_s10, %s4505_s27 }
0x19e8   : > { %v2535_v55 = vadd.f32 %v2531_v47, %v2512_v22  ;;  %v8322_v47 = vld [vmem:[#allocation27_spill] sm:$0xff] }
0x19e9   : > { %v2489_v56 = vadd.f32 %v2485_v25, %v2467_v16 }
0x19ea   : > { %v2557_v20 = vadd.f32 %v2553_v11, %v2535_v55 }
0x19eb   : > { %v2511_v18 = vadd.f32 %v2507_v23, %v2489_v56 }
0x19ec   : > { %v2579_v63 = vadd.f32 %v2575_v54, %v2557_v20  ;;  %v2793_v20 = vld [vmem:[%s5524_s8] ss:$4 sm:$0xf] }
0x19ed   : > { %v2534_v50 = vadd.f32 %v2530_v37, %v2511_v18  ;;  %v2803_v9 = vrot.slane %v2793_v20, %v5589_v34  ;;  %v2811_v36 = vrot.slane %v2793_v20, %v8322_v47 }
0x19ee   : > { %v2601_v2 = vadd.f32 %v2597_v44, %v2579_v63 }
0x19ef   : > { %v2556_v59 = vadd.f32 %v2552_v45, %v2534_v50 }
0x19f0   : > { %v2624_v15 = vadd.f32 %v2620_v41, %v2601_v2 }
0x19f1   : > { %v2578_v42 = vadd.f32 %v2574_v43, %v2556_v59 }
0x19f2   : > { %v2646_v19 = vadd.f32 %v2642_v62, %v2624_v15  ;;  %v2841_v62 = vrot.slane %v4489_v60, %v5591_v35  ;;  %v2845_v15 = vrot.slane %v4489_v60, %v8322_v47 }
0x19f3   : > { %v2600_v39 = vadd.f32 %v2596_v13, %v2578_v42 }
0x19f4   : > { %v2668_v48 = vadd.f32 %v2664_v40, %v2646_v19  ;;  %v4490_v40 = vld [vmem:[%s5524_s8 + $0x2] ss:$4 sm:$0xf] }
0x19f5   : > { %v2623_v38 = vadd.f32 %v2619_v8, %v2600_v39  ;;  %v2807_v8 = vrot.slane %v2793_v20, %v5591_v35 }
0x19f7   : > { %v2645_v24 = vadd.f32 %v2641_v31, %v2623_v38  ;;  %v2837_v31 = vrot.slane %v4489_v60, %v5589_v34  ;;  %v2815_v38 = vrot.slane %v2793_v20, %v8323_v52 }
0x19f9   : > { %v2667_v27 = vadd.f32 %v2663_v28, %v2645_v24 }
0x19fe   : > { %v2682_v17 = vpop.permute.xlu1 %2681  ;;  %v2680_v32 = vpop.permute.xlu0 %2679 }
0x19ff   : > { %v2685_v29 = vsel %vm2618_vm11, %v2680_v32, %v2682_v17 }
0x1a00   : > { %v2689_v58 = vadd.f32 %v2685_v29, %v2667_v27 }
0x1a02   : > { %v2684_v61 = vpop.permute.xlu0 %2683  ;;  %v2695_v25 = vmul.f32 %v2694_v12, %v2689_v58  ;;  %vm2692_vm12 = vcmp.ge.f32.partialorder %v2689_v58, 0.0 }
0x1a03   : > { %v2686_v3 = vsel %vm2618_vm11, %v2682_v17, %v2684_v61 }
0x1a04   : > { %v2690_v30 = vadd.f32 %v2686_v3, %v2668_v48  ;;  %v2697_v0 = vsel %vm2692_vm12, %v2689_v58, %v2695_v25 }
0x1a05   : > { %v2715_v53 = vrot.slane %v2697_v0, %v5589_v34  ;;  %v2731_v51 = vrot.slane %v2697_v0, %v5591_v35  ;;  %v2747_v22 = vrot.slane %v2697_v0, %v8322_v47  ;;  %v2763_v50 = vrot.slane %v2697_v0, %v8323_v52 }
0x1a06   : > { %v2696_v16 = vmul.f32 %v2694_v12, %v2690_v30  ;;  %vm2693_vm13 = vcmp.ge.f32.partialorder %v2690_v30, 0.0  ;;  %v2871_v0 = vrot.slane %v4490_v40, %v5589_v34 }
0x1a08   : > { %v2698_v26 = vsel %vm2693_vm13, %v2690_v30, %v2696_v16 }
0x1a09   : > { %v2719_v49 = vrot.slane %v2698_v26, %v5589_v34  ;;  %v2735_v7 = vrot.slane %v2698_v26, %v5591_v35  ;;  %v2751_v14 = vrot.slane %v2698_v26, %v8322_v47  ;;  %v2767_v11 = vrot.slane %v2698_v26, %v8323_v52 }
0x1a0a   : > { %v2875_v26 = vrot.slane %v4490_v40, %v5591_v35 }
0x1a0b   : > { %v2703_v57 = vpop.permute.xlu1 %2702 }
0x1a0f   : > { %v2710_v23 = vpop.permute.xlu0 %2709 }
0x1a10   : > { %v2720_v5 = vmul.f32 %v2715_v53, %v2710_v23  ;;  %v2721_v56 = vmul.f32 %v2719_v49, %v2710_v23  ;;  %v2726_v21 = vpop.permute.xlu1 %2725  ;;  %v2883_v53 = vrot.slane %v4490_v40, %v8323_v52 }
0x1a11   : > { %v2736_v37 = vmul.f32 %v2731_v51, %v2726_v21  ;;  %v2737_v18 = vmul.f32 %v2735_v7, %v2726_v21  ;;  %v4491_v21 = vld [vmem:[%s5524_s8 + $0x3] ss:$4 sm:$0xf]  ;;  %s5267_s8 = smov 127  }
0x1a12   : > { %v2722_v1 = vadd.f32 %v2720_v5, %v2703_v57  ;;  %v2723_v4 = vadd.f32 %v2721_v56, %v2703_v57  ;;  %v2879_v57 = vrot.slane %v4490_v40, %v8322_v47  ;;  %v8326_v40 = vld [vmem:[#allocation30_spill] sm:$0xff] }
0x1a14   : > { %v2758_v45 = vpop.permute.xlu0 %2757  ;;  %v2738_v10 = vadd.f32 %v2736_v37, %v2722_v1  ;;  %v2739_v43 = vadd.f32 %v2737_v18, %v2723_v4 }
0x1a15   : > { %v2742_v55 = vpop.permute.xlu1 %2741  ;;  %v2768_v13 = vmul.f32 %v2763_v50, %v2758_v45  ;;  %v2769_v42 = vmul.f32 %v2767_v11, %v2758_v45  ;;  %v2905_v50 = vrot.slane %v4491_v21, %v5589_v34  ;;  %v2909_v11 = vrot.slane %v4491_v21, %v5591_v35 }
0x1a16   : > { %v2752_v59 = vmul.f32 %v2747_v22, %v2742_v55  ;;  %v2753_v54 = vmul.f32 %v2751_v14, %v2742_v55  ;;  %v2913_v55 = vrot.slane %v4491_v21, %v8322_v47 }
0x1a18   : > { %v2754_v44 = vadd.f32 %v2752_v59, %v2738_v10  ;;  %v2755_v63 = vadd.f32 %v2753_v54, %v2739_v43  ;;  %v2917_v10 = vrot.slane %v4491_v21, %v8323_v52  ;;  %v5268_v21 = vmov 78  }
0x1a19   : > { %v2831_v28 = vpop.permute.xlu0 %2830 }
0x1a1a   : > { %v2770_v39 = vadd.f32 %v2768_v13, %v2754_v44  ;;  %v2771_v41 = vadd.f32 %v2769_v42, %v2755_v63  ;;  %v2789_v2 = vpop.permute.xlu1 %2788  ;;  %v2854_v24 = vmul.f32 %v2837_v31, %v2831_v28  ;;  %v2855_v48 = vmul.f32 %v2841_v62, %v2831_v28 }
0x1a1b   : > { %v2856_v61 = vmul.f32 %v2845_v15, %v2831_v28  ;;  %v2857_v58 = vmul.f32 %v2849_v46, %v2831_v28 }
0x1a1c   : > { %vm2773_vm14 = vcmp.ge.f32.partialorder %v2770_v39, 0.0  ;;  %vm2774_vm15 = vcmp.ge.f32.partialorder %v2771_v41, 0.0  ;;  %v2776_v17 = vmul.f32 %v2775_v6, %v2770_v39  ;;  %v2777_v32 = vmul.f32 %v2775_v6, %v2771_v41 }
0x1a1e   : > { %v2778_v19 = vsel %vm2773_vm14, %v2770_v39, %v2776_v17  ;;  %v2779_v29 = vsel %vm2774_vm15, %v2771_v41, %v2777_v32  ;;  %v8325_v32 = vld [vmem:[#allocation29_spill] sm:$0xff] }
0x1a1f   : > { %v2797_v27 = vpop.permute.xlu1 %2796  ;;  %v2782_v3 = vcombine.low %v2778_v19, %v2779_v29  ;;  %v8327_v29 = vld [vmem:[#allocation31_spill] sm:$0xff] }
0x1a20   : > { %v2820_v12 = vmul.f32 %v2803_v9, %v2797_v27  ;;  %v2821_v30 = vmul.f32 %v2807_v8, %v2797_v27  ;;  %v2822_v25 = vmul.f32 %v2811_v36, %v2797_v27  ;;  %v2823_v16 = vmul.f32 %v2815_v38, %v2797_v27 }
0x1a21   : > { %2784 = vst [vmem:[%s7075_s15] sm:$0xff] %v2782_v3  ;;  %v2935_v9 = vstv %s4492_s25  ;;  %s4263_s25 = sshll.u32 %s7075_s15, 4  ;;  %s4264_s25 = int_to_ptr.vmem [resolvable:$true] %s4263_s25 }
0x1a22   : > { %v2824_v49 = vadd.f32 %v2820_v12, %v2789_v2  ;;  %v2825_v23 = vadd.f32 %v2821_v30, %v2789_v2  ;;  %v2826_v5 = vadd.f32 %v2822_v25, %v2789_v2  ;;  %v2827_v56 = vadd.f32 %v2823_v16, %v2789_v2 }
0x1a24   : > { %v2858_v51 = vadd.f32 %v2854_v24, %v2824_v49  ;;  %v2859_v7 = vadd.f32 %v2855_v48, %v2825_v23  ;;  %v2860_v1 = vadd.f32 %v2856_v61, %v2826_v5  ;;  %v2861_v4 = vadd.f32 %v2857_v58, %v2827_v56  ;;  %v2865_v37 = vpop.permute.xlu1 %2864  ;;  %v8328_v48 = vld [vmem:[#allocation32_spill] sm:$0xff] }
0x1a25   : > { %v2888_v18 = vmul.f32 %v2871_v0, %v2865_v37  ;;  %v2889_v22 = vmul.f32 %v2875_v26, %v2865_v37  ;;  %v2890_v14 = vmul.f32 %v2879_v57, %v2865_v37  ;;  %v2891_v45 = vmul.f32 %v2883_v53, %v2865_v37 }
0x1a27   : > { %v2892_v43 = vadd.f32 %v2888_v18, %v2858_v51  ;;  %v2893_v59 = vadd.f32 %v2889_v22, %v2859_v7  ;;  %v2894_v54 = vadd.f32 %v2890_v14, %v2860_v1  ;;  %v2895_v20 = vadd.f32 %v2891_v45, %v2861_v4  ;;  %v7114_v51 = vpop.permute.xlu0 %2961 }
0x1a29   : > { %v2899_v60 = vpop.permute.xlu1 %2898 }
0x1a2a   : > { %v2922_v13 = vmul.f32 %v2905_v50, %v2899_v60  ;;  %v2923_v42 = vmul.f32 %v2909_v11, %v2899_v60  ;;  %v2924_v44 = vmul.f32 %v2913_v55, %v2899_v60  ;;  %v2925_v63 = vmul.f32 %v2917_v10, %v2899_v60 }
0x1a2b   : > { %v7116_v7 = vpop.permute.xlu0 %3023 }
0x1a2c   : > { %v2926_v8 = vadd.f32 %v2922_v13, %v2892_v43  ;;  %v2927_v6 = vadd.f32 %v2923_v42, %v2893_v59  ;;  %v2928_v39 = vadd.f32 %v2924_v44, %v2894_v54  ;;  %v2929_v41 = vadd.f32 %v2925_v63, %v2895_v20 }
0x1a2d   : > { %v5269_v59 = vmov 79  }
0x1a2e   : > { %vm2931_vm0 = vcmp.ge.f32.partialorder %v2926_v8, 0.0  ;;  %vm2932_vm1 = vcmp.ge.f32.partialorder %v2927_v6, 0.0  ;;  %vm2933_vm2 = vcmp.ge.f32.partialorder %v2928_v39, 0.0  ;;  %vm2934_vm3 = vcmp.ge.f32.partialorder %v2929_v41, 0.0  ;;  %v7083_v17 = vpop.permute.xlu1 %2969 }
0x1a2f   : > { %v2936_v2 = vmul.f32 %v2935_v9, %v2926_v8  ;;  %v2937_v36 = vmul.f32 %v2935_v9, %v2927_v6  ;;  %v2938_v31 = vmul.f32 %v2935_v9, %v2928_v39  ;;  %v2939_v38 = vmul.f32 %v2935_v9, %v2929_v41  ;;  %8324 = vst [vmem:[#allocation82_spill] sm:$0xff] %v7083_v17 }
0x1a31   : > { %v2940_v62 = vsel %vm2931_vm0, %v2926_v8, %v2936_v2  ;;  %v2941_v15 = vsel %vm2932_vm1, %v2927_v6, %v2937_v36  ;;  %v2942_v46 = vsel %vm2933_vm2, %v2928_v39, %v2938_v31  ;;  %v2943_v28 = vsel %vm2934_vm3, %v2929_v41, %v2939_v38 }
0x1a32   : > { %v2944_v24 = vmul.f32 %v2940_v62, %v8325_v32  ;;  %v2945_v19 = vmul.f32 %v2941_v15, %v8326_v40  ;;  %v2946_v27 = vmul.f32 %v2942_v46, %v8327_v29  ;;  %v2947_v61 = vmul.f32 %v2943_v28, %v8328_v48 }
0x1a33   : > { %v7089_v12 = vpop.permute.xlu1 %2996  ;;  %v5270_v41 = vmov 80  }
0x1a34   : > { %v2952_v58 = vcombine.low %v2944_v24, %v2945_v19  ;;  %v2953_v3 = vcombine.low %v2946_v27, %v2947_v61  ;;  %8329 = vst [vmem:[#allocation46_spill] sm:$0xff] %v7089_v12  ;;  %v5271_v19 = vmov 81  }
0x1a36   : > { %2957 = vst [vmem:[#allocation2 + $0x8] sm:$0xff] %v2953_v3  ;;  %2956 = vst [vmem:[#allocation2] sm:$0xff] %v2952_v58 }
0x1a38   : > { %v7091_v30 = vpop.permute.xlu1 %3050 }
0x1a3d   : > { %v3075_v25 = vld [vmem:[#allocation2] ss:$4 sm:$0xf]  ;;  %v3078_v16 = vpop.permute.xlu1 %3077  ;;  %v3128_v37 = vld [vmem:[#allocation2 + $0x1] ss:$4 sm:$0xf] }
0x1a3e   : > { %v7094_v0 = vrot.slane %v3075_v25, %v5591_v35  ;;  %v7097_v26 = vrot.slane %v3075_v25, %v5589_v34  ;;  %v7101_v53 = vrot.slane %v3075_v25, %v8323_v52  ;;  %v7105_v23 = vrot.slane %v3075_v25, %v8322_v47  ;;  %v3180_v20 = vld [vmem:[#allocation2 + $0x2] ss:$4 sm:$0xf]  ;;  %v3232_v36 = vld [vmem:[#allocation2 + $0x3] ss:$4 sm:$0xf] }
0x1a3f   : > { %v7123_v18 = vrot.slane %v3128_v37, %v8322_v47  ;;  %v7126_v22 = vrot.slane %v3128_v37, %v5589_v34  ;;  %v7133_v11 = vrot.slane %v3128_v37, %v5591_v35  ;;  %v7139_v10 = vrot.slane %v3128_v37, %v8323_v52 }
0x1a40   : > { %v3102_v57 = vmul.f32 %v7094_v0, %v3078_v16  ;;  %v3101_v49 = vmul.f32 %v7097_v26, %v3078_v16  ;;  %v3104_v5 = vmul.f32 %v7101_v53, %v3078_v16  ;;  %v3103_v56 = vmul.f32 %v7105_v23, %v3078_v16 }
0x1a41   : > { %v7146_v60 = vrot.slane %v3180_v20, %v8322_v47  ;;  %v7149_v13 = vrot.slane %v3180_v20, %v5589_v34  ;;  %v7156_v9 = vrot.slane %v3180_v20, %v5591_v35  ;;  %v7162_v6 = vrot.slane %v3180_v20, %v8323_v52 }
0x1a42   : > { %3111 = vrot.lane.b32.xlu1 %v3102_v57, %s5267_s8  ;;  %3109 = vrot.lane.b32.xlu0 %v3101_v49, %s5267_s8  ;;  %v7169_v31 = vrot.slane %v3232_v36, %v8322_v47  ;;  %v7172_v38 = vrot.slane %v3232_v36, %v5589_v34  ;;  %v7179_v28 = vrot.slane %v3232_v36, %v5591_v35  ;;  %v5272_v25 = vmov 82  }
0x1a43   : > { %8331 = vst [vmem:[#allocation84_spill] sm:$0xff] %v7162_v6  ;;  %v7185_v24 = vrot.slane %v3232_v36, %v8323_v52  ;;  %v5273_v37 = vmov 83   ;;  %v5274_v20 = vmov 84   ;;  %v5275_v36 = vmov 85  }
0x1a44   : > { %8332 = vst [vmem:[#allocation47_spill] sm:$0xff] %v7169_v31  ;;  %8333 = vst [vmem:[#allocation85_spill] sm:$0xff] %v7172_v38 }
0x1a45   : > { %8334 = vst [vmem:[#allocation86_spill] sm:$0xff] %v7179_v28  ;;  %8335 = vst [vmem:[#allocation48_spill] sm:$0xff] %v7185_v24 }
0x1a46   : > { %3115 = vrot.lane.b32.xlu1 %v3104_v5, %s5267_s8  ;;  %3113 = vrot.lane.b32.xlu0 %v3103_v56, %s5267_s8 }
0x1a4a   : > { %3130 = vperm.xlu0 %4846, %v6816_v33  }
0x1a4e   : > { %4847 = vset.pattern.permute.xlu0 %v5268_v21 }
0x1ab4   : > { %v7118_v1 = vpop.permute.xlu0 %3109 }
0x1ab5   : > { %8330 = vst [vmem:[#allocation83_spill] sm:$0xff] %v7118_v1 }
0x1ab8   : > { %v7120_v4 = vpop.permute.xlu0 %3113 }
0x1ac5   : > { %v3131_v14 = vpop.permute.xlu0 %3130 }
0x1ac6   : > { %v3156_v45 = vmul.f32 %v7123_v18, %v3131_v14  ;;  %v3154_v50 = vmul.f32 %v7126_v22, %v3131_v14  ;;  %v3155_v55 = vmul.f32 %v7133_v11, %v3131_v14  ;;  %v3157_v43 = vmul.f32 %v7139_v10, %v3131_v14 }
0x1ac8   : > { %3166 = vrot.lane.b32.xlu0 %v3156_v45, %s5267_s8  ;;  %3162 = vrot.lane.b32.xlu1 %v3154_v50, %s5267_s8 }
0x1acc   : > { %3182 = vperm.xlu0 %4847, %v6816_v33   ;;  %3164 = vrot.lane.b32.xlu1 %v3155_v55, %s5267_s8 }
0x1ad0   : > { %3168 = vrot.lane.b32.xlu1 %v3157_v43, %s5267_s8  ;;  %4848 = vset.pattern.permute.xlu0 %v5269_v59 }
0x1b3a   : > { %v7143_v54 = vpop.permute.xlu0 %3166 }
0x1b47   : > { %v3183_v42 = vpop.permute.xlu0 %3182 }
0x1b48   : > { %v3208_v44 = vmul.f32 %v7146_v60, %v3183_v42  ;;  %v3206_v63 = vmul.f32 %v7149_v13, %v3183_v42  ;;  %v3207_v8 = vmul.f32 %v7156_v9, %v3183_v42  ;;  %v3209_v39 = vmul.f32 %v7162_v6, %v3183_v42 }
0x1b4a   : > { %3218 = vrot.lane.b32.xlu0 %v3208_v44, %s5267_s8  ;;  %3214 = vrot.lane.b32.xlu1 %v3206_v63, %s5267_s8 }
0x1b4e   : > { %3234 = vperm.xlu0 %4848, %v6816_v33   ;;  %3216 = vrot.lane.b32.xlu1 %v3207_v8, %s5267_s8 }
0x1b52   : > { %3220 = vrot.lane.b32.xlu1 %v3209_v39, %s5267_s8  ;;  %4849 = vset.pattern.permute.xlu0 %v5270_v41 }
0x1bbc   : > { %v7166_v2 = vpop.permute.xlu0 %3218 }
0x1bc9   : > { %v3235_v62 = vpop.permute.xlu0 %3234 }
0x1bca   : > { %v3260_v15 = vmul.f32 %v7169_v31, %v3235_v62  ;;  %v3258_v46 = vmul.f32 %v7172_v38, %v3235_v62  ;;  %v3259_v32 = vmul.f32 %v7179_v28, %v3235_v62  ;;  %v3261_v40 = vmul.f32 %v7185_v24, %v3235_v62 }
0x1bcc   : > { %3270 = vrot.lane.b32.xlu0 %v3260_v15, %s5267_s8  ;;  %3266 = vrot.lane.b32.xlu1 %v3258_v46, %s5267_s8 }
0x1bd0   : > { %3284 = vperm.xlu0 %4849, %v6816_v33   ;;  %3268 = vrot.lane.b32.xlu1 %v3259_v32, %s5267_s8 }
0x1bd4   : > { %3272 = vrot.lane.b32.xlu1 %v3261_v40, %s5267_s8  ;;  %4850 = vset.pattern.permute.xlu0 %v5271_v19 }
0x1c3e   : > { %v7189_v29 = vpop.permute.xlu0 %3270 }
0x1c4b   : > { %v3285_v27 = vpop.permute.xlu0 %3284 }
0x1c4c   : > { %v3289_v48 = vmul.f32 %v3285_v27, %v7105_v23  ;;  %v3287_v61 = vmul.f32 %v3285_v27, %v7097_v26  ;;  %v3288_v58 = vmul.f32 %v3285_v27, %v7094_v0  ;;  %v3290_v3 = vmul.f32 %v3285_v27, %v7101_v53 }
0x1c4d   : > { %v5277_v27 = vmov 86  }
0x1c4e   : > { %3299 = vrot.lane.b32.xlu0 %v3289_v48, %s5223_s29  ;;  %3295 = vrot.lane.b32.xlu1 %v3287_v61, %s5223_s29 }
0x1c52   : > { %3313 = vperm.xlu0 %4850, %v6816_v33   ;;  %3297 = vrot.lane.b32.xlu1 %v3288_v58, %s5223_s29 }
0x1c56   : > { %3301 = vrot.lane.b32.xlu1 %v3290_v3, %s5223_s29  ;;  %4851 = vset.pattern.permute.xlu0 %v5272_v25 }
0x1cc0   : > { %v7200_v16 = vpop.permute.xlu0 %3299 }
0x1ccd   : > { %v3314_v57 = vpop.permute.xlu0 %3313 }
0x1cce   : > { %v3318_v49 = vmul.f32 %v3314_v57, %v7123_v18  ;;  %v3316_v5 = vmul.f32 %v3314_v57, %v7126_v22  ;;  %v3317_v56 = vmul.f32 %v3314_v57, %v7133_v11  ;;  %v3319_v21 = vmul.f32 %v3314_v57, %v7139_v10 }
0x1cd0   : > { %3328 = vrot.lane.b32.xlu0 %v3318_v49, %s5223_s29  ;;  %3324 = vrot.lane.b32.xlu1 %v3316_v5, %s5223_s29  ;;  %v5278_v49 = vmov 87  }
0x1cd4   : > { %3342 = vperm.xlu0 %4851, %v6816_v33   ;;  %3326 = vrot.lane.b32.xlu1 %v3317_v56, %s5223_s29 }
0x1cd8   : > { %3330 = vrot.lane.b32.xlu1 %v3319_v21, %s5223_s29  ;;  %4852 = vset.pattern.permute.xlu0 %v5273_v37 }
0x1d42   : > { %v7211_v14 = vpop.permute.xlu0 %3328 }
0x1d4f   : > { %v3343_v45 = vpop.permute.xlu0 %3342 }
0x1d50   : > { %v3347_v50 = vmul.f32 %v3343_v45, %v7146_v60  ;;  %v3345_v55 = vmul.f32 %v3343_v45, %v7149_v13  ;;  %v3346_v43 = vmul.f32 %v3343_v45, %v7156_v9  ;;  %v3348_v59 = vmul.f32 %v3343_v45, %v7162_v6 }
0x1d52   : > { %3357 = vrot.lane.b32.xlu0 %v3347_v50, %s5223_s29  ;;  %3353 = vrot.lane.b32.xlu1 %v3345_v55, %s5223_s29  ;;  %v5279_v55 = vmov 88  }
0x1d56   : > { %3371 = vperm.xlu0 %4852, %v6816_v33   ;;  %3355 = vrot.lane.b32.xlu1 %v3346_v43, %s5223_s29  ;;  %v7266_v43 = vpop.permute.xlu1 %3111 }
0x1d5a   : > { %3359 = vrot.lane.b32.xlu1 %v3348_v59, %s5223_s29  ;;  %4853 = vset.pattern.permute.xlu0 %v5274_v20  ;;  %v7268_v59 = vpop.permute.xlu1 %3115 }
0x1d5e   : > { %v7270_v20 = vpop.permute.xlu1 %3162 }
0x1d5f   : > { %8336 = vst [vmem:[#allocation88_spill] sm:$0xff] %v7270_v20 }
0x1dc4   : > { %v7222_v42 = vpop.permute.xlu0 %3357 }
0x1dd1   : > { %v3372_v44 = vpop.permute.xlu0 %3371 }
0x1dd2   : > { %v3376_v63 = vmul.f32 %v3372_v44, %v7169_v31  ;;  %v3374_v8 = vmul.f32 %v3372_v44, %v7172_v38  ;;  %v3375_v39 = vmul.f32 %v3372_v44, %v7179_v28  ;;  %v3377_v41 = vmul.f32 %v3372_v44, %v7185_v24  ;;  %v7272_v44 = vpop.permute.xlu1 %3164 }
0x1dd4   : > { %3386 = vrot.lane.b32.xlu0 %v3376_v63, %s5223_s29  ;;  %3382 = vrot.lane.b32.xlu1 %v3374_v8, %s5223_s29 }
0x1dd6   : > { %v7274_v63 = vpop.permute.xlu1 %3168 }
0x1dd8   : > { %3400 = vperm.xlu0 %4853, %v6816_v33   ;;  %3384 = vrot.lane.b32.xlu1 %v3375_v39, %s5223_s29 }
0x1dda   : > { %v7276_v8 = vpop.permute.xlu1 %3214 }
0x1ddb   : > { %8337 = vst [vmem:[#allocation89_spill] sm:$0xff] %v7276_v8  ;;  %v7344_v8 = vld [vmem:[#allocation2 + $0x2] ss:$4 sm:$0x7] }
0x1ddc   : > { %3388 = vrot.lane.b32.xlu1 %v3377_v41, %s5223_s29  ;;  %4854 = vset.pattern.permute.xlu0 %v5275_v36  ;;  %s5281_s29 = smov 109  }
0x1e46   : > { %v7233_v62 = vpop.permute.xlu0 %3386 }
0x1e53   : > { %v3401_v15 = vpop.permute.xlu0 %3400 }
0x1e54   : > { %v3405_v46 = vmul.f32 %v3401_v15, %v7105_v23  ;;  %v3403_v32 = vmul.f32 %v3401_v15, %v7097_v26  ;;  %v3404_v40 = vmul.f32 %v3401_v15, %v7094_v0  ;;  %v3406_v19 = vmul.f32 %v3401_v15, %v7101_v53 }
0x1e56   : > { %3415 = vrot.lane.b32.xlu0 %v3405_v46, %s5276_s12  ;;  %3411 = vrot.lane.b32.xlu1 %v3403_v32, %s5276_s12 }
0x1e5a   : > { %3430 = vperm.xlu0 %4854, %v6816_v33   ;;  %3413 = vrot.lane.b32.xlu1 %v3404_v40, %s5276_s12 }
0x1e5e   : > { %3417 = vrot.lane.b32.xlu1 %v3406_v19, %s5276_s12  ;;  %4855 = vset.pattern.permute.xlu0 %v5277_v27 }
0x1ec8   : > { %v7244_v48 = vpop.permute.xlu0 %3415 }
0x1ed5   : > { %v3431_v61 = vpop.permute.xlu0 %3430 }
0x1ed6   : > { %v3435_v58 = vmul.f32 %v3431_v61, %v7123_v18  ;;  %v3433_v3 = vmul.f32 %v3431_v61, %v7126_v22  ;;  %v3434_v25 = vmul.f32 %v3431_v61, %v7133_v11  ;;  %v3436_v57 = vmul.f32 %v3431_v61, %v7139_v10 }
0x1ed8   : > { %3445 = vrot.lane.b32.xlu0 %v3435_v58, %s5276_s12  ;;  %3441 = vrot.lane.b32.xlu1 %v3433_v3, %s5276_s12  ;;  %v7297_v58 = vld [vmem:[#allocation10] sm:$0xf] }
0x1edc   : > { %3459 = vperm.xlu0 %4855, %v6816_v33   ;;  %3443 = vrot.lane.b32.xlu1 %v3434_v25, %s5276_s12 }
0x1ee0   : > { %3447 = vrot.lane.b32.xlu1 %v3436_v57, %s5276_s12  ;;  %4856 = vset.pattern.permute.xlu0 %v5278_v49  ;;  %v5280_v57 = vmov 89  }
0x1f4a   : > { %v7255_v5 = vpop.permute.xlu0 %3445 }
0x1f57   : > { %v3460_v56 = vpop.permute.xlu0 %3459 }
0x1f58   : > { %v3464_v21 = vmul.f32 %v3460_v56, %v7146_v60  ;;  %v3462_v37 = vmul.f32 %v3460_v56, %v7149_v13  ;;  %v3463_v45 = vmul.f32 %v3460_v56, %v7156_v9  ;;  %v3465_v50 = vmul.f32 %v3460_v56, %v7162_v6 }
0x1f5a   : > { %3474 = vrot.lane.b32.xlu0 %v3464_v21, %s5276_s12  ;;  %3470 = vrot.lane.b32.xlu1 %v3462_v37, %s5276_s12 }
0x1f5e   : > { %3488 = vperm.xlu0 %4856, %v6816_v33   ;;  %3472 = vrot.lane.b32.xlu1 %v3463_v45, %s5276_s12  ;;  %v7278_v33 = vpop.permute.xlu1 %3216 }
0x1f62   : > { %3476 = vrot.lane.b32.xlu1 %v3465_v50, %s5276_s12  ;;  %4857 = vset.pattern.permute.xlu0 %v5279_v55  ;;  %v7280_v39 = vpop.permute.xlu1 %3220 }
0x1f66   : > { %v7282_v41 = vpop.permute.xlu1 %3266 }
0x1f67   : > { %8338 = vst [vmem:[#allocation49_spill] sm:$0xff] %v7282_v41 }
0x1f6a   : > { %v7284_v36 = vpop.permute.xlu1 %3268 }
0x1f6e   : > { %v7288_v32 = vpop.permute.xlu1 %3272 }
0x1f72   : > { %v7294_v27 = vpop.permute.xlu1 %3295 }
0x1f73   : > { %8339 = vst [vmem:[#allocation90_spill] sm:$0xff] %v7294_v27 }
0x1f76   : > { %v7302_v25 = vpop.permute.xlu1 %3297 }
0x1f7a   : > { %v7305_v49 = vpop.permute.xlu1 %3301 }
0x1f7e   : > { %v7307_v56 = vpop.permute.xlu1 %3324 }
0x1f7f   : > { %8340 = vst [vmem:[#allocation91_spill] sm:$0xff] %v7307_v56  ;;  %v7335_v56 = vld [vmem:[#allocation2 + $0x1] ss:$4 sm:$0x7] }
0x1f80   : > { %8345 = vst [vmem:[#allocation94_spill] sm:$0xff] %v7335_v56  ;;  %v3007_v41 = vrot.slane %v7335_v56, %v5591_v35  ;;  %v3011_v34 = vrot.slane %v7335_v56, %v8322_v47 }
0x1f82   : > { %v7309_v21 = vpop.permute.xlu1 %3326 }
0x1f86   : > { %v7311_v37 = vpop.permute.xlu1 %3330 }
0x1f8a   : > { %v7313_v45 = vpop.permute.xlu1 %3353 }
0x1f8b   : > { %8341 = vst [vmem:[#allocation50_spill] sm:$0xff] %v7313_v45 }
0x1f8e   : > { %v7315_v50 = vpop.permute.xlu1 %3355 }
0x1f92   : > { %v7317_v55 = vpop.permute.xlu1 %3359 }
0x1fcc   : > { %v7286_v15 = vpop.permute.xlu0 %3474 }
0x1fd9   : > { %v3489_v46 = vpop.permute.xlu0 %3488 }
0x1fda   : > { %v3491_v40 = vmul.f32 %v3489_v46, %v7172_v38  ;;  %v3493_v19 = vmul.f32 %v3489_v46, %v7169_v31  ;;  %v3492_v61 = vmul.f32 %v3489_v46, %v7179_v28  ;;  %v3494_v3 = vmul.f32 %v3489_v46, %v7185_v24  ;;  %v7319_v46 = vpop.permute.xlu1 %3382 }
0x1fdb   : > { %8342 = vst [vmem:[#allocation92_spill] sm:$0xff] %v7319_v46  ;;  %v3016_v24 = vmul.f32 %v3007_v41, %v7089_v12  ;;  %v3017_v38 = vmul.f32 %v3011_v34, %v7089_v12  ;;  %v3119_v34 = vsel %vm3117_vm5, %v7266_v43, %v7120_v4 }
0x1fdc   : > { %3503 = vrot.lane.b32.xlu0 %v3493_v19, %s5276_s12  ;;  %3499 = vrot.lane.b32.xlu1 %v3491_v40, %s5276_s12 }
0x1fde   : > { %v7321_v40 = vpop.permute.xlu1 %3384 }
0x1fe0   : > { %3517 = vperm.xlu0 %4857, %v7297_v58   ;;  %3501 = vrot.lane.b32.xlu1 %v3492_v61, %s5276_s12 }
0x1fe2   : > { %v7323_v19 = vpop.permute.xlu1 %3388 }
0x1fe4   : > { %3505 = vrot.lane.b32.xlu1 %v3494_v3, %s5276_s12  ;;  %4858 = vset.pattern.permute.xlu0 %v5280_v57  ;;  %v7329_v57 = vld [vmem:[#allocation2] ss:$4 sm:$0x7] }
0x1fe5   : > { %8344 = vst [vmem:[#allocation51_spill] sm:$0xff] %v7329_v57  ;;  %v2980_v52 = vrot.slane %v7329_v57, %v5591_v35  ;;  %v2984_v46 = vrot.slane %v7329_v57, %v8322_v47  ;;  %v3034_v57 = vrot.slane %v7344_v8, %v5591_v35 }
0x1fe6   : > { %v7325_v61 = vpop.permute.xlu1 %3411 }
0x1fe7   : > { %8343 = vst [vmem:[#allocation93_spill] sm:$0xff] %v7325_v61  ;;  %v2989_v27 = vmul.f32 %v2980_v52, %v7083_v17  ;;  %v2990_v20 = vmul.f32 %v2984_v46, %v7083_v17  ;;  %v7353_v52 = vld [vmem:[#allocation2 + $0x3] ss:$4 sm:$0x7]  ;;  %v3038_v46 = vrot.slane %v7344_v8, %v8322_v47  ;;  %v3043_v41 = vmul.f32 %v3034_v57, %v7116_v7 }
0x1fe8   : > { %v3065_v6 = vrot.slane %v7353_v52, %v8322_v47 }
0x1fe9   : > { %v2992_v1 = vadd.f32 %v2989_v27, %v7114_v51  ;;  %v2993_v28 = vadd.f32 %v2990_v20, %v7114_v51  ;;  %v3061_v27 = vrot.slane %v7353_v52, %v5591_v35 }
0x1fea   : > { %v7327_v3 = vpop.permute.xlu1 %3413 }
0x1feb   : > { %v3019_v31 = vadd.f32 %v3016_v24, %v2992_v1  ;;  %v3020_v56 = vadd.f32 %v3017_v38, %v2993_v28  ;;  %v3070_v20 = vmul.f32 %v3061_v27, %v7091_v30  ;;  %v3044_v1 = vmul.f32 %v3038_v46, %v7116_v7 }
0x1fec   : > { %v3171_v38 = vsel %vm3117_vm5, %v7272_v44, %v7143_v54  ;;  %v3120_v27 = vsel %vm3117_vm5, %v7120_v4, %v7268_v59  ;;  %v3223_v46 = vsel %vm3117_vm5, %v7278_v33, %v7166_v2  ;;  %v3224_v4 = vsel %vm3117_vm5, %v7166_v2, %v7280_v39 }
0x1fed   : > { %v3046_v17 = vadd.f32 %v3043_v41, %v3019_v31  ;;  %v3047_v35 = vadd.f32 %v3044_v1, %v3020_v56  ;;  %v3071_v31 = vmul.f32 %v3065_v6, %v7091_v30  ;;  %v3304_v59 = vsel %vm1944_vm4, %v7302_v25, %v7200_v16 }
0x1fee   : > { %v7333_v45 = vpop.permute.xlu1 %3417  ;;  %v3305_v2 = vsel %vm1944_vm4, %v7200_v16, %v7305_v49  ;;  %v3362_v39 = vsel %vm1944_vm4, %v7315_v50, %v7222_v42  ;;  %v3363_v16 = vsel %vm1944_vm4, %v7222_v42, %v7317_v55  ;;  %v3421_v49 = vsel %vm3419_vm8, %v7327_v3, %v7244_v48 }
0x1fef   : > { %v3073_v12 = vadd.f32 %v3070_v20, %v3046_v17  ;;  %v3074_v41 = vadd.f32 %v3071_v31, %v3047_v35  ;;  %v3172_v17 = vsel %vm3117_vm5, %v7143_v54, %v7274_v63  ;;  %v3276_v54 = vsel %vm3117_vm5, %v7189_v29, %v7288_v32 }
0x1ff0   : > { %v3333_v63 = vsel %vm1944_vm4, %v7309_v21, %v7211_v14  ;;  %v3391_v32 = vsel %vm1944_vm4, %v7321_v40, %v7233_v62  ;;  %v3422_v42 = vsel %vm3419_vm8, %v7244_v48, %v7333_v45 }
0x1ff1   : > { %v3125_v28 = vadd.f32 %v3119_v34, %v3073_v12  ;;  %v3275_v12 = vsel %vm3117_vm5, %v7284_v36, %v7189_v29  ;;  %v3126_v6 = vadd.f32 %v3120_v27, %v3074_v41  ;;  %v3334_v29 = vsel %vm1944_vm4, %v7211_v14, %v7311_v37 }
0x1ff2   : > { %v7342_v61 = vpop.permute.xlu1 %3441  ;;  %v3392_v14 = vsel %vm1944_vm4, %v7233_v62, %v7323_v19 }
0x1ff3   : > { %8346 = vst [vmem:[#allocation95_spill] sm:$0xff] %v7342_v61  ;;  %v3177_v56 = vadd.f32 %v3171_v38, %v3125_v28  ;;  %v3178_v35 = vadd.f32 %v3172_v17, %v3126_v6 }
0x1ff5   : > { %v3229_v20 = vadd.f32 %v3223_v46, %v3177_v56  ;;  %v3230_v38 = vadd.f32 %v3224_v4, %v3178_v35 }
0x1ff6   : > { %v7356_v61 = vpop.permute.xlu1 %3443 }
0x1ff7   : > { %v3281_v1 = vadd.f32 %v3275_v12, %v3229_v20  ;;  %v3282_v28 = vadd.f32 %v3276_v54, %v3230_v38  ;;  %v3450_v37 = vsel %vm3419_vm8, %v7356_v61, %v7255_v5 }
0x1ff9   : > { %v3310_v31 = vadd.f32 %v3304_v59, %v3281_v1  ;;  %v3311_v46 = vadd.f32 %v3305_v2, %v3282_v28 }
0x1ffa   : > { %v3448_v24 = vpop.permute.xlu1 %3447 }
0x1ffb   : > { %v3339_v27 = vadd.f32 %v3333_v63, %v3310_v31  ;;  %v3340_v17 = vadd.f32 %v3334_v29, %v3311_v46  ;;  %v3451_v62 = vsel %vm3419_vm8, %v7255_v5, %v3448_v24  ;;  %v5282_v46 = vmov 90  }
0x1ffd   : > { %v3368_v41 = vadd.f32 %v3362_v39, %v3339_v27  ;;  %v3369_v6 = vadd.f32 %v3363_v16, %v3340_v17 }
0x1ffe   : > { %v7375_v57 = vpop.permute.xlu1 %3470 }
0x1fff   : > { %v3397_v12 = vadd.f32 %v3391_v32, %v3368_v41  ;;  %v3398_v59 = vadd.f32 %v3392_v14, %v3369_v6 }
0x2001   : > { %v3427_v20 = vadd.f32 %v3421_v49, %v3397_v12  ;;  %v3428_v19 = vadd.f32 %v3422_v42, %v3398_v59 }
0x2002   : > { %v7395_v34 = vpop.permute.xlu1 %3472 }
0x2003   : > { %v3479_v55 = vsel %vm3419_vm8, %v7395_v34, %v7286_v15  ;;  %v3456_v35 = vadd.f32 %v3450_v37, %v3427_v20  ;;  %v3457_v45 = vadd.f32 %v3451_v62, %v3428_v19 }
0x2005   : > { %v3485_v1 = vadd.f32 %v3479_v55, %v3456_v35  ;;  %v5283_v35 = vmov 91  }
0x2006   : > { %v3477_v56 = vpop.permute.xlu1 %3476 }
0x2007   : > { %v3480_v38 = vsel %vm3419_vm8, %v7286_v15, %v3477_v56 }
0x2008   : > { %v3486_v2 = vadd.f32 %v3480_v38, %v3457_v45 }
0x204e   : > { %v7427_v4 = vpop.permute.xlu1 %3499  ;;  %v3504_v54 = vpop.permute.xlu0 %3503 }
0x2052   : > { %v7437_v63 = vpop.permute.xlu1 %3501 }
0x2053   : > { %v3508_v48 = vsel %vm3419_vm8, %v7437_v63, %v3504_v54 }
0x2054   : > { %v3514_v31 = vadd.f32 %v3508_v48, %v3485_v1 }
0x2056   : > { %v3506_v39 = vpop.permute.xlu1 %3505 }
0x2057   : > { %v3509_v28 = vsel %vm3419_vm8, %v3504_v54, %v3506_v39 }
0x2058   : > { %v3515_v27 = vadd.f32 %v3509_v28, %v3486_v2 }
0x205b   : > { %v3518_v29 = vpop.permute.xlu0 %3517 }
0x205c   : > { %v3520_v5 = vmul.f32 %v3518_v29, %v7097_v26  ;;  %v3522_v24 = vmul.f32 %v3518_v29, %v7105_v23  ;;  %v3521_v15 = vmul.f32 %v3518_v29, %v7094_v0  ;;  %v3523_v32 = vmul.f32 %v3518_v29, %v7101_v53  ;;  %v8347_v29 = vld [vmem:[#allocation84_spill] sm:$0xff] }
0x205e   : > { %3532 = vrot.lane.b32.xlu0 %v3522_v24, %s5281_s29  ;;  %3528 = vrot.lane.b32.xlu1 %v3520_v5, %s5281_s29  ;;  %v5284_v24 = vmov 92  }
0x2062   : > { %3547 = vperm.xlu0 %4858, %v7297_v58   ;;  %3530 = vrot.lane.b32.xlu1 %v3521_v15, %s5281_s29 }
0x2066   : > { %3534 = vrot.lane.b32.xlu1 %v3523_v32, %s5281_s29  ;;  %4859 = vset.pattern.permute.xlu0 %v5282_v46 }
0x20d0   : > { %v7453_v41 = vpop.permute.xlu1 %3528  ;;  %v3533_v56 = vpop.permute.xlu0 %3532 }
0x20d4   : > { %v7455_v16 = vpop.permute.xlu1 %3530 }
0x20d5   : > { %v3538_v49 = vsel %vm3536_vm9, %v7455_v16, %v3533_v56 }
0x20d6   : > { %v3544_v17 = vadd.f32 %v3538_v49, %v3514_v31 }
0x20d8   : > { %v3535_v12 = vpop.permute.xlu1 %3534 }
0x20d9   : > { %v3539_v14 = vsel %vm3536_vm9, %v3533_v56, %v3535_v12 }
0x20da   : > { %v3545_v37 = vadd.f32 %v3539_v14, %v3515_v27 }
0x20dd   : > { %v3548_v6 = vpop.permute.xlu0 %3547 }
0x20de   : > { %v3550_v20 = vmul.f32 %v3548_v6, %v7126_v22  ;;  %v3552_v42 = vmul.f32 %v3548_v6, %v7123_v18  ;;  %v3551_v55 = vmul.f32 %v3548_v6, %v7133_v11  ;;  %v3553_v59 = vmul.f32 %v3548_v6, %v7139_v10  ;;  %v8348_v6 = vld [vmem:[#allocation85_spill] sm:$0xff] }
0x20e0   : > { %3562 = vrot.lane.b32.xlu0 %v3552_v42, %s5281_s29  ;;  %3558 = vrot.lane.b32.xlu1 %v3550_v20, %s5281_s29  ;;  %v8349_v42 = vld [vmem:[#allocation47_spill] sm:$0xff] }
0x20e4   : > { %3576 = vperm.xlu0 %4859, %v7297_v58   ;;  %3560 = vrot.lane.b32.xlu1 %v3551_v55, %s5281_s29 }
0x20e8   : > { %3564 = vrot.lane.b32.xlu1 %v3553_v59, %s5281_s29  ;;  %4860 = vset.pattern.permute.xlu0 %v5283_v35  ;;  %v8350_v59 = vld [vmem:[#allocation86_spill] sm:$0xff] }
0x2152   : > { %v7469_v62 = vpop.permute.xlu1 %3558  ;;  %v3563_v19 = vpop.permute.xlu0 %3562 }
0x2156   : > { %v7471_v1 = vpop.permute.xlu1 %3560 }
0x2157   : > { %v3567_v54 = vsel %vm3536_vm9, %v7471_v1, %v3563_v19 }
0x2158   : > { %v3573_v38 = vadd.f32 %v3567_v54, %v3544_v17 }
0x215a   : > { %v3565_v48 = vpop.permute.xlu1 %3564 }
0x215b   : > { %v3568_v45 = vsel %vm3536_vm9, %v3563_v19, %v3565_v48  ;;  %v8351_v19 = vld [vmem:[#allocation48_spill] sm:$0xff] }
0x215c   : > { %v3574_v31 = vadd.f32 %v3568_v45, %v3545_v37 }
0x215f   : > { %v3577_v2 = vpop.permute.xlu0 %3576 }
0x2160   : > { %v3579_v39 = vmul.f32 %v3577_v2, %v7149_v13  ;;  %v3581_v28 = vmul.f32 %v3577_v2, %v7146_v60  ;;  %v3580_v27 = vmul.f32 %v3577_v2, %v7156_v9  ;;  %v3582_v5 = vmul.f32 %v3577_v2, %v8347_v29 }
0x2162   : > { %3591 = vrot.lane.b32.xlu0 %v3581_v28, %s5281_s29  ;;  %3587 = vrot.lane.b32.xlu1 %v3579_v39, %s5281_s29 }
0x2166   : > { %3605 = vperm.xlu0 %4860, %v7297_v58   ;;  %3589 = vrot.lane.b32.xlu1 %v3580_v27, %s5281_s29 }
0x216a   : > { %3593 = vrot.lane.b32.xlu1 %v3582_v5, %s5281_s29  ;;  %4861 = vset.pattern.permute.xlu0 %v5284_v24 }
0x21d4   : > { %v7485_v15 = vpop.permute.xlu1 %3587  ;;  %v3592_v32 = vpop.permute.xlu0 %3591 }
0x21d8   : > { %v7487_v46 = vpop.permute.xlu1 %3589 }
0x21d9   : > { %v3596_v56 = vsel %vm3536_vm9, %v7487_v46, %v3592_v32 }
0x21da   : > { %v3602_v49 = vadd.f32 %v3596_v56, %v3573_v38  ;;  %v5285_v38 = vmov 93  }
0x21dc   : > { %v3594_v17 = vpop.permute.xlu1 %3593 }
0x21dd   : > { %v3597_v12 = vsel %vm3536_vm9, %v3592_v32, %v3594_v17 }
0x21de   : > { %v3603_v14 = vadd.f32 %v3597_v12, %v3574_v31  ;;  %v5287_v12 = vmov 94  }
0x21e1   : > { %v3606_v37 = vpop.permute.xlu0 %3605 }
0x21e2   : > { %v3608_v20 = vmul.f32 %v3606_v37, %v8348_v6  ;;  %v3610_v55 = vmul.f32 %v3606_v37, %v8349_v42  ;;  %v3609_v35 = vmul.f32 %v3606_v37, %v8350_v59  ;;  %v3611_v54 = vmul.f32 %v3606_v37, %v8351_v19  ;;  %v8353_v37 = vld [vmem:[#allocation51_spill] sm:$0xff] }
0x21e4   : > { %3620 = vrot.lane.b32.xlu0 %v3610_v55, %s5281_s29  ;;  %3616 = vrot.lane.b32.xlu1 %v3608_v20, %s5281_s29  ;;  %v8354_v55 = vld [vmem:[#allocation82_spill] sm:$0xff] }
0x21e8   : > { %3634 = vperm.xlu0 %4861, %v7297_v58   ;;  %3618 = vrot.lane.b32.xlu1 %v3609_v35, %s5281_s29 }
0x21ec   : > { %3622 = vrot.lane.b32.xlu1 %v3611_v54, %s5281_s29  ;;  %4862 = vset.pattern.permute.xlu0 %v5285_v38  ;;  %v8355_v54 = vld [vmem:[#allocation94_spill] sm:$0xff]  ;;  %s7782_s29 = scalar_lea.hbm %s7916_s9, %s4505_s27 }
0x2256   : > { %v7501_v48 = vpop.permute.xlu1 %3616  ;;  %v3621_v45 = vpop.permute.xlu0 %3620 }
0x225a   : > { %v3619_v31 = vpop.permute.xlu1 %3618 }
0x225b   : > { %v3625_v2 = vsel %vm3536_vm9, %v3619_v31, %v3621_v45 }
0x225c   : > { %v7504_v39 = vadd.f32 %v3625_v2, %v3602_v49  ;;  %v8356_v2 = vld [vmem:[#allocation46_spill] sm:$0xff] }
0x225e   : > { %v3623_v28 = vpop.permute.xlu1 %3622 }
0x225f   : > { %v3626_v27 = vsel %vm3536_vm9, %v3621_v45, %v3623_v28 }
0x2260   : > { %v7507_v5 = vadd.f32 %v3626_v27, %v3603_v14  ;;  %v8352_v14 = vld [vmem:[#allocation25_spill] sm:$0xff] }
0x2261   : > { %v2976_v20 = vrot.slane %v8353_v37, %v8352_v14  ;;  %v3003_v38 = vrot.slane %v8355_v54, %v8352_v14  ;;  %v3030_v27 = vrot.slane %v7344_v8, %v8352_v14  ;;  %v8359_v8 = vld [vmem:[#allocation89_spill] sm:$0xff] }
0x2262   : > { %v3222_v54 = vsel %vm3117_vm5, %v8359_v8, %v7278_v33 }
0x2263   : > { %v3635_v24 = vpop.permute.xlu0 %3634  ;;  %v2988_v35 = vmul.f32 %v2976_v20, %v8354_v55  ;;  %v3015_v28 = vmul.f32 %v3003_v38, %v8356_v2 }
0x2264   : > { %v3637_v32 = vmul.f32 %v3635_v24, %v7097_v26  ;;  %v3639_v56 = vmul.f32 %v3635_v24, %v7105_v23  ;;  %v3638_v17 = vmul.f32 %v3635_v24, %v7094_v0  ;;  %v3640_v49 = vmul.f32 %v3635_v24, %v7101_v53 }
0x2265   : > { %v2991_v45 = vadd.f32 %v2988_v35, %v7114_v51  ;;  %v8358_v51 = vld [vmem:[#allocation88_spill] sm:$0xff] }
0x2266   : > { %3649 = vrot.lane.b32.xlu0 %v3639_v56, %s5286_s26  ;;  %3645 = vrot.lane.b32.xlu1 %v3637_v32, %s5286_s26  ;;  %v3057_v32 = vrot.slane %v7353_v52, %v8352_v14  ;;  %v3042_v56 = vmul.f32 %v3030_v27, %v7116_v7  ;;  %v3170_v55 = vsel %vm3117_vm5, %v8358_v51, %v7272_v44  ;;  %v8360_v7 = vld [vmem:[#allocation49_spill] sm:$0xff] }
0x2267   : > { %v3018_v24 = vadd.f32 %v3015_v28, %v2991_v45  ;;  %v3274_v38 = vsel %vm3117_vm5, %v8360_v7, %v7284_v36  ;;  %v8361_v45 = vld [vmem:[#allocation90_spill] sm:$0xff]  ;;  %v8362_v28 = vld [vmem:[#allocation91_spill] sm:$0xff] }
0x2268   : > { %v3332_v44 = vsel %vm1944_vm4, %v8362_v28, %v7309_v21 }
0x226a   : > { %3664 = vperm.xlu0 %4862, %v7297_v58   ;;  %3647 = vrot.lane.b32.xlu1 %v3638_v17, %s5286_s26  ;;  %v3045_v17 = vadd.f32 %v3042_v56, %v3018_v24  ;;  %v8363_v24 = vld [vmem:[#allocation50_spill] sm:$0xff]  ;;  %v8364_v56 = vld [vmem:[#allocation92_spill] sm:$0xff] }
0x226b   : > { %v3361_v33 = vsel %vm1944_vm4, %v8363_v24, %v7315_v50  ;;  %v3390_v36 = vsel %vm1944_vm4, %v8364_v56, %v7321_v40  ;;  %v3478_v50 = vsel %vm3419_vm8, %v7375_v57, %v7395_v34  ;;  %v3507_v40 = vsel %vm3419_vm8, %v7427_v4, %v7437_v63 }
0x226c   : > { %v3595_v57 = vsel %vm3536_vm9, %v7485_v15, %v7487_v46  ;;  %v3624_v4 = vsel %vm3536_vm9, %v7501_v48, %v3619_v31 }
0x226e   : > { %3651 = vrot.lane.b32.xlu1 %v3640_v49, %s5286_s26  ;;  %4863 = vset.pattern.permute.xlu0 %v5287_v12  ;;  %v3069_v49 = vmul.f32 %v3057_v32, %v7091_v30  ;;  %v8357_v12 = vld [vmem:[#allocation83_spill] sm:$0xff] }
0x226f   : > { %v3118_v37 = vsel %vm3117_vm5, %v8357_v12, %v7266_v43  ;;  %v3303_v43 = vsel %vm1944_vm4, %v8361_v45, %v7302_v25  ;;  %vm3653_vm4 = vcmask 883712  }
0x2270   : > { %v3072_v20 = vadd.f32 %v3069_v49, %v3045_v17  ;;  %v8365_v49 = vld [vmem:[#allocation93_spill] sm:$0xff] }
0x2271   : > { %v3420_v25 = vsel %vm3419_vm8, %v8365_v49, %v7327_v3  ;;  %v3537_v3 = vsel %vm3536_vm9, %v7453_v41, %v7455_v16 }
0x2272   : > { %v3124_v35 = vadd.f32 %v3118_v37, %v3072_v20  ;;  %v8366_v37 = vld [vmem:[#allocation95_spill] sm:$0xff] }
0x2273   : > { %v3449_v21 = vsel %vm3419_vm8, %v8366_v37, %v7356_v61  ;;  %v3566_v61 = vsel %vm3536_vm9, %v7469_v62, %v7471_v1 }
0x2274   : > { %v3176_v52 = vadd.f32 %v3170_v55, %v3124_v35 }
0x2276   : > { %v3228_v30 = vadd.f32 %v3222_v54, %v3176_v52 }
0x2278   : > { %v3280_v2 = vadd.f32 %v3274_v38, %v3228_v30 }
0x227a   : > { %v3309_v27 = vadd.f32 %v3303_v43, %v3280_v2 }
0x227c   : > { %v3338_v32 = vadd.f32 %v3332_v44, %v3309_v27 }
0x227e   : > { %v3367_v17 = vadd.f32 %v3361_v33, %v3338_v32 }
0x2280   : > { %v3396_v12 = vadd.f32 %v3390_v36, %v3367_v17 }
0x2282   : > { %v3426_v20 = vadd.f32 %v3420_v25, %v3396_v12 }
0x2284   : > { %v3455_v51 = vadd.f32 %v3449_v21, %v3426_v20  ;;  %v5289_v20 = vmov 96  }
0x2286   : > { %v3484_v55 = vadd.f32 %v3478_v50, %v3455_v51  ;;  %v5290_v50 = vmov 97   ;;  %v5291_v51 = vmov 99  }
0x2287   : > { %4866 = vset.pattern.permute.xlu1 %v5290_v50 }
0x2288   : > { %v3513_v35 = vadd.f32 %v3507_v40, %v3484_v55  ;;  %v5292_v40 = vmov 102   ;;  %v5293_v55 = vmov 105  }
0x228a   : > { %v3543_v8 = vadd.f32 %v3537_v3, %v3513_v35  ;;  %v8367_v3 = vmov 8  }
0x228c   : > { %v3572_v34 = vadd.f32 %v3566_v61, %v3543_v8 }
0x228e   : > { %v3601_v63 = vadd.f32 %v3595_v57, %v3572_v34 }
0x2290   : > { %v3630_v52 = vadd.f32 %v3624_v4, %v3601_v63 }
0x22d8   : > { %v3646_v54 = vpop.permute.xlu1 %3645  ;;  %v3650_v7 = vpop.permute.xlu0 %3649 }
0x22dc   : > { %v3648_v41 = vpop.permute.xlu1 %3647 }
0x22dd   : > { %v3654_v16 = vsel %vm3653_vm4, %v3646_v54, %v3648_v41  ;;  %v3655_v38 = vsel %vm3653_vm4, %v3648_v41, %v3650_v7 }
0x22de   : > { %v3660_v62 = vadd.f32 %v3654_v16, %v3630_v52  ;;  %v3661_v1 = vadd.f32 %v3655_v38, %v7504_v39 }
0x22e0   : > { %v3652_v30 = vpop.permute.xlu1 %3651 }
0x22e1   : > { %v3656_v15 = vsel %vm3653_vm4, %v3650_v7, %v3652_v30 }
0x22e2   : > { %v3662_v46 = vadd.f32 %v3656_v15, %v7507_v5  ;;  %v5288_v5 = vmov 95  }
0x22e5   : > { %v3665_v45 = vpop.permute.xlu0 %3664 }
0x22e6   : > { %v3667_v48 = vmul.f32 %v3665_v45, %v7126_v22  ;;  %v3669_v31 = vmul.f32 %v3665_v45, %v7123_v18  ;;  %v3668_v43 = vmul.f32 %v3665_v45, %v7133_v11  ;;  %v3670_v39 = vmul.f32 %v3665_v45, %v7139_v10 }
0x22e7   : > { %v5295_v45 = vmov 100  }
0x22e8   : > { %3679 = vrot.lane.b32.xlu0 %v3669_v31, %s5286_s26  ;;  %3675 = vrot.lane.b32.xlu1 %v3667_v48, %s5286_s26  ;;  %v5296_v48 = vmov 101   ;;  %v5297_v31 = vmov 103  }
0x22ec   : > { %3693 = vperm.xlu0 %4863, %v7297_v58   ;;  %3677 = vrot.lane.b32.xlu1 %v3668_v43, %s5286_s26  ;;  %v5298_v43 = vmov 104  }
0x22f0   : > { %3681 = vrot.lane.b32.xlu1 %v3670_v39, %s5286_s26  ;;  %4864 = vset.pattern.permute.xlu0 %v5288_v5  ;;  %v5299_v39 = vmov 106   ;;  %v5300_v5 = vmov 107  }
0x235a   : > { %v3676_v2 = vpop.permute.xlu1 %3675  ;;  %v3680_v28 = vpop.permute.xlu0 %3679 }
0x235e   : > { %v3678_v44 = vpop.permute.xlu1 %3677 }
0x235f   : > { %v3683_v27 = vsel %vm3653_vm4, %v3676_v2, %v3678_v44  ;;  %v3684_v24 = vsel %vm3653_vm4, %v3678_v44, %v3680_v28 }
0x2360   : > { %v3689_v33 = vadd.f32 %v3683_v27, %v3660_v62  ;;  %v3690_v32 = vadd.f32 %v3684_v24, %v3661_v1 }
0x2362   : > { %v3682_v56 = vpop.permute.xlu1 %3681 }
0x2363   : > { %v3685_v36 = vsel %vm3653_vm4, %v3680_v28, %v3682_v56  ;;  %v8368_v28 = vmov 2  }
0x2364   : > { %v3691_v17 = vadd.f32 %v3685_v36, %v3662_v46  ;;  %v5294_v46 = vmov 98  }
0x2367   : > { %v3694_v49 = vpop.permute.xlu0 %3693 }
0x2368   : > { %v3696_v25 = vmul.f32 %v3694_v49, %v7149_v13  ;;  %v3698_v12 = vmul.f32 %v3694_v49, %v7146_v60  ;;  %v3697_v37 = vmul.f32 %v3694_v49, %v7156_v9  ;;  %v3699_v21 = vmul.f32 %v3694_v49, %v8347_v29 }
0x236a   : > { %3708 = vrot.lane.b32.xlu0 %v3698_v12, %s5286_s26  ;;  %3704 = vrot.lane.b32.xlu1 %v3696_v25, %s5286_s26 }
0x236e   : > { %3722 = vperm.xlu0 %4864, %v7297_v58   ;;  %3706 = vrot.lane.b32.xlu1 %v3697_v37, %s5286_s26 }
0x2372   : > { %4865 = vset.pattern.permute.xlu0 %v5289_v20  ;;  %3710 = vrot.lane.b32.xlu1 %v3699_v21, %s5286_s26 }
0x2373   : > { %3751 = vperm.xlu0 %4865, %v7297_v58  }
0x2377   : > { %4868 = vset.pattern.permute.xlu0 %v5291_v51 }
0x2378   : > { %3838 = vperm.xlu0 %4868, %v7297_v58  }
0x237c   : > { %4871 = vset.pattern.permute.xlu0 %v5292_v40 }
0x237d   : > { %3926 = vperm.xlu0 %4871, %v7297_v58  }
0x2381   : > { %4874 = vset.pattern.permute.xlu0 %v5293_v55 }
0x2382   : > { %4013 = vperm.xlu0 %4874, %v7297_v58  }
0x2386   : > { %4877 = vset.pattern.permute.xlu0 %v8367_v3 }
0x23dc   : > { %v3705_v35 = vpop.permute.xlu1 %3704  ;;  %v3709_v61 = vpop.permute.xlu0 %3708 }
0x23e0   : > { %v3707_v8 = vpop.permute.xlu1 %3706 }
0x23e1   : > { %v3712_v57 = vsel %vm3653_vm4, %v3705_v35, %v3707_v8  ;;  %v3713_v34 = vsel %vm3653_vm4, %v3707_v8, %v3709_v61 }
0x23e2   : > { %v3718_v54 = vadd.f32 %v3712_v57, %v3689_v33  ;;  %v3719_v4 = vadd.f32 %v3713_v34, %v3690_v32 }
0x23e4   : > { %v3711_v63 = vpop.permute.xlu1 %3710 }
0x23e5   : > { %v3714_v52 = vsel %vm3653_vm4, %v3709_v61, %v3711_v63 }
0x23e6   : > { %v7612_v7 = vadd.f32 %v3714_v52, %v3691_v17 }
0x23e9   : > { %v3723_v41 = vpop.permute.xlu0 %3722 }
0x23ea   : > { %v3725_v16 = vmul.f32 %v3723_v41, %v8348_v6  ;;  %v3727_v38 = vmul.f32 %v3723_v41, %v8349_v42  ;;  %v3726_v62 = vmul.f32 %v3723_v41, %v8350_v59  ;;  %v3728_v2 = vmul.f32 %v3723_v41, %v8351_v19 }
0x23ec   : > { %3737 = vrot.lane.b32.xlu0 %v3727_v38, %s5286_s26  ;;  %3733 = vrot.lane.b32.xlu1 %v3725_v16, %s5286_s26 }
0x23ee   : > { %v3752_v1 = vpop.permute.xlu0 %3751 }
0x23ef   : > { %v3754_v30 = vmul.f32 %v3752_v1, %v7097_v26  ;;  %v3756_v15 = vmul.f32 %v3752_v1, %v7105_v23  ;;  %v3755_v44 = vmul.f32 %v3752_v1, %v7094_v0  ;;  %v3757_v27 = vmul.f32 %v3752_v1, %v7101_v53 }
0x23f0   : > { %3735 = vrot.lane.b32.xlu1 %v3726_v62, %s5286_s26 }
0x23f1   : > { %3762 = vrot.lane.b32.xlu0 %v3754_v30, %s5233_s6 }
0x23f3   : > { %v3839_v24 = vpop.permute.xlu0 %3838 }
0x23f4   : > { %3780 = vperm.xlu1 %4866, %v7297_v58   ;;  %v3842_v34 = vmul.f32 %v3839_v24, %v8350_v59  ;;  %v3844_v63 = vmul.f32 %v3839_v24, %v8351_v19  ;;  %v3843_v52 = vmul.f32 %v3839_v24, %v8349_v42 }
0x23f5   : > { %3766 = vrot.lane.b32.xlu0 %v3756_v15, %s5233_s6 }
0x23f8   : > { %4867 = vset.pattern.permute.xlu1 %v5294_v46  ;;  %v7639_v33 = vpop.permute.xlu0 %3926 }
0x23f9   : > { %3809 = vperm.xlu1 %4867, %v7297_v58  }
0x23fd   : > { %4869 = vset.pattern.permute.xlu1 %v5295_v45  ;;  %v7641_v32 = vpop.permute.xlu0 %4013 }
0x23fe   : > { %3867 = vperm.xlu1 %4869, %v7297_v58  }
0x2402   : > { %4870 = vset.pattern.permute.xlu1 %v5296_v48 }
0x2403   : > { %3897 = vperm.xlu1 %4870, %v7297_v58  }
0x2407   : > { %4872 = vset.pattern.permute.xlu1 %v5297_v31 }
0x2408   : > { %3955 = vperm.xlu1 %4872, %v7297_v58  }
0x240c   : > { %4873 = vset.pattern.permute.xlu1 %v5298_v43 }
0x240d   : > { %3984 = vperm.xlu1 %4873, %v7297_v58  }
0x2411   : > { %4875 = vset.pattern.permute.xlu1 %v5299_v39 }
0x2412   : > { %4042 = vperm.xlu1 %4875, %v7297_v58  }
0x2416   : > { %4876 = vset.pattern.permute.xlu1 %v5300_v5 }
0x2417   : > { %4071 = vperm.xlu1 %4876, %v7297_v58  }
0x241b   : > { %3739 = vrot.lane.b32.xlu1 %v3728_v2, %s5286_s26  ;;  %v3930_v2 = vmul.f32 %v7639_v33, %v7156_v9 }
0x241c   : > { %4878 = vset.pattern.permute.xlu1 %v8368_v28 }
0x241f   : > { %3764 = vrot.lane.b32.xlu1 %v3755_v44, %s5233_s6  ;;  %v3929_v44 = vmul.f32 %v7639_v33, %v7149_v13 }
0x2423   : > { %3768 = vrot.lane.b32.xlu1 %v3757_v27, %s5233_s6 }
0x245e   : > { %v3734_v58 = vpop.permute.xlu1 %3733  ;;  %v3738_v56 = vpop.permute.xlu0 %3737 }
0x2462   : > { %v3736_v36 = vpop.permute.xlu1 %3735 }
0x2463   : > { %v3741_v17 = vsel %vm3653_vm4, %v3734_v58, %v3736_v36  ;;  %v3742_v49 = vsel %vm3653_vm4, %v3736_v36, %v3738_v56  ;;  %v3763_v48 = vpop.permute.xlu0 %3762 }
0x2464   : > { %v7645_v25 = vadd.f32 %v3741_v17, %v3718_v54  ;;  %v7647_v12 = vadd.f32 %v3742_v49, %v3719_v4  ;;  %v3841_v54 = vmul.f32 %v3839_v24, %v8348_v6  ;;  %v3931_v49 = vmul.f32 %v7639_v33, %v7146_v60 }
0x2467   : > { %v3767_v27 = vpop.permute.xlu0 %3766 }
0x246f   : > { %v3781_v37 = vpop.permute.xlu1 %3780 }
0x2470   : > { %v3783_v21 = vmul.f32 %v3781_v37, %v7126_v22  ;;  %v3784_v20 = vmul.f32 %v3781_v37, %v7133_v11  ;;  %v3785_v50 = vmul.f32 %v3781_v37, %v7123_v18  ;;  %v3786_v51 = vmul.f32 %v3781_v37, %v7139_v10 }
0x2472   : > { %3793 = vrot.lane.b32.xlu1 %v3784_v20, %s5233_s6  ;;  %3791 = vrot.lane.b32.xlu0 %v3783_v21, %s5233_s6 }
0x2474   : > { %v3810_v40 = vpop.permute.xlu1 %3809 }
0x2475   : > { %v3813_v55 = vmul.f32 %v3810_v40, %v7156_v9  ;;  %v3812_v3 = vmul.f32 %v3810_v40, %v7149_v13  ;;  %v3815_v61 = vmul.f32 %v3810_v40, %v8347_v29  ;;  %v3814_v8 = vmul.f32 %v3810_v40, %v7146_v60 }
0x2476   : > { %3797 = vrot.lane.b32.xlu1 %v3786_v51, %s5233_s6  ;;  %3795 = vrot.lane.b32.xlu0 %v3785_v50, %s5233_s6 }
0x2479   : > { %v3868_v35 = vpop.permute.xlu1 %3867 }
0x247a   : > { %3822 = vrot.lane.b32.xlu1 %v3813_v55, %s5233_s6  ;;  %3820 = vrot.lane.b32.xlu0 %v3812_v3, %s5233_s6  ;;  %v3871_v41 = vmul.f32 %v3868_v35, %v7094_v0  ;;  %v3870_v38 = vmul.f32 %v3868_v35, %v7097_v26  ;;  %v3873_v62 = vmul.f32 %v3868_v35, %v7101_v53 }
0x247b   : > { %v3872_v1 = vmul.f32 %v3868_v35, %v7105_v23  ;;  %v4017_v35 = vmul.f32 %v7641_v32, %v7133_v11 }
0x247e   : > { %3826 = vrot.lane.b32.xlu1 %v3815_v61, %s5233_s6  ;;  %v3898_v57 = vpop.permute.xlu1 %3897  ;;  %3824 = vrot.lane.b32.xlu0 %v3814_v8, %s5233_s6 }
0x247f   : > { %v3901_v15 = vmul.f32 %v3898_v57, %v7133_v11  ;;  %v3900_v46 = vmul.f32 %v3898_v57, %v7126_v22  ;;  %v3903_v31 = vmul.f32 %v3898_v57, %v7139_v10  ;;  %v3902_v43 = vmul.f32 %v3898_v57, %v7123_v18 }
0x2482   : > { %3851 = vrot.lane.b32.xlu1 %v3842_v34, %s5233_s6  ;;  %3849 = vrot.lane.b32.xlu0 %v3841_v54, %s5233_s6 }
0x2483   : > { %v3956_v4 = vpop.permute.xlu1 %3955 }
0x2484   : > { %v3959_v20 = vmul.f32 %v3956_v4, %v8350_v59 }
0x2486   : > { %3855 = vrot.lane.b32.xlu1 %v3844_v63, %s5233_s6  ;;  %3853 = vrot.lane.b32.xlu0 %v3843_v52, %s5233_s6  ;;  %s5302_s6 = smov [#allocation15]  }
0x2487   : > { %s5037_s22 = sshll.u32 %s5302_s6, 4  ;;  %s5038_s22 = int_to_ptr.vmem [resolvable:$false] %s5037_s22 }
0x2488   : > { %v3985_v16 = vpop.permute.xlu1 %3984  ;;  %s5039_s1 = scalar_lea.vmem %s5038_s22, 256  ;;  %p5040_p2 = scmp.lt.s32.totalorder %s4264_s25, %s5038_s22 }
0x2489   : > { %v3988_v51 = vmul.f32 %v3985_v16, %v7094_v0  ;;  %v3987_v40 = vmul.f32 %v3985_v16, %v7097_v26  ;;  %v3990_v55 = vmul.f32 %v3985_v16, %v7101_v53  ;;  %v3989_v3 = vmul.f32 %v3985_v16, %v7105_v23 }
0x248a   : > { %3880 = vrot.lane.b32.xlu1 %v3871_v41, %s5301_s14  ;;  %3878 = vrot.lane.b32.xlu0 %v3870_v38, %s5301_s14  ;;  %v4016_v0 = vmul.f32 %v7641_v32, %v7126_v22  ;;  %v4019_v26 = vmul.f32 %v7641_v32, %v7139_v10  ;;  %v4018_v53 = vmul.f32 %v7641_v32, %v7123_v18 }
0x248d   : > { %v4043_v30 = vpop.permute.xlu1 %4042 }
0x248e   : > { %3884 = vrot.lane.b32.xlu1 %v3873_v62, %s5301_s14  ;;  %3882 = vrot.lane.b32.xlu0 %v3872_v1, %s5301_s14  ;;  %v4046_v23 = vmul.f32 %v4043_v30, %v7156_v9  ;;  %v4045_v11 = vmul.f32 %v4043_v30, %v7149_v13  ;;  %v4048_v22 = vmul.f32 %v4043_v30, %v8347_v29  ;;  %v4110_v9 = vld [vmem:[%s7914_s7] sm:$0xf] }
0x248f   : > { %v4047_v61 = vmul.f32 %v4043_v30, %v7146_v60 }
0x2492   : > { %3910 = vrot.lane.b32.xlu1 %v3901_v15, %s5301_s14  ;;  %v7684_v45 = vpop.permute.xlu1 %4071  ;;  %3908 = vrot.lane.b32.xlu0 %v3900_v46, %s5301_s14 }
0x2493   : > { %v4075_v18 = vmul.f32 %v7684_v45, %v8350_v59  ;;  %v4074_v10 = vmul.f32 %v7684_v45, %v8348_v6  ;;  %v4077_v13 = vmul.f32 %v7684_v45, %v8351_v19  ;;  %v4076_v60 = vmul.f32 %v7684_v45, %v8349_v42 }
0x2494   : > { %v8370_v59 = vmov 10  }
0x2496   : > { %3914 = vrot.lane.b32.xlu1 %v3903_v31, %s5301_s14  ;;  %v3740_v39 = vpop.permute.xlu1 %3739  ;;  %3912 = vrot.lane.b32.xlu0 %v3902_v43, %s5301_s14 }
0x2497   : > { %v3743_v5 = vsel %vm3653_vm4, %v3738_v56, %v3740_v39  ;;  %v3932_v56 = vmul.f32 %v7639_v33, %v8347_v29  ;;  %v3960_v33 = vmul.f32 %v3956_v4, %v8349_v42  ;;  %v4117_v29 = vld [vmem:[#allocation12] sm:$0xf]  ;;  %v8371_v42 = vmov 11  }
0x2498   : > { %v3749_v28 = vadd.f32 %v3743_v5, %v7612_v7 }
0x249a   : > { %3939 = vrot.lane.b32.xlu1 %v3930_v2, %s5301_s14  ;;  %v3765_v24 = vpop.permute.xlu1 %3764  ;;  %3937 = vrot.lane.b32.xlu0 %v3929_v44, %s5301_s14 }
0x249b   : > { %v3770_v58 = vsel %vm2173_vm6, %v3763_v48, %v3765_v24  ;;  %v3771_v36 = vsel %vm2173_vm6, %v3765_v24, %v3767_v27 }
0x249c   : > { %v7704_v17 = vadd.f32 %v3770_v58, %v7645_v25  ;;  %v7707_v7 = vadd.f32 %v3771_v36, %v7647_v12  ;;  %v3958_v25 = vmul.f32 %v3956_v4, %v8348_v6  ;;  %v3961_v12 = vmul.f32 %v3956_v4, %v8351_v19 }
0x249d   : > { %v8369_v6 = vmov 9  }
0x249e   : > { %3943 = vrot.lane.b32.xlu1 %v3932_v56, %s5301_s14  ;;  %v3769_v37 = vpop.permute.xlu1 %3768  ;;  %3941 = vrot.lane.b32.xlu0 %v3931_v49, %s5301_s14 }
0x249f   : > { %v3772_v21 = vsel %vm2173_vm6, %v3767_v27, %v3769_v37 }
0x24a0   : > { %v7715_v50 = vadd.f32 %v3772_v21, %v3749_v28 }
0x24a2   : > { %3968 = vrot.lane.b32.xlu1 %v3959_v20, %s5301_s14  ;;  %3966 = vrot.lane.b32.xlu0 %v3958_v25, %s5301_s14 }
0x24a6   : > { %3972 = vrot.lane.b32.xlu1 %v3961_v12, %s5301_s14  ;;  %3970 = vrot.lane.b32.xlu0 %v3960_v33, %s5301_s14  ;;  %s5033_s14 = scalar_lea.vmem %s4264_s25, 128 }
0x24a7   : > { %p5034_p11 = scmp.ne.s32.totalorder %s4264_s25, %s5033_s14  ;;  %p5041_p5 = scmp.lt.s32.totalorder %s5039_s1, %s5033_s14 }
0x24a9   : > { %p5035_p1 = pnand %p5034_p11, %p8372_p12  ;;  %p5042_p8 = por %p5041_p5, %p5040_p2 }
0x24aa   : > { %3997 = vrot.lane.b32.xlu1 %v3988_v51, %s5238_s28  ;;  %3995 = vrot.lane.b32.xlu0 %v3987_v40, %s5238_s28 }
0x24ab   : > { %p5036_p4 = pneg %p5035_p1 }
0x24ad   : > { %p5043_p7 = pnand %p5042_p8, %p5036_p4 }
0x24ae   : > { %4001 = vrot.lane.b32.xlu1 %v3990_v55, %s5238_s28  ;;  %3999 = vrot.lane.b32.xlu0 %v3989_v3, %s5238_s28 }
0x24b2   : > { %4026 = vrot.lane.b32.xlu1 %v4017_v35, %s5238_s28  ;;  %4024 = vrot.lane.b32.xlu0 %v4016_v0, %s5238_s28 }
0x24b6   : > { %4030 = vrot.lane.b32.xlu1 %v4019_v26, %s5238_s28  ;;  %4028 = vrot.lane.b32.xlu0 %v4018_v53, %s5238_s28 }
0x24ba   : > { %4055 = vrot.lane.b32.xlu1 %v4046_v23, %s5238_s28  ;;  %4053 = vrot.lane.b32.xlu0 %v4045_v11, %s5238_s28 }
0x24be   : > { %4059 = vrot.lane.b32.xlu1 %v4048_v22, %s5238_s28  ;;  %4057 = vrot.lane.b32.xlu0 %v4047_v61, %s5238_s28 }
0x24c2   : > { %4084 = vrot.lane.b32.xlu1 %v4075_v18, %s5238_s28  ;;  %4082 = vrot.lane.b32.xlu0 %v4074_v10, %s5238_s28 }
0x24c6   : > { %4088 = vrot.lane.b32.xlu1 %v4077_v13, %s5238_s28  ;;  %4086 = vrot.lane.b32.xlu0 %v4076_v60, %s5238_s28  ;;  %s4229_s28 = sand.u32 1, %s5386_s23  }
0x24c7   : > { %s7784_s26 = scalar_lea.sflag [#allocation16], %s4229_s28 }
0x24ca   : > { %4113 = vperm.xlu1 %4878, %v4110_v9   ;;  %4120 = vperm.xlu0 %4877, %v4117_v29  }
0x24ce   : > { %4879 = vset.pattern.permute.xlu1 %v8369_v6  ;;  %4880 = vset.pattern.permute.xlu0 %v8370_v59 }
0x24cf   : > { %4142 = vperm.xlu1 %4879, %v4117_v29   ;;  %4164 = vperm.xlu0 %4880, %v4117_v29  }
0x24d3   : > { %4881 = vset.pattern.permute.xlu1 %v8371_v42  ;;  %4882 = vset.pattern.permute.xlu0 %v8371_v42 }
0x24d4   : > { %4186 = vperm.xlu1 %4881, %v4117_v29  }
0x24d5   : > { %5046 = shalt.err (!%p5043_p7)
}
0x24d6   : > { %s5047_s15 = scalar_lea.hbm %s7776_s24, 128  ;;  %s5051_s2 = scalar_lea.hbm %s7917_s10, 256 }
0x24d7   : > { %p5048_p13 = scmp.ne.s32.totalorder %s7776_s24, %s5047_s15  ;;  %p5052_p0 = scmp.lt.s32.totalorder %s7776_s24, %s7917_s10 }
0x24d8   : > { %p5053_p9 = scmp.lt.s32.totalorder %s5051_s2, %s5047_s15 }
0x24d9   : > { %p5049_p6 = pnand %p5048_p13, %p8372_p12 }
0x24da   : > { %p5054_p10 = por %p5053_p9, %p5052_p0 }
0x24db   : > { %p5050_p3 = pneg %p5049_p6 }
0x24dd   : > { %p5055_p11 = pnand %p5054_p10, %p5050_p3 }
0x24df   : > { %5058 = shalt.err (!%p5055_p11)
}
0x24e0   : > { %4532 = dma.vmem_to_hbm [thread:$0]  (%p8372_p12), %s4264_s25, 128, %s7776_s24, %s7784_s26  }
0x24e1   : > { %s4249_s14 = sshll.u32 %s6395_s21, 4  ;;  %s4225_s6 = scalar_lea.sflag [#allocation5], %s5520_s4  ;;  %s4250_s14 = int_to_ptr.vmem [resolvable:$true] %s4249_s14 }
0x24e2   : > { %s5059_s22 = scalar_lea.vmem %s4250_s14, 128  ;;  %s5303_s1 = smov [#allocation14]  }
0x24e3   : > { %p5060_p1 = scmp.ne.s32.totalorder %s4250_s14, %s5059_s22  ;;  %s5063_s15 = sshll.u32 %s5303_s1, 4  ;;  %s5064_s15 = int_to_ptr.vmem [resolvable:$false] %s5063_s15 }
0x24e4   : > { %s5065_s28 = scalar_lea.vmem %s5064_s15, 256  ;;  %p5066_p5 = scmp.lt.s32.totalorder %s4250_s14, %s5064_s15 }
0x24e5   : > { %p5061_p4 = pnand %p5060_p1, %p8372_p12  ;;  %p5067_p8 = scmp.lt.s32.totalorder %s5065_s28, %s5059_s22 }
0x24e7   : > { %p5062_p2 = pneg %p5061_p4  ;;  %p5068_p7 = por %p5067_p8, %p5066_p5 }
0x24e9   : > { %p5069_p13 = pnand %p5068_p7, %p5062_p2 }
0x24eb   : > { %5072 = shalt.err (!%p5069_p13)
}
0x24ec   : > { %s5073_s21 = scalar_lea.hbm %s7782_s29, 128  ;;  %s5077_s27 = scalar_lea.hbm %s7916_s9, 256 }
0x24ed   : > { %p5074_p6 = scmp.ne.s32.totalorder %s7782_s29, %s5073_s21  ;;  %p5078_p9 = scmp.lt.s32.totalorder %s7782_s29, %s7916_s9 }
0x24ee   : > { %p5079_p10 = scmp.lt.s32.totalorder %s5077_s27, %s5073_s21 }
0x24ef   : > { %p5075_p3 = pnand %p5074_p6, %p8372_p12 }
0x24f0   : > { %p5080_p11 = por %p5079_p10, %p5078_p9 }
0x24f1   : > { %p5076_p0 = pneg %p5075_p3 }
0x24f3   : > { %p5081_p1 = pnand %p5080_p11, %p5076_p0 }
0x24f5   : > { %5084 = shalt.err (!%p5081_p1)
}
0x24f6   : > { %4531 = dma.vmem_to_hbm [thread:$0]  (%p8372_p12), %s4250_s14, 128, %s7782_s29, %s4225_s6   ;;  %v3792_v19 = vpop.permute.xlu0 %3791  ;;  %v3794_v32 = vpop.permute.xlu1 %3793  ;;  %vm3886_vm10 = vcmask 744448  }
0x24f7   : > { %v3799_v8 = vsel %vm2173_vm6, %v3792_v19, %v3794_v32  ;;  %s4493_s29 = sld [smem:[#allocation13 + $0x5]]  ;;  %s4507_s14 = smul.u32 12, %s5520_s4 }
0x24f8   : > { %v3805_v57 = vadd.f32 %v3799_v8, %v7704_v17  ;;  %s4494_s12 = sld [smem:[#allocation13 + $0x8]]  ;;  %s4508_s6 = smul.u32 192, %s5386_s23 }
0x24f9   : > { %s484_s4 = scalar_lea.vmem [#allocation17], %s4507_s14  ;;  %s5304_s23 = smov [#allocation17]  }
0x24fa   : > { %v3796_v34 = vpop.permute.xlu0 %3795  ;;  %v3798_v54 = vpop.permute.xlu1 %3797  ;;  %s4277_s22 = sshll.u32 %s484_s4, 4  ;;  %s4275_s28 = scalar_lea.hbm %s7918_s11, %s4508_s6  ;;  %s4278_s22 = int_to_ptr.vmem [resolvable:$true] %s4277_s22 }
0x24fb   : > { %v3800_v4 = vsel %vm2173_vm6, %v3794_v32, %v3796_v34  ;;  %v3801_v20 = vsel %vm2173_vm6, %v3796_v34, %v3798_v54  ;;  %s5085_s21 = scalar_lea.vmem %s4278_s22, 192  ;;  %s5089_s24 = sshll.u32 %s5304_s23, 4  ;;  %s5090_s24 = int_to_ptr.vmem [resolvable:$false] %s5089_s24 }
0x24fc   : > { %v3806_v63 = vadd.f32 %v3800_v4, %v7707_v7  ;;  %v3807_v55 = vadd.f32 %v3801_v20, %v7715_v50  ;;  %p5086_p4 = scmp.ne.s32.totalorder %s4278_s22, %s5085_s21  ;;  %s5091_s25 = scalar_lea.vmem %s5090_s24, 384 }
0x24fd   : > { %p5092_p8 = scmp.lt.s32.totalorder %s4278_s22, %s5090_s24  ;;  %p5093_p7 = scmp.lt.s32.totalorder %s5091_s25, %s5085_s21 }
0x24fe   : > { %v3823_v52 = vpop.permute.xlu1 %3822  ;;  %v3821_v41 = vpop.permute.xlu0 %3820  ;;  %p5087_p2 = pnand %p5086_p4, %p8372_p12 }
0x24ff   : > { %v3828_v12 = vsel %vm2173_vm6, %v3821_v41, %v3823_v52  ;;  %p5094_p13 = por %p5093_p7, %p5092_p8 }
0x2500   : > { %v3834_v35 = vadd.f32 %v3828_v12, %v3805_v57  ;;  %p5088_p5 = pneg %p5087_p2 }
0x2502   : > { %v3827_v16 = vpop.permute.xlu1 %3826  ;;  %v3825_v38 = vpop.permute.xlu0 %3824  ;;  %p5095_p6 = pnand %p5094_p13, %p5088_p5 }
0x2503   : > { %v3829_v51 = vsel %vm2173_vm6, %v3823_v52, %v3825_v38  ;;  %v3830_v40 = vsel %vm2173_vm6, %v3825_v38, %v3827_v16 }
0x2504   : > { %v3835_v23 = vadd.f32 %v3829_v51, %v3806_v63  ;;  %v3836_v11 = vadd.f32 %v3830_v40, %v3807_v55 }
0x2506   : > { %v3852_v62 = vpop.permute.xlu1 %3851  ;;  %v3850_v1 = vpop.permute.xlu0 %3849 }
0x2507   : > { %v3857_v3 = vsel %vm2173_vm6, %v3850_v1, %v3852_v62 }
0x2508   : > { %v3863_v18 = vadd.f32 %v3857_v3, %v3834_v35 }
0x250a   : > { %v3856_v30 = vpop.permute.xlu1 %3855  ;;  %v3854_v15 = vpop.permute.xlu0 %3853 }
0x250b   : > { %v3858_v0 = vsel %vm2173_vm6, %v3852_v62, %v3854_v15  ;;  %v3859_v26 = vsel %vm2173_vm6, %v3854_v15, %v3856_v30 }
0x250c   : > { %v3864_v60 = vadd.f32 %v3858_v0, %v3835_v23  ;;  %v3865_v50 = vadd.f32 %v3859_v26, %v3836_v11  ;;  %v4103_v26 = vstv %s4493_s29 }
0x250e   : > { %v3881_v46 = vpop.permute.xlu1 %3880  ;;  %v3879_v45 = vpop.permute.xlu0 %3878 }
0x250f   : > { %v3887_v22 = vsel %vm3886_vm10, %v3879_v45, %v3881_v46 }
0x2510   : > { %v3893_v29 = vadd.f32 %v3887_v22, %v3863_v18 }
0x2512   : > { %v3885_v48 = vpop.permute.xlu1 %3884  ;;  %v3883_v31 = vpop.permute.xlu0 %3882 }
0x2513   : > { %v3888_v10 = vsel %vm3886_vm10, %v3881_v46, %v3883_v31  ;;  %v3889_v13 = vsel %vm3886_vm10, %v3883_v31, %v3885_v48 }
0x2514   : > { %v3894_v19 = vadd.f32 %v3888_v10, %v3864_v60  ;;  %v3895_v32 = vadd.f32 %v3889_v13, %v3865_v50 }
0x2516   : > { %v3911_v43 = vpop.permute.xlu1 %3910  ;;  %v3909_v39 = vpop.permute.xlu0 %3908 }
0x2517   : > { %v3916_v9 = vsel %vm3886_vm10, %v3909_v39, %v3911_v43 }
0x2518   : > { %v3922_v34 = vadd.f32 %v3916_v9, %v3893_v29 }
0x251a   : > { %v3915_v5 = vpop.permute.xlu1 %3914  ;;  %v3913_v2 = vpop.permute.xlu0 %3912 }
0x251b   : > { %v3917_v6 = vsel %vm3886_vm10, %v3911_v43, %v3913_v2  ;;  %v3918_v59 = vsel %vm3886_vm10, %v3913_v2, %v3915_v5 }
0x251c   : > { %v3923_v63 = vadd.f32 %v3917_v6, %v3894_v19  ;;  %v3924_v52 = vadd.f32 %v3918_v59, %v3895_v32 }
0x251e   : > { %v3940_v28 = vpop.permute.xlu1 %3939  ;;  %v3938_v44 = vpop.permute.xlu0 %3937 }
0x251f   : > { %v3945_v8 = vsel %vm3886_vm10, %v3938_v44, %v3940_v28 }
0x2520   : > { %v3951_v16 = vadd.f32 %v3945_v8, %v3922_v34  ;;  %v8373_v8 = vld [vmem:[#allocation26_spill] sm:$0xff] }
0x2522   : > { %v3944_v27 = vpop.permute.xlu1 %3943  ;;  %v3942_v24 = vpop.permute.xlu0 %3941 }
0x2523   : > { %v3946_v54 = vsel %vm3886_vm10, %v3940_v28, %v3942_v24  ;;  %v3947_v4 = vsel %vm3886_vm10, %v3942_v24, %v3944_v27 }
0x2524   : > { %v3952_v30 = vadd.f32 %v3946_v54, %v3923_v63  ;;  %v3953_v15 = vadd.f32 %v3947_v4, %v3924_v52 }
0x2526   : > { %v3969_v58 = vpop.permute.xlu1 %3968  ;;  %v3967_v36 = vpop.permute.xlu0 %3966 }
0x2527   : > { %v3974_v41 = vsel %vm3886_vm10, %v3967_v36, %v3969_v58 }
0x2528   : > { %v3980_v48 = vadd.f32 %v3974_v41, %v3951_v16 }
0x252a   : > { %v3973_v56 = vpop.permute.xlu1 %3972  ;;  %v3971_v17 = vpop.permute.xlu0 %3970 }
0x252b   : > { %v3975_v38 = vsel %vm3886_vm10, %v3969_v58, %v3971_v17  ;;  %v3976_v62 = vsel %vm3886_vm10, %v3971_v17, %v3973_v56 }
0x252c   : > { %v3981_v39 = vadd.f32 %v3975_v38, %v3952_v30  ;;  %v3982_v5 = vadd.f32 %v3976_v62, %v3953_v15 }
0x252e   : > { %v3998_v7 = vpop.permute.xlu1 %3997  ;;  %v3996_v49 = vpop.permute.xlu0 %3995 }
0x252f   : > { %v4003_v46 = vsel %vm2262_vm7, %v3996_v49, %v3998_v7 }
0x2530   : > { %v4009_v28 = vadd.f32 %v4003_v46, %v3980_v48 }
0x2532   : > { %v4002_v37 = vpop.permute.xlu1 %4001  ;;  %v4000_v21 = vpop.permute.xlu0 %3999 }
0x2533   : > { %v4004_v31 = vsel %vm2262_vm7, %v3998_v7, %v4000_v21  ;;  %v4005_v43 = vsel %vm2262_vm7, %v4000_v21, %v4002_v37 }
0x2534   : > { %v4010_v58 = vadd.f32 %v4004_v31, %v3981_v39  ;;  %v4011_v36 = vadd.f32 %v4005_v43, %v3982_v5  ;;  %v8374_v39 = vld [vmem:[#allocation28_spill] sm:$0xff] }
0x2536   : > { %v4027_v25 = vpop.permute.xlu1 %4026  ;;  %v4025_v33 = vpop.permute.xlu0 %4024 }
0x2537   : > { %v4032_v2 = vsel %vm2262_vm7, %v4025_v33, %v4027_v25 }
0x2538   : > { %v4038_v49 = vadd.f32 %v4032_v2, %v4009_v28 }
0x253a   : > { %v4031_v53 = vpop.permute.xlu1 %4030  ;;  %v4029_v61 = vpop.permute.xlu0 %4028 }
0x253b   : > { %v4033_v44 = vsel %vm2262_vm7, %v4027_v25, %v4029_v61  ;;  %v4034_v27 = vsel %vm2262_vm7, %v4029_v61, %v4031_v53 }
0x253c   : > { %v4039_v21 = vadd.f32 %v4033_v44, %v4010_v58  ;;  %v4040_v20 = vadd.f32 %v4034_v27, %v4011_v36 }
0x253e   : > { %v4056_v42 = vpop.permute.xlu1 %4055  ;;  %v4054_v57 = vpop.permute.xlu0 %4053 }
0x253f   : > { %v4061_v56 = vsel %vm2262_vm7, %v4054_v57, %v4056_v42 }
0x2540   : > { %v4067_v33 = vadd.f32 %v4061_v56, %v4038_v49 }
0x2542   : > { %v4060_v1 = vpop.permute.xlu1 %4059  ;;  %v4058_v45 = vpop.permute.xlu0 %4057 }
0x2543   : > { %v4062_v7 = vsel %vm2262_vm7, %v4056_v42, %v4058_v45  ;;  %v4063_v37 = vsel %vm2262_vm7, %v4058_v45, %v4060_v1 }
0x2544   : > { %v4068_v25 = vadd.f32 %v4062_v7, %v4039_v21  ;;  %v4069_v40 = vadd.f32 %v4063_v37, %v4040_v20 }
0x2546   : > { %v4085_v24 = vpop.permute.xlu1 %4084  ;;  %v4083_v17 = vpop.permute.xlu0 %4082 }
0x2547   : > { %v4090_v12 = vsel %vm2262_vm7, %v4083_v17, %v4085_v24  ;;  %v4211_v17 = vstv %s4494_s12 }
0x2548   : > { %v4096_v3 = vadd.f32 %v4090_v12, %v4067_v33 }
0x254a   : > { %v4089_v51 = vpop.permute.xlu1 %4088  ;;  %v4087_v55 = vpop.permute.xlu0 %4086  ;;  %v4104_v11 = vmul.f32 %v4103_v26, %v4096_v3  ;;  %vm4100_vm6 = vcmp.ge.f32.partialorder %v4096_v3, 0.0 }
0x254b   : > { %v4091_v35 = vsel %vm2262_vm7, %v4085_v24, %v4087_v55  ;;  %v4092_v0 = vsel %vm2262_vm7, %v4087_v55, %v4089_v51 }
0x254c   : > { %v4097_v53 = vadd.f32 %v4091_v35, %v4068_v25  ;;  %v4098_v23 = vadd.f32 %v4092_v0, %v4069_v40  ;;  %v4107_v18 = vsel %vm4100_vm6, %v4096_v3, %v4104_v11 }
0x254d   : > { %v4126_v60 = vrot.slane %v4107_v18, %v8352_v14  ;;  %v4170_v32 = vrot.slane %v4107_v18, %v8322_v47  ;;  %v4148_v57 = vrot.slane %v4107_v18, %v8373_v8  ;;  %v4192_v5 = vrot.slane %v4107_v18, %v8374_v39 }
0x254e   : > { %v4105_v22 = vmul.f32 %v4103_v26, %v4097_v53  ;;  %v4106_v61 = vmul.f32 %v4103_v26, %v4098_v23  ;;  %vm4101_vm11 = vcmp.ge.f32.partialorder %v4097_v53, 0.0  ;;  %vm4102_vm12 = vcmp.ge.f32.partialorder %v4098_v23, 0.0  ;;  %v4114_v29 = vpop.permute.xlu1 %4113  ;;  %v4121_v6 = vpop.permute.xlu0 %4120 }
0x254f   : > { %v4135_v59 = vmul.f32 %v4126_v60, %v4121_v6 }
0x2550   : > { %v4108_v10 = vsel %vm4101_vm11, %v4097_v53, %v4105_v22  ;;  %v4109_v13 = vsel %vm4102_vm12, %v4098_v23, %v4106_v61 }
0x2551   : > { %v4130_v50 = vrot.slane %v4108_v10, %v8352_v14  ;;  %v4134_v9 = vrot.slane %v4109_v13, %v8352_v14  ;;  %v4152_v34 = vrot.slane %v4108_v10, %v8373_v8  ;;  %v4156_v54 = vrot.slane %v4109_v13, %v8373_v8 }
0x2552   : > { %v4138_v4 = vadd.f32 %v4135_v59, %v4114_v29  ;;  %v4174_v52 = vrot.slane %v4108_v10, %v8322_v47  ;;  %v4178_v14 = vrot.slane %v4109_v13, %v8322_v47  ;;  %v4143_v41 = vpop.permute.xlu1 %4142  ;;  %v4165_v38 = vpop.permute.xlu0 %4164  ;;  %v4196_v2 = vrot.slane %v4108_v10, %v8374_v39 }
0x2553   : > { %v4136_v42 = vmul.f32 %v4130_v50, %v4121_v6  ;;  %v4137_v19 = vmul.f32 %v4134_v9, %v4121_v6  ;;  %v4157_v62 = vmul.f32 %v4148_v57, %v4143_v41  ;;  %v4158_v1 = vmul.f32 %v4152_v34, %v4143_v41 }
0x2554   : > { %v4159_v30 = vmul.f32 %v4156_v54, %v4143_v41  ;;  %v4179_v15 = vmul.f32 %v4170_v32, %v4165_v38  ;;  %v4180_v46 = vmul.f32 %v4174_v52, %v4165_v38  ;;  %v4181_v45 = vmul.f32 %v4178_v14, %v4165_v38 }
0x2555   : > { %v4139_v63 = vadd.f32 %v4136_v42, %v4114_v29  ;;  %v4140_v16 = vadd.f32 %v4137_v19, %v4114_v29  ;;  %v4160_v48 = vadd.f32 %v4157_v62, %v4138_v4  ;;  %v4200_v28 = vrot.slane %v4109_v13, %v8374_v39 }
0x2556   : > { %v4187_v47 = vpop.permute.xlu1 %4186 }
0x2557   : > { %v4161_v31 = vadd.f32 %v4158_v1, %v4139_v63  ;;  %v4162_v43 = vadd.f32 %v4159_v30, %v4140_v16  ;;  %v4182_v44 = vadd.f32 %v4179_v15, %v4160_v48  ;;  %v4201_v58 = vmul.f32 %v4192_v5, %v4187_v47 }
0x2558   : > { %v4202_v36 = vmul.f32 %v4196_v2, %v4187_v47  ;;  %v4203_v56 = vmul.f32 %v4200_v28, %v4187_v47 }
0x2559   : > { %v4183_v27 = vadd.f32 %v4180_v46, %v4161_v31  ;;  %v4184_v24 = vadd.f32 %v4181_v45, %v4162_v43  ;;  %v4204_v49 = vadd.f32 %v4201_v58, %v4182_v44 }
0x255b   : > { %v4205_v7 = vadd.f32 %v4202_v36, %v4183_v27  ;;  %v4206_v37 = vadd.f32 %v4203_v56, %v4184_v24  ;;  %vm4208_vm7 = vcmp.ge.f32.partialorder %v4204_v49, 0.0  ;;  %v4212_v21 = vmul.f32 %v4211_v17, %v4204_v49 }
0x255d   : > { %vm4209_vm13 = vcmp.ge.f32.partialorder %v4205_v7, 0.0  ;;  %vm4210_vm14 = vcmp.ge.f32.partialorder %v4206_v37, 0.0  ;;  %v4213_v20 = vmul.f32 %v4211_v17, %v4205_v7  ;;  %v4214_v12 = vmul.f32 %v4211_v17, %v4206_v37 }
0x255e   : > { %v4215_v33 = vsel %vm4208_vm7, %v4204_v49, %v4212_v21 }
0x255f   : > { %v4216_v51 = vsel %vm4209_vm13, %v4205_v7, %v4213_v20  ;;  %v4217_v25 = vsel %vm4210_vm14, %v4206_v37, %v4214_v12 }
0x2560   : > { %v4220_v40 = vcombine.low %v4215_v33, %v4216_v51  ;;  %4223 = vst [vmem:[%s484_s4 + $0x8] sm:$0xf] %v4217_v25 }
0x2562   : > { %4222 = vst [vmem:[%s484_s4] sm:$0xff] %v4220_v40 }
0x2563   : > { %5098 = shalt.err (!%p5095_p6)
}
0x2564   : > { %s5099_s27 = scalar_lea.hbm %s4275_s28, 192  ;;  %s5103_s29 = scalar_lea.hbm %s7918_s11, 384 }
0x2565   : > { %p5100_p3 = scmp.ne.s32.totalorder %s4275_s28, %s5099_s27  ;;  %p5104_p10 = scmp.lt.s32.totalorder %s4275_s28, %s7918_s11 }
0x2566   : > { %p5105_p11 = scmp.lt.s32.totalorder %s5103_s29, %s5099_s27 }
0x2567   : > { %p5101_p0 = pnand %p5100_p3, %p8372_p12 }
0x2568   : > { %p5106_p1 = por %p5105_p11, %p5104_p10 }
0x2569   : > { %p5102_p9 = pneg %p5101_p0 }
0x256b   : > { %p5107_p4 = pnand %p5106_p1, %p5102_p9 }
0x256d   : > { %5110 = shalt.err (!%p5107_p4)
}
0x256e   : > { %4533 = dma.vmem_to_hbm [thread:$0]  (%p8372_p12), %s4278_s22, 192, %s4275_s28, %s7784_s26  }
0x256f PF: > { %s4289_s6 = sand.u32 1, %s5153_s17   ;;  %p8375_p2 = scmp.ne.s32.totalorder %s8044_s30, 0 }
0x2570   : > { %p8376_p5 = scmp.ge.s32.totalorder %s5165_s20, 2  ;;  %s4290_s4 = scalar_lea.sflag [#allocation5], %s4289_s6 }
0x2572   : > { %p4558_p8 = pnand %p8376_p5, %p8375_p2 }
0x2574   : > { %p4559_p7 = pneg %p4558_p8 }
0x2576   : > { %5144 = dma.done.wait (%p4559_p7), %s4290_s4, 128  }
0x2577   : > { %5146 = vsyncadd (%p4559_p7), %s4290_s4, 4294967168  ;;  %s8377_s1 = sadd.s32 4294967294, %s5165_s20  }
0x2578   : > { %s4298_s15 = sand.u32 1, %s8377_s1  }
0x2579   : > { %s4299_s21 = scalar_lea.sflag [#allocation16], %s4298_s15 }
0x257a   : > { %5148 = dma.done.wait (%p4559_p7), %s4299_s21, 320  }
0x257b   : > { %5150 = vsyncadd (%p4559_p7), %s4299_s21, 4294966976  ;;  %s8378_s13 = sld [smem:[#allocation24_spill]]  ;;  %p31_p12 = scmp.ge.s32.totalorder %s5461_s16, 4  }
0x257c   : > { %s8379_s17 = smov %s5157_s18  ;;  %s8380_s18 = smov %s5161_s19 }
0x257d   : > { %s8382_s20 = smov %s5461_s16  ;;  %33 = sbr.rel (!%p31_p12) target bundleno = 16 (0x10), region = 163 }
0x2581   : > { %s8381_s19 = smov %s8378_s13 }
0x2582   :  { %4313 = vsyncpa [#allocation4], 1 }
0x2583   :  { %4315 = vsyncpa [#allocation4 + $0x1], 1 }
0x2584   :  { %4316 = vsyncpa [#allocation8], 1 }
0x2585   :  { %4317 = vsyncpa [#allocation11], 1 }
0x2586   :  { %4318 = vsyncpa [#allocation5], 1 }
0x2587   :  { %4320 = vsyncpa [#allocation5 + $0x1], 1 }
0x2588   :  { %4321 = vsyncpa [#allocation16], 1 }
0x2589   :  { %4323 = vsyncpa [#allocation16 + $0x1], 1 }
0x258a   :  { %4324 = vsyncpa [#allocation6], 1 }
0x258b   :  { %4326 = vsyncpa [#allocation6 + $0x1], 1 }

</bundles_post_ra>
